<compile_context>
chip_gen: v6e
topology: v6e:2x2x1
jax: 0.10.0
libtpu: 0.0.40
codegen_flags: <defaults>
</compile_context>

<pallas_src>
import functools

import jax
import jax.numpy as jnp
from jax import lax
from jax.experimental import pallas as pl
from jax.experimental.pallas import tpu as pltpu

GROUPS = 8
EPS = 1e-5


def temporal_attention_kernel(x_ref, w_ref, vec_ref, pool_ref, bcast_ref,
                              o_ref, *, T, HW):
    Bt, C, THW = x_ref.shape
    G = vec_ref.shape[1] - 2
    S = Bt * T
    inv_hw = 1.0 / HW
    inv_n = 1.0 / ((C // G) * T * HW)
    scale = float(C) ** (-0.5)

    # ---- unpack fused parameter slabs (single small DMAs, cached by Pallas) ----
    vs = vec_ref[...]                        # (4C, 2+G)
    bqkv = vs[0:3 * C, 0:1]                  # (3C, 1) stacked q/k/v bias
    bp = vs[3 * C:4 * C, 0:1]                # (C, 1)  proj bias
    gamma = vs[0:C, 1:2]                     # (C, 1)
    beta = vs[C:2 * C, 1:2]                  # (C, 1)
    grp = vs[0:C, 2:2 + G]                   # (C, G) one-hot channel -> group

    pool = pool_ref[...]                     # (T*HW, T+1) frame-pooling matrix
    bcast = bcast_ref[...]                   # (T, T*HW)   frame-broadcast matrix

    # ---- GroupNorm stats + spatial pooling on the MXU ----
    # st[:, t<T] = sum over frame t's HW positions, st[:, T] = full (T,H,W) sum.
    sp_cols, ch_sum_cols, ch_ssq_cols = [], [], []
    for b in range(Bt):
        xb = x_ref[b].astype(jnp.float32)                                  # (C, THW)
        st = jnp.dot(xb, pool, preferred_element_type=jnp.float32)         # (C, T+1)
        st2 = jnp.dot(xb * xb, pool, preferred_element_type=jnp.float32)   # (C, T+1)
        sp_cols.append(st[:, 0:T])
        ch_sum_cols.append(st[:, T:T + 1])
        ch_ssq_cols.append(st2[:, T:T + 1])
    ch_stats = jnp.concatenate(ch_sum_cols + ch_ssq_cols, axis=-1)         # (C, 2*Bt)

    # Gather per-group sums, scatter mu/rstd back to channels (two matmuls).
    g_stats = lax.dot_general(grp, ch_stats, (((0,), (0,)), ((), ())),
                              preferred_element_type=jnp.float32)          # (G, 2*Bt)
    mu_g = g_stats[:, :Bt] * inv_n
    ex2_g = g_stats[:, Bt:] * inv_n
    var_g = jnp.maximum(ex2_g - mu_g * mu_g, 0.0)     # clamp single-pass variance
    rstd_g = lax.rsqrt(var_g + EPS)
    c_stats = jnp.dot(grp, jnp.concatenate([mu_g, rstd_g], axis=-1),
                      preferred_element_type=jnp.float32)                  # (C, 2*Bt)
    scale_c = c_stats[:, Bt:] * gamma                 # rstd * gamma       (C, Bt)
    shift_c = beta - c_stats[:, :Bt] * scale_c        # beta - mu * scale  (C, Bt)

    # Normalized pooled features laid out lane-wide as (C, Bt*T).
    h_pool = jnp.concatenate(
        [sp_cols[b] * (inv_hw * scale_c[:, b:b + 1]) + shift_c[:, b:b + 1]
         for b in range(Bt)], axis=-1)                                     # (C, S)

    # ---- fused q/k/v projection: one (3C, C) x (C, S) matmul ----
    qkv = jnp.dot(w_ref[0:3 * C, :], h_pool,
                  preferred_element_type=jnp.float32) + bqkv               # (3C, S)
    q, k, v = qkv[0:C], qkv[C:2 * C], qkv[2 * C:3 * C]

    # ---- temporal attention for all samples at once (block-diagonal mask) ----
    s = lax.dot_general(q, k, (((0,), (0,)), ((), ())),
                        preferred_element_type=jnp.float32) * scale        # (S, S)
    # Frame id via float floor with +0.5 offset: exact for any T, and avoids
    # depending on vector integer-division lowering.  (S,S) is tiny (<=1 vreg).
    ri = lax.broadcasted_iota(jnp.int32, (S, S), 0).astype(jnp.float32)
    ci = lax.broadcasted_iota(jnp.int32, (S, S), 1).astype(jnp.float32)
    same = (jnp.floor((ri + 0.5) * (1.0 / T))
            == jnp.floor((ci + 0.5) * (1.0 / T)))
    neg_cap = float(jnp.finfo(jnp.float32).min)
    m = jnp.max(jnp.where(same, s, neg_cap), axis=-1, keepdims=True)
    e = jnp.where(same, jnp.exp(s - m), 0.0)          # masked probs exactly 0
    p = e * pl.reciprocal(jnp.sum(e, axis=-1, keepdims=True), approx=True)
    ov = lax.dot_general(v, p, (((1,), (1,)), ((), ())),
                         preferred_element_type=jnp.float32)               # (C, S)
    out = jnp.dot(w_ref[3 * C:4 * C, :], ov,
                  preferred_element_type=jnp.float32) + bp                 # (C, S)

    # ---- residual: broadcast over HW via MXU, ONE fused lane-dense store ----
    outs = [jnp.dot(out[:, b * T:(b + 1) * T], bcast,
                    preferred_element_type=jnp.float32)                    # (C, THW)
            for b in range(Bt)]
    out_full = jnp.stack(outs, axis=0)                                     # (Bt, C, THW)
    o_ref[...] = (x_ref[...].astype(jnp.float32) + out_full).astype(o_ref.dtype)


def _pick_block_b(B, C, T, HW, block_b):
    """Largest divisor of B that (in priority order) keeps the per-step f32 x
    tile under ~4 MiB (VMEM guard, v7x has only 64 MiB/TC), gives a deep
    (>= 4 step) grid, an even grid (2 TensorCores on v7x), then maximizes the
    tile size (DMA efficiency, matters most on v5e)."""
    per_sample = C * T * HW * 4
    vmem_cap = max(1, (4 * 1024 * 1024) // max(per_sample, 1))
    cap = max(1, min(block_b, B, vmem_cap))
    cands = [d for d in range(1, cap + 1) if B % d == 0]

    def rank(d):
        g = B // d
        return (g >= 4, g % 2 == 0, d)

    return max(cands, key=rank)


def temporal_attention(x, packed, *, block_b=2):
    B, C, T, H, W = x.shape
    HW = H * W
    THW = T * HW
    bt = _pick_block_b(B, C, T, HW, block_b)
    x3 = x.reshape(B, C, THW)
    wslab, vslab = packed["w"], packed["vec"]

    # Pooling matrix: columns 0..T-1 one-hot select frame t's HW positions,
    # column T is all-ones (full (T,H,W) reduction).  Broadcast matrix is the
    # per-frame transpose.  Both are DMA'd into VMEM once (constant index_map).
    frame_id = jnp.arange(THW, dtype=jnp.int32) // HW
    onehot = frame_id[:, None] == jnp.arange(T, dtype=jnp.int32)[None, :]
    pool = jnp.concatenate([onehot.astype(jnp.float32),
                            jnp.ones((THW, 1), jnp.float32)], axis=1)   # (THW, T+1)
    bcast = onehot.T.astype(jnp.float32)                                # (T, THW)

    # VMEM budget: in/out double buffers + lane-padded pooling matrix + temps.
    per_step = bt * C * THW * 4
    pool_pad = THW * 128 * 4
    vmem_need = 4 * per_step + 2 * pool_pad + 4 * per_step
    vmem_limit = int(min(64 * 2 ** 20, max(16 * 2 ** 20, 2 * vmem_need)))

    flops = int(4 * B * C * THW * (T + 1)          # pooled stats matmuls
                + 2 * B * C * THW                  # x*x + residual add
                + 8 * C * C * B * T                # q/k/v/proj matmuls
                + 4 * C * bt * T * T * B           # attention matmuls
                + 2 * B * C * T * THW)             # HW-broadcast matmuls
    transc = int(B * bt * T * T + B * T + B * GROUPS)
    bytes_acc = int(2 * x3.size * x3.dtype.itemsize
                    + wslab.size * 4 + vslab.size * 4
                    + pool.size * 4 + bcast.size * 4)

    kernel = functools.partial(temporal_attention_kernel, T=T, HW=HW)
    rep2 = lambda i: (0, 0)
    out = pl.pallas_call(
        kernel,
        out_shape=jax.ShapeDtypeStruct((B, C, THW), x.dtype),
        grid_spec=pltpu.PrefetchScalarGridSpec(
            num_scalar_prefetch=0,
            grid=(B // bt,),
            in_specs=[
                pl.BlockSpec((bt, C, THW), lambda i: (i, 0, 0)),  # x
                pl.BlockSpec(wslab.shape, rep2),                  # (4C, C) weights
                pl.BlockSpec(vslab.shape, rep2),                  # (4C, 2+G) biases/affine/groups
                pl.BlockSpec(pool.shape, rep2),                   # (THW, T+1)
                pl.BlockSpec(bcast.shape, rep2),                  # (T, THW)
            ],
            out_specs=pl.BlockSpec((bt, C, THW), lambda i: (i, 0, 0)),
        ),
        compiler_params=pltpu.CompilerParams(
            dimension_semantics=("parallel",),
            vmem_limit_bytes=vmem_limit,
        ),
        cost_estimate=pl.CostEstimate(
            flops=flops, transcendentals=transc, bytes_accessed=bytes_acc),
    )(x3, wslab, vslab, pool, bcast)
    return out.reshape(B, C, T, H, W)


def init_params(key, C):
    ks = jax.random.split(key, 10)
    s = 1.0 / (C ** 0.5)
    return {
        "gamma": 1.0 + 0.1 * jax.random.normal(ks[0], (C, 1), jnp.float32),
        "beta": 0.1 * jax.random.normal(ks[1], (C, 1), jnp.float32),
        "wq": s * jax.random.normal(ks[2], (C, C), jnp.float32),
        "bq": 0.05 * jax.random.normal(ks[3], (C, 1), jnp.float32),
        "wk": s * jax.random.normal(ks[4], (C, C), jnp.float32),
        "bk": 0.05 * jax.random.normal(ks[5], (C, 1), jnp.float32),
        "wv": s * jax.random.normal(ks[6], (C, C), jnp.float32),
        "bv": 0.05 * jax.random.normal(ks[7], (C, 1), jnp.float32),
        "wp": s * jax.random.normal(ks[8], (C, C), jnp.float32),
        "bp": 0.05 * jax.random.normal(ks[9], (C, 1), jnp.float32),
    }


def pack_params(p):
    """Fuse the 12 per-layer params into 2 kernel-side slabs (done once)."""
    C = p["wq"].shape[0]
    G = GROUPS
    wslab = jnp.concatenate([p["wq"], p["wk"], p["wv"], p["wp"]], axis=0)  # (4C, C)
    bcol = jnp.concatenate([p["bq"], p["bk"], p["bv"], p["bp"]], axis=0)   # (4C, 1)
    affcol = jnp.concatenate(
        [p["gamma"], p["beta"], jnp.zeros((2 * C, 1), jnp.float32)], axis=0)
    grp_cg = (jnp.arange(C)[:, None] // (C // G)
              == jnp.arange(G)[None, :]).astype(jnp.float32)               # (C, G)
    grp_pad = jnp.concatenate([grp_cg, jnp.zeros((3 * C, G), jnp.float32)], axis=0)
    vslab = jnp.concatenate([bcol, affcol, grp_pad], axis=1)               # (4C, 2+G)
    return {"w": wslab, "vec": vslab}


def ref_forward(x, p):
    """Pure-JAX reference mirroring the PyTorch module."""
    B, C, T, H, W = x.shape
    G = GROUPS
    xr = x.reshape(B, G, C // G, T, H, W)
    mu = xr.mean(axis=(2, 3, 4, 5), keepdims=True)
    var = xr.var(axis=(2, 3, 4, 5), keepdims=True)
    h = ((xr - mu) / jnp.sqrt(var + EPS)).reshape(B, C, T, H, W)
    h = h * p["gamma"].reshape(1, C, 1, 1, 1) + p["beta"].reshape(1, C, 1, 1, 1)
    hf = h.mean(axis=(-1, -2))                                   # (B, C, T)

    def lin(w, b, z):
        return jnp.einsum("oc,bct->bot", w, z) + b.reshape(1, C, 1)

    q = lin(p["wq"], p["bq"], hf)
    k = lin(p["wk"], p["bk"], hf)
    v = lin(p["wv"], p["bv"], hf)
    attn = jnp.einsum("bci,bcj->bij", q, k) * (C ** (-0.5))
    attn = jax.nn.softmax(attn, axis=-1)
    out = jnp.einsum("bcj,bij->bci", v, attn)
    out = lin(p["wp"], p["bp"], out)
    return x + out[:, :, :, None, None]


if __name__ == "__main__":
    B, C, T, H, W = 8, 32, 8, 16, 16
    key = jax.random.PRNGKey(0)
    kx, kp = jax.random.split(key)
    x = jax.random.normal(kx, (B, C, T, H, W), jnp.float32)
    params = init_params(kp, C)
    packed = pack_params(params)

    y = temporal_attention(x, packed, block_b=2)   # bt=2 -> grid=(4,), even & deep
    y = jax.block_until_ready(y)

    y_ref = ref_forward(x, params)
    assert y.shape == (B, C, T, H, W)
    max_err = float(jnp.max(jnp.abs(y - y_ref)))
    assert jnp.allclose(y, y_ref, atol=5e-3, rtol=5e-3), max_err
    print("KERNEL_OK")
</pallas_src>

<mosaic_0001>
module attributes {stable_mosaic.version = 11 : i64} {
  func.func @temporal_attention_kernel(%arg0: i32, %arg1: memref<2x32x2048xf32, #tpu.memory_space<vmem>>, %arg2: memref<128x32xf32, #tpu.memory_space<vmem>>, %arg3: memref<128x10xf32, #tpu.memory_space<vmem>>, %arg4: memref<2048x9xf32, #tpu.memory_space<vmem>>, %arg5: memref<8x2048xf32, #tpu.memory_space<vmem>>, %arg6: memref<2x32x2048xf32, #tpu.memory_space<vmem>>) attributes {dimension_semantics = [#tpu.dimension_semantics<parallel>], iteration_bounds = array<i64: 4>, scalar_prefetch = 0 : i64, scratch_operands = 0 : i64, tpu.core_type = #tpu.core_type<tc>, window_params = [{transform_indices = @transform_0, window_bounds = array<i64: 2, 32, 2048>}, {pipeline_mode = #tpu.pipeline_mode<synchronous>, transform_indices = @transform_1, window_bounds = array<i64: 128, 32>}, {pipeline_mode = #tpu.pipeline_mode<synchronous>, transform_indices = @transform_2, window_bounds = array<i64: 128, 10>}, {pipeline_mode = #tpu.pipeline_mode<synchronous>, transform_indices = @transform_3, window_bounds = array<i64: 2048, 9>}, {pipeline_mode = #tpu.pipeline_mode<synchronous>, transform_indices = @transform_4, window_bounds = array<i64: 8, 2048>}, {transform_indices = @transform_5, window_bounds = array<i64: 2, 32, 2048>}]} {
    %c0 = arith.constant 0 : index
    %c0_0 = arith.constant 0 : index
    %0 = vector.load %arg3[%c0, %c0_0] : memref<128x10xf32, #tpu.memory_space<vmem>>, vector<128x10xf32>
    %1 = vector.extract_strided_slice %0 {offsets = [0, 0], sizes = [96, 1], strides = [1, 1]} : vector<128x10xf32> to vector<96x1xf32>
    %2 = vector.extract_strided_slice %0 {offsets = [96, 0], sizes = [32, 1], strides = [1, 1]} : vector<128x10xf32> to vector<32x1xf32>
    %3 = vector.extract_strided_slice %0 {offsets = [0, 1], sizes = [32, 1], strides = [1, 1]} : vector<128x10xf32> to vector<32x1xf32>
    %4 = vector.extract_strided_slice %0 {offsets = [32, 1], sizes = [32, 1], strides = [1, 1]} : vector<128x10xf32> to vector<32x1xf32>
    %5 = vector.extract_strided_slice %0 {offsets = [0, 2], sizes = [32, 8], strides = [1, 1]} : vector<128x10xf32> to vector<32x8xf32>
    %c0_1 = arith.constant 0 : index
    %c0_2 = arith.constant 0 : index
    %6 = vector.load %arg4[%c0_1, %c0_2] : memref<2048x9xf32, #tpu.memory_space<vmem>>, vector<2048x9xf32>
    %c0_3 = arith.constant 0 : index
    %c0_4 = arith.constant 0 : index
    %7 = vector.load %arg5[%c0_3, %c0_4] : memref<8x2048xf32, #tpu.memory_space<vmem>>, vector<8x2048xf32>
    %c0_5 = arith.constant 0 : index
    %c0_6 = arith.constant 0 : index
    %c0_7 = arith.constant 0 : index
    %8 = vector.load %arg1[%c0_5, %c0_6, %c0_7] : memref<2x32x2048xf32, #tpu.memory_space<vmem>>, vector<1x32x2048xf32>
    %9 = vector.shape_cast %8 : vector<1x32x2048xf32> to vector<32x2048xf32>
    %cst = arith.constant dense<0.000000e+00> : vector<32x9xf32>
    %10 = tpu.matmul %9, %6, %cst {dimension_numbers = #tpu.dot_dimension_numbers<[1], [0], [0], [1], [0, 0, 1, 1], [], []>} : vector<32x2048xf32>, vector<2048x9xf32>, vector<32x9xf32> -> vector<32x9xf32>
    %11 = arith.mulf %9, %9 : vector<32x2048xf32>
    %cst_8 = arith.constant dense<0.000000e+00> : vector<32x9xf32>
    %12 = tpu.matmul %11, %6, %cst_8 {dimension_numbers = #tpu.dot_dimension_numbers<[1], [0], [0], [1], [0, 0, 1, 1], [], []>} : vector<32x2048xf32>, vector<2048x9xf32>, vector<32x9xf32> -> vector<32x9xf32>
    %13 = vector.extract_strided_slice %10 {offsets = [0, 0], sizes = [32, 8], strides = [1, 1]} : vector<32x9xf32> to vector<32x8xf32>
    %14 = vector.extract_strided_slice %10 {offsets = [0, 8], sizes = [32, 1], strides = [1, 1]} : vector<32x9xf32> to vector<32x1xf32>
    %15 = vector.extract_strided_slice %12 {offsets = [0, 8], sizes = [32, 1], strides = [1, 1]} : vector<32x9xf32> to vector<32x1xf32>
    %c1 = arith.constant 1 : index
    %c0_9 = arith.constant 0 : index
    %c0_10 = arith.constant 0 : index
    %16 = vector.load %arg1[%c1, %c0_9, %c0_10] : memref<2x32x2048xf32, #tpu.memory_space<vmem>>, vector<1x32x2048xf32>
    %17 = vector.shape_cast %16 : vector<1x32x2048xf32> to vector<32x2048xf32>
    %cst_11 = arith.constant dense<0.000000e+00> : vector<32x9xf32>
    %18 = tpu.matmul %17, %6, %cst_11 {dimension_numbers = #tpu.dot_dimension_numbers<[1], [0], [0], [1], [0, 0, 1, 1], [], []>} : vector<32x2048xf32>, vector<2048x9xf32>, vector<32x9xf32> -> vector<32x9xf32>
    %19 = arith.mulf %17, %17 : vector<32x2048xf32>
    %cst_12 = arith.constant dense<0.000000e+00> : vector<32x9xf32>
    %20 = tpu.matmul %19, %6, %cst_12 {dimension_numbers = #tpu.dot_dimension_numbers<[1], [0], [0], [1], [0, 0, 1, 1], [], []>} : vector<32x2048xf32>, vector<2048x9xf32>, vector<32x9xf32> -> vector<32x9xf32>
    %21 = vector.extract_strided_slice %18 {offsets = [0, 0], sizes = [32, 8], strides = [1, 1]} : vector<32x9xf32> to vector<32x8xf32>
    %22 = vector.extract_strided_slice %18 {offsets = [0, 8], sizes = [32, 1], strides = [1, 1]} : vector<32x9xf32> to vector<32x1xf32>
    %23 = vector.extract_strided_slice %20 {offsets = [0, 8], sizes = [32, 1], strides = [1, 1]} : vector<32x9xf32> to vector<32x1xf32>
    %24 = tpu.concatenate %14, %22, %15, %23 in 1 : vector<32x1xf32>, vector<32x1xf32>, vector<32x1xf32>, vector<32x1xf32> -> vector<32x4xf32>
    %cst_13 = arith.constant dense<0.000000e+00> : vector<8x4xf32>
    %25 = tpu.matmul %5, %24, %cst_13 {dimension_numbers = #tpu.dot_dimension_numbers<[0], [0], [1], [1], [0, 1, 1, 1], [], []>} : vector<32x8xf32>, vector<32x4xf32>, vector<8x4xf32> -> vector<8x4xf32>
    %26 = vector.extract_strided_slice %25 {offsets = [0, 0], sizes = [8, 2], strides = [1, 1]} : vector<8x4xf32> to vector<8x2xf32>
    %cst_14 = arith.constant 1.22070313E-4 : f32
    %27 = vector.broadcast %cst_14 : f32 to vector<8x2xf32>
    %28 = arith.mulf %26, %27 : vector<8x2xf32>
    %29 = vector.extract_strided_slice %25 {offsets = [0, 2], sizes = [8, 2], strides = [1, 1]} : vector<8x4xf32> to vector<8x2xf32>
    %cst_15 = arith.constant 1.22070313E-4 : f32
    %30 = vector.broadcast %cst_15 : f32 to vector<8x2xf32>
    %31 = arith.mulf %29, %30 : vector<8x2xf32>
    %32 = arith.mulf %28, %28 : vector<8x2xf32>
    %33 = arith.subf %31, %32 : vector<8x2xf32>
    %cst_16 = arith.constant 0.000000e+00 : f32
    %34 = vector.broadcast %cst_16 : f32 to vector<8x2xf32>
    %35 = arith.maximumf %33, %34 : vector<8x2xf32>
    %cst_17 = arith.constant 9.99999974E-6 : f32
    %36 = vector.broadcast %cst_17 : f32 to vector<8x2xf32>
    %37 = arith.addf %35, %36 : vector<8x2xf32>
    %38 = math.rsqrt %37 : vector<8x2xf32>
    %39 = tpu.concatenate %28, %38 in 1 : vector<8x2xf32>, vector<8x2xf32> -> vector<8x4xf32>
    %cst_18 = arith.constant dense<0.000000e+00> : vector<32x4xf32>
    %40 = tpu.matmul %5, %39, %cst_18 {dimension_numbers = #tpu.dot_dimension_numbers<[1], [0], [0], [1], [0, 0, 1, 1], [], []>} : vector<32x8xf32>, vector<8x4xf32>, vector<32x4xf32> -> vector<32x4xf32>
    %41 = vector.extract_strided_slice %40 {offsets = [0, 2], sizes = [32, 2], strides = [1, 1]} : vector<32x4xf32> to vector<32x2xf32>
    %42 = vector.broadcast %3 : vector<32x1xf32> to vector<32x2xf32>
    %43 = arith.mulf %41, %42 : vector<32x2xf32>
    %44 = vector.extract_strided_slice %40 {offsets = [0, 0], sizes = [32, 2], strides = [1, 1]} : vector<32x4xf32> to vector<32x2xf32>
    %45 = arith.mulf %44, %43 : vector<32x2xf32>
    %46 = vector.broadcast %4 : vector<32x1xf32> to vector<32x2xf32>
    %47 = arith.subf %46, %45 : vector<32x2xf32>
    %48 = vector.extract_strided_slice %43 {offsets = [0, 0], sizes = [32, 1], strides = [1, 1]} : vector<32x2xf32> to vector<32x1xf32>
    %cst_19 = arith.constant 3.906250e-03 : f32
    %49 = vector.broadcast %cst_19 : f32 to vector<32x1xf32>
    %50 = arith.mulf %49, %48 : vector<32x1xf32>
    %51 = vector.broadcast %50 : vector<32x1xf32> to vector<32x8xf32>
    %52 = arith.mulf %13, %51 : vector<32x8xf32>
    %53 = vector.extract_strided_slice %47 {offsets = [0, 0], sizes = [32, 1], strides = [1, 1]} : vector<32x2xf32> to vector<32x1xf32>
    %54 = vector.broadcast %53 : vector<32x1xf32> to vector<32x8xf32>
    %55 = arith.addf %52, %54 : vector<32x8xf32>
    %56 = vector.extract_strided_slice %43 {offsets = [0, 1], sizes = [32, 1], strides = [1, 1]} : vector<32x2xf32> to vector<32x1xf32>
    %cst_20 = arith.constant 3.906250e-03 : f32
    %57 = vector.broadcast %cst_20 : f32 to vector<32x1xf32>
    %58 = arith.mulf %57, %56 : vector<32x1xf32>
    %59 = vector.broadcast %58 : vector<32x1xf32> to vector<32x8xf32>
    %60 = arith.mulf %21, %59 : vector<32x8xf32>
    %61 = vector.extract_strided_slice %47 {offsets = [0, 1], sizes = [32, 1], strides = [1, 1]} : vector<32x2xf32> to vector<32x1xf32>
    %62 = vector.broadcast %61 : vector<32x1xf32> to vector<32x8xf32>
    %63 = arith.addf %60, %62 : vector<32x8xf32>
    %64 = tpu.concatenate %55, %63 in 1 : vector<32x8xf32>, vector<32x8xf32> -> vector<32x16xf32>
    %c0_21 = arith.constant 0 : index
    %c0_22 = arith.constant 0 : index
    %65 = vector.load %arg2[%c0_21, %c0_22] : memref<128x32xf32, #tpu.memory_space<vmem>>, vector<96x32xf32>
    %cst_23 = arith.constant dense<0.000000e+00> : vector<96x16xf32>
    %66 = tpu.matmul %65, %64, %cst_23 {dimension_numbers = #tpu.dot_dimension_numbers<[1], [0], [0], [1], [0, 0, 1, 1], [], []>} : vector<96x32xf32>, vector<32x16xf32>, vector<96x16xf32> -> vector<96x16xf32>
    %67 = vector.broadcast %1 : vector<96x1xf32> to vector<96x16xf32>
    %68 = arith.addf %66, %67 : vector<96x16xf32>
    %69 = vector.extract_strided_slice %68 {offsets = [0, 0], sizes = [32, 16], strides = [1, 1]} : vector<96x16xf32> to vector<32x16xf32>
    %70 = vector.extract_strided_slice %68 {offsets = [32, 0], sizes = [32, 16], strides = [1, 1]} : vector<96x16xf32> to vector<32x16xf32>
    %71 = vector.extract_strided_slice %68 {offsets = [64, 0], sizes = [32, 16], strides = [1, 1]} : vector<96x16xf32> to vector<32x16xf32>
    %cst_24 = arith.constant dense<0.000000e+00> : vector<16x16xf32>
    %72 = tpu.matmul %69, %70, %cst_24 {dimension_numbers = #tpu.dot_dimension_numbers<[0], [0], [1], [1], [0, 1, 1, 1], [], []>} : vector<32x16xf32>, vector<32x16xf32>, vector<16x16xf32> -> vector<16x16xf32>
    %cst_25 = arith.constant 0.176776692 : f32
    %73 = vector.broadcast %cst_25 : f32 to vector<16x16xf32>
    %74 = arith.mulf %72, %73 : vector<16x16xf32>
    %75 = tpu.iota {dimensions = array<i32: 0>} : vector<16x16xi32>
    %76 = arith.sitofp %75 : vector<16x16xi32> to vector<16x16xf32>
    %77 = tpu.iota {dimensions = array<i32: 1>} : vector<16x16xi32>
    %78 = arith.sitofp %77 : vector<16x16xi32> to vector<16x16xf32>
    %cst_26 = arith.constant 5.000000e-01 : f32
    %79 = vector.broadcast %cst_26 : f32 to vector<16x16xf32>
    %80 = arith.addf %76, %79 : vector<16x16xf32>
    %cst_27 = arith.constant 1.250000e-01 : f32
    %81 = vector.broadcast %cst_27 : f32 to vector<16x16xf32>
    %82 = arith.mulf %80, %81 : vector<16x16xf32>
    %83 = math.floor %82 : vector<16x16xf32>
    %cst_28 = arith.constant 5.000000e-01 : f32
    %84 = vector.broadcast %cst_28 : f32 to vector<16x16xf32>
    %85 = arith.addf %78, %84 : vector<16x16xf32>
    %cst_29 = arith.constant 1.250000e-01 : f32
    %86 = vector.broadcast %cst_29 : f32 to vector<16x16xf32>
    %87 = arith.mulf %85, %86 : vector<16x16xf32>
    %88 = math.floor %87 : vector<16x16xf32>
    %89 = arith.cmpf oeq, %83, %88 : vector<16x16xf32>
    %cst_30 = arith.constant -3.40282347E+38 : f32
    %90 = vector.broadcast %cst_30 : f32 to vector<16x16xf32>
    %91 = arith.select %89, %74, %90 : vector<16x16xi1>, vector<16x16xf32>
    %cst_31 = arith.constant dense<0xFF800000> : vector<16xf32>
    %92 = vector.multi_reduction <maximumf>, %91, %cst_31 [1] : vector<16x16xf32> to vector<16xf32>
    %93 = vector.shape_cast %92 : vector<16xf32> to vector<16x1xf32>
    %94 = vector.broadcast %93 : vector<16x1xf32> to vector<16x16xf32>
    %95 = arith.subf %74, %94 : vector<16x16xf32>
    %96 = math.exp %95 : vector<16x16xf32>
    %cst_32 = arith.constant 0.000000e+00 : f32
    %97 = vector.broadcast %cst_32 : f32 to vector<16x16xf32>
    %98 = arith.select %89, %96, %97 : vector<16x16xi1>, vector<16x16xf32>
    %cst_33 = arith.constant dense<0.000000e+00> : vector<16xf32>
    %99 = vector.multi_reduction <add>, %98, %cst_33 [1] : vector<16x16xf32> to vector<16xf32>
    %100 = vector.shape_cast %99 : vector<16xf32> to vector<16x1xf32>
    %101 = tpu.reciprocal %100 {approx = true} : vector<16x1xf32> -> vector<16x1xf32>
    %102 = vector.broadcast %101 : vector<16x1xf32> to vector<16x16xf32>
    %103 = arith.mulf %98, %102 : vector<16x16xf32>
    %cst_34 = arith.constant dense<0.000000e+00> : vector<32x16xf32>
    %104 = tpu.matmul %71, %103, %cst_34 {dimension_numbers = #tpu.dot_dimension_numbers<[1], [1], [0], [0], [0, 0, 1, 0], [], []>} : vector<32x16xf32>, vector<16x16xf32>, vector<32x16xf32> -> vector<32x16xf32>
    %c96 = arith.constant 96 : index
    %c0_35 = arith.constant 0 : index
    %105 = vector.load %arg2[%c96, %c0_35] : memref<128x32xf32, #tpu.memory_space<vmem>>, vector<32x32xf32>
    %cst_36 = arith.constant dense<0.000000e+00> : vector<32x16xf32>
    %106 = tpu.matmul %105, %104, %cst_36 {dimension_numbers = #tpu.dot_dimension_numbers<[1], [0], [0], [1], [0, 0, 1, 1], [], []>} : vector<32x32xf32>, vector<32x16xf32>, vector<32x16xf32> -> vector<32x16xf32>
    %107 = vector.broadcast %2 : vector<32x1xf32> to vector<32x16xf32>
    %108 = arith.addf %106, %107 : vector<32x16xf32>
    %109 = vector.extract_strided_slice %108 {offsets = [0, 0], sizes = [32, 8], strides = [1, 1]} : vector<32x16xf32> to vector<32x8xf32>
    %cst_37 = arith.constant dense<0.000000e+00> : vector<32x2048xf32>
    %110 = tpu.matmul %109, %7, %cst_37 {dimension_numbers = #tpu.dot_dimension_numbers<[1], [0], [0], [1], [0, 0, 1, 1], [], []>} : vector<32x8xf32>, vector<8x2048xf32>, vector<32x2048xf32> -> vector<32x2048xf32>
    %111 = vector.extract_strided_slice %108 {offsets = [0, 8], sizes = [32, 8], strides = [1, 1]} : vector<32x16xf32> to vector<32x8xf32>
    %cst_38 = arith.constant dense<0.000000e+00> : vector<32x2048xf32>
    %112 = tpu.matmul %111, %7, %cst_38 {dimension_numbers = #tpu.dot_dimension_numbers<[1], [0], [0], [1], [0, 0, 1, 1], [], []>} : vector<32x8xf32>, vector<8x2048xf32>, vector<32x2048xf32> -> vector<32x2048xf32>
    %113 = vector.shape_cast %110 : vector<32x2048xf32> to vector<1x32x2048xf32>
    %114 = vector.shape_cast %112 : vector<32x2048xf32> to vector<1x32x2048xf32>
    %115 = tpu.concatenate %113, %114 in 0 : vector<1x32x2048xf32>, vector<1x32x2048xf32> -> vector<2x32x2048xf32>
    %c0_39 = arith.constant 0 : index
    %c0_40 = arith.constant 0 : index
    %c0_41 = arith.constant 0 : index
    %116 = vector.load %arg1[%c0_39, %c0_40, %c0_41] : memref<2x32x2048xf32, #tpu.memory_space<vmem>>, vector<2x32x2048xf32>
    %117 = arith.addf %116, %115 : vector<2x32x2048xf32>
    %c0_42 = arith.constant 0 : index
    %c0_43 = arith.constant 0 : index
    %c0_44 = arith.constant 0 : index
    %118 = vector.load %arg6[%c0_42, %c0_43, %c0_44] : memref<2x32x2048xf32, #tpu.memory_space<vmem>>, vector<2x32x2048xf32>
    tpu.vector_store %arg6[%c0_42, %c0_43, %c0_44], %117 {strides = array<i32>} : memref<2x32x2048xf32, #tpu.memory_space<vmem>>, vector<2x32x2048xf32>,
    return
  }
  func.func @transform_0(%arg0: i32) -> (i32, i32, i32) {
    %c0_i32 = arith.constant 0 : i32
    %c0_i32_0 = arith.constant 0 : i32
    %c0_i32_1 = arith.constant 0 : i32
    return %arg0, %c0_i32, %c0_i32_0 : i32, i32, i32
  }
  func.func @transform_1(%arg0: i32) -> (i32, i32) {
    %c0_i32 = arith.constant 0 : i32
    %c0_i32_0 = arith.constant 0 : i32
    %c0_i32_1 = arith.constant 0 : i32
    return %c0_i32, %c0_i32_0 : i32, i32
  }
  func.func @transform_2(%arg0: i32) -> (i32, i32) {
    %c0_i32 = arith.constant 0 : i32
    %c0_i32_0 = arith.constant 0 : i32
    %c0_i32_1 = arith.constant 0 : i32
    return %c0_i32, %c0_i32_0 : i32, i32
  }
  func.func @transform_3(%arg0: i32) -> (i32, i32) {
    %c0_i32 = arith.constant 0 : i32
    %c0_i32_0 = arith.constant 0 : i32
    %c0_i32_1 = arith.constant 0 : i32
    return %c0_i32, %c0_i32_0 : i32, i32
  }
  func.func @transform_4(%arg0: i32) -> (i32, i32) {
    %c0_i32 = arith.constant 0 : i32
    %c0_i32_0 = arith.constant 0 : i32
    %c0_i32_1 = arith.constant 0 : i32
    return %c0_i32, %c0_i32_0 : i32, i32
  }
  func.func @transform_5(%arg0: i32) -> (i32, i32, i32) {
    %c0_i32 = arith.constant 0 : i32
    %c0_i32_0 = arith.constant 0 : i32
    %c0_i32_1 = arith.constant 0 : i32
    return %arg0, %c0_i32, %c0_i32_0 : i32, i32, i32
  }
}

</mosaic_0001>

<bundles_post_ra>
// kernel: tpu_custom_call.1
= control target key start
LH: loop header
LB: loop body
LE: loop exit
PB: predicated region body
PF: predicated region fallthrough
CT: control target
= control target key end

     0   :  { %10 = vsyncpa [#allocation3], 0  ;;  %s14473_s0 = inlined_call_operand.hbm [shape: f32[8,32,2048], index: 0, kind: input, shape index: {}]   ;;  %s14474_s1 = inlined_call_operand.vmem [shape: f32[128,32], index: 1, kind: input, shape index: {}]   ;;  %s14475_s2 = inlined_call_operand.vmem [shape: f32[128,10], index: 2, kind: input, shape index: {}]   ;;  %s14476_s3 = inlined_call_operand.vmem [shape: f32[2048,9], index: 3, kind: input, shape index: {}]   ;;  %s14477_s4 = inlined_call_operand.hbm [shape: f32[8,2048], index: 4, kind: input, shape index: {}]   ;;  %s14478_s5 = inlined_call_operand.hbm [shape: f32[8,32,2048], index: 5, kind: output, shape index: {}]  }
   0x1   :  { %12 = vsyncpa [#allocation3 + $0x1], 0 }
   0x2   :  { %13 = vsyncpa [#allocation6], 0 }
   0x3   :  { %14 = vsyncpa [#allocation4], 0 }
   0x4   :  { %16 = vsyncpa [#allocation4 + $0x1], 0  ;;  %s8959_s18 = smov 0   ;;  %s8961_s19 = smov 0  }
   0x5   :  { %s8963_s20 = smov 0   ;;  %s8965_s21 = smov 0  }
   0x6 LB: > { %s8980_s22 = sadd.s32 4294967295, %s8907_s21   ;;  %s6550_s23 = sadd.s32 4294967294, %s8907_s21   ;;  %s8907_s21 = sphi %s8965_s21, %s15737_s21   ;;  %s8903_s20 = sphi %s8963_s20, %s15736_s20   ;;  %s8899_s19 = sphi %s8961_s19, %s15735_s19   ;;  %s8895_s18 = sphi %s8959_s18, %s15734_s18  }
   0x7   : > { %s8984_s24 = sadd.s32 1, %s8907_s21   ;;  %s29_s25 = sadd.s32 1, %s8903_s20 }
   0x8   : > { %s26_s26 = ssub.s32 %s8907_s21, %s8984_s24  ;;  %p36_p0 = scmp.ne.s32.totalorder %s8903_s20, %s8899_s19 }
   0x9   : > { %p27_p1 = scmp.eq.s32.totalorder %s26_s26, 0  ;;  %p37_p2 = scmp.eq.s32.totalorder %s8907_s21, 0 }
   0xa   : > { %p42_p3 = scmp.ne.s32.totalorder %s8899_s19, %s8895_s18  ;;  %p14480_p4 = scmp.eq.s32.totalorder %s8980_s22, 0 }
   0xb   : > { %s8996_s27 = scalar_select %p27_p1, %s8903_s20, %s29_s25  }
   0xc   : > { %p8998_p5 = por %p37_p2, %p36_p0  ;;  %p9004_p6 = por %p14480_p4, %p42_p3 }
   0xd   : > { %p150_p7 = scmp.eq.s32.totalorder %s8980_s22, 3  ;;  %p156_p8 = scmp.eq.s32.totalorder %s6550_s23, 3 }
   0xe   : > { %s14880_s29 = scalar_select %p9004_p6, 1, 0 }
   0xf   : > { %p6551_p9 = scmp.ge.s32.totalorder %s8907_s21, 1  ;;  %p163_p10 = scmp.lt.s32.totalorder %s8907_s21, 5 }
  0x10   : > { %p9011_p11 = por %p150_p7, %p36_p0  ;;  %p9015_p12 = por %p156_p8, %p42_p3 }
  0x11   : > { %p9019_p13 = pnand %p6551_p9, %p163_p10  ;;  %s8909_s8 = smov [#allocation5]  }
  0x12   : > { %s14881_s30 = scalar_select %p9011_p11, 1, 0 }
  0x13   : > { %s14882_s6 = scalar_select %p9015_p12, 1, 0 }
  0x14   : > { %s14883_s7 = scalar_select %p9019_p13, 1, 0 }
  0x15   : > { %p8271_p1 = pneg %p9019_p13  ;;  %s185_s9 = sshll.u32 %s8909_s8, 4  ;;  %s186_s9 = int_to_ptr.vmem [resolvable:$true] %s185_s9 }
  0x16   : > { %p8284_p2 = scmp.lt.s32.totalorder %s8907_s21, 4  ;;  %s196_s11 = sand.u32 1, %s8903_s20  }
  0x17   : > { %p9028_p0 = pnand %p8271_p1, %p14480_p4  ;;  %s6554_s13 = sshll.u32 %s196_s11, 10 }
  0x18   : > { %p9035_p3 = pnand %p8284_p2, %p8998_p5  ;;  %s8796_s14 = scalar_lea.vmem %s186_s9, 2048 }
  0x19   : > { %p8787_p7 = pneg %p9028_p0  ;;  %p8797_p8 = scmp.ne.s32.totalorder %s186_s9, %s8796_s14 }
  0x1a   : > { %p8804_p12 = scmp.lt.s32.totalorder %s186_s9, %s186_s9  ;;  %p8805_p11 = scmp.lt.s32.totalorder %s8796_s14, %s8796_s14 }
  0x1b   : > { %p8799_p9 = pnand %p8797_p8, %p8787_p7 }
  0x1c   : > { %p8806_p1 = por %p8805_p11, %p8804_p12 }
  0x1d   : > { %p8800_p10 = pneg %p8799_p9 }
  0x1f   : > { %p8807_p4 = pnand %p8806_p1, %p8800_p10 }
  0x21   : > { %8810 = shalt.err (!%p8807_p4)
}
  0x22   : > { %8274 = dma.hbm_to_vmem [thread:$0]  (!%p9028_p0), %s14477_s4, 2048, %s186_s9, [#allocation6]  }
  0x23   : > { %s6726_s17 = sshll.u32 %s8907_s21, 14  ;;  %s200_s23 = scalar_lea.vmem [#allocation2], %s6554_s13 }
  0x24   : > { %s208_s25 = sshll.u32 %s200_s23, 4  ;;  %s9050_s8 = scalar_lea.hbm %s14473_s0, %s6726_s17  ;;  %s9052_s25 = int_to_ptr.vmem [resolvable:$true] %s208_s25 }
  0x25   : > { %s9054_s10 = scalar_lea.sflag [#allocation3], %s196_s11  ;;  %s8811_s14 = scalar_lea.hbm %s9050_s8, 16384 }
  0x26   : > { %p8812_p4 = scmp.ne.s32.totalorder %s9050_s8, %s8811_s14  ;;  %p8813_p5 = pneg %p9035_p3 }
  0x27   : > { %s8816_s15 = scalar_lea.hbm %s14473_s0, 65536  ;;  %p8817_p2 = scmp.lt.s32.totalorder %s9050_s8, %s14473_s0 }
  0x28   : > { %p8814_p11 = pnand %p8813_p5, %p8812_p4  ;;  %p8818_p0 = scmp.lt.s32.totalorder %s8816_s15, %s8811_s14 }
  0x2a   : > { %p8815_p12 = pneg %p8814_p11  ;;  %p8819_p7 = por %p8818_p0, %p8817_p2 }
  0x2c   : > { %p8820_p8 = pnand %p8819_p7, %p8815_p12 }
  0x2e   : > { %8823 = shalt.err (!%p8820_p8)
}
  0x2f   : > { %s8824_s11 = scalar_lea.vmem %s9052_s25, 16384  ;;  %s8910_s23 = smov [#allocation2]  }
  0x30   : > { %p8825_p9 = scmp.ne.s32.totalorder %s9052_s25, %s8824_s11  ;;  %s8829_s26 = sshll.u32 %s8910_s23, 4  ;;  %s8830_s26 = int_to_ptr.vmem [resolvable:$false] %s8829_s26 }
  0x31   : > { %s8831_s28 = scalar_lea.vmem %s8830_s26, 32768  ;;  %p8832_p4 = scmp.lt.s32.totalorder %s9052_s25, %s8830_s26 }
  0x32   : > { %p8827_p10 = pnand %p8825_p9, %p8813_p5  ;;  %p8833_p11 = scmp.lt.s32.totalorder %s8831_s28, %s8824_s11 }
  0x34   : > { %p8828_p1 = pneg %p8827_p10  ;;  %p8834_p6 = por %p8833_p11, %p8832_p4 }
  0x36   : > { %p8835_p13 = pnand %p8834_p6, %p8828_p1 }
  0x38   : > { %8838 = shalt.err (!%p8835_p13)
}
  0x39   : > { %s8911_s14 = smov 2048   ;;  %s8912_s9 = smov 128  }
  0x3a   : > { %8278 = dma.hbm_to_vmem [thread:$0]  (!%p9035_p3), %s9050_s8, 16384, %s9052_s25, %s9054_s10, %s8911_s14, %s8911_s14, %s8912_s9  }
  0x3b   : > { %p14886_p5 = scmp.ne.s32.totalorder %s14883_s7, 0 }
  0x3d   : > { %220 = sbr.rel (%p14886_p5) target bundleno = 3590 (0xe06), region = 40 }
  0x42   : > { %s9078_s13 = sand.u32 1, %s8899_s19   ;;  %p14887_p6 = scmp.ne.s32.totalorder %s14880_s29, 0 }
  0x43   : > { %s6559_s15 = sshll.u32 %s9078_s13, 10  ;;  %s223_s16 = scalar_lea.sflag [#allocation3], %s9078_s13 }
  0x44   : > { %s9084_s17 = scalar_lea.vmem [#allocation2], %s6559_s15 }
  0x45   : > { %8882 = dma.done.wait (%p14887_p6), %s223_s16, 16384  }
  0x46   : > { %8884 = vsyncadd (%p14887_p6), %s223_s16, 4294950912  ;;  %p14888_p13 = scmp.eq.s32.totalorder %s8980_s22, 0 }
  0x48   : > { %8886 = dma.done.wait (%p14888_p13), [#allocation6], 2048   ;;  %p14889_p3 = pmov %p14888_p13 }
  0x49   : > { %v306_v0 = vld [vmem:[%s14476_s3 + $0xf8] sm:$0xff]  ;;  %v305_v4 = vld [vmem:[%s14476_s3 + $0xf0] sm:$0xff]  ;;  %v304_v8 = vld [vmem:[%s14476_s3 + $0xe8] sm:$0xff]  ;;  %s8913_s29 = smov 126   ;;  %s8914_s28 = smov 120   ;;  %vm3736_vm0 = vcmask 64512  }
  0x4a   : > { %8888 = vsyncadd (%p14889_p3), [#allocation6], 4294965248  ;;  %v338_v1 = vld [vmem:[%s14476_s3 + $0x1f8] sm:$0xff]  ;;  %6729 = vmatprep.subr.mxu0 %v306_v0  ;;  %v337_v5 = vld [vmem:[%s14476_s3 + $0x1f0] sm:$0xff]  ;;  %s8915_s26 = smov 122   ;;  %s8916_s14 = smov 121  }
  0x4b   : > { %v290_v2 = vld [vmem:[%s14476_s3 + $0x78] sm:$0xff]  ;;  %6773 = vmatprep.subr.mxu1 %v338_v1  ;;  %v289_v6 = vld [vmem:[%s14476_s3 + $0x70] sm:$0xff]  ;;  %v336_v9 = vld [vmem:[%s14476_s3 + $0x1e8] sm:$0xff]  ;;  %s8918_s9 = smov 123   ;;  %vm8919_vm1 = vmmov 0   ;;  %vm3588_vm2 = vcmask 7168  }
  0x4c   : > { %v322_v3 = vld [vmem:[%s14476_s3 + $0x178] sm:$0xff]  ;;  %6730 = vmatpush3.msra.mxu0 %v290_v2  ;;  %v321_v7 = vld [vmem:[%s14476_s3 + $0x170] sm:$0xff]  ;;  %v288_v10 = vld [vmem:[%s14476_s3 + $0x68] sm:$0xff]  ;;  %vm3593_vm3 = vcmask 15360   ;;  %vm3598_vm4 = vcmask 23552   ;;  %vm3651_vm5 = vcmask 261120  }
  0x4d   : > { %6774 = vmatpush3.msra.mxu1 %v322_v3  ;;  %6731 = vmatprep.subr.mxu0 %v305_v4  ;;  %v320_v11 = vld [vmem:[%s14476_s3 + $0x168] sm:$0xff]  ;;  %v303_v12 = vld [vmem:[%s14476_s3 + $0xe0] sm:$0xff]  ;;  %v302_v16 = vld [vmem:[%s14476_s3 + $0xd8] sm:$0xff]  ;;  %s8920_s16 = smov 2   ;;  %s8925_s23 = smov 8   ;;  %vm4367_vm7 = vcmask 130048  }
  0x4e   : > { %6775 = vmatprep.subr.mxu1 %v337_v5  ;;  %6732 = vmatpush3.msra.mxu0 %v289_v6  ;;  %v335_v13 = vld [vmem:[%s14476_s3 + $0x1e0] sm:$0xff]  ;;  %v334_v17 = vld [vmem:[%s14476_s3 + $0x1d8] sm:$0xff]  ;;  %v301_v20 = vld [vmem:[%s14476_s3 + $0xd0] sm:$0xff]  ;;  %p15732_p2 = scmp.ne.s32.totalorder %s14881_s30, 0 }
  0x4f   : > { %6776 = vmatpush3.msra.mxu1 %v321_v7  ;;  %6733 = vmatprep.subr.mxu0 %v304_v8  ;;  %v287_v14 = vld [vmem:[%s14476_s3 + $0x60] sm:$0xff]  ;;  %v286_v18 = vld [vmem:[%s14476_s3 + $0x58] sm:$0xff]  ;;  %v333_v21 = vld [vmem:[%s14476_s3 + $0x1d0] sm:$0xff] }
  0x50   : > { %6777 = vmatprep.subr.mxu1 %v336_v9  ;;  %v319_v15 = vld [vmem:[%s14476_s3 + $0x160] sm:$0xff]  ;;  %6734 = vmatpush3.msra.mxu0 %v288_v10  ;;  %v318_v19 = vld [vmem:[%s14476_s3 + $0x158] sm:$0xff]  ;;  %v285_v22 = vld [vmem:[%s14476_s3 + $0x50] sm:$0xff] }
  0x51   : > { %6778 = vmatpush3.msra.mxu1 %v320_v11  ;;  %6735 = vmatprep.subr.mxu0 %v303_v12  ;;  %v317_v23 = vld [vmem:[%s14476_s3 + $0x150] sm:$0xff]  ;;  %v300_v24 = vld [vmem:[%s14476_s3 + $0xc8] sm:$0xff]  ;;  %v299_v28 = vld [vmem:[%s14476_s3 + $0xc0] sm:$0xff] }
  0x52   : > { %6779 = vmatprep.subr.mxu1 %v335_v13  ;;  %6736 = vmatpush3.msra.mxu0 %v287_v14  ;;  %v332_v25 = vld [vmem:[%s14476_s3 + $0x1c8] sm:$0xff]  ;;  %v331_v29 = vld [vmem:[%s14476_s3 + $0x1c0] sm:$0xff]  ;;  %v298_v32 = vld [vmem:[%s14476_s3 + $0xb8] sm:$0xff] }
  0x53   : > { %6780 = vmatpush3.msra.mxu1 %v319_v15  ;;  %6737 = vmatprep.subr.mxu0 %v302_v16  ;;  %v284_v26 = vld [vmem:[%s14476_s3 + $0x48] sm:$0xff]  ;;  %v283_v30 = vld [vmem:[%s14476_s3 + $0x40] sm:$0xff]  ;;  %v330_v33 = vld [vmem:[%s14476_s3 + $0x1b8] sm:$0xff] }
  0x54   : > { %6781 = vmatprep.subr.mxu1 %v334_v17  ;;  %6738 = vmatpush3.msra.mxu0 %v286_v18  ;;  %v316_v27 = vld [vmem:[%s14476_s3 + $0x148] sm:$0xff]  ;;  %v315_v31 = vld [vmem:[%s14476_s3 + $0x140] sm:$0xff]  ;;  %v282_v34 = vld [vmem:[%s14476_s3 + $0x38] sm:$0xff] }
  0x55   : > { %6782 = vmatpush3.msra.mxu1 %v318_v19  ;;  %6739 = vmatprep.subr.mxu0 %v301_v20  ;;  %v314_v35 = vld [vmem:[%s14476_s3 + $0x138] sm:$0xff]  ;;  %v297_v36 = vld [vmem:[%s14476_s3 + $0xb0] sm:$0xff]  ;;  %v296_v40 = vld [vmem:[%s14476_s3 + $0xa8] sm:$0xff] }
  0x56   : > { %6783 = vmatprep.subr.mxu1 %v333_v21  ;;  %6740 = vmatpush3.msra.mxu0 %v285_v22  ;;  %v329_v37 = vld [vmem:[%s14476_s3 + $0x1b0] sm:$0xff]  ;;  %v328_v41 = vld [vmem:[%s14476_s3 + $0x1a8] sm:$0xff]  ;;  %v295_v44 = vld [vmem:[%s14476_s3 + $0xa0] sm:$0xff] }
  0x57   : > { %6784 = vmatpush3.msra.mxu1 %v317_v23  ;;  %6741 = vmatprep.subr.mxu0 %v300_v24  ;;  %v281_v38 = vld [vmem:[%s14476_s3 + $0x30] sm:$0xff]  ;;  %v280_v42 = vld [vmem:[%s14476_s3 + $0x28] sm:$0xff]  ;;  %v327_v45 = vld [vmem:[%s14476_s3 + $0x1a0] sm:$0xff] }
  0x58   : > { %6785 = vmatprep.subr.mxu1 %v332_v25  ;;  %6742 = vmatpush3.msra.mxu0 %v284_v26  ;;  %v313_v39 = vld [vmem:[%s14476_s3 + $0x130] sm:$0xff]  ;;  %v312_v43 = vld [vmem:[%s14476_s3 + $0x128] sm:$0xff]  ;;  %v279_v46 = vld [vmem:[%s14476_s3 + $0x20] sm:$0xff] }
  0x59   : > { %6786 = vmatpush3.msra.mxu1 %v316_v27  ;;  %6743 = vmatprep.subr.mxu0 %v299_v28  ;;  %v311_v47 = vld [vmem:[%s14476_s3 + $0x120] sm:$0xff]  ;;  %v294_v48 = vld [vmem:[%s14476_s3 + $0x98] sm:$0xff]  ;;  %v293_v52 = vld [vmem:[%s14476_s3 + $0x90] sm:$0xff] }
  0x5a   : > { %6787 = vmatprep.subr.mxu1 %v331_v29  ;;  %6744 = vmatpush3.msra.mxu0 %v283_v30  ;;  %v326_v49 = vld [vmem:[%s14476_s3 + $0x198] sm:$0xff]  ;;  %v325_v53 = vld [vmem:[%s14476_s3 + $0x190] sm:$0xff]  ;;  %v292_v56 = vld [vmem:[%s14476_s3 + $0x88] sm:$0xff] }
  0x5b   : > { %6788 = vmatpush3.msra.mxu1 %v315_v31  ;;  %6745 = vmatprep.subr.mxu0 %v298_v32  ;;  %v278_v50 = vld [vmem:[%s14476_s3 + $0x18] sm:$0xff]  ;;  %v277_v54 = vld [vmem:[%s14476_s3 + $0x10] sm:$0xff]  ;;  %v324_v57 = vld [vmem:[%s14476_s3 + $0x188] sm:$0xff] }
  0x5c   : > { %6789 = vmatprep.subr.mxu1 %v330_v33  ;;  %6746 = vmatpush3.msra.mxu0 %v282_v34  ;;  %v310_v51 = vld [vmem:[%s14476_s3 + $0x118] sm:$0xff]  ;;  %v309_v55 = vld [vmem:[%s14476_s3 + $0x110] sm:$0xff]  ;;  %v276_v58 = vld [vmem:[%s14476_s3 + $0x8] sm:$0xff] }
  0x5d   : > { %6790 = vmatpush3.msra.mxu1 %v314_v35  ;;  %6747 = vmatprep.subr.mxu0 %v297_v36  ;;  %v308_v59 = vld [vmem:[%s14476_s3 + $0x108] sm:$0xff]  ;;  %v291_v60 = vld [vmem:[%s14476_s3 + $0x80] sm:$0xff]  ;;  %v550_v1 = vld [vmem:[%s9084_s17 + $0x18] sm:$0xff] }
  0x5e   : > { %6791 = vmatprep.subr.mxu1 %v329_v37  ;;  %6748 = vmatpush3.msra.mxu0 %v281_v38  ;;  %v323_v61 = vld [vmem:[%s14476_s3 + $0x180] sm:$0xff]  ;;  %v548_v63 = vld [vmem:[%s9084_s17 + $0x8] sm:$0xff]  ;;  %v549_v3 = vld [vmem:[%s9084_s17 + $0x10] sm:$0xff] }
  0x5f   : > { %6792 = vmatpush3.msra.mxu1 %v313_v39  ;;  %6749 = vmatprep.subr.mxu0 %v296_v40  ;;  %v275_v62 = vld [vmem:[%s14476_s3] sm:$0xff]  ;;  %v370_v4 = vld [vmem:[%s14476_s3 + $0x2f8] sm:$0xff]  ;;  %v369_v8 = vld [vmem:[%s14476_s3 + $0x2f0] sm:$0xff] }
  0x60   : > { %6793 = vmatprep.subr.mxu1 %v328_v41  ;;  %6750 = vmatpush3.msra.mxu0 %v280_v42  ;;  %v307_v0 = vld [vmem:[%s14476_s3 + $0x100] sm:$0xff]  ;;  %v402_v5 = vld [vmem:[%s14476_s3 + $0x3f8] sm:$0xff]  ;;  %v401_v9 = vld [vmem:[%s14476_s3 + $0x3f0] sm:$0xff] }
  0x61   : > { %6794 = vmatpush3.msra.mxu1 %v312_v43  ;;  %6751 = vmatprep.subr.mxu0 %v295_v44  ;;  %v547_v2 = vld [vmem:[%s9084_s17] sm:$0xff]  ;;  %v354_v6 = vld [vmem:[%s14476_s3 + $0x278] sm:$0xff]  ;;  %v353_v10 = vld [vmem:[%s14476_s3 + $0x270] sm:$0xff] }
  0x62   : > { %6795 = vmatprep.subr.mxu1 %v327_v45  ;;  %6752 = vmatpush3.msra.mxu0 %v279_v46  ;;  %v386_v7 = vld [vmem:[%s14476_s3 + $0x378] sm:$0xff]  ;;  %v385_v11 = vld [vmem:[%s14476_s3 + $0x370] sm:$0xff]  ;;  %v368_v12 = vld [vmem:[%s14476_s3 + $0x2e8] sm:$0xff] }
  0x63   : > { %6796 = vmatpush3.msra.mxu1 %v311_v47  ;;  %6753 = vmatprep.subr.mxu0 %v294_v48  ;;  %v400_v13 = vld [vmem:[%s14476_s3 + $0x3e8] sm:$0xff]  ;;  %v367_v16 = vld [vmem:[%s14476_s3 + $0x2e0] sm:$0xff]  ;;  %v366_v20 = vld [vmem:[%s14476_s3 + $0x2d8] sm:$0xff] }
  0x64   : > { %6797 = vmatprep.subr.mxu1 %v326_v49  ;;  %6754 = vmatpush3.msra.mxu0 %v278_v50  ;;  %v352_v14 = vld [vmem:[%s14476_s3 + $0x268] sm:$0xff]  ;;  %v399_v17 = vld [vmem:[%s14476_s3 + $0x3e0] sm:$0xff]  ;;  %v398_v21 = vld [vmem:[%s14476_s3 + $0x3d8] sm:$0xff] }
  0x65   : > { %6798 = vmatpush3.msra.mxu1 %v310_v51  ;;  %6755 = vmatprep.subr.mxu0 %v293_v52  ;;  %v384_v15 = vld [vmem:[%s14476_s3 + $0x368] sm:$0xff]  ;;  %v351_v18 = vld [vmem:[%s14476_s3 + $0x260] sm:$0xff]  ;;  %v350_v22 = vld [vmem:[%s14476_s3 + $0x258] sm:$0xff] }
  0x66   : > { %6799 = vmatprep.subr.mxu1 %v325_v53  ;;  %6756 = vmatpush3.msra.mxu0 %v277_v54  ;;  %v383_v19 = vld [vmem:[%s14476_s3 + $0x360] sm:$0xff]  ;;  %v382_v23 = vld [vmem:[%s14476_s3 + $0x358] sm:$0xff]  ;;  %v365_v24 = vld [vmem:[%s14476_s3 + $0x2d0] sm:$0xff] }
  0x67   : > { %6800 = vmatpush3.msra.mxu1 %v309_v55  ;;  %6757 = vmatprep.subr.mxu0 %v292_v56  ;;  %v397_v25 = vld [vmem:[%s14476_s3 + $0x3d0] sm:$0xff]  ;;  %v364_v28 = vld [vmem:[%s14476_s3 + $0x2c8] sm:$0xff]  ;;  %v363_v32 = vld [vmem:[%s14476_s3 + $0x2c0] sm:$0xff] }
  0x68   : > { %6801 = vmatprep.subr.mxu1 %v324_v57  ;;  %6758 = vmatpush3.msra.mxu0 %v276_v58  ;;  %v349_v26 = vld [vmem:[%s14476_s3 + $0x250] sm:$0xff]  ;;  %v396_v29 = vld [vmem:[%s14476_s3 + $0x3c8] sm:$0xff]  ;;  %v395_v33 = vld [vmem:[%s14476_s3 + $0x3c0] sm:$0xff] }
  0x69   : > { %6802 = vmatpush3.msra.mxu1 %v308_v59  ;;  %6759 = vmatprep.subr.mxu0 %v291_v60  ;;  %v381_v27 = vld [vmem:[%s14476_s3 + $0x350] sm:$0xff]  ;;  %v348_v30 = vld [vmem:[%s14476_s3 + $0x248] sm:$0xff]  ;;  %v347_v34 = vld [vmem:[%s14476_s3 + $0x240] sm:$0xff] }
  0x6a   : > { %6803 = vmatprep.subr.mxu1 %v323_v61  ;;  %6760 = vmatpush3.msra.mxu0 %v275_v62  ;;  %v380_v31 = vld [vmem:[%s14476_s3 + $0x348] sm:$0xff]  ;;  %v379_v35 = vld [vmem:[%s14476_s3 + $0x340] sm:$0xff]  ;;  %v362_v36 = vld [vmem:[%s14476_s3 + $0x2b8] sm:$0xff] }
  0x6b   : > { %675 = vmatprep.mubr.f32.mxu0 %v548_v63  ;;  %6804 = vmatpush3.msra.mxu1 %v307_v0  ;;  %v394_v37 = vld [vmem:[%s14476_s3 + $0x3b8] sm:$0xff]  ;;  %v564_v40 = vld [vmem:[%s9084_s17 + $0x88] sm:$0xff]  ;;  %v361_v42 = vld [vmem:[%s14476_s3 + $0x2b0] sm:$0xff] }
  0x6c   : > { %760 = vmatprep.mubr.f32.mxu1 %v550_v1  ;;  %676 = vmatmul.mubr.f32.vlgmr.msra.gmra.mxu0 %v547_v2  ;;  %v346_v38 = vld [vmem:[%s14476_s3 + $0x238] sm:$0xff]  ;;  %v393_v43 = vld [vmem:[%s14476_s3 + $0x3b0] sm:$0xff]  ;;  %v563_v44 = vld [vmem:[%s9084_s17 + $0x80] sm:$0xff] }
  0x6d   : > { %761 = vmatmul.mubr.f32.vlgmr.msra.gmra.mxu1 %v549_v3  ;;  %6817 = vmatprep.subr.mxu0 %v370_v4  ;;  %v378_v39 = vld [vmem:[%s14476_s3 + $0x338] sm:$0xff]  ;;  %v565_v45 = vld [vmem:[%s9084_s17 + $0x90] sm:$0xff]  ;;  %v360_v48 = vld [vmem:[%s14476_s3 + $0x2a8] sm:$0xff] }
  0x6e   : > { %6861 = vmatprep.subr.mxu1 %v402_v5  ;;  %6818 = vmatpush3.msra.mxu0 %v354_v6  ;;  %v566_v41 = vld [vmem:[%s9084_s17 + $0x98] sm:$0xff]  ;;  %v345_v46 = vld [vmem:[%s14476_s3 + $0x230] sm:$0xff]  ;;  %v392_v49 = vld [vmem:[%s14476_s3 + $0x3a8] sm:$0xff] }
  0x6f   : > { %6862 = vmatpush3.msra.mxu1 %v386_v7  ;;  %6819 = vmatprep.subr.mxu0 %v369_v8  ;;  %v377_v47 = vld [vmem:[%s14476_s3 + $0x330] sm:$0xff]  ;;  %v344_v50 = vld [vmem:[%s14476_s3 + $0x228] sm:$0xff]  ;;  %v582_v53 = vld [vmem:[%s9084_s17 + $0x118] sm:$0xff] }
  0x70   : > { %6863 = vmatprep.subr.mxu1 %v401_v9  ;;  %6820 = vmatpush3.msra.mxu0 %v353_v10  ;;  %v376_v51 = vld [vmem:[%s14476_s3 + $0x328] sm:$0xff]  ;;  %v359_v54 = vld [vmem:[%s14476_s3 + $0x2a0] sm:$0xff]  ;;  %v581_v57 = vld [vmem:[%s9084_s17 + $0x110] sm:$0xff] }
  0x71   : > { %6864 = vmatpush3.msra.mxu1 %v385_v11  ;;  %6821 = vmatprep.subr.mxu0 %v368_v12  ;;  %v580_v52 = vld [vmem:[%s9084_s17 + $0x108] sm:$0xff]  ;;  %v391_v55 = vld [vmem:[%s14476_s3 + $0x3a0] sm:$0xff]  ;;  %v358_v60 = vld [vmem:[%s14476_s3 + $0x298] sm:$0xff] }
  0x72   : > { %6865 = vmatprep.subr.mxu1 %v400_v13  ;;  %6822 = vmatpush3.msra.mxu0 %v352_v14  ;;  %v579_v56 = vld [vmem:[%s9084_s17 + $0x100] sm:$0xff]  ;;  %v390_v61 = vld [vmem:[%s14476_s3 + $0x398] sm:$0xff]  ;;  %v596_v0 = vld [vmem:[%s9084_s17 + $0x188] sm:$0xff] }
  0x73   : > { %6866 = vmatpush3.msra.mxu1 %v384_v15  ;;  %6823 = vmatprep.subr.mxu0 %v367_v16  ;;  %v343_v58 = vld [vmem:[%s14476_s3 + $0x220] sm:$0xff]  ;;  %v342_v62 = vld [vmem:[%s14476_s3 + $0x218] sm:$0xff]  ;;  %v357_v2 = vld [vmem:[%s14476_s3 + $0x290] sm:$0xff] }
  0x74   : > { %6867 = vmatprep.subr.mxu1 %v399_v17  ;;  %6824 = vmatpush3.msra.mxu0 %v351_v18  ;;  %v375_v59 = vld [vmem:[%s14476_s3 + $0x320] sm:$0xff]  ;;  %v374_v63 = vld [vmem:[%s14476_s3 + $0x318] sm:$0xff]  ;;  %v389_v3 = vld [vmem:[%s14476_s3 + $0x390] sm:$0xff] }
  0x75   : > { %6868 = vmatpush3.msra.mxu1 %v383_v19  ;;  %6825 = vmatprep.subr.mxu0 %v366_v20  ;;  %v598_v1 = vld [vmem:[%s9084_s17 + $0x198] sm:$0xff]  ;;  %v595_v4 = vld [vmem:[%s9084_s17 + $0x180] sm:$0xff]  ;;  %v597_v5 = vld [vmem:[%s9084_s17 + $0x190] sm:$0xff] }
  0x76   : > { %6869 = vmatprep.subr.mxu1 %v398_v21  ;;  %6826 = vmatpush3.msra.mxu0 %v350_v22  ;;  %v341_v6 = vld [vmem:[%s14476_s3 + $0x210] sm:$0xff]  ;;  %v356_v8 = vld [vmem:[%s14476_s3 + $0x288] sm:$0xff]  ;;  %v355_v12 = vld [vmem:[%s14476_s3 + $0x280] sm:$0xff] }
  0x77   : > { %6870 = vmatpush3.msra.mxu1 %v382_v23  ;;  %6827 = vmatprep.subr.mxu0 %v365_v24  ;;  %v373_v7 = vld [vmem:[%s14476_s3 + $0x310] sm:$0xff]  ;;  %v388_v9 = vld [vmem:[%s14476_s3 + $0x388] sm:$0xff]  ;;  %v387_v13 = vld [vmem:[%s14476_s3 + $0x380] sm:$0xff] }
  0x78   : > { %6871 = vmatprep.subr.mxu1 %v397_v25  ;;  %6828 = vmatpush3.msra.mxu0 %v349_v26  ;;  %v340_v10 = vld [vmem:[%s14476_s3 + $0x208] sm:$0xff]  ;;  %v339_v14 = vld [vmem:[%s14476_s3 + $0x200] sm:$0xff]  ;;  %v9501_v18 = vld [vmem:[%s9084_s17 + $0x38] sm:$0xff] }
  0x79   : > { %6872 = vmatpush3.msra.mxu1 %v381_v27  ;;  %6829 = vmatprep.subr.mxu0 %v364_v28  ;;  %v372_v11 = vld [vmem:[%s14476_s3 + $0x308] sm:$0xff]  ;;  %v371_v16 = vld [vmem:[%s14476_s3 + $0x300] sm:$0xff]  ;;  %v434_v19 = vld [vmem:[%s14476_s3 + $0x4f8] sm:$0xff] }
  0x7a   : > { %6873 = vmatprep.subr.mxu1 %v396_v29  ;;  %6830 = vmatpush3.msra.mxu0 %v348_v30  ;;  %v9492_v15 = vld [vmem:[%s9084_s17 + $0x28] sm:$0xff]  ;;  %v9498_v17 = vld [vmem:[%s9084_s17 + $0x20] sm:$0xff]  ;;  %v466_v20 = vld [vmem:[%s14476_s3 + $0x5f8] sm:$0xff] }
  0x7b   : > { %6874 = vmatpush3.msra.mxu1 %v380_v31  ;;  %6831 = vmatprep.subr.mxu0 %v363_v32  ;;  %v9511_v21 = vld [vmem:[%s9084_s17 + $0x30] sm:$0xff]  ;;  %v418_v22 = vld [vmem:[%s14476_s3 + $0x478] sm:$0xff]  ;;  %v9529_v26 = vld [vmem:[%s9084_s17 + $0xa8] sm:$0xff] }
  0x7c   : > { %6875 = vmatprep.subr.mxu1 %v395_v33  ;;  %6832 = vmatpush3.msra.mxu0 %v347_v34  ;;  %v450_v23 = vld [vmem:[%s14476_s3 + $0x578] sm:$0xff]  ;;  %v433_v24 = vld [vmem:[%s14476_s3 + $0x4f0] sm:$0xff]  ;;  %v9538_v29 = vld [vmem:[%s9084_s17 + $0xa0] sm:$0xff] }
  0x7d   : > { %6876 = vmatpush3.msra.mxu1 %v379_v35  ;;  %6833 = vmatprep.subr.mxu0 %v362_v36  ;;  %v465_v25 = vld [vmem:[%s14476_s3 + $0x5f0] sm:$0xff]  ;;  %v9543_v30 = vld [vmem:[%s14476_s3 + $0x4e8] sm:$0xff]  ;;  %v9552_v32 = vld [vmem:[%s9084_s17 + $0xb8] sm:$0xff] }
  0x7e   : > { %6877 = vmatprep.subr.mxu1 %v394_v37  ;;  %6834 = vmatpush3.msra.mxu0 %v346_v38  ;;  %v417_v27 = vld [vmem:[%s14476_s3 + $0x470] sm:$0xff]  ;;  %v9548_v31 = vld [vmem:[%s14476_s3 + $0x5e8] sm:$0xff]  ;;  %v9568_v35 = vld [vmem:[%s14476_s3 + $0x4e0] sm:$0xff] }
  0x7f   : > { %6878 = vmatpush3.msra.mxu1 %v378_v39  ;;  %680 = vmatprep.mubr.f32.mxu0 %v564_v40  ;;  %v449_v28 = vld [vmem:[%s14476_s3 + $0x570] sm:$0xff]  ;;  %v9557_v33 = vld [vmem:[%s14476_s3 + $0x468] sm:$0xff]  ;;  %v9578_v37 = vld [vmem:[%s14476_s3 + $0x5e0] sm:$0xff] }
  0x80   : > { %765 = vmatprep.mubr.f32.mxu1 %v566_v41  ;;  %6835 = vmatprep.subr.mxu0 %v361_v42  ;;  %v9563_v34 = vld [vmem:[%s14476_s3 + $0x568] sm:$0xff]  ;;  %v9573_v36 = vld [vmem:[%s9084_s17 + $0xb0] sm:$0xff]  ;;  %v9588_v39 = vld [vmem:[%s14476_s3 + $0x460] sm:$0xff] }
  0x81   : > { %6879 = vmatprep.subr.mxu1 %v393_v43  ;;  %681 = vmatmul.mubr.f32.gmra.mxu0 %v563_v44  ;;  %v9583_v38 = vld [vmem:[%s9084_s17 + $0x128] sm:$0xff]  ;;  %v9595_v40 = vld [vmem:[%s14476_s3 + $0x560] sm:$0xff]  ;;  %v9605_v42 = vld [vmem:[%s14476_s3 + $0x4d8] sm:$0xff] }
  0x82   : > { %766 = vmatmul.mubr.f32.gmra.mxu1 %v565_v45  ;;  %6836 = vmatpush3.msra.mxu0 %v345_v46  ;;  %v9598_v41 = vld [vmem:[%s9084_s17 + $0x120] sm:$0xff]  ;;  %v9610_v43 = vld [vmem:[%s14476_s3 + $0x5d8] sm:$0xff] }
  0x83   : > { %6880 = vmatpush3.msra.mxu1 %v377_v47  ;;  %6837 = vmatprep.subr.mxu0 %v360_v48  ;;  %v9615_v44 = vld [vmem:[%s9084_s17 + $0x138] sm:$0xff]  ;;  %v9632_v47 = vld [vmem:[%s14476_s3 + $0x4d0] sm:$0xff] }
  0x84   : > { %6881 = vmatprep.subr.mxu1 %v392_v49  ;;  %6838 = vmatpush3.msra.mxu0 %v344_v50  ;;  %v9620_v45 = vld [vmem:[%s14476_s3 + $0x458] sm:$0xff]  ;;  %v9637_v48 = vld [vmem:[%s9084_s17 + $0x130] sm:$0xff]  ;;  %v9647_v50 = vld [vmem:[%s9084_s17 + $0x1a8] sm:$0xff] }
  0x85   : > { %6882 = vmatpush3.msra.mxu1 %v376_v51  ;;  %685 = vmatprep.mubr.f32.mxu0 %v580_v52  ;;  %v9627_v46 = vld [vmem:[%s14476_s3 + $0x558] sm:$0xff]  ;;  %v9642_v49 = vld [vmem:[%s14476_s3 + $0x5d0] sm:$0xff] }
  0x86   : > { %770 = vmatprep.mubr.f32.mxu1 %v582_v53  ;;  %6839 = vmatprep.subr.mxu0 %v359_v54  ;;  %v9652_v51 = vld [vmem:[%s14476_s3 + $0x450] sm:$0xff]  ;;  %v9662_v53 = vld [vmem:[%s9084_s17 + $0x1a0] sm:$0xff]  ;;  %v9669_v54 = vld [vmem:[%s14476_s3 + $0x4c8] sm:$0xff] }
  0x87   : > { %6883 = vmatprep.subr.mxu1 %v391_v55  ;;  %686 = vmatmul.mubr.f32.gmra.mxu0 %v579_v56  ;;  %v9659_v52 = vld [vmem:[%s14476_s3 + $0x550] sm:$0xff]  ;;  %v9674_v55 = vld [vmem:[%s14476_s3 + $0x5c8] sm:$0xff]  ;;  %v9679_v56 = vld [vmem:[%s9084_s17 + $0x1b8] sm:$0xff] }
  0x88   : > { %771 = vmatmul.mubr.f32.gmra.mxu1 %v581_v57  ;;  %6840 = vmatpush3.msra.mxu0 %v343_v58  ;;  %v9684_v57 = vld [vmem:[%s14476_s3 + $0x448] sm:$0xff] }
  0x89   : > { %6884 = vmatpush3.msra.mxu1 %v375_v59  ;;  %6841 = vmatprep.subr.mxu0 %v358_v60  ;;  %v9691_v58 = vld [vmem:[%s14476_s3 + $0x548] sm:$0xff]  ;;  %v9696_v59 = vld [vmem:[%s14476_s3 + $0x4c0] sm:$0xff]  ;;  %v9701_v60 = vld [vmem:[%s9084_s17 + $0x1b0] sm:$0xff] }
  0x8a   : > { %6885 = vmatprep.subr.mxu1 %v390_v61  ;;  %6842 = vmatpush3.msra.mxu0 %v342_v62  ;;  %v9706_v61 = vld [vmem:[%s14476_s3 + $0x5c0] sm:$0xff] }
  0x8b   : > { %6886 = vmatpush3.msra.mxu1 %v374_v63  ;;  %690 = vmatprep.mubr.f32.mxu0 %v596_v0  ;;  %v9713_v62 = vld [vmem:[%s14476_s3 + $0x440] sm:$0xff]  ;;  %v9725_v0 = vld [vmem:[%s14476_s3 + $0x4b8] sm:$0xff] }
  0x8c   : > { %775 = vmatprep.mubr.f32.mxu1 %v598_v1  ;;  %6843 = vmatprep.subr.mxu0 %v357_v2  ;;  %v9718_v63 = vld [vmem:[%s14476_s3 + $0x540] sm:$0xff]  ;;  %v9730_v1 = vld [vmem:[%s14476_s3 + $0x5b8] sm:$0xff] }
  0x8d   : > { %6887 = vmatprep.subr.mxu1 %v389_v3  ;;  %691 = vmatmul.mubr.f32.gmra.mxu0 %v595_v4  ;;  %v9737_v2 = vld [vmem:[%s14476_s3 + $0x438] sm:$0xff]  ;;  %v9749_v4 = vld [vmem:[%s14476_s3 + $0x4b0] sm:$0xff] }
  0x8e   : > { %776 = vmatmul.mubr.f32.gmra.mxu1 %v597_v5  ;;  %6844 = vmatpush3.msra.mxu0 %v341_v6  ;;  %v9742_v3 = vld [vmem:[%s14476_s3 + $0x538] sm:$0xff]  ;;  %v9754_v5 = vld [vmem:[%s14476_s3 + $0x5b0] sm:$0xff] }
  0x8f   : > { %6888 = vmatpush3.msra.mxu1 %v373_v7  ;;  %6845 = vmatprep.subr.mxu0 %v356_v8  ;;  %v9761_v6 = vld [vmem:[%s14476_s3 + $0x430] sm:$0xff]  ;;  %v9773_v8 = vld [vmem:[%s14476_s3 + $0x4a8] sm:$0xff] }
  0x90   : > { %6889 = vmatprep.subr.mxu1 %v388_v9  ;;  %6846 = vmatpush3.msra.mxu0 %v340_v10  ;;  %v9766_v7 = vld [vmem:[%s14476_s3 + $0x530] sm:$0xff]  ;;  %v9778_v9 = vld [vmem:[%s14476_s3 + $0x5a8] sm:$0xff] }
  0x91   : > { %6890 = vmatpush3.msra.mxu1 %v372_v11  ;;  %6847 = vmatprep.subr.mxu0 %v355_v12  ;;  %v9785_v10 = vld [vmem:[%s14476_s3 + $0x428] sm:$0xff]  ;;  %v9797_v12 = vld [vmem:[%s14476_s3 + $0x4a0] sm:$0xff] }
  0x92   : > { %6891 = vmatprep.subr.mxu1 %v387_v13  ;;  %6848 = vmatpush3.msra.mxu0 %v339_v14  ;;  %v9790_v11 = vld [vmem:[%s14476_s3 + $0x528] sm:$0xff]  ;;  %v9802_v13 = vld [vmem:[%s14476_s3 + $0x5a0] sm:$0xff] }
  0x93   : > { %845 = vmatprep.mubr.f32.mxu0 %v9492_v15  ;;  %6892 = vmatpush3.msra.mxu1 %v371_v16  ;;  %v9809_v14 = vld [vmem:[%s14476_s3 + $0x420] sm:$0xff] }
  0x94   : > { %846 = vmatmul.mubr.f32.vlgmr.msra.gmra.mxu0 %v9498_v17  ;;  %930 = vmatprep.mubr.f32.mxu1 %v9501_v18  ;;  %14890 = vst [vmem:[#allocation11_spill] sm:$0xff] %v9809_v14  ;;  %v9814_v16 = vld [vmem:[%s14476_s3 + $0x520] sm:$0xff] }
  0x95   : > { %6905 = vmatprep.subr.mxu0 %v434_v19  ;;  %6949 = vmatprep.subr.mxu1 %v466_v20  ;;  %14891 = vst [vmem:[#allocation12_spill] sm:$0xff] %v9814_v16  ;;  %v9821_v19 = vld [vmem:[%s14476_s3 + $0x498] sm:$0xff] }
  0x96   : > { %931 = vmatmul.mubr.f32.vlgmr.msra.gmra.mxu1 %v9511_v21  ;;  %6906 = vmatpush3.msra.mxu0 %v418_v22  ;;  %14892 = vst [vmem:[#allocation13_spill] sm:$0xff] %v9821_v19  ;;  %v9826_v20 = vld [vmem:[%s14476_s3 + $0x598] sm:$0xff] }
  0x97   : > { %6950 = vmatpush3.msra.mxu1 %v450_v23  ;;  %6907 = vmatprep.subr.mxu0 %v433_v24  ;;  %14893 = vst [vmem:[#allocation14_spill] sm:$0xff] %v9826_v20  ;;  %v9833_v22 = vld [vmem:[%s14476_s3 + $0x418] sm:$0xff]  ;;  %v9845_v24 = vld [vmem:[%s14476_s3 + $0x490] sm:$0xff] }
  0x98   : > { %6951 = vmatprep.subr.mxu1 %v465_v25  ;;  %850 = vmatprep.mubr.f32.mxu0 %v9529_v26  ;;  %14894 = vst [vmem:[#allocation15_spill] sm:$0xff] %v9833_v22  ;;  %v9838_v23 = vld [vmem:[%s14476_s3 + $0x518] sm:$0xff]  ;;  %14896 = vst [vmem:[#allocation17_spill] sm:$0xff] %v9845_v24  ;;  %v9850_v25 = vld [vmem:[%s14476_s3 + $0x590] sm:$0xff] }
  0x99   : > { %6908 = vmatpush3.msra.mxu0 %v417_v27  ;;  %6952 = vmatpush3.msra.mxu1 %v449_v28  ;;  %14895 = vst [vmem:[#allocation16_spill] sm:$0xff] %v9838_v23  ;;  %14897 = vst [vmem:[#allocation18_spill] sm:$0xff] %v9850_v25  ;;  %v9857_v27 = vld [vmem:[%s14476_s3 + $0x410] sm:$0xff] }
  0x9a   : > { %851 = vmatmul.mubr.f32.gmra.mxu0 %v9538_v29  ;;  %6909 = vmatprep.subr.mxu0 %v9543_v30  ;;  %14898 = vst [vmem:[#allocation19_spill] sm:$0xff] %v9857_v27  ;;  %v9862_v28 = vld [vmem:[%s14476_s3 + $0x510] sm:$0xff] }
  0x9b   : > { %6953 = vmatprep.subr.mxu1 %v9548_v31  ;;  %935 = vmatprep.mubr.f32.mxu1 %v9552_v32  ;;  %14899 = vst [vmem:[#allocation20_spill] sm:$0xff] %v9862_v28 }
  0x9c   : > { %6910 = vmatpush3.msra.mxu0 %v9557_v33  ;;  %6954 = vmatpush3.msra.mxu1 %v9563_v34 }
  0x9d   : > { %6911 = vmatprep.subr.mxu0 %v9568_v35  ;;  %936 = vmatmul.mubr.f32.gmra.mxu1 %v9573_v36 }
  0x9e   : > { %6955 = vmatprep.subr.mxu1 %v9578_v37  ;;  %855 = vmatprep.mubr.f32.mxu0 %v9583_v38 }
  0x9f   : > { %6912 = vmatpush3.msra.mxu0 %v9588_v39  ;;  %6956 = vmatpush3.msra.mxu1 %v9595_v40 }
  0xa0   : > { %856 = vmatmul.mubr.f32.gmra.mxu0 %v9598_v41  ;;  %6913 = vmatprep.subr.mxu0 %v9605_v42 }
  0xa1   : > { %6957 = vmatprep.subr.mxu1 %v9610_v43  ;;  %940 = vmatprep.mubr.f32.mxu1 %v9615_v44 }
  0xa2   : > { %6914 = vmatpush3.msra.mxu0 %v9620_v45  ;;  %6958 = vmatpush3.msra.mxu1 %v9627_v46 }
  0xa3   : > { %6915 = vmatprep.subr.mxu0 %v9632_v47  ;;  %941 = vmatmul.mubr.f32.gmra.mxu1 %v9637_v48 }
  0xa4   : > { %6959 = vmatprep.subr.mxu1 %v9642_v49  ;;  %860 = vmatprep.mubr.f32.mxu0 %v9647_v50 }
  0xa5   : > { %6916 = vmatpush3.msra.mxu0 %v9652_v51  ;;  %6960 = vmatpush3.msra.mxu1 %v9659_v52 }
  0xa6   : > { %861 = vmatmul.mubr.f32.gmra.mxu0 %v9662_v53  ;;  %6917 = vmatprep.subr.mxu0 %v9669_v54 }
  0xa7   : > { %6961 = vmatprep.subr.mxu1 %v9674_v55  ;;  %945 = vmatprep.mubr.f32.mxu1 %v9679_v56 }
  0xa8   : > { %6918 = vmatpush3.msra.mxu0 %v9684_v57  ;;  %6962 = vmatpush3.msra.mxu1 %v9691_v58 }
  0xa9   : > { %6919 = vmatprep.subr.mxu0 %v9696_v59  ;;  %946 = vmatmul.mubr.f32.gmra.mxu1 %v9701_v60 }
  0xaa   : > { %6963 = vmatprep.subr.mxu1 %v9706_v61  ;;  %6920 = vmatpush3.msra.mxu0 %v9713_v62 }
  0xab   : > { %6964 = vmatpush3.msra.mxu1 %v9718_v63  ;;  %6921 = vmatprep.subr.mxu0 %v9725_v0 }
  0xac   : > { %6965 = vmatprep.subr.mxu1 %v9730_v1  ;;  %6922 = vmatpush3.msra.mxu0 %v9737_v2 }
  0xad   : > { %6966 = vmatpush3.msra.mxu1 %v9742_v3  ;;  %6923 = vmatprep.subr.mxu0 %v9749_v4 }
  0xae   : > { %6967 = vmatprep.subr.mxu1 %v9754_v5  ;;  %6924 = vmatpush3.msra.mxu0 %v9761_v6 }
  0xaf   : > { %6968 = vmatpush3.msra.mxu1 %v9766_v7  ;;  %6925 = vmatprep.subr.mxu0 %v9773_v8 }
  0xb0   : > { %6969 = vmatprep.subr.mxu1 %v9778_v9  ;;  %6926 = vmatpush3.msra.mxu0 %v9785_v10 }
  0xb1   : > { %6970 = vmatpush3.msra.mxu1 %v9790_v11  ;;  %6927 = vmatprep.subr.mxu0 %v9797_v12 }
  0xb2   : > { %6971 = vmatprep.subr.mxu1 %v9802_v13  ;;  %6928 = vmatpush3.msra.mxu0 %v9809_v14  ;;  %v9918_v14 = vld [vmem:[%s9084_s17 + $0x40] sm:$0xff] }
  0xb3   : > { %6972 = vmatpush3.msra.mxu1 %v9814_v16  ;;  %6929 = vmatprep.subr.mxu0 %v9821_v19  ;;  %v9869_v19 = vld [vmem:[%s14476_s3 + $0x488] sm:$0xff]  ;;  %v9915_v16 = vld [vmem:[%s14476_s3 + $0x500] sm:$0xff]  ;;  %14909 = vst [vmem:[#allocation30_spill] sm:$0xff] %v9918_v14 }
  0xb4   : > { %6973 = vmatprep.subr.mxu1 %v9826_v20  ;;  %6930 = vmatpush3.msra.mxu0 %v9833_v22  ;;  %14900 = vst [vmem:[#allocation21_spill] sm:$0xff] %v9869_v19  ;;  %v9874_v20 = vld [vmem:[%s14476_s3 + $0x588] sm:$0xff]  ;;  %14908 = vst [vmem:[#allocation29_spill] sm:$0xff] %v9915_v16 }
  0xb5   : > { %6974 = vmatpush3.msra.mxu1 %v9838_v23  ;;  %14901 = vst [vmem:[#allocation22_spill] sm:$0xff] %v9874_v20  ;;  %6931 = vmatprep.subr.mxu0 %v9845_v24  ;;  %v9881_v22 = vld [vmem:[%s14476_s3 + $0x408] sm:$0xff]  ;;  %v9893_v24 = vld [vmem:[%s14476_s3 + $0x480] sm:$0xff] }
  0xb6   : > { %6975 = vmatprep.subr.mxu1 %v9850_v25  ;;  %14902 = vst [vmem:[#allocation23_spill] sm:$0xff] %v9881_v22  ;;  %v9886_v23 = vld [vmem:[%s14476_s3 + $0x508] sm:$0xff]  ;;  %6932 = vmatpush3.msra.mxu0 %v9857_v27  ;;  %14904 = vst [vmem:[#allocation25_spill] sm:$0xff] %v9893_v24  ;;  %v9898_v25 = vld [vmem:[%s14476_s3 + $0x580] sm:$0xff] }
  0xb7   : > { %14903 = vst [vmem:[#allocation24_spill] sm:$0xff] %v9886_v23  ;;  %6976 = vmatpush3.msra.mxu1 %v9862_v28  ;;  %14905 = vst [vmem:[#allocation26_spill] sm:$0xff] %v9898_v25  ;;  %6933 = vmatprep.subr.mxu0 %v9869_v19  ;;  %v9905_v27 = vld [vmem:[%s14476_s3 + $0x400] sm:$0xff]  ;;  %v9908_v28 = vld [vmem:[%s9084_s17 + $0x48] sm:$0xff] }
  0xb8   : > { %6977 = vmatprep.subr.mxu1 %v9874_v20  ;;  %14906 = vst [vmem:[#allocation27_spill] sm:$0xff] %v9905_v27  ;;  %14907 = vst [vmem:[#allocation28_spill] sm:$0xff] %v9908_v28  ;;  %6934 = vmatpush3.msra.mxu0 %v9881_v22  ;;  %v9923_v20 = vld [vmem:[%s9084_s17 + $0x58] sm:$0xff]  ;;  %v9962_v19 = vld [vmem:[%s14476_s3 + $0x7f0] sm:$0xff] }
  0xb9   : > { %6978 = vmatpush3.msra.mxu1 %v9886_v23  ;;  %6935 = vmatprep.subr.mxu0 %v9893_v24  ;;  %14910 = vst [vmem:[#allocation31_spill] sm:$0xff] %v9923_v20  ;;  %v9928_v22 = vld [vmem:[%s14476_s3 + $0x6f8] sm:$0xff]  ;;  %v9938_v24 = vld [vmem:[%s9084_s17 + $0x50] sm:$0xff]  ;;  %14917 = vst [vmem:[#allocation38_spill] sm:$0xff] %v9962_v19 }
  0xba   : > { %6979 = vmatprep.subr.mxu1 %v9898_v25  ;;  %14911 = vst [vmem:[#allocation32_spill] sm:$0xff] %v9928_v22  ;;  %6936 = vmatpush3.msra.mxu0 %v9905_v27  ;;  %v9935_v23 = vld [vmem:[%s14476_s3 + $0x7f8] sm:$0xff]  ;;  %14913 = vst [vmem:[#allocation34_spill] sm:$0xff] %v9938_v24 }
  0xbb   : > { %1015 = vmatprep.mubr.f32.mxu0 %v9908_v28  ;;  %14912 = vst [vmem:[#allocation33_spill] sm:$0xff] %v9935_v23  ;;  %6980 = vmatpush3.msra.mxu1 %v9915_v16  ;;  %v9945_v25 = vld [vmem:[%s14476_s3 + $0x678] sm:$0xff]  ;;  %v9957_v16 = vld [vmem:[%s14476_s3 + $0x6f0] sm:$0xff] }
  0xbc   : > { %1016 = vmatmul.mubr.f32.vlgmr.msra.gmra.mxu0 %v9918_v14  ;;  %14914 = vst [vmem:[#allocation35_spill] sm:$0xff] %v9945_v25  ;;  %v9950_v27 = vld [vmem:[%s14476_s3 + $0x778] sm:$0xff]  ;;  %1100 = vmatprep.mubr.f32.mxu1 %v9923_v20  ;;  %14916 = vst [vmem:[#allocation37_spill] sm:$0xff] %v9957_v16  ;;  %v9967_v14 = vld [vmem:[%s9084_s17 + $0xc8] sm:$0xff] }
  0xbd   : > { %14915 = vst [vmem:[#allocation36_spill] sm:$0xff] %v9950_v27  ;;  %6993 = vmatprep.subr.mxu0 %v9928_v22  ;;  %7037 = vmatprep.subr.mxu1 %v9935_v23  ;;  %14918 = vst [vmem:[#allocation39_spill] sm:$0xff] %v9967_v14  ;;  %v9972_v22 = vld [vmem:[%s14476_s3 + $0x670] sm:$0xff]  ;;  %v9982_v23 = vld [vmem:[%s9084_s17 + $0xc0] sm:$0xff] }
  0xbe   : > { %1101 = vmatmul.mubr.f32.vlgmr.msra.gmra.mxu1 %v9938_v24  ;;  %14919 = vst [vmem:[#allocation40_spill] sm:$0xff] %v9972_v22  ;;  %6994 = vmatpush3.msra.mxu0 %v9945_v25  ;;  %v9979_v20 = vld [vmem:[%s14476_s3 + $0x770] sm:$0xff]  ;;  %14921 = vst [vmem:[#allocation42_spill] sm:$0xff] %v9982_v23  ;;  %v9989_v24 = vld [vmem:[%s14476_s3 + $0x6e8] sm:$0xff] }
  0xbf   : > { %7038 = vmatpush3.msra.mxu1 %v9950_v27  ;;  %14920 = vst [vmem:[#allocation41_spill] sm:$0xff] %v9979_v20  ;;  %6995 = vmatprep.subr.mxu0 %v9957_v16  ;;  %14922 = vst [vmem:[#allocation43_spill] sm:$0xff] %v9989_v24  ;;  %v9994_v27 = vld [vmem:[%s14476_s3 + $0x7e8] sm:$0xff]  ;;  %v9999_v25 = vld [vmem:[%s9084_s17 + $0xd8] sm:$0xff] }
  0xc0   : > { %7039 = vmatprep.subr.mxu1 %v9962_v19  ;;  %14923 = vst [vmem:[#allocation44_spill] sm:$0xff] %v9994_v27  ;;  %1020 = vmatprep.mubr.f32.mxu0 %v9967_v14  ;;  %14924 = vst [vmem:[#allocation45_spill] sm:$0xff] %v9999_v25  ;;  %v10004_v19 = vld [vmem:[%s14476_s3 + $0x668] sm:$0xff]  ;;  %v10021_v14 = vld [vmem:[%s9084_s17 + $0xd0] sm:$0xff] }
  0xc1   : > { %6996 = vmatpush3.msra.mxu0 %v9972_v22  ;;  %14925 = vst [vmem:[#allocation46_spill] sm:$0xff] %v10004_v19  ;;  %7040 = vmatpush3.msra.mxu1 %v9979_v20  ;;  %v10011_v16 = vld [vmem:[%s14476_s3 + $0x768] sm:$0xff]  ;;  %v10016_v22 = vld [vmem:[%s14476_s3 + $0x6e0] sm:$0xff]  ;;  %14928 = vst [vmem:[#allocation49_spill] sm:$0xff] %v10021_v14 }
  0xc2   : > { %1021 = vmatmul.mubr.f32.gmra.mxu0 %v9982_v23  ;;  %14926 = vst [vmem:[#allocation47_spill] sm:$0xff] %v10011_v16  ;;  %14927 = vst [vmem:[#allocation48_spill] sm:$0xff] %v10016_v22  ;;  %6997 = vmatprep.subr.mxu0 %v9989_v24  ;;  %v10026_v20 = vld [vmem:[%s14476_s3 + $0x7e0] sm:$0xff]  ;;  %v10031_v23 = vld [vmem:[%s9084_s17 + $0x148] sm:$0xff] }
  0xc3   : > { %7041 = vmatprep.subr.mxu1 %v9994_v27  ;;  %14929 = vst [vmem:[#allocation50_spill] sm:$0xff] %v10026_v20  ;;  %1105 = vmatprep.mubr.f32.mxu1 %v9999_v25  ;;  %14930 = vst [vmem:[#allocation51_spill] sm:$0xff] %v10031_v23  ;;  %v10036_v24 = vld [vmem:[%s14476_s3 + $0x660] sm:$0xff]  ;;  %v8471_v28 = vld [vmem:[%s9084_s17 + $0x110] sm:$0xff] }
  0xc4   : > { %6998 = vmatpush3.msra.mxu0 %v10004_v19  ;;  %14931 = vst [vmem:[#allocation52_spill] sm:$0xff] %v10036_v24  ;;  %7042 = vmatpush3.msra.mxu1 %v10011_v16  ;;  %v10043_v27 = vld [vmem:[%s14476_s3 + $0x760] sm:$0xff]  ;;  %v10053_v19 = vld [vmem:[%s14476_s3 + $0x6d8] sm:$0xff] }
  0xc5   : > { %6999 = vmatprep.subr.mxu0 %v10016_v22  ;;  %14932 = vst [vmem:[#allocation53_spill] sm:$0xff] %v10043_v27  ;;  %v10046_v25 = vld [vmem:[%s9084_s17 + $0x140] sm:$0xff]  ;;  %1106 = vmatmul.mubr.f32.gmra.mxu1 %v10021_v14  ;;  %14934 = vst [vmem:[#allocation55_spill] sm:$0xff] %v10053_v19  ;;  %v10058_v22 = vld [vmem:[%s14476_s3 + $0x7d8] sm:$0xff] }
  0xc6   : > { %14933 = vst [vmem:[#allocation54_spill] sm:$0xff] %v10046_v25  ;;  %7043 = vmatprep.subr.mxu1 %v10026_v20  ;;  %14935 = vst [vmem:[#allocation56_spill] sm:$0xff] %v10058_v22  ;;  %1025 = vmatprep.mubr.f32.mxu0 %v10031_v23  ;;  %v10063_v16 = vld [vmem:[%s9084_s17 + $0x158] sm:$0xff]  ;;  %v10085_v23 = vld [vmem:[%s9084_s17 + $0x150] sm:$0xff] }
  0xc7   : > { %7000 = vmatpush3.msra.mxu0 %v10036_v24  ;;  %14936 = vst [vmem:[#allocation57_spill] sm:$0xff] %v10063_v16  ;;  %v10068_v20 = vld [vmem:[%s14476_s3 + $0x658] sm:$0xff]  ;;  %7044 = vmatpush3.msra.mxu1 %v10043_v27  ;;  %v10080_v24 = vld [vmem:[%s14476_s3 + $0x6d0] sm:$0xff]  ;;  %14940 = vst [vmem:[#allocation61_spill] sm:$0xff] %v10085_v23 }
  0xc8   : > { %14937 = vst [vmem:[#allocation58_spill] sm:$0xff] %v10068_v20  ;;  %1026 = vmatmul.mubr.f32.gmra.mxu0 %v10046_v25  ;;  %v10075_v14 = vld [vmem:[%s14476_s3 + $0x758] sm:$0xff]  ;;  %14939 = vst [vmem:[#allocation60_spill] sm:$0xff] %v10080_v24  ;;  %7001 = vmatprep.subr.mxu0 %v10053_v19  ;;  %v10090_v27 = vld [vmem:[%s14476_s3 + $0x7d0] sm:$0xff] }
  0xc9   : > { %14938 = vst [vmem:[#allocation59_spill] sm:$0xff] %v10075_v14  ;;  %7045 = vmatprep.subr.mxu1 %v10058_v22  ;;  %14941 = vst [vmem:[#allocation62_spill] sm:$0xff] %v10090_v27  ;;  %1110 = vmatprep.mubr.f32.mxu1 %v10063_v16  ;;  %v10095_v25 = vld [vmem:[%s9084_s17 + $0x1c8] sm:$0xff]  ;;  %v10100_v19 = vld [vmem:[%s14476_s3 + $0x650] sm:$0xff] }
  0xca   : > { %7002 = vmatpush3.msra.mxu0 %v10068_v20  ;;  %14942 = vst [vmem:[#allocation63_spill] sm:$0xff] %v10095_v25  ;;  %14943 = vst [vmem:[#allocation64_spill] sm:$0xff] %v10100_v19  ;;  %7046 = vmatpush3.msra.mxu1 %v10075_v14  ;;  %v10107_v22 = vld [vmem:[%s14476_s3 + $0x750] sm:$0xff]  ;;  %v10110_v16 = vld [vmem:[%s9084_s17 + $0x1c0] sm:$0xff] }
  0xcb   : > { %7003 = vmatprep.subr.mxu0 %v10080_v24  ;;  %14944 = vst [vmem:[#allocation65_spill] sm:$0xff] %v10107_v22  ;;  %14945 = vst [vmem:[#allocation66_spill] sm:$0xff] %v10110_v16  ;;  %1111 = vmatmul.mubr.f32.gmra.mxu1 %v10085_v23  ;;  %v10117_v20 = vld [vmem:[%s14476_s3 + $0x6c8] sm:$0xff]  ;;  %v10127_v14 = vld [vmem:[%s9084_s17 + $0x1d8] sm:$0xff] }
  0xcc   : > { %7047 = vmatprep.subr.mxu1 %v10090_v27  ;;  %14946 = vst [vmem:[#allocation67_spill] sm:$0xff] %v10117_v20  ;;  %v10122_v24 = vld [vmem:[%s14476_s3 + $0x7c8] sm:$0xff]  ;;  %1030 = vmatprep.mubr.f32.mxu0 %v10095_v25  ;;  %14948 = vst [vmem:[#allocation69_spill] sm:$0xff] %v10127_v14  ;;  %v10149_v25 = vld [vmem:[%s9084_s17 + $0x1d0] sm:$0xff] }
  0xcd   : > { %14947 = vst [vmem:[#allocation68_spill] sm:$0xff] %v10122_v24  ;;  %7004 = vmatpush3.msra.mxu0 %v10100_v19  ;;  %v10132_v27 = vld [vmem:[%s14476_s3 + $0x648] sm:$0xff]  ;;  %7048 = vmatpush3.msra.mxu1 %v10107_v22  ;;  %v10144_v19 = vld [vmem:[%s14476_s3 + $0x6c0] sm:$0xff]  ;;  %14952 = vst [vmem:[#allocation73_spill] sm:$0xff] %v10149_v25 }
  0xce   : > { %14949 = vst [vmem:[#allocation70_spill] sm:$0xff] %v10132_v27  ;;  %1031 = vmatmul.mubr.f32.gmra.mxu0 %v10110_v16  ;;  %v10139_v23 = vld [vmem:[%s14476_s3 + $0x748] sm:$0xff]  ;;  %14951 = vst [vmem:[#allocation72_spill] sm:$0xff] %v10144_v19  ;;  %7005 = vmatprep.subr.mxu0 %v10117_v20  ;;  %v10154_v22 = vld [vmem:[%s14476_s3 + $0x7c0] sm:$0xff] }
  0xcf   : > { %14950 = vst [vmem:[#allocation71_spill] sm:$0xff] %v10139_v23  ;;  %7049 = vmatprep.subr.mxu1 %v10122_v24  ;;  %14953 = vst [vmem:[#allocation74_spill] sm:$0xff] %v10154_v22  ;;  %1115 = vmatprep.mubr.f32.mxu1 %v10127_v14  ;;  %v10161_v16 = vld [vmem:[%s14476_s3 + $0x640] sm:$0xff]  ;;  %v10173_v20 = vld [vmem:[%s14476_s3 + $0x6b8] sm:$0xff] }
  0xd0   : > { %7006 = vmatpush3.msra.mxu0 %v10132_v27  ;;  %14954 = vst [vmem:[#allocation75_spill] sm:$0xff] %v10161_v16  ;;  %v10166_v24 = vld [vmem:[%s14476_s3 + $0x740] sm:$0xff]  ;;  %7050 = vmatpush3.msra.mxu1 %v10139_v23  ;;  %14956 = vst [vmem:[#allocation77_spill] sm:$0xff] %v10173_v20  ;;  %v10178_v27 = vld [vmem:[%s14476_s3 + $0x7b8] sm:$0xff] }
  0xd1   : > { %14955 = vst [vmem:[#allocation76_spill] sm:$0xff] %v10166_v24  ;;  %7007 = vmatprep.subr.mxu0 %v10144_v19  ;;  %14957 = vst [vmem:[#allocation78_spill] sm:$0xff] %v10178_v27  ;;  %1116 = vmatmul.mubr.f32.gmra.mxu1 %v10149_v25  ;;  %v10185_v23 = vld [vmem:[%s14476_s3 + $0x638] sm:$0xff]  ;;  %v10197_v25 = vld [vmem:[%s14476_s3 + $0x6b0] sm:$0xff] }
  0xd2   : > { %7051 = vmatprep.subr.mxu1 %v10154_v22  ;;  %14958 = vst [vmem:[#allocation79_spill] sm:$0xff] %v10185_v23  ;;  %v10190_v19 = vld [vmem:[%s14476_s3 + $0x738] sm:$0xff]  ;;  %7008 = vmatpush3.msra.mxu0 %v10161_v16  ;;  %14960 = vst [vmem:[#allocation81_spill] sm:$0xff] %v10197_v25  ;;  %v10202_v22 = vld [vmem:[%s14476_s3 + $0x7b0] sm:$0xff] }
  0xd3   : > { %14959 = vst [vmem:[#allocation80_spill] sm:$0xff] %v10190_v19  ;;  %7052 = vmatpush3.msra.mxu1 %v10166_v24  ;;  %14961 = vst [vmem:[#allocation82_spill] sm:$0xff] %v10202_v22  ;;  %7009 = vmatprep.subr.mxu0 %v10173_v20  ;;  %v10209_v16 = vld [vmem:[%s14476_s3 + $0x630] sm:$0xff]  ;;  %v10221_v20 = vld [vmem:[%s14476_s3 + $0x6a8] sm:$0xff] }
  0xd4   : > { %7053 = vmatprep.subr.mxu1 %v10178_v27  ;;  %14962 = vst [vmem:[#allocation83_spill] sm:$0xff] %v10209_v16  ;;  %v10214_v24 = vld [vmem:[%s14476_s3 + $0x730] sm:$0xff]  ;;  %7010 = vmatpush3.msra.mxu0 %v10185_v23  ;;  %14964 = vst [vmem:[#allocation85_spill] sm:$0xff] %v10221_v20  ;;  %v10226_v27 = vld [vmem:[%s14476_s3 + $0x7a8] sm:$0xff] }
  0xd5   : > { %14963 = vst [vmem:[#allocation84_spill] sm:$0xff] %v10214_v24  ;;  %7054 = vmatpush3.msra.mxu1 %v10190_v19  ;;  %14965 = vst [vmem:[#allocation86_spill] sm:$0xff] %v10226_v27  ;;  %7011 = vmatprep.subr.mxu0 %v10197_v25  ;;  %v10233_v23 = vld [vmem:[%s14476_s3 + $0x628] sm:$0xff]  ;;  %v10245_v25 = vld [vmem:[%s14476_s3 + $0x6a0] sm:$0xff] }
  0xd6   : > { %7055 = vmatprep.subr.mxu1 %v10202_v22  ;;  %14966 = vst [vmem:[#allocation87_spill] sm:$0xff] %v10233_v23  ;;  %v10238_v19 = vld [vmem:[%s14476_s3 + $0x728] sm:$0xff]  ;;  %7012 = vmatpush3.msra.mxu0 %v10209_v16  ;;  %14968 = vst [vmem:[#allocation89_spill] sm:$0xff] %v10245_v25  ;;  %v10250_v22 = vld [vmem:[%s14476_s3 + $0x7a0] sm:$0xff] }
  0xd7   : > { %14967 = vst [vmem:[#allocation88_spill] sm:$0xff] %v10238_v19  ;;  %7056 = vmatpush3.msra.mxu1 %v10214_v24  ;;  %14969 = vst [vmem:[#allocation90_spill] sm:$0xff] %v10250_v22  ;;  %7013 = vmatprep.subr.mxu0 %v10221_v20  ;;  %v10257_v16 = vld [vmem:[%s14476_s3 + $0x620] sm:$0xff]  ;;  %v10269_v20 = vld [vmem:[%s14476_s3 + $0x698] sm:$0xff] }
  0xd8   : > { %7057 = vmatprep.subr.mxu1 %v10226_v27  ;;  %14970 = vst [vmem:[#allocation91_spill] sm:$0xff] %v10257_v16  ;;  %v10262_v24 = vld [vmem:[%s14476_s3 + $0x720] sm:$0xff]  ;;  %7014 = vmatpush3.msra.mxu0 %v10233_v23  ;;  %14972 = vst [vmem:[#allocation93_spill] sm:$0xff] %v10269_v20  ;;  %v10274_v27 = vld [vmem:[%s14476_s3 + $0x798] sm:$0xff] }
  0xd9   : > { %14971 = vst [vmem:[#allocation92_spill] sm:$0xff] %v10262_v24  ;;  %7058 = vmatpush3.msra.mxu1 %v10238_v19  ;;  %14973 = vst [vmem:[#allocation94_spill] sm:$0xff] %v10274_v27  ;;  %7015 = vmatprep.subr.mxu0 %v10245_v25  ;;  %v10281_v23 = vld [vmem:[%s14476_s3 + $0x618] sm:$0xff]  ;;  %v10293_v25 = vld [vmem:[%s14476_s3 + $0x690] sm:$0xff] }
  0xda   : > { %7059 = vmatprep.subr.mxu1 %v10250_v22  ;;  %14974 = vst [vmem:[#allocation95_spill] sm:$0xff] %v10281_v23  ;;  %v10286_v19 = vld [vmem:[%s14476_s3 + $0x718] sm:$0xff]  ;;  %7016 = vmatpush3.msra.mxu0 %v10257_v16  ;;  %14976 = vst [vmem:[#allocation97_spill] sm:$0xff] %v10293_v25  ;;  %v10298_v22 = vld [vmem:[%s14476_s3 + $0x790] sm:$0xff] }
  0xdb   : > { %14975 = vst [vmem:[#allocation96_spill] sm:$0xff] %v10286_v19  ;;  %7060 = vmatpush3.msra.mxu1 %v10262_v24  ;;  %14977 = vst [vmem:[#allocation98_spill] sm:$0xff] %v10298_v22  ;;  %7017 = vmatprep.subr.mxu0 %v10269_v20  ;;  %v10305_v16 = vld [vmem:[%s14476_s3 + $0x610] sm:$0xff]  ;;  %v10317_v20 = vld [vmem:[%s14476_s3 + $0x688] sm:$0xff] }
  0xdc   : > { %7061 = vmatprep.subr.mxu1 %v10274_v27  ;;  %14978 = vst [vmem:[#allocation99_spill] sm:$0xff] %v10305_v16  ;;  %v10310_v24 = vld [vmem:[%s14476_s3 + $0x710] sm:$0xff]  ;;  %7018 = vmatpush3.msra.mxu0 %v10281_v23  ;;  %14980 = vst [vmem:[#allocation101_spill] sm:$0xff] %v10317_v20  ;;  %v10322_v27 = vld [vmem:[%s14476_s3 + $0x788] sm:$0xff] }
  0xdd   : > { %14979 = vst [vmem:[#allocation100_spill] sm:$0xff] %v10310_v24  ;;  %7062 = vmatpush3.msra.mxu1 %v10286_v19  ;;  %14981 = vst [vmem:[#allocation102_spill] sm:$0xff] %v10322_v27  ;;  %7019 = vmatprep.subr.mxu0 %v10293_v25  ;;  %v10329_v23 = vld [vmem:[%s14476_s3 + $0x608] sm:$0xff]  ;;  %v10346_v25 = vld [vmem:[%s14476_s3 + $0x780] sm:$0xff] }
  0xde   : > { %7063 = vmatprep.subr.mxu1 %v10298_v22  ;;  %14982 = vst [vmem:[#allocation103_spill] sm:$0xff] %v10329_v23  ;;  %v10334_v19 = vld [vmem:[%s14476_s3 + $0x708] sm:$0xff]  ;;  %7020 = vmatpush3.msra.mxu0 %v10305_v16  ;;  %v10341_v22 = vld [vmem:[%s14476_s3 + $0x680] sm:$0xff]  ;;  %14985 = vst [vmem:[#allocation106_spill] sm:$0xff] %v10346_v25 }
  0xdf   : > { %14983 = vst [vmem:[#allocation104_spill] sm:$0xff] %v10334_v19  ;;  %7064 = vmatpush3.msra.mxu1 %v10310_v24  ;;  %14984 = vst [vmem:[#allocation105_spill] sm:$0xff] %v10341_v22  ;;  %7021 = vmatprep.subr.mxu0 %v10317_v20  ;;  %v10353_v16 = vld [vmem:[%s14476_s3 + $0x600] sm:$0xff]  ;;  %v10356_v24 = vld [vmem:[%s9084_s17 + $0x68] sm:$0xff] }
  0xe0   : > { %7065 = vmatprep.subr.mxu1 %v10322_v27  ;;  %14986 = vst [vmem:[#allocation107_spill] sm:$0xff] %v10353_v16  ;;  %14987 = vst [vmem:[#allocation108_spill] sm:$0xff] %v10356_v24  ;;  %7022 = vmatpush3.msra.mxu0 %v10329_v23  ;;  %v10363_v14 = vld [vmem:[%s14476_s3 + $0x700] sm:$0xff]  ;;  %v10371_v27 = vld [vmem:[%s9084_s17 + $0x78] sm:$0xff] }
  0xe1   : > { %7066 = vmatpush3.msra.mxu1 %v10334_v19  ;;  %14988 = vst [vmem:[#allocation109_spill] sm:$0xff] %v10363_v14  ;;  %v10366_v20 = vld [vmem:[%s9084_s17 + $0x60] sm:$0xff]  ;;  %7023 = vmatprep.subr.mxu0 %v10341_v22  ;;  %14990 = vst [vmem:[#allocation111_spill] sm:$0xff] %v10371_v27  ;;  %v10376_v19 = vld [vmem:[%s9084_s17 + $0x70] sm:$0xff] }
  0xe2   : > { %14989 = vst [vmem:[#allocation110_spill] sm:$0xff] %v10366_v20  ;;  %7067 = vmatprep.subr.mxu1 %v10346_v25  ;;  %7024 = vmatpush3.msra.mxu0 %v10353_v16  ;;  %14991 = vst [vmem:[#allocation112_spill] sm:$0xff] %v10376_v19  ;;  %v10384_v22 = vld [vmem:[%s14476_s3 + $0xf8] sm:$0xff]  ;;  %v10410_v23 = vld [vmem:[%s9084_s17 + $0xe0] sm:$0xff] }
  0xe3   : > { %1185 = vmatprep.mubr.f32.mxu0 %v10356_v24  ;;  %7068 = vmatpush3.msra.mxu1 %v10363_v14  ;;  %14992 = vst [vmem:[#allocation113_spill] sm:$0xff] %v10384_v22  ;;  %v10390_v16 = vld [vmem:[%s14476_s3 + $0x1f8] sm:$0xff]  ;;  %v10395_v14 = vld [vmem:[%s9084_s17 + $0xe8] sm:$0xff]  ;;  %14997 = vst [vmem:[#allocation118_spill] sm:$0xff] %v10410_v23 }
  0xe4   : > { %1186 = vmatmul.mubr.f32.vlgmr.msra.gmra.mxu0 %v10366_v20  ;;  %1270 = vmatprep.mubr.f32.mxu1 %v10371_v27  ;;  %14993 = vst [vmem:[#allocation114_spill] sm:$0xff] %v10390_v16  ;;  %14994 = vst [vmem:[#allocation115_spill] sm:$0xff] %v10395_v14  ;;  %v10400_v25 = vld [vmem:[%s14476_s3 + $0x78] sm:$0xff]  ;;  %v8417_v24 = vld [vmem:[%s9084_s17 + $0x10] sm:$0xff] }
  0xe5   : > { %7081 = vmatprep.subr.mxu0 %v10384_v22  ;;  %7125 = vmatprep.subr.mxu1 %v10390_v16  ;;  %14995 = vst [vmem:[#allocation116_spill] sm:$0xff] %v10400_v25  ;;  %v10406_v22 = vld [vmem:[%s14476_s3 + $0x178] sm:$0xff]  ;;  %v10415_v16 = vld [vmem:[%s14476_s3 + $0xf0] sm:$0xff] }
  0xe6   : > { %1271 = vmatmul.mubr.f32.vlgmr.msra.gmra.mxu1 %v10376_v19  ;;  %7082 = vmatpush3.msra.mxu0 %v10400_v25  ;;  %14996 = vst [vmem:[#allocation117_spill] sm:$0xff] %v10406_v22  ;;  %14998 = vst [vmem:[#allocation119_spill] sm:$0xff] %v10415_v16  ;;  %v10421_v25 = vld [vmem:[%s14476_s3 + $0x1f0] sm:$0xff]  ;;  %v10432_v19 = vld [vmem:[%s9084_s17 + $0xf8] sm:$0xff] }
  0xe7   : > { %7126 = vmatpush3.msra.mxu1 %v10406_v22  ;;  %7083 = vmatprep.subr.mxu0 %v10415_v16  ;;  %14999 = vst [vmem:[#allocation120_spill] sm:$0xff] %v10421_v25  ;;  %v10428_v22 = vld [vmem:[%s14476_s3 + $0x70] sm:$0xff]  ;;  %15001 = vst [vmem:[#allocation122_spill] sm:$0xff] %v10432_v19 }
  0xe8   : > { %7127 = vmatprep.subr.mxu1 %v10421_v25  ;;  %1190 = vmatprep.mubr.f32.mxu0 %v10395_v14  ;;  %15000 = vst [vmem:[#allocation121_spill] sm:$0xff] %v10428_v22  ;;  %v10437_v16 = vld [vmem:[%s14476_s3 + $0x170] sm:$0xff]  ;;  %v10444_v25 = vld [vmem:[%s14476_s3 + $0xe8] sm:$0xff] }
  0xe9   : > { %7084 = vmatpush3.msra.mxu0 %v10428_v22  ;;  %15002 = vst [vmem:[#allocation123_spill] sm:$0xff] %v10437_v16  ;;  %7128 = vmatpush3.msra.mxu1 %v10437_v16  ;;  %15003 = vst [vmem:[#allocation124_spill] sm:$0xff] %v10444_v25  ;;  %v10450_v22 = vld [vmem:[%s14476_s3 + $0x1e8] sm:$0xff]  ;;  %v10454_v14 = vld [vmem:[%s9084_s17 + $0xf0] sm:$0xff] }
  0xea   : > { %1191 = vmatmul.mubr.f32.gmra.mxu0 %v10410_v23  ;;  %7085 = vmatprep.subr.mxu0 %v10444_v25  ;;  %15004 = vst [vmem:[#allocation125_spill] sm:$0xff] %v10450_v22  ;;  %15005 = vst [vmem:[#allocation126_spill] sm:$0xff] %v10454_v14  ;;  %v10460_v16 = vld [vmem:[%s14476_s3 + $0x68] sm:$0xff] }
  0xeb   : > { %7129 = vmatprep.subr.mxu1 %v10450_v22  ;;  %1275 = vmatprep.mubr.f32.mxu1 %v10432_v19  ;;  %15006 = vst [vmem:[#allocation127_spill] sm:$0xff] %v10460_v16  ;;  %v10464_v25 = vld [vmem:[%s9084_s17 + $0x168] sm:$0xff]  ;;  %v10475_v22 = vld [vmem:[%s14476_s3 + $0xe0] sm:$0xff] }
  0xec   : > { %7086 = vmatpush3.msra.mxu0 %v10460_v16  ;;  %15007 = vst [vmem:[#allocation128_spill] sm:$0xff] %v10464_v25  ;;  %v10469_v23 = vld [vmem:[%s14476_s3 + $0x168] sm:$0xff]  ;;  %15009 = vst [vmem:[#allocation130_spill] sm:$0xff] %v10475_v22  ;;  %v10479_v19 = vld [vmem:[%s9084_s17 + $0x160] sm:$0xff]  ;;  %1276 = vmatmul.mubr.f32.gmra.mxu1 %v10454_v14 }
  0xed   : > { %15008 = vst [vmem:[#allocation129_spill] sm:$0xff] %v10469_v23  ;;  %7130 = vmatpush3.msra.mxu1 %v10469_v23  ;;  %7087 = vmatprep.subr.mxu0 %v10475_v22  ;;  %15010 = vst [vmem:[#allocation131_spill] sm:$0xff] %v10479_v19  ;;  %v10485_v16 = vld [vmem:[%s14476_s3 + $0x1e0] sm:$0xff]  ;;  %v10496_v22 = vld [vmem:[%s9084_s17 + $0x178] sm:$0xff] }
  0xee   : > { %15011 = vst [vmem:[#allocation132_spill] sm:$0xff] %v10485_v16  ;;  %7131 = vmatprep.subr.mxu1 %v10485_v16  ;;  %1195 = vmatprep.mubr.f32.mxu0 %v10464_v25  ;;  %v10492_v23 = vld [vmem:[%s14476_s3 + $0x60] sm:$0xff]  ;;  %15013 = vst [vmem:[#allocation134_spill] sm:$0xff] %v10496_v22  ;;  %v10508_v16 = vld [vmem:[%s14476_s3 + $0xd8] sm:$0xff] }
  0xef   : > { %15012 = vst [vmem:[#allocation133_spill] sm:$0xff] %v10492_v23  ;;  %7088 = vmatpush3.msra.mxu0 %v10492_v23  ;;  %v10501_v14 = vld [vmem:[%s14476_s3 + $0x160] sm:$0xff]  ;;  %15015 = vst [vmem:[#allocation136_spill] sm:$0xff] %v10508_v16  ;;  %v10514_v23 = vld [vmem:[%s14476_s3 + $0x1d8] sm:$0xff]  ;;  %1280 = vmatprep.mubr.f32.mxu1 %v10496_v22 }
  0xf0   : > { %15014 = vst [vmem:[#allocation135_spill] sm:$0xff] %v10501_v14  ;;  %7132 = vmatpush3.msra.mxu1 %v10501_v14  ;;  %1196 = vmatmul.mubr.f32.gmra.mxu0 %v10479_v19  ;;  %15016 = vst [vmem:[#allocation137_spill] sm:$0xff] %v10514_v23  ;;  %v10518_v25 = vld [vmem:[%s9084_s17 + $0x170] sm:$0xff]  ;;  %v10524_v14 = vld [vmem:[%s14476_s3 + $0x58] sm:$0xff] }
  0xf1   : > { %7089 = vmatprep.subr.mxu0 %v10508_v16  ;;  %7133 = vmatprep.subr.mxu1 %v10514_v23  ;;  %15017 = vst [vmem:[#allocation138_spill] sm:$0xff] %v10518_v25  ;;  %15018 = vst [vmem:[#allocation139_spill] sm:$0xff] %v10524_v14  ;;  %v10528_v16 = vld [vmem:[%s9084_s17 + $0x1e8] sm:$0xff]  ;;  %v10533_v19 = vld [vmem:[%s14476_s3 + $0x158] sm:$0xff] }
  0xf2   : > { %7090 = vmatpush3.msra.mxu0 %v10524_v14  ;;  %15019 = vst [vmem:[#allocation140_spill] sm:$0xff] %v10528_v16  ;;  %15020 = vst [vmem:[#allocation141_spill] sm:$0xff] %v10533_v19  ;;  %7134 = vmatpush3.msra.mxu1 %v10533_v19  ;;  %v10539_v23 = vld [vmem:[%s14476_s3 + $0xd0] sm:$0xff]  ;;  %v10543_v22 = vld [vmem:[%s9084_s17 + $0x1e0] sm:$0xff] }
  0xf3   : > { %15021 = vst [vmem:[#allocation142_spill] sm:$0xff] %v10539_v23  ;;  %7091 = vmatprep.subr.mxu0 %v10539_v23  ;;  %15022 = vst [vmem:[#allocation143_spill] sm:$0xff] %v10543_v22  ;;  %1281 = vmatmul.mubr.f32.gmra.mxu1 %v10518_v25  ;;  %v10549_v14 = vld [vmem:[%s14476_s3 + $0x1d0] sm:$0xff]  ;;  %v10560_v23 = vld [vmem:[%s9084_s17 + $0x1f8] sm:$0xff] }
  0xf4   : > { %15023 = vst [vmem:[#allocation144_spill] sm:$0xff] %v10549_v14  ;;  %7135 = vmatprep.subr.mxu1 %v10549_v14  ;;  %1200 = vmatprep.mubr.f32.mxu0 %v10528_v16  ;;  %v10556_v19 = vld [vmem:[%s14476_s3 + $0x50] sm:$0xff]  ;;  %15025 = vst [vmem:[#allocation146_spill] sm:$0xff] %v10560_v23  ;;  %v10572_v14 = vld [vmem:[%s14476_s3 + $0xc8] sm:$0xff] }
  0xf5   : > { %15024 = vst [vmem:[#allocation145_spill] sm:$0xff] %v10556_v19  ;;  %7092 = vmatpush3.msra.mxu0 %v10556_v19  ;;  %v10565_v25 = vld [vmem:[%s14476_s3 + $0x150] sm:$0xff]  ;;  %15027 = vst [vmem:[#allocation148_spill] sm:$0xff] %v10572_v14  ;;  %v10578_v19 = vld [vmem:[%s14476_s3 + $0x1c8] sm:$0xff]  ;;  %1285 = vmatprep.mubr.f32.mxu1 %v10560_v23 }
  0xf6   : > { %15026 = vst [vmem:[#allocation147_spill] sm:$0xff] %v10565_v25  ;;  %7136 = vmatpush3.msra.mxu1 %v10565_v25  ;;  %1201 = vmatmul.mubr.f32.gmra.mxu0 %v10543_v22  ;;  %15028 = vst [vmem:[#allocation149_spill] sm:$0xff] %v10578_v19  ;;  %v10582_v16 = vld [vmem:[%s9084_s17 + $0x1f0] sm:$0xff]  ;;  %v10588_v25 = vld [vmem:[%s14476_s3 + $0x48] sm:$0xff] }
  0xf7   : > { %7093 = vmatprep.subr.mxu0 %v10572_v14  ;;  %7137 = vmatprep.subr.mxu1 %v10578_v19  ;;  %15029 = vst [vmem:[#allocation150_spill] sm:$0xff] %v10582_v16  ;;  %15030 = vst [vmem:[#allocation151_spill] sm:$0xff] %v10588_v25  ;;  %v10594_v14 = vld [vmem:[%s14476_s3 + $0x148] sm:$0xff]  ;;  %v10600_v19 = vld [vmem:[%s14476_s3 + $0xc0] sm:$0xff] }
  0xf8   : > { %7094 = vmatpush3.msra.mxu0 %v10588_v25  ;;  %15031 = vst [vmem:[#allocation152_spill] sm:$0xff] %v10594_v14  ;;  %7138 = vmatpush3.msra.mxu1 %v10594_v14  ;;  %15032 = vst [vmem:[#allocation153_spill] sm:$0xff] %v10600_v19  ;;  %v10607_v25 = vld [vmem:[%s14476_s3 + $0x1c0] sm:$0xff]  ;;  %v8413_v22 = vld [vmem:[%s9084_s17 + $0x18] sm:$0xff] }
  0xf9   : > { %7095 = vmatprep.subr.mxu0 %v10600_v19  ;;  %1286 = vmatmul.mubr.f32.gmra.mxu1 %v10582_v16  ;;  %15033 = vst [vmem:[#allocation154_spill] sm:$0xff] %v10607_v25  ;;  %v10613_v14 = vld [vmem:[%s14476_s3 + $0x40] sm:$0xff]  ;;  %v10625_v16 = vld [vmem:[%s14476_s3 + $0xb8] sm:$0xff]  ;;  %v1294_v27 = vmul.f32 %v8413_v22, %v8413_v22  ;;  %v10785_v22 = vld [vmem:[%s14476_s3 + $0x8] sm:$0xff] }
  0xfa   : > { %7139 = vmatprep.subr.mxu1 %v10607_v25  ;;  %15034 = vst [vmem:[#allocation155_spill] sm:$0xff] %v10613_v14  ;;  %7096 = vmatpush3.msra.mxu0 %v10613_v14  ;;  %v10619_v19 = vld [vmem:[%s14476_s3 + $0x140] sm:$0xff]  ;;  %15036 = vst [vmem:[#allocation157_spill] sm:$0xff] %v10625_v16  ;;  %v10631_v25 = vld [vmem:[%s14476_s3 + $0x1b8] sm:$0xff] }
  0xfb   : > { %15035 = vst [vmem:[#allocation156_spill] sm:$0xff] %v10619_v19  ;;  %7140 = vmatpush3.msra.mxu1 %v10619_v19  ;;  %7097 = vmatprep.subr.mxu0 %v10625_v16  ;;  %15037 = vst [vmem:[#allocation158_spill] sm:$0xff] %v10631_v25  ;;  %v10637_v14 = vld [vmem:[%s14476_s3 + $0x38] sm:$0xff]  ;;  %v10649_v16 = vld [vmem:[%s14476_s3 + $0xb0] sm:$0xff] }
  0xfc   : > { %7141 = vmatprep.subr.mxu1 %v10631_v25  ;;  %15038 = vst [vmem:[#allocation159_spill] sm:$0xff] %v10637_v14  ;;  %7098 = vmatpush3.msra.mxu0 %v10637_v14  ;;  %v10643_v19 = vld [vmem:[%s14476_s3 + $0x138] sm:$0xff]  ;;  %15040 = vst [vmem:[#allocation161_spill] sm:$0xff] %v10649_v16  ;;  %v10655_v25 = vld [vmem:[%s14476_s3 + $0x1b0] sm:$0xff] }
  0xfd   : > { %15039 = vst [vmem:[#allocation160_spill] sm:$0xff] %v10643_v19  ;;  %7142 = vmatpush3.msra.mxu1 %v10643_v19  ;;  %7099 = vmatprep.subr.mxu0 %v10649_v16  ;;  %15041 = vst [vmem:[#allocation162_spill] sm:$0xff] %v10655_v25  ;;  %v10661_v14 = vld [vmem:[%s14476_s3 + $0x30] sm:$0xff]  ;;  %v10673_v16 = vld [vmem:[%s14476_s3 + $0xa8] sm:$0xff] }
  0xfe   : > { %7143 = vmatprep.subr.mxu1 %v10655_v25  ;;  %15042 = vst [vmem:[#allocation163_spill] sm:$0xff] %v10661_v14  ;;  %7100 = vmatpush3.msra.mxu0 %v10661_v14  ;;  %v10667_v19 = vld [vmem:[%s14476_s3 + $0x130] sm:$0xff]  ;;  %15044 = vst [vmem:[#allocation165_spill] sm:$0xff] %v10673_v16  ;;  %v10679_v25 = vld [vmem:[%s14476_s3 + $0x1a8] sm:$0xff] }
  0xff   : > { %15043 = vst [vmem:[#allocation164_spill] sm:$0xff] %v10667_v19  ;;  %7144 = vmatpush3.msra.mxu1 %v10667_v19  ;;  %7101 = vmatprep.subr.mxu0 %v10673_v16  ;;  %15045 = vst [vmem:[#allocation166_spill] sm:$0xff] %v10679_v25  ;;  %v10685_v14 = vld [vmem:[%s14476_s3 + $0x28] sm:$0xff]  ;;  %v10697_v16 = vld [vmem:[%s14476_s3 + $0xa0] sm:$0xff] }
 0x100   : > { %7145 = vmatprep.subr.mxu1 %v10679_v25  ;;  %15046 = vst [vmem:[#allocation167_spill] sm:$0xff] %v10685_v14  ;;  %7102 = vmatpush3.msra.mxu0 %v10685_v14  ;;  %v10691_v19 = vld [vmem:[%s14476_s3 + $0x128] sm:$0xff]  ;;  %15048 = vst [vmem:[#allocation169_spill] sm:$0xff] %v10697_v16  ;;  %v10703_v25 = vld [vmem:[%s14476_s3 + $0x1a0] sm:$0xff] }
 0x101   : > { %15047 = vst [vmem:[#allocation168_spill] sm:$0xff] %v10691_v19  ;;  %7146 = vmatpush3.msra.mxu1 %v10691_v19  ;;  %7103 = vmatprep.subr.mxu0 %v10697_v16  ;;  %15049 = vst [vmem:[#allocation170_spill] sm:$0xff] %v10703_v25  ;;  %v10709_v14 = vld [vmem:[%s14476_s3 + $0x20] sm:$0xff]  ;;  %v10721_v16 = vld [vmem:[%s14476_s3 + $0x98] sm:$0xff] }
 0x102   : > { %7147 = vmatprep.subr.mxu1 %v10703_v25  ;;  %15050 = vst [vmem:[#allocation171_spill] sm:$0xff] %v10709_v14  ;;  %7104 = vmatpush3.msra.mxu0 %v10709_v14  ;;  %v10715_v19 = vld [vmem:[%s14476_s3 + $0x120] sm:$0xff]  ;;  %15052 = vst [vmem:[#allocation173_spill] sm:$0xff] %v10721_v16  ;;  %v10727_v25 = vld [vmem:[%s14476_s3 + $0x198] sm:$0xff] }
 0x103   : > { %15051 = vst [vmem:[#allocation172_spill] sm:$0xff] %v10715_v19  ;;  %7148 = vmatpush3.msra.mxu1 %v10715_v19  ;;  %7105 = vmatprep.subr.mxu0 %v10721_v16  ;;  %15053 = vst [vmem:[#allocation174_spill] sm:$0xff] %v10727_v25  ;;  %v10733_v14 = vld [vmem:[%s14476_s3 + $0x18] sm:$0xff]  ;;  %v10745_v16 = vld [vmem:[%s14476_s3 + $0x90] sm:$0xff] }
 0x104   : > { %7149 = vmatprep.subr.mxu1 %v10727_v25  ;;  %15054 = vst [vmem:[#allocation175_spill] sm:$0xff] %v10733_v14  ;;  %7106 = vmatpush3.msra.mxu0 %v10733_v14  ;;  %v10739_v19 = vld [vmem:[%s14476_s3 + $0x118] sm:$0xff]  ;;  %15056 = vst [vmem:[#allocation177_spill] sm:$0xff] %v10745_v16  ;;  %v10751_v25 = vld [vmem:[%s14476_s3 + $0x190] sm:$0xff] }
 0x105   : > { %15055 = vst [vmem:[#allocation176_spill] sm:$0xff] %v10739_v19  ;;  %7150 = vmatpush3.msra.mxu1 %v10739_v19  ;;  %7107 = vmatprep.subr.mxu0 %v10745_v16  ;;  %15057 = vst [vmem:[#allocation178_spill] sm:$0xff] %v10751_v25  ;;  %v8410_v14 = vld [vmem:[%s9084_s17 + $0x8] sm:$0xff]  ;;  %v10758_v19 = vld [vmem:[%s14476_s3 + $0x10] sm:$0xff] }
 0x106   : > { %7151 = vmatprep.subr.mxu1 %v10751_v25  ;;  %v1292_v23 = vmul.f32 %v8410_v14, %v8410_v14  ;;  %15058 = vst [vmem:[#allocation179_spill] sm:$0xff] %v10758_v19  ;;  %7108 = vmatpush3.msra.mxu0 %v10758_v19  ;;  %v10764_v16 = vld [vmem:[%s14476_s3 + $0x110] sm:$0xff]  ;;  %v10771_v14 = vld [vmem:[%s14476_s3 + $0x88] sm:$0xff]  ;;  %v8416_v25 = vld [vmem:[%s9084_s17] sm:$0xff] }
 0x107   : > { %15059 = vst [vmem:[#allocation180_spill] sm:$0xff] %v10764_v16  ;;  %7152 = vmatpush3.msra.mxu1 %v10764_v16  ;;  %15060 = vst [vmem:[#allocation181_spill] sm:$0xff] %v10771_v14  ;;  %7109 = vmatprep.subr.mxu0 %v10771_v14  ;;  %v10777_v19 = vld [vmem:[%s14476_s3 + $0x188] sm:$0xff]  ;;  %v1291_v20 = vmul.f32 %v8416_v25, %v8416_v25  ;;  %v1293_v16 = vmul.f32 %v8417_v24, %v8417_v24  ;;  %v10797_v25 = vld [vmem:[%s14476_s3 + $0x80] sm:$0xff] }
 0x108   : > { %15061 = vst [vmem:[#allocation182_spill] sm:$0xff] %v10777_v19  ;;  %7153 = vmatprep.subr.mxu1 %v10777_v19  ;;  %15062 = vst [vmem:[#allocation183_spill] sm:$0xff] %v10785_v22  ;;  %7110 = vmatpush3.msra.mxu0 %v10785_v22  ;;  %v10791_v14 = vld [vmem:[%s14476_s3 + $0x108] sm:$0xff]  ;;  %v10803_v24 = vld [vmem:[%s14476_s3 + $0x180] sm:$0xff] }
 0x109   : > { %15063 = vst [vmem:[#allocation184_spill] sm:$0xff] %v10791_v14  ;;  %7154 = vmatpush3.msra.mxu1 %v10791_v14  ;;  %15064 = vst [vmem:[#allocation185_spill] sm:$0xff] %v10797_v25  ;;  %7111 = vmatprep.subr.mxu0 %v10797_v25  ;;  %v10809_v22 = vld [vmem:[%s14476_s3] sm:$0xff]  ;;  %v8459_v25 = vld [vmem:[%s9084_s17 + $0x90] sm:$0xff] }
 0x10a   : > { %15065 = vst [vmem:[#allocation186_spill] sm:$0xff] %v10803_v24  ;;  %7155 = vmatprep.subr.mxu1 %v10803_v24  ;;  %15066 = vst [vmem:[#allocation187_spill] sm:$0xff] %v10809_v22  ;;  %7112 = vmatpush3.msra.mxu0 %v10809_v22  ;;  %v10815_v14 = vld [vmem:[%s14476_s3 + $0x100] sm:$0xff]  ;;  %v10821_v24 = vld [vmem:[%s14476_s3 + $0x2f8] sm:$0xff]  ;;  %v1309_v19 = vmul.f32 %v8459_v25, %v8459_v25 }
 0x10b   : > { %1419 = vmatprep.mubr.f32.mxu0 %v1292_v23  ;;  %15067 = vst [vmem:[#allocation188_spill] sm:$0xff] %v10815_v14  ;;  %7156 = vmatpush3.msra.mxu1 %v10815_v14  ;;  %15068 = vst [vmem:[#allocation189_spill] sm:$0xff] %v10821_v24  ;;  %v10827_v23 = vld [vmem:[%s14476_s3 + $0x3f8] sm:$0xff]  ;;  %v10991_v22 = vld [vmem:[%s14476_s3 + $0x2c0] sm:$0xff] }
 0x10c   : > { %1504 = vmatprep.mubr.f32.mxu1 %v1294_v27  ;;  %1420 = vmatmul.mubr.f32.vlgmr.msra.gmra.mxu0 %v1291_v20  ;;  %15069 = vst [vmem:[#allocation190_spill] sm:$0xff] %v10827_v23  ;;  %v10833_v27 = vld [vmem:[%s14476_s3 + $0x278] sm:$0xff]  ;;  %v10845_v20 = vld [vmem:[%s14476_s3 + $0x2f0] sm:$0xff]  ;;  %15096 = vst [vmem:[#allocation217_spill] sm:$0xff] %v10991_v22 }
 0x10d   : > { %1505 = vmatmul.mubr.f32.vlgmr.msra.gmra.mxu1 %v1293_v16  ;;  %7169 = vmatprep.subr.mxu0 %v10821_v24  ;;  %15070 = vst [vmem:[#allocation191_spill] sm:$0xff] %v10833_v27  ;;  %v10839_v16 = vld [vmem:[%s14476_s3 + $0x378] sm:$0xff]  ;;  %15072 = vst [vmem:[#allocation193_spill] sm:$0xff] %v10845_v20 }
 0x10e   : > { %7213 = vmatprep.subr.mxu1 %v10827_v23  ;;  %7170 = vmatpush3.msra.mxu0 %v10833_v27  ;;  %15071 = vst [vmem:[#allocation192_spill] sm:$0xff] %v10839_v16  ;;  %v10851_v23 = vld [vmem:[%s14476_s3 + $0x3f0] sm:$0xff]  ;;  %v8453_v14 = vld [vmem:[%s9084_s17 + $0x98] sm:$0xff] }
 0x10f   : > { %7214 = vmatpush3.msra.mxu1 %v10839_v16  ;;  %7171 = vmatprep.subr.mxu0 %v10845_v20  ;;  %15073 = vst [vmem:[#allocation194_spill] sm:$0xff] %v10851_v23  ;;  %v10857_v27 = vld [vmem:[%s14476_s3 + $0x270] sm:$0xff]  ;;  %v10869_v20 = vld [vmem:[%s14476_s3 + $0x2e8] sm:$0xff]  ;;  %v11035_v25 = vld [vmem:[%s14476_s3 + $0x338] sm:$0xff] }
 0x110   : > { %7215 = vmatprep.subr.mxu1 %v10851_v23  ;;  %15074 = vst [vmem:[#allocation195_spill] sm:$0xff] %v10857_v27  ;;  %7172 = vmatpush3.msra.mxu0 %v10857_v27  ;;  %v10863_v16 = vld [vmem:[%s14476_s3 + $0x370] sm:$0xff]  ;;  %15076 = vst [vmem:[#allocation197_spill] sm:$0xff] %v10869_v20  ;;  %v10875_v23 = vld [vmem:[%s14476_s3 + $0x3e8] sm:$0xff] }
 0x111   : > { %15075 = vst [vmem:[#allocation196_spill] sm:$0xff] %v10863_v16  ;;  %7216 = vmatpush3.msra.mxu1 %v10863_v16  ;;  %7173 = vmatprep.subr.mxu0 %v10869_v20  ;;  %15077 = vst [vmem:[#allocation198_spill] sm:$0xff] %v10875_v23  ;;  %v10881_v27 = vld [vmem:[%s14476_s3 + $0x268] sm:$0xff]  ;;  %v10893_v20 = vld [vmem:[%s14476_s3 + $0x2e0] sm:$0xff] }
 0x112   : > { %7217 = vmatprep.subr.mxu1 %v10875_v23  ;;  %15078 = vst [vmem:[#allocation199_spill] sm:$0xff] %v10881_v27  ;;  %7174 = vmatpush3.msra.mxu0 %v10881_v27  ;;  %v10887_v16 = vld [vmem:[%s14476_s3 + $0x368] sm:$0xff]  ;;  %15080 = vst [vmem:[#allocation201_spill] sm:$0xff] %v10893_v20  ;;  %v10899_v23 = vld [vmem:[%s14476_s3 + $0x3e0] sm:$0xff] }
 0x113   : > { %15079 = vst [vmem:[#allocation200_spill] sm:$0xff] %v10887_v16  ;;  %7218 = vmatpush3.msra.mxu1 %v10887_v16  ;;  %7175 = vmatprep.subr.mxu0 %v10893_v20  ;;  %15081 = vst [vmem:[#allocation202_spill] sm:$0xff] %v10899_v23  ;;  %v10905_v27 = vld [vmem:[%s14476_s3 + $0x260] sm:$0xff]  ;;  %v10917_v20 = vld [vmem:[%s14476_s3 + $0x2d8] sm:$0xff] }
 0x114   : > { %7219 = vmatprep.subr.mxu1 %v10899_v23  ;;  %15082 = vst [vmem:[#allocation203_spill] sm:$0xff] %v10905_v27  ;;  %7176 = vmatpush3.msra.mxu0 %v10905_v27  ;;  %v10911_v16 = vld [vmem:[%s14476_s3 + $0x360] sm:$0xff]  ;;  %15084 = vst [vmem:[#allocation205_spill] sm:$0xff] %v10917_v20  ;;  %v10923_v23 = vld [vmem:[%s14476_s3 + $0x3d8] sm:$0xff] }
 0x115   : > { %15083 = vst [vmem:[#allocation204_spill] sm:$0xff] %v10911_v16  ;;  %7220 = vmatpush3.msra.mxu1 %v10911_v16  ;;  %7177 = vmatprep.subr.mxu0 %v10917_v20  ;;  %15085 = vst [vmem:[#allocation206_spill] sm:$0xff] %v10923_v23  ;;  %v10929_v27 = vld [vmem:[%s14476_s3 + $0x258] sm:$0xff]  ;;  %v10941_v20 = vld [vmem:[%s14476_s3 + $0x2d0] sm:$0xff] }
 0x116   : > { %7221 = vmatprep.subr.mxu1 %v10923_v23  ;;  %15086 = vst [vmem:[#allocation207_spill] sm:$0xff] %v10929_v27  ;;  %7178 = vmatpush3.msra.mxu0 %v10929_v27  ;;  %v10935_v16 = vld [vmem:[%s14476_s3 + $0x358] sm:$0xff]  ;;  %15088 = vst [vmem:[#allocation209_spill] sm:$0xff] %v10941_v20  ;;  %v10947_v23 = vld [vmem:[%s14476_s3 + $0x3d0] sm:$0xff] }
 0x117   : > { %15087 = vst [vmem:[#allocation208_spill] sm:$0xff] %v10935_v16  ;;  %7222 = vmatpush3.msra.mxu1 %v10935_v16  ;;  %7179 = vmatprep.subr.mxu0 %v10941_v20  ;;  %15089 = vst [vmem:[#allocation210_spill] sm:$0xff] %v10947_v23  ;;  %v10953_v16 = vld [vmem:[%s14476_s3 + $0x250] sm:$0xff]  ;;  %v10965_v20 = vld [vmem:[%s14476_s3 + $0x2c8] sm:$0xff] }
 0x118   : > { %7223 = vmatprep.subr.mxu1 %v10947_v23  ;;  %15090 = vst [vmem:[#allocation211_spill] sm:$0xff] %v10953_v16  ;;  %7180 = vmatpush3.msra.mxu0 %v10953_v16  ;;  %v10959_v27 = vld [vmem:[%s14476_s3 + $0x350] sm:$0xff]  ;;  %15092 = vst [vmem:[#allocation213_spill] sm:$0xff] %v10965_v20  ;;  %v10971_v23 = vld [vmem:[%s14476_s3 + $0x3c8] sm:$0xff] }
 0x119   : > { %15091 = vst [vmem:[#allocation212_spill] sm:$0xff] %v10959_v27  ;;  %7224 = vmatpush3.msra.mxu1 %v10959_v27  ;;  %7181 = vmatprep.subr.mxu0 %v10965_v20  ;;  %15093 = vst [vmem:[#allocation214_spill] sm:$0xff] %v10971_v23  ;;  %v10977_v16 = vld [vmem:[%s14476_s3 + $0x248] sm:$0xff] }
 0x11a   : > { %7225 = vmatprep.subr.mxu1 %v10971_v23  ;;  %15094 = vst [vmem:[#allocation215_spill] sm:$0xff] %v10977_v16  ;;  %7182 = vmatpush3.msra.mxu0 %v10977_v16  ;;  %v10983_v27 = vld [vmem:[%s14476_s3 + $0x348] sm:$0xff]  ;;  %v1310_v23 = vmul.f32 %v8453_v14, %v8453_v14  ;;  %v10997_v16 = vld [vmem:[%s14476_s3 + $0x3c0] sm:$0xff]  ;;  %15103 = vst [vmem:[#allocation224_spill] sm:$0xff] %v11035_v25 }
 0x11b   : > { %15095 = vst [vmem:[#allocation216_spill] sm:$0xff] %v10983_v27  ;;  %7226 = vmatpush3.msra.mxu1 %v10983_v27  ;;  %v8452_v20 = vld [vmem:[%s9084_s17 + $0x88] sm:$0xff]  ;;  %7183 = vmatprep.subr.mxu0 %v10991_v22  ;;  %15097 = vst [vmem:[#allocation218_spill] sm:$0xff] %v10997_v16  ;;  %v11009_v14 = vld [vmem:[%s14476_s3 + $0x340] sm:$0xff] }
 0x11c   : > { %v1308_v24 = vmul.f32 %v8452_v20, %v8452_v20  ;;  %7227 = vmatprep.subr.mxu1 %v10997_v16  ;;  %v11003_v20 = vld [vmem:[%s14476_s3 + $0x240] sm:$0xff]  ;;  %15099 = vst [vmem:[#allocation220_spill] sm:$0xff] %v11009_v14  ;;  %v11017_v16 = vld [vmem:[%s14476_s3 + $0x2b8] sm:$0xff]  ;;  %1509 = vmatprep.mubr.f32.mxu1 %v1310_v23  ;;  %v11055_v23 = vld [vmem:[%s14476_s3 + $0x230] sm:$0xff] }
 0x11d   : > { %15098 = vst [vmem:[#allocation219_spill] sm:$0xff] %v11003_v20  ;;  %7184 = vmatpush3.msra.mxu0 %v11003_v20  ;;  %7228 = vmatpush3.msra.mxu1 %v11009_v14  ;;  %v8458_v22 = vld [vmem:[%s9084_s17 + $0x80] sm:$0xff]  ;;  %15100 = vst [vmem:[#allocation221_spill] sm:$0xff] %v11017_v16  ;;  %v11023_v20 = vld [vmem:[%s14476_s3 + $0x3b8] sm:$0xff] }
 0x11e   : > { %v1307_v27 = vmul.f32 %v8458_v22, %v8458_v22  ;;  %7185 = vmatprep.subr.mxu0 %v11017_v16  ;;  %15101 = vst [vmem:[#allocation222_spill] sm:$0xff] %v11023_v20  ;;  %7229 = vmatprep.subr.mxu1 %v11023_v20  ;;  %v11029_v22 = vld [vmem:[%s14476_s3 + $0x238] sm:$0xff]  ;;  %v11041_v20 = vld [vmem:[%s14476_s3 + $0x2b0] sm:$0xff]  ;;  %v8466_v16 = vld [vmem:[%s9084_s17 + $0x108] sm:$0xff] }
 0x11f   : > { %15102 = vst [vmem:[#allocation223_spill] sm:$0xff] %v11029_v22  ;;  %7186 = vmatpush3.msra.mxu0 %v11029_v22  ;;  %7230 = vmatpush3.msra.mxu1 %v11035_v25  ;;  %15104 = vst [vmem:[#allocation225_spill] sm:$0xff] %v11041_v20  ;;  %v11047_v22 = vld [vmem:[%s14476_s3 + $0x3b0] sm:$0xff]  ;;  %v1324_v25 = vmul.f32 %v8466_v16, %v8466_v16 }
 0x120   : > { %1424 = vmatprep.mubr.f32.mxu0 %v1308_v24  ;;  %7187 = vmatprep.subr.mxu0 %v11041_v20  ;;  %15105 = vst [vmem:[#allocation226_spill] sm:$0xff] %v11047_v22  ;;  %v8467_v24 = vld [vmem:[%s9084_s17 + $0x118] sm:$0xff]  ;;  %15106 = vst [vmem:[#allocation227_spill] sm:$0xff] %v11055_v23  ;;  %v11061_v20 = vld [vmem:[%s14476_s3 + $0x330] sm:$0xff] }
 0x121   : > { %7231 = vmatprep.subr.mxu1 %v11047_v22  ;;  %v1326_v14 = vmul.f32 %v8467_v24, %v8467_v24  ;;  %1425 = vmatmul.mubr.f32.gmra.mxu0 %v1307_v27  ;;  %15107 = vst [vmem:[#allocation228_spill] sm:$0xff] %v11061_v20  ;;  %v8470_v22 = vld [vmem:[%s9084_s17 + $0x100] sm:$0xff]  ;;  %v1325_v27 = vmul.f32 %v8471_v28, %v8471_v28  ;;  %v11075_v24 = vld [vmem:[%s14476_s3 + $0x3a8] sm:$0xff] }
 0x122   : > { %1510 = vmatmul.mubr.f32.gmra.mxu1 %v1309_v19  ;;  %7188 = vmatpush3.msra.mxu0 %v11055_v23  ;;  %v1323_v16 = vmul.f32 %v8470_v22, %v8470_v22  ;;  %v11069_v19 = vld [vmem:[%s14476_s3 + $0x2a8] sm:$0xff]  ;;  %15109 = vst [vmem:[#allocation230_spill] sm:$0xff] %v11075_v24  ;;  %v8483_v23 = vld [vmem:[%s9084_s17 + $0x190] sm:$0xff] }
 0x123   : > { %7232 = vmatpush3.msra.mxu1 %v11061_v20  ;;  %15108 = vst [vmem:[#allocation229_spill] sm:$0xff] %v11069_v19  ;;  %7189 = vmatprep.subr.mxu0 %v11069_v19  ;;  %v11081_v22 = vld [vmem:[%s14476_s3 + $0x228] sm:$0xff] }
 0x124   : > { %7233 = vmatprep.subr.mxu1 %v11075_v24  ;;  %15110 = vst [vmem:[#allocation231_spill] sm:$0xff] %v11081_v22  ;;  %7190 = vmatpush3.msra.mxu0 %v11081_v22  ;;  %v11087_v28 = vld [vmem:[%s14476_s3 + $0x328] sm:$0xff]  ;;  %v11093_v24 = vld [vmem:[%s14476_s3 + $0x2a0] sm:$0xff] }
 0x125   : > { %15111 = vst [vmem:[#allocation232_spill] sm:$0xff] %v11087_v28  ;;  %7234 = vmatpush3.msra.mxu1 %v11087_v28  ;;  %1429 = vmatprep.mubr.f32.mxu0 %v1324_v25  ;;  %15112 = vst [vmem:[#allocation233_spill] sm:$0xff] %v11093_v24  ;;  %v11099_v22 = vld [vmem:[%s14476_s3 + $0x3a0] sm:$0xff]  ;;  %v8478_v19 = vld [vmem:[%s9084_s17 + $0x188] sm:$0xff] }
 0x126   : > { %1514 = vmatprep.mubr.f32.mxu1 %v1326_v14  ;;  %7191 = vmatprep.subr.mxu0 %v11093_v24  ;;  %15113 = vst [vmem:[#allocation234_spill] sm:$0xff] %v11099_v22  ;;  %v1340_v28 = vmul.f32 %v8478_v19, %v8478_v19  ;;  %v8479_v25 = vld [vmem:[%s9084_s17 + $0x198] sm:$0xff]  ;;  %v11107_v14 = vld [vmem:[%s14476_s3 + $0x220] sm:$0xff] }
 0x127   : > { %7235 = vmatprep.subr.mxu1 %v11099_v22  ;;  %v1342_v20 = vmul.f32 %v8479_v25, %v8479_v25  ;;  %1430 = vmatmul.mubr.f32.gmra.mxu0 %v1323_v16  ;;  %v11113_v24 = vld [vmem:[%s14476_s3 + $0x320] sm:$0xff]  ;;  %v1341_v25 = vmul.f32 %v8483_v23, %v8483_v23  ;;  %v11121_v16 = vld [vmem:[%s14476_s3 + $0x298] sm:$0xff] }
 0x128   : > { %1515 = vmatmul.mubr.f32.gmra.mxu1 %v1325_v27  ;;  %7192 = vmatpush3.msra.mxu0 %v11107_v14  ;;  %v8482_v22 = vld [vmem:[%s9084_s17 + $0x180] sm:$0xff]  ;;  %v11127_v27 = vld [vmem:[%s14476_s3 + $0x398] sm:$0xff] }
 0x129   : > { %7236 = vmatpush3.msra.mxu1 %v11113_v24  ;;  %v1339_v19 = vmul.f32 %v8482_v22, %v8482_v22  ;;  %7193 = vmatprep.subr.mxu0 %v11121_v16  ;;  %15114 = vst [vmem:[#allocation235_spill] sm:$0xff] %v11127_v27  ;;  %v11133_v22 = vld [vmem:[%s14476_s3 + $0x218] sm:$0xff] }
 0x12a   : > { %7237 = vmatprep.subr.mxu1 %v11127_v27  ;;  %15115 = vst [vmem:[#allocation236_spill] sm:$0xff] %v11133_v22  ;;  %7194 = vmatpush3.msra.mxu0 %v11133_v22  ;;  %v11139_v23 = vld [vmem:[%s14476_s3 + $0x318] sm:$0xff]  ;;  %v11145_v27 = vld [vmem:[%s14476_s3 + $0x290] sm:$0xff] }
 0x12b   : > { %7238 = vmatpush3.msra.mxu1 %v11139_v23  ;;  %1434 = vmatprep.mubr.f32.mxu0 %v1340_v28  ;;  %15116 = vst [vmem:[#allocation237_spill] sm:$0xff] %v11145_v27  ;;  %v11151_v22 = vld [vmem:[%s14476_s3 + $0x390] sm:$0xff]  ;;  %v1296_v28 = vmul.f32 %v9492_v15, %v9492_v15  ;;  %v11173_v15 = vld [vmem:[%s14476_s3 + $0x288] sm:$0xff] }
 0x12c   : > { %1519 = vmatprep.mubr.f32.mxu1 %v1342_v20  ;;  %7195 = vmatprep.subr.mxu0 %v11145_v27  ;;  %v11159_v20 = vld [vmem:[%s14476_s3 + $0x210] sm:$0xff]  ;;  %15118 = vst [vmem:[#allocation239_spill] sm:$0xff] %v11173_v15 }
 0x12d   : > { %7239 = vmatprep.subr.mxu1 %v11151_v22  ;;  %1435 = vmatmul.mubr.f32.gmra.mxu0 %v1339_v19  ;;  %v11165_v27 = vld [vmem:[%s14476_s3 + $0x310] sm:$0xff]  ;;  %v1295_v19 = vmul.f32 %v9498_v17, %v9498_v17  ;;  %v11187_v17 = vld [vmem:[%s14476_s3 + $0x208] sm:$0xff] }
 0x12e   : > { %1520 = vmatmul.mubr.f32.gmra.mxu1 %v1341_v25  ;;  %7196 = vmatpush3.msra.mxu0 %v11159_v20  ;;  %15117 = vst [vmem:[#allocation238_spill] sm:$0xff] %v11165_v27  ;;  %v11179_v25 = vld [vmem:[%s14476_s3 + $0x388] sm:$0xff]  ;;  %15120 = vst [vmem:[#allocation241_spill] sm:$0xff] %v11187_v17 }
 0x12f   : > { %7240 = vmatpush3.msra.mxu1 %v11165_v27  ;;  %7197 = vmatprep.subr.mxu0 %v11173_v15  ;;  %15119 = vst [vmem:[#allocation240_spill] sm:$0xff] %v11179_v25  ;;  %v1298_v27 = vmul.f32 %v9501_v18, %v9501_v18  ;;  %v11193_v15 = vld [vmem:[%s14476_s3 + $0x308] sm:$0xff]  ;;  %v11201_v18 = vld [vmem:[%s14476_s3 + $0x280] sm:$0xff] }
 0x130   : > { %7241 = vmatprep.subr.mxu1 %v11179_v25  ;;  %7198 = vmatpush3.msra.mxu0 %v11187_v17  ;;  %15121 = vst [vmem:[#allocation242_spill] sm:$0xff] %v11193_v15  ;;  %v1297_v25 = vmul.f32 %v9511_v21, %v9511_v21  ;;  %15122 = vst [vmem:[#allocation243_spill] sm:$0xff] %v11201_v18  ;;  %v11207_v17 = vld [vmem:[%s14476_s3 + $0x380] sm:$0xff] }
 0x131   : > { %7242 = vmatpush3.msra.mxu1 %v11193_v15  ;;  %7199 = vmatprep.subr.mxu0 %v11201_v18  ;;  %15123 = vst [vmem:[#allocation244_spill] sm:$0xff] %v11207_v17  ;;  %v11213_v15 = vld [vmem:[%s14476_s3 + $0x200] sm:$0xff]  ;;  %v1312_v18 = vmul.f32 %v9529_v26, %v9529_v26  ;;  %v11241_v26 = vld [vmem:[%s14476_s3 + $0x478] sm:$0xff] }
 0x132   : > { %7243 = vmatprep.subr.mxu1 %v11207_v17  ;;  %15124 = vst [vmem:[#allocation245_spill] sm:$0xff] %v11213_v15  ;;  %7200 = vmatpush3.msra.mxu0 %v11213_v15  ;;  %v11219_v21 = vld [vmem:[%s14476_s3 + $0x300] sm:$0xff]  ;;  %v11227_v17 = vld [vmem:[%s14476_s3 + $0x4f8] sm:$0xff] }
 0x133   : > { %1589 = vmatprep.mubr.f32.mxu0 %v1296_v28  ;;  %7244 = vmatpush3.msra.mxu1 %v11219_v21  ;;  %v1311_v28 = vmul.f32 %v9538_v29, %v9538_v29  ;;  %v11235_v15 = vld [vmem:[%s14476_s3 + $0x5f8] sm:$0xff]  ;;  %v1314_v29 = vmul.f32 %v9552_v32, %v9552_v32  ;;  %v1313_v32 = vmul.f32 %v9573_v36, %v9573_v36 }
 0x134   : > { %1590 = vmatmul.mubr.f32.vlgmr.msra.gmra.mxu0 %v1295_v19  ;;  %1674 = vmatprep.mubr.f32.mxu1 %v1298_v27  ;;  %v11247_v27 = vld [vmem:[%s14476_s3 + $0x578] sm:$0xff]  ;;  %v11255_v19 = vld [vmem:[%s14476_s3 + $0x4f0] sm:$0xff]  ;;  %v1330_v36 = vmul.f32 %v9615_v44, %v9615_v44 }
 0x135   : > { %7257 = vmatprep.subr.mxu0 %v11227_v17  ;;  %7301 = vmatprep.subr.mxu1 %v11235_v15  ;;  %15125 = vst [vmem:[#allocation246_spill] sm:$0xff] %v11247_v27  ;;  %15126 = vst [vmem:[#allocation247_spill] sm:$0xff] %v11255_v19  ;;  %v15134_v44 = vld [vmem:[#allocation17_spill] sm:$0xff] }
 0x136   : > { %1675 = vmatmul.mubr.f32.vlgmr.msra.gmra.mxu1 %v1297_v25  ;;  %7258 = vmatpush3.msra.mxu0 %v11241_v26  ;;  %v11261_v25 = vld [vmem:[%s14476_s3 + $0x5f0] sm:$0xff] }
 0x137   : > { %7302 = vmatpush3.msra.mxu1 %v11247_v27  ;;  %7259 = vmatprep.subr.mxu0 %v11255_v19  ;;  %v11267_v27 = vld [vmem:[%s14476_s3 + $0x470] sm:$0xff] }
 0x138   : > { %7303 = vmatprep.subr.mxu1 %v11261_v25  ;;  %1594 = vmatprep.mubr.f32.mxu0 %v1312_v18  ;;  %15127 = vst [vmem:[#allocation248_spill] sm:$0xff] %v11267_v27  ;;  %v11275_v19 = vld [vmem:[%s14476_s3 + $0x570] sm:$0xff]  ;;  %v1328_v18 = vmul.f32 %v9583_v38, %v9583_v38  ;;  %v15129_v38 = vld [vmem:[#allocation12_spill] sm:$0xff] }
 0x139   : > { %7260 = vmatpush3.msra.mxu0 %v11267_v27  ;;  %7304 = vmatpush3.msra.mxu1 %v11275_v19  ;;  %v1327_v27 = vmul.f32 %v9598_v41, %v9598_v41  ;;  %v15132_v41 = vld [vmem:[#allocation15_spill] sm:$0xff] }
 0x13a   : > { %1595 = vmatmul.mubr.f32.gmra.mxu0 %v1311_v28  ;;  %7261 = vmatprep.subr.mxu0 %v9543_v30  ;;  %v1329_v30 = vmul.f32 %v9637_v48, %v9637_v48  ;;  %v15137_v48 = vld [vmem:[#allocation19_spill] sm:$0xff]  ;;  %v15156_v28 = vld [vmem:[#allocation45_spill] sm:$0xff] }
 0x13b   : > { %7305 = vmatprep.subr.mxu1 %v9548_v31  ;;  %1679 = vmatprep.mubr.f32.mxu1 %v1314_v29  ;;  %v1344_v31 = vmul.f32 %v9647_v50, %v9647_v50  ;;  %v11346_v50 = vpop.f32.mrf.mxu1  ;;  %v15157_v29 = vld [vmem:[#allocation37_spill] sm:$0xff] }
 0x13c   : > { %7262 = vmatpush3.msra.mxu0 %v9557_v33  ;;  %7306 = vmatpush3.msra.mxu1 %v9563_v34  ;;  %v1343_v33 = vmul.f32 %v9662_v53, %v9662_v53  ;;  %v1346_v34 = vmul.f32 %v9679_v56, %v9679_v56  ;;  %v15140_v53 = vld [vmem:[#allocation21_spill] sm:$0xff] }
 0x13d   : > { %7263 = vmatprep.subr.mxu0 %v9568_v35  ;;  %1680 = vmatmul.mubr.f32.gmra.mxu1 %v1313_v32  ;;  %v1345_v35 = vmul.f32 %v9701_v60, %v9701_v60  ;;  %v15145_v60 = vld [vmem:[#allocation34_spill] sm:$0xff] }
 0x13e   : > { %7307 = vmatprep.subr.mxu1 %v9578_v37  ;;  %1599 = vmatprep.mubr.f32.mxu0 %v1328_v18  ;;  %v15128_v37 = vld [vmem:[#allocation11_spill] sm:$0xff]  ;;  %v15158_v32 = vld [vmem:[#allocation38_spill] sm:$0xff]  ;;  %v15159_v18 = vld [vmem:[#allocation40_spill] sm:$0xff] }
 0x13f   : > { %7264 = vmatpush3.msra.mxu0 %v9588_v39  ;;  %7308 = vmatpush3.msra.mxu1 %v9595_v40  ;;  %v15130_v39 = vld [vmem:[#allocation13_spill] sm:$0xff]  ;;  %v15131_v40 = vld [vmem:[#allocation14_spill] sm:$0xff] }
 0x140   : > { %1600 = vmatmul.mubr.f32.gmra.mxu0 %v1327_v27  ;;  %7265 = vmatprep.subr.mxu0 %v9605_v42  ;;  %v15133_v42 = vld [vmem:[#allocation16_spill] sm:$0xff]  ;;  %v1318_v27 = vmul.f32 %v15156_v28, %v15156_v28 }
 0x141   : > { %7309 = vmatprep.subr.mxu1 %v9610_v43  ;;  %1684 = vmatprep.mubr.f32.mxu1 %v1330_v36  ;;  %v11338_v43 = vpop.f32.mrf.mxu0 }
 0x142   : > { %7266 = vmatpush3.msra.mxu0 %v9620_v45  ;;  %7310 = vmatpush3.msra.mxu1 %v9627_v46  ;;  %v15135_v45 = vld [vmem:[#allocation18_spill] sm:$0xff]  ;;  %v15136_v46 = vld [vmem:[#allocation28_spill] sm:$0xff] }
 0x143   : > { %7267 = vmatprep.subr.mxu0 %v9632_v47  ;;  %1685 = vmatmul.mubr.f32.gmra.mxu1 %v1329_v30  ;;  %v1300_v47 = vmul.f32 %v15136_v46, %v15136_v46  ;;  %v15160_v30 = vld [vmem:[#allocation49_spill] sm:$0xff] }
 0x144   : > { %7311 = vmatprep.subr.mxu1 %v9642_v49  ;;  %1604 = vmatprep.mubr.f32.mxu0 %v1344_v31  ;;  %v15138_v49 = vld [vmem:[#allocation20_spill] sm:$0xff]  ;;  %v1317_v31 = vmul.f32 %v15160_v30, %v15160_v30  ;;  %v15188_v30 = vld [vmem:[#allocation70_spill] sm:$0xff] }
 0x145   : > { %7268 = vmatpush3.msra.mxu0 %v9652_v51  ;;  %7312 = vmatpush3.msra.mxu1 %v9659_v52  ;;  %v15139_v51 = vld [vmem:[#allocation30_spill] sm:$0xff] }
 0x146   : > { %1605 = vmatmul.mubr.f32.gmra.mxu0 %v1343_v33  ;;  %7269 = vmatprep.subr.mxu0 %v9669_v54  ;;  %v1299_v52 = vmul.f32 %v15139_v51, %v15139_v51  ;;  %v15141_v54 = vld [vmem:[#allocation22_spill] sm:$0xff]  ;;  %v15161_v33 = vld [vmem:[#allocation41_spill] sm:$0xff]  ;;  %v15171_v51 = vld [vmem:[#allocation52_spill] sm:$0xff] }
 0x147   : > { %7313 = vmatprep.subr.mxu1 %v9674_v55  ;;  %1689 = vmatprep.mubr.f32.mxu1 %v1346_v34  ;;  %v15142_v55 = vld [vmem:[#allocation31_spill] sm:$0xff] }
 0x148   : > { %7270 = vmatpush3.msra.mxu0 %v9684_v57  ;;  %7314 = vmatpush3.msra.mxu1 %v9691_v58  ;;  %v1302_v56 = vmul.f32 %v15142_v55, %v15142_v55  ;;  %v15143_v57 = vld [vmem:[#allocation23_spill] sm:$0xff]  ;;  %v15144_v58 = vld [vmem:[#allocation24_spill] sm:$0xff]  ;;  %v15173_v55 = vld [vmem:[#allocation53_spill] sm:$0xff] }
 0x149   : > { %7271 = vmatprep.subr.mxu0 %v9696_v59  ;;  %1690 = vmatmul.mubr.f32.gmra.mxu1 %v1345_v35  ;;  %v11356_v59 = vpop.f32.mrf.mxu0  ;;  %v15162_v34 = vld [vmem:[#allocation51_spill] sm:$0xff] }
 0x14a   : > { %7315 = vmatprep.subr.mxu1 %v9706_v61  ;;  %7272 = vmatpush3.msra.mxu0 %v9713_v62  ;;  %v1301_v61 = vmul.f32 %v15145_v60, %v15145_v60  ;;  %v15146_v62 = vld [vmem:[#allocation25_spill] sm:$0xff]  ;;  %v1332_v35 = vmul.f32 %v15162_v34, %v15162_v34  ;;  %v15176_v60 = vld [vmem:[#allocation56_spill] sm:$0xff] }
 0x14b   : > { %7316 = vmatpush3.msra.mxu1 %v9718_v63  ;;  %7273 = vmatprep.subr.mxu0 %v9725_v0  ;;  %v15147_v63 = vld [vmem:[#allocation26_spill] sm:$0xff]  ;;  %v15148_v0 = vld [vmem:[#allocation27_spill] sm:$0xff] }
 0x14c   : > { %7317 = vmatprep.subr.mxu1 %v9730_v1  ;;  %7274 = vmatpush3.msra.mxu0 %v9737_v2  ;;  %v11363_v1 = vpop.f32.mrf.mxu1  ;;  %v11365_v2 = vpop.f32.mrf.mxu0 }
 0x14d   : > { %7318 = vmatpush3.msra.mxu1 %v9742_v3  ;;  %7275 = vmatprep.subr.mxu0 %v9749_v4  ;;  %v15149_v3 = vld [vmem:[#allocation29_spill] sm:$0xff]  ;;  %v15150_v4 = vld [vmem:[#allocation39_spill] sm:$0xff] }
 0x14e   : > { %7319 = vmatprep.subr.mxu1 %v9754_v5  ;;  %7276 = vmatpush3.msra.mxu0 %v9761_v6  ;;  %v1316_v5 = vmul.f32 %v15150_v4, %v15150_v4  ;;  %v15151_v6 = vld [vmem:[#allocation32_spill] sm:$0xff] }
 0x14f   : > { %7320 = vmatpush3.msra.mxu1 %v9766_v7  ;;  %7277 = vmatprep.subr.mxu0 %v9773_v8  ;;  %v11371_v7 = vpop.f32.mrf.mxu1  ;;  %v15152_v8 = vld [vmem:[#allocation42_spill] sm:$0xff]  ;;  %v15180_v4 = vld [vmem:[#allocation60_spill] sm:$0xff] }
 0x150   : > { %7321 = vmatprep.subr.mxu1 %v9778_v9  ;;  %7278 = vmatpush3.msra.mxu0 %v9785_v10  ;;  %v1315_v9 = vmul.f32 %v15152_v8, %v15152_v8  ;;  %v15153_v10 = vld [vmem:[#allocation33_spill] sm:$0xff] }
 0x151   : > { %7322 = vmatpush3.msra.mxu1 %v9790_v11  ;;  %7279 = vmatprep.subr.mxu0 %v9797_v12  ;;  %v15154_v11 = vld [vmem:[#allocation35_spill] sm:$0xff]  ;;  %v15155_v12 = vld [vmem:[#allocation36_spill] sm:$0xff]  ;;  %v11385_v36 = vpop.f32.mrf.mxu1 }
 0x152   : > { %7323 = vmatprep.subr.mxu1 %v9802_v13  ;;  %7280 = vmatpush3.msra.mxu0 %v15128_v37  ;;  %v11378_v13 = vpop.f32.mrf.mxu0  ;;  %v15163_v37 = vld [vmem:[#allocation43_spill] sm:$0xff] }
 0x153   : > { %7324 = vmatpush3.msra.mxu1 %v15129_v38  ;;  %7281 = vmatprep.subr.mxu0 %v15130_v39  ;;  %v15164_v38 = vld [vmem:[#allocation44_spill] sm:$0xff]  ;;  %v11401_v46 = vpop.f32.mrf.mxu1 }
 0x154   : > { %7325 = vmatprep.subr.mxu1 %v15131_v40  ;;  %7282 = vmatpush3.msra.mxu0 %v15132_v41  ;;  %v11394_v39 = vpop.f32.mrf.mxu0  ;;  %v15165_v40 = vld [vmem:[#allocation54_spill] sm:$0xff] }
 0x155   : > { %7326 = vmatpush3.msra.mxu1 %v15133_v42  ;;  %7283 = vmatprep.subr.mxu0 %v15134_v44  ;;  %v1331_v41 = vmul.f32 %v15165_v40, %v15165_v40  ;;  %v15166_v42 = vld [vmem:[#allocation46_spill] sm:$0xff]  ;;  %v15167_v44 = vld [vmem:[#allocation47_spill] sm:$0xff] }
 0x156   : > { %7327 = vmatprep.subr.mxu1 %v15135_v45  ;;  %7284 = vmatpush3.msra.mxu0 %v15137_v48  ;;  %v15168_v45 = vld [vmem:[#allocation48_spill] sm:$0xff] }
 0x157   : > { %7328 = vmatpush3.msra.mxu1 %v15138_v49  ;;  %7285 = vmatprep.subr.mxu0 %v15140_v53  ;;  %v15170_v49 = vld [vmem:[#allocation50_spill] sm:$0xff]  ;;  %v15172_v53 = vld [vmem:[#allocation61_spill] sm:$0xff] }
 0x158   : > { %7329 = vmatprep.subr.mxu1 %v15141_v54  ;;  %7286 = vmatpush3.msra.mxu0 %v15143_v57  ;;  %v1333_v54 = vmul.f32 %v15172_v53, %v15172_v53  ;;  %v15201_v53 = vld [vmem:[#allocation84_spill] sm:$0xff] }
 0x159   : > { %7330 = vmatpush3.msra.mxu1 %v15144_v58  ;;  %7287 = vmatprep.subr.mxu0 %v15146_v62  ;;  %v15175_v58 = vld [vmem:[#allocation55_spill] sm:$0xff]  ;;  %v15177_v62 = vld [vmem:[#allocation66_spill] sm:$0xff] }
 0x15a   : > { %7331 = vmatprep.subr.mxu1 %v15147_v63  ;;  %7288 = vmatpush3.msra.mxu0 %v15148_v0  ;;  %v1347_v63 = vmul.f32 %v15177_v62, %v15177_v62  ;;  %v15178_v0 = vld [vmem:[#allocation58_spill] sm:$0xff]  ;;  %v15206_v62 = vld [vmem:[#allocation89_spill] sm:$0xff] }
 0x15b   : > { %1759 = vmatprep.mubr.f32.mxu0 %v1300_v47  ;;  %7332 = vmatpush3.msra.mxu1 %v15149_v3  ;;  %v15169_v47 = vld [vmem:[#allocation57_spill] sm:$0xff]  ;;  %v15179_v3 = vld [vmem:[#allocation59_spill] sm:$0xff] }
 0x15c   : > { %1760 = vmatmul.mubr.f32.vlgmr.msra.gmra.mxu0 %v1299_v52  ;;  %1844 = vmatprep.mubr.f32.mxu1 %v1302_v56  ;;  %v1334_v48 = vmul.f32 %v15169_v47, %v15169_v47  ;;  %v11407_v52 = vpop.f32.mrf.mxu0  ;;  %v15174_v56 = vld [vmem:[#allocation63_spill] sm:$0xff]  ;;  %v15197_v47 = vld [vmem:[#allocation80_spill] sm:$0xff] }
 0x15d   : > { %7345 = vmatprep.subr.mxu0 %v15151_v6  ;;  %7389 = vmatprep.subr.mxu1 %v15153_v10  ;;  %v1348_v57 = vmul.f32 %v15174_v56, %v15174_v56  ;;  %v15181_v6 = vld [vmem:[#allocation69_spill] sm:$0xff]  ;;  %v15183_v10 = vld [vmem:[#allocation64_spill] sm:$0xff] }
 0x15e   : > { %1845 = vmatmul.mubr.f32.vlgmr.msra.gmra.mxu1 %v1301_v61  ;;  %7346 = vmatpush3.msra.mxu0 %v15154_v11  ;;  %v11416_v61 = vpop.f32.mrf.mxu1  ;;  %v1350_v8 = vmul.f32 %v15181_v6, %v15181_v6  ;;  %v15202_v56 = vld [vmem:[#allocation85_spill] sm:$0xff] }
 0x15f   : > { %7390 = vmatpush3.msra.mxu1 %v15155_v12  ;;  %7347 = vmatprep.subr.mxu0 %v15157_v29  ;;  %v15184_v12 = vld [vmem:[#allocation73_spill] sm:$0xff]  ;;  %v15186_v29 = vld [vmem:[#allocation67_spill] sm:$0xff] }
 0x160   : > { %7391 = vmatprep.subr.mxu1 %v15158_v32  ;;  %1764 = vmatprep.mubr.f32.mxu0 %v1316_v5  ;;  %v11423_v5 = vpop.f32.mrf.mxu0  ;;  %v11429_v11 = vpop.f32.mrf.mxu1  ;;  %v1349_v28 = vmul.f32 %v15184_v12, %v15184_v12  ;;  %v15187_v32 = vld [vmem:[#allocation68_spill] sm:$0xff] }
 0x161   : > { %7348 = vmatpush3.msra.mxu0 %v15159_v18  ;;  %7392 = vmatpush3.msra.mxu1 %v15161_v33  ;;  %v15190_v33 = vld [vmem:[#allocation72_spill] sm:$0xff] }
 0x162   : > { %1765 = vmatmul.mubr.f32.gmra.mxu0 %v1315_v9  ;;  %7349 = vmatprep.subr.mxu0 %v15163_v37  ;;  %v15182_v9 = vld [vmem:[#allocation62_spill] sm:$0xff]  ;;  %v11436_v18 = vpop.f32.mrf.mxu0  ;;  %v11441_v34 = vpop.f32.mrf.mxu1  ;;  %v15192_v37 = vld [vmem:[#allocation75_spill] sm:$0xff]  ;;  %v15213_v12 = vld [vmem:[#allocation96_spill] sm:$0xff] }
 0x163   : > { %7393 = vmatprep.subr.mxu1 %v15164_v38  ;;  %1849 = vmatprep.mubr.f32.mxu1 %v1318_v27  ;;  %v15185_v27 = vld [vmem:[#allocation65_spill] sm:$0xff]  ;;  %v15193_v38 = vld [vmem:[#allocation76_spill] sm:$0xff] }
 0x164   : > { %7350 = vmatpush3.msra.mxu0 %v15166_v42  ;;  %7394 = vmatpush3.msra.mxu1 %v15167_v44  ;;  %v11446_v40 = vpop.f32.mrf.mxu0  ;;  %v15194_v42 = vld [vmem:[#allocation77_spill] sm:$0xff]  ;;  %v15195_v44 = vld [vmem:[#allocation78_spill] sm:$0xff] }
 0x165   : > { %7351 = vmatprep.subr.mxu0 %v15168_v45  ;;  %1850 = vmatmul.mubr.f32.gmra.mxu1 %v1317_v31  ;;  %v15189_v31 = vld [vmem:[#allocation71_spill] sm:$0xff] }
 0x166   : > { %7395 = vmatprep.subr.mxu1 %v15170_v49  ;;  %1769 = vmatprep.mubr.f32.mxu0 %v1332_v35  ;;  %v15191_v35 = vld [vmem:[#allocation74_spill] sm:$0xff]  ;;  %v15196_v45 = vld [vmem:[#allocation79_spill] sm:$0xff] }
 0x167   : > { %7352 = vmatpush3.msra.mxu0 %v15171_v51  ;;  %7396 = vmatpush3.msra.mxu1 %v15173_v55  ;;  %v15199_v49 = vld [vmem:[#allocation82_spill] sm:$0xff]  ;;  %v15200_v51 = vld [vmem:[#allocation83_spill] sm:$0xff] }
 0x168   : > { %1770 = vmatmul.mubr.f32.gmra.mxu0 %v1331_v41  ;;  %7353 = vmatprep.subr.mxu0 %v15175_v58  ;;  %v11448_v41 = vpop.f32.mrf.mxu1  ;;  %v15204_v58 = vld [vmem:[#allocation87_spill] sm:$0xff] }
 0x169   : > { %7397 = vmatprep.subr.mxu1 %v15176_v60  ;;  %1854 = vmatprep.mubr.f32.mxu1 %v1334_v48  ;;  %v15198_v48 = vld [vmem:[#allocation81_spill] sm:$0xff]  ;;  %v15205_v60 = vld [vmem:[#allocation88_spill] sm:$0xff] }
 0x16a   : > { %7354 = vmatpush3.msra.mxu0 %v15178_v0  ;;  %7398 = vmatpush3.msra.mxu1 %v15179_v3  ;;  %v11460_v55 = vpop.f32.mrf.mxu1  ;;  %v15208_v0 = vld [vmem:[#allocation91_spill] sm:$0xff]  ;;  %v15209_v3 = vld [vmem:[#allocation92_spill] sm:$0xff] }
 0x16b   : > { %7355 = vmatprep.subr.mxu0 %v15180_v4  ;;  %1855 = vmatmul.mubr.f32.gmra.mxu1 %v1333_v54  ;;  %v11458_v54 = vpop.f32.mrf.mxu0 }
 0x16c   : > { %7399 = vmatprep.subr.mxu1 %v15182_v9  ;;  %1774 = vmatprep.mubr.f32.mxu0 %v1348_v57  ;;  %v15203_v57 = vld [vmem:[#allocation86_spill] sm:$0xff]  ;;  %v11472_v6 = vpop.f32.mrf.mxu1 }
 0x16d   : > { %7356 = vmatpush3.msra.mxu0 %v15183_v10  ;;  %7400 = vmatpush3.msra.mxu1 %v15185_v27  ;;  %v11470_v4 = vpop.f32.mrf.mxu0  ;;  %v15211_v9 = vld [vmem:[#allocation94_spill] sm:$0xff]  ;;  %v15212_v10 = vld [vmem:[#allocation95_spill] sm:$0xff] }
 0x16e   : > { %1775 = vmatmul.mubr.f32.gmra.mxu0 %v1347_v63  ;;  %7357 = vmatprep.subr.mxu0 %v15186_v29  ;;  %v15207_v63 = vld [vmem:[#allocation90_spill] sm:$0xff]  ;;  %v15216_v29 = vld [vmem:[#allocation108_spill] sm:$0xff] }
 0x16f   : > { %7401 = vmatprep.subr.mxu1 %v15187_v32  ;;  %1859 = vmatprep.mubr.f32.mxu1 %v1350_v8  ;;  %v15210_v8 = vld [vmem:[#allocation93_spill] sm:$0xff]  ;;  %v15215_v27 = vld [vmem:[#allocation98_spill] sm:$0xff]  ;;  %v1304_v32 = vmul.f32 %v15216_v29, %v15216_v29 }
 0x170   : > { %7358 = vmatpush3.msra.mxu0 %v15188_v30  ;;  %7402 = vmatpush3.msra.mxu1 %v15189_v31  ;;  %v15217_v30 = vld [vmem:[#allocation99_spill] sm:$0xff]  ;;  %v15218_v31 = vld [vmem:[#allocation100_spill] sm:$0xff] }
 0x171   : > { %7359 = vmatprep.subr.mxu0 %v15190_v33  ;;  %1860 = vmatmul.mubr.f32.gmra.mxu1 %v1349_v28  ;;  %v15214_v28 = vld [vmem:[#allocation97_spill] sm:$0xff]  ;;  %v11484_v33 = vpop.f32.mrf.mxu0 }
 0x172   : > { %7403 = vmatprep.subr.mxu1 %v15191_v35  ;;  %7360 = vmatpush3.msra.mxu0 %v15192_v37  ;;  %v11486_v35 = vpop.f32.mrf.mxu1  ;;  %v15219_v37 = vld [vmem:[#allocation110_spill] sm:$0xff] }
 0x173   : > { %7404 = vmatpush3.msra.mxu1 %v15193_v38  ;;  %7361 = vmatprep.subr.mxu0 %v15194_v42  ;;  %v1303_v38 = vmul.f32 %v15219_v37, %v15219_v37  ;;  %v15220_v42 = vld [vmem:[#allocation101_spill] sm:$0xff]  ;;  %v15237_v37 = vld [vmem:[#allocation119_spill] sm:$0xff] }
 0x174   : > { %7405 = vmatprep.subr.mxu1 %v15195_v44  ;;  %7362 = vmatpush3.msra.mxu0 %v15196_v45  ;;  %v15221_v44 = vld [vmem:[#allocation102_spill] sm:$0xff]  ;;  %v15222_v45 = vld [vmem:[#allocation111_spill] sm:$0xff] }
 0x175   : > { %7406 = vmatpush3.msra.mxu1 %v15197_v47  ;;  %7363 = vmatprep.subr.mxu0 %v15198_v48  ;;  %v1306_v47 = vmul.f32 %v15222_v45, %v15222_v45  ;;  %v15223_v48 = vld [vmem:[#allocation103_spill] sm:$0xff] }
 0x176   : > { %7407 = vmatprep.subr.mxu1 %v15199_v49  ;;  %7364 = vmatpush3.msra.mxu0 %v15200_v51  ;;  %v15224_v49 = vld [vmem:[#allocation104_spill] sm:$0xff] }
 0x177   : > { %7408 = vmatpush3.msra.mxu1 %v15201_v53  ;;  %7365 = vmatprep.subr.mxu0 %v15202_v56  ;;  %v15225_v51 = vld [vmem:[#allocation112_spill] sm:$0xff]  ;;  %v15226_v56 = vld [vmem:[#allocation105_spill] sm:$0xff] }
 0x178   : > { %7409 = vmatprep.subr.mxu1 %v15203_v57  ;;  %7366 = vmatpush3.msra.mxu0 %v15204_v58  ;;  %v1305_v53 = vmul.f32 %v15225_v51, %v15225_v51  ;;  %v15227_v57 = vld [vmem:[#allocation106_spill] sm:$0xff]  ;;  %v15228_v58 = vld [vmem:[#allocation107_spill] sm:$0xff]  ;;  %v15243_v51 = vld [vmem:[#allocation124_spill] sm:$0xff] }
 0x179   : > { %7410 = vmatpush3.msra.mxu1 %v15205_v60  ;;  %7367 = vmatprep.subr.mxu0 %v15206_v62  ;;  %v11501_v60 = vpop.f32.mrf.mxu0  ;;  %v11503_v62 = vpop.f32.mrf.mxu1 }
 0x17a   : > { %7411 = vmatprep.subr.mxu1 %v15207_v63  ;;  %7368 = vmatpush3.msra.mxu0 %v15208_v0  ;;  %v15229_v63 = vld [vmem:[#allocation109_spill] sm:$0xff]  ;;  %v15230_v0 = vld [vmem:[#allocation115_spill] sm:$0xff] }
 0x17b   : > { %7412 = vmatpush3.msra.mxu1 %v15209_v3  ;;  %7369 = vmatprep.subr.mxu0 %v15210_v8  ;;  %v1320_v3 = vmul.f32 %v15230_v0, %v15230_v0  ;;  %v15231_v8 = vld [vmem:[#allocation113_spill] sm:$0xff]  ;;  %v11514_v29 = vpop.f32.mrf.mxu0  ;;  %v15247_v0 = vld [vmem:[#allocation127_spill] sm:$0xff] }
 0x17c   : > { %7413 = vmatprep.subr.mxu1 %v15211_v9  ;;  %7370 = vmatpush3.msra.mxu0 %v15212_v10  ;;  %v15232_v9 = vld [vmem:[#allocation118_spill] sm:$0xff] }
 0x17d   : > { %7414 = vmatpush3.msra.mxu1 %v15213_v12  ;;  %7371 = vmatprep.subr.mxu0 %v15214_v28  ;;  %v1319_v10 = vmul.f32 %v15232_v9, %v15232_v9  ;;  %v15233_v12 = vld [vmem:[#allocation114_spill] sm:$0xff]  ;;  %v15234_v28 = vld [vmem:[#allocation116_spill] sm:$0xff] }
 0x17e   : > { %7415 = vmatprep.subr.mxu1 %v15215_v27  ;;  %7372 = vmatpush3.msra.mxu0 %v15217_v30  ;;  %v15235_v27 = vld [vmem:[#allocation117_spill] sm:$0xff]  ;;  %v15236_v30 = vld [vmem:[#allocation122_spill] sm:$0xff] }
 0x17f   : > { %7416 = vmatpush3.msra.mxu1 %v15218_v31  ;;  %7373 = vmatprep.subr.mxu0 %v15220_v42  ;;  %v1322_v31 = vmul.f32 %v15236_v30, %v15236_v30  ;;  %v15239_v42 = vld [vmem:[#allocation121_spill] sm:$0xff]  ;;  %v15250_v9 = vld [vmem:[#allocation134_spill] sm:$0xff] }
 0x180   : > { %7417 = vmatprep.subr.mxu1 %v15221_v44  ;;  %7374 = vmatpush3.msra.mxu0 %v15223_v48  ;;  %v15240_v44 = vld [vmem:[#allocation126_spill] sm:$0xff]  ;;  %v15242_v48 = vld [vmem:[#allocation128_spill] sm:$0xff] }
 0x181   : > { %7418 = vmatpush3.msra.mxu1 %v15224_v49  ;;  %7375 = vmatprep.subr.mxu0 %v15226_v56  ;;  %v1321_v45 = vmul.f32 %v15240_v44, %v15240_v44  ;;  %v1336_v49 = vmul.f32 %v15242_v48, %v15242_v48  ;;  %v11530_v56 = vpop.f32.mrf.mxu0 }
 0x182   : > { %7419 = vmatprep.subr.mxu1 %v15227_v57  ;;  %7376 = vmatpush3.msra.mxu0 %v15228_v58  ;;  %v15246_v58 = vld [vmem:[#allocation131_spill] sm:$0xff] }
 0x183   : > { %1929 = vmatprep.mubr.f32.mxu0 %v1304_v32  ;;  %7420 = vmatpush3.msra.mxu1 %v15229_v63  ;;  %v11516_v32 = vpop.f32.mrf.mxu1  ;;  %v1335_v63 = vmul.f32 %v15246_v58, %v15246_v58  ;;  %v15261_v58 = vld [vmem:[#allocation139_spill] sm:$0xff] }
 0x184   : > { %1930 = vmatmul.mubr.f32.vlgmr.msra.gmra.mxu0 %v1303_v38  ;;  %2014 = vmatprep.mubr.f32.mxu1 %v1306_v47  ;;  %v15238_v38 = vld [vmem:[#allocation120_spill] sm:$0xff]  ;;  %v15241_v47 = vld [vmem:[#allocation123_spill] sm:$0xff] }
 0x185   : > { %7433 = vmatprep.subr.mxu0 %v15231_v8  ;;  %7477 = vmatprep.subr.mxu1 %v15233_v12  ;;  %v11532_v57 = vpop.f32.mrf.mxu1  ;;  %v15249_v8 = vld [vmem:[#allocation130_spill] sm:$0xff]  ;;  %v15251_v12 = vld [vmem:[#allocation132_spill] sm:$0xff] }
 0x186   : > { %2015 = vmatmul.mubr.f32.vlgmr.msra.gmra.mxu1 %v1305_v53  ;;  %7434 = vmatpush3.msra.mxu0 %v15234_v28  ;;  %v15244_v53 = vld [vmem:[#allocation125_spill] sm:$0xff]  ;;  %15245 = vst [vmem:[#allocation11_spill] sm:$0xff] %v11532_v57 }
 0x187   : > { %7478 = vmatpush3.msra.mxu1 %v15235_v27  ;;  %7435 = vmatprep.subr.mxu0 %v15237_v37  ;;  %v15252_v28 = vld [vmem:[#allocation133_spill] sm:$0xff]  ;;  %v11543_v27 = vpop.f32.mrf.mxu0  ;;  %v11545_v30 = vpop.f32.mrf.mxu1 }
 0x188   : > { %7479 = vmatprep.subr.mxu1 %v15238_v38  ;;  %1934 = vmatprep.mubr.f32.mxu0 %v1320_v3  ;;  %v15248_v3 = vld [vmem:[#allocation129_spill] sm:$0xff]  ;;  %15253 = vst [vmem:[#allocation12_spill] sm:$0xff] %v11543_v27  ;;  %15254 = vst [vmem:[#allocation13_spill] sm:$0xff] %v11545_v30  ;;  %v15256_v38 = vld [vmem:[#allocation135_spill] sm:$0xff] }
 0x189   : > { %7436 = vmatpush3.msra.mxu0 %v15239_v42  ;;  %7480 = vmatpush3.msra.mxu1 %v15241_v47  ;;  %v15257_v42 = vld [vmem:[#allocation140_spill] sm:$0xff]  ;;  %v11554_v48 = vpop.f32.mrf.mxu0  ;;  %v6565_v30 = vld [vmem:[%s9084_s17 + $0x218] sm:$0xff] }
 0x18a   : > { %1935 = vmatmul.mubr.f32.gmra.mxu0 %v1319_v10  ;;  %7437 = vmatprep.subr.mxu0 %v15243_v51  ;;  %v1338_v10 = vmul.f32 %v15250_v9, %v15250_v9  ;;  %v1352_v44 = vmul.f32 %v15257_v42, %v15257_v42  ;;  %v15258_v47 = vld [vmem:[#allocation136_spill] sm:$0xff]  ;;  %v15260_v51 = vld [vmem:[#allocation143_spill] sm:$0xff] }
 0x18b   : > { %7481 = vmatprep.subr.mxu1 %v15244_v53  ;;  %2019 = vmatprep.mubr.f32.mxu1 %v1322_v31  ;;  %v15255_v31 = vld [vmem:[#allocation138_spill] sm:$0xff]  ;;  %v1351_v53 = vmul.f32 %v15260_v51, %v15260_v51  ;;  %v15265_v9 = vld [vmem:[#allocation144_spill] sm:$0xff]  ;;  %v15268_v42 = vld [vmem:[#allocation147_spill] sm:$0xff] }
 0x18c   : > { %7438 = vmatpush3.msra.mxu0 %v15247_v0  ;;  %7482 = vmatpush3.msra.mxu1 %v15248_v3  ;;  %v1337_v37 = vmul.f32 %v15255_v31, %v15255_v31  ;;  %v15262_v0 = vld [vmem:[#allocation141_spill] sm:$0xff]  ;;  %v15264_v3 = vld [vmem:[#allocation146_spill] sm:$0xff] }
 0x18d   : > { %7439 = vmatprep.subr.mxu0 %v15249_v8  ;;  %2020 = vmatmul.mubr.f32.gmra.mxu1 %v1321_v45  ;;  %v15259_v45 = vld [vmem:[#allocation137_spill] sm:$0xff]  ;;  %v1354_v8 = vmul.f32 %v15264_v3, %v15264_v3  ;;  %v15276_v3 = vld [vmem:[#allocation155_spill] sm:$0xff] }
 0x18e   : > { %7483 = vmatprep.subr.mxu1 %v15251_v12  ;;  %1939 = vmatprep.mubr.f32.mxu0 %v1336_v49  ;;  %v11556_v49 = vpop.f32.mrf.mxu1  ;;  %v15266_v12 = vld [vmem:[#allocation145_spill] sm:$0xff] }
 0x18f   : > { %7440 = vmatpush3.msra.mxu0 %v15252_v28  ;;  %7484 = vmatpush3.msra.mxu1 %v15256_v38  ;;  %v11567_v28 = vpop.f32.mrf.mxu0  ;;  %v15273_v51 = vld [vmem:[#allocation153_spill] sm:$0xff] }
 0x190   : > { %1940 = vmatmul.mubr.f32.gmra.mxu0 %v1335_v63  ;;  %7441 = vmatprep.subr.mxu0 %v15258_v47  ;;  %v15263_v63 = vld [vmem:[#allocation142_spill] sm:$0xff]  ;;  %v11569_v31 = vpop.f32.mrf.mxu1  ;;  %v15269_v47 = vld [vmem:[#allocation148_spill] sm:$0xff] }
 0x191   : > { %7485 = vmatprep.subr.mxu1 %v15259_v45  ;;  %2024 = vmatprep.mubr.f32.mxu1 %v1338_v10  ;;  %v15267_v10 = vld [vmem:[#allocation150_spill] sm:$0xff]  ;;  %v15270_v45 = vld [vmem:[#allocation149_spill] sm:$0xff] }
 0x192   : > { %7442 = vmatpush3.msra.mxu0 %v15261_v58  ;;  %7486 = vmatpush3.msra.mxu1 %v15262_v0  ;;  %v1353_v38 = vmul.f32 %v15267_v10, %v15267_v10  ;;  %v11579_v58 = vpop.f32.mrf.mxu0  ;;  %v11581_v0 = vpop.f32.mrf.mxu1  ;;  %v15281_v10 = vld [vmem:[#allocation160_spill] sm:$0xff] }
 0x193   : > { %7443 = vmatprep.subr.mxu0 %v15263_v63  ;;  %2025 = vmatmul.mubr.f32.gmra.mxu1 %v1337_v37  ;;  %v15271_v37 = vld [vmem:[#allocation151_spill] sm:$0xff]  ;;  %15274 = vst [vmem:[#allocation14_spill] sm:$0xff] %v11581_v0  ;;  %v15275_v63 = vld [vmem:[#allocation154_spill] sm:$0xff] }
 0x194   : > { %7487 = vmatprep.subr.mxu1 %v15265_v9  ;;  %1944 = vmatprep.mubr.f32.mxu0 %v1352_v44  ;;  %v15272_v44 = vld [vmem:[#allocation152_spill] sm:$0xff]  ;;  %v15278_v9 = vld [vmem:[#allocation157_spill] sm:$0xff]  ;;  %v15356_v0 = vld [vmem:[#allocation222_spill] sm:$0xff] }
 0x195   : > { %7444 = vmatpush3.msra.mxu0 %v15266_v12  ;;  %7488 = vmatpush3.msra.mxu1 %v15268_v42  ;;  %v15280_v12 = vld [vmem:[#allocation159_spill] sm:$0xff]  ;;  %v11590_v42 = vpop.f32.mrf.mxu0 }
 0x196   : > { %1945 = vmatmul.mubr.f32.gmra.mxu0 %v1351_v53  ;;  %7445 = vmatprep.subr.mxu0 %v15269_v47  ;;  %v15277_v53 = vld [vmem:[#allocation156_spill] sm:$0xff]  ;;  %v11592_v47 = vpop.f32.mrf.mxu1 }
 0x197   : > { %7489 = vmatprep.subr.mxu1 %v15270_v45  ;;  %2029 = vmatprep.mubr.f32.mxu1 %v1354_v8  ;;  %v15279_v8 = vld [vmem:[#allocation158_spill] sm:$0xff]  ;;  %15282 = vst [vmem:[#allocation15_spill] sm:$0xff] %v11592_v47  ;;  %v15283_v45 = vld [vmem:[#allocation161_spill] sm:$0xff] }
 0x198   : > { %7446 = vmatpush3.msra.mxu0 %v15271_v37  ;;  %7490 = vmatpush3.msra.mxu1 %v15272_v44  ;;  %v15285_v37 = vld [vmem:[#allocation163_spill] sm:$0xff]  ;;  %v15286_v44 = vld [vmem:[#allocation164_spill] sm:$0xff]  ;;  %v6581_v47 = vld [vmem:[%s9084_s17 + $0x298] sm:$0xff] }
 0x199   : > { %7447 = vmatprep.subr.mxu0 %v15273_v51  ;;  %2030 = vmatmul.mubr.f32.gmra.mxu1 %v1353_v38  ;;  %v15284_v38 = vld [vmem:[#allocation162_spill] sm:$0xff]  ;;  %v15287_v51 = vld [vmem:[#allocation165_spill] sm:$0xff] }
 0x19a   : > { %7491 = vmatprep.subr.mxu1 %v15275_v63  ;;  %7448 = vmatpush3.msra.mxu0 %v15276_v3  ;;  %v15288_v63 = vld [vmem:[#allocation166_spill] sm:$0xff]  ;;  %v15289_v3 = vld [vmem:[#allocation167_spill] sm:$0xff] }
 0x19b   : > { %7492 = vmatpush3.msra.mxu1 %v15277_v53  ;;  %7449 = vmatprep.subr.mxu0 %v15278_v9  ;;  %v15290_v53 = vld [vmem:[#allocation168_spill] sm:$0xff]  ;;  %v11602_v9 = vpop.f32.mrf.mxu0 }
 0x19c   : > { %7493 = vmatprep.subr.mxu1 %v15279_v8  ;;  %7450 = vmatpush3.msra.mxu0 %v15280_v12  ;;  %15291 = vst [vmem:[#allocation16_spill] sm:$0xff] %v11602_v9  ;;  %v11604_v8 = vpop.f32.mrf.mxu1  ;;  %v15293_v12 = vld [vmem:[#allocation169_spill] sm:$0xff] }
 0x19d   : > { %7494 = vmatpush3.msra.mxu1 %v15281_v10  ;;  %7451 = vmatprep.subr.mxu0 %v15283_v45  ;;  %15292 = vst [vmem:[#allocation17_spill] sm:$0xff] %v11604_v8  ;;  %v15294_v10 = vld [vmem:[#allocation170_spill] sm:$0xff]  ;;  %v15295_v45 = vld [vmem:[#allocation171_spill] sm:$0xff]  ;;  %v15310_v8 = vld [vmem:[#allocation184_spill] sm:$0xff] }
 0x19e   : > { %7495 = vmatprep.subr.mxu1 %v15284_v38  ;;  %7452 = vmatpush3.msra.mxu0 %v15285_v37  ;;  %v15296_v38 = vld [vmem:[#allocation172_spill] sm:$0xff]  ;;  %v15297_v37 = vld [vmem:[#allocation173_spill] sm:$0xff] }
 0x19f   : > { %7496 = vmatpush3.msra.mxu1 %v15286_v44  ;;  %7453 = vmatprep.subr.mxu0 %v15287_v51  ;;  %v15298_v44 = vld [vmem:[#allocation174_spill] sm:$0xff]  ;;  %v15299_v51 = vld [vmem:[#allocation175_spill] sm:$0xff] }
 0x1a0   : > { %7497 = vmatprep.subr.mxu1 %v15288_v63  ;;  %7454 = vmatpush3.msra.mxu0 %v15289_v3  ;;  %v15300_v63 = vld [vmem:[#allocation176_spill] sm:$0xff]  ;;  %v11614_v3 = vpop.f32.mrf.mxu0 }
 0x1a1   : > { %7498 = vmatpush3.msra.mxu1 %v15290_v53  ;;  %7455 = vmatprep.subr.mxu0 %v15293_v12  ;;  %15301 = vst [vmem:[#allocation18_spill] sm:$0xff] %v11614_v3  ;;  %v11616_v53 = vpop.f32.mrf.mxu1  ;;  %v15303_v12 = vld [vmem:[#allocation177_spill] sm:$0xff]  ;;  %v15315_v3 = vld [vmem:[#allocation187_spill] sm:$0xff] }
 0x1a2   : > { %7499 = vmatprep.subr.mxu1 %v15294_v10  ;;  %7456 = vmatpush3.msra.mxu0 %v15295_v45  ;;  %15302 = vst [vmem:[#allocation28_spill] sm:$0xff] %v11616_v53  ;;  %v15304_v10 = vld [vmem:[#allocation178_spill] sm:$0xff]  ;;  %v15305_v45 = vld [vmem:[#allocation179_spill] sm:$0xff]  ;;  %v11628_v53 = vpop.f32.mrf.mxu0 }
 0x1a3   : > { %7500 = vmatpush3.msra.mxu1 %v15296_v38  ;;  %7457 = vmatprep.subr.mxu0 %v15297_v37  ;;  %v15306_v38 = vld [vmem:[#allocation180_spill] sm:$0xff]  ;;  %v15307_v37 = vld [vmem:[#allocation181_spill] sm:$0xff]  ;;  %15311 = vst [vmem:[#allocation19_spill] sm:$0xff] %v11628_v53  ;;  %v11630_v57 = vpop.f32.mrf.mxu1 }
 0x1a4   : > { %7501 = vmatprep.subr.mxu1 %v15298_v44  ;;  %7458 = vmatpush3.msra.mxu0 %v15299_v51  ;;  %v15308_v44 = vld [vmem:[#allocation182_spill] sm:$0xff]  ;;  %v6563_v51 = vld [vmem:[%s9084_s17 + $0x208] sm:$0xff]  ;;  %15312 = vst [vmem:[#allocation20_spill] sm:$0xff] %v11630_v57 }
 0x1a5   : > { %7502 = vmatpush3.msra.mxu1 %v15300_v63  ;;  %7459 = vmatprep.subr.mxu0 %v15303_v12  ;;  %v15309_v63 = vld [vmem:[#allocation183_spill] sm:$0xff]  ;;  %v15313_v12 = vld [vmem:[#allocation185_spill] sm:$0xff]  ;;  %v15320_v57 = vld [vmem:[#allocation190_spill] sm:$0xff] }
 0x1a6   : > { %7503 = vmatprep.subr.mxu1 %v15304_v10  ;;  %7460 = vmatpush3.msra.mxu0 %v15305_v45  ;;  %v15314_v10 = vld [vmem:[#allocation186_spill] sm:$0xff]  ;;  %v6562_v45 = vld [vmem:[%s9084_s17 + $0x200] sm:$0xff] }
 0x1a7   : > { %7504 = vmatpush3.msra.mxu1 %v15306_v38  ;;  %7461 = vmatprep.subr.mxu0 %v15307_v37  ;;  %v6564_v38 = vld [vmem:[%s9084_s17 + $0x210] sm:$0xff]  ;;  %v15316_v37 = vld [vmem:[#allocation188_spill] sm:$0xff] }
 0x1a8   : > { %7505 = vmatprep.subr.mxu1 %v15308_v44  ;;  %7462 = vmatpush3.msra.mxu0 %v15309_v63  ;;  %v11640_v44 = vpop.f32.mrf.mxu1  ;;  %v15319_v63 = vld [vmem:[#allocation189_spill] sm:$0xff] }
 0x1a9   : > { %7506 = vmatpush3.msra.mxu1 %v15310_v8  ;;  %7463 = vmatprep.subr.mxu0 %v15313_v12  ;;  %v11638_v8 = vpop.f32.mrf.mxu0  ;;  %15318 = vst [vmem:[#allocation21_spill] sm:$0xff] %v11640_v44  ;;  %v15321_v12 = vld [vmem:[#allocation191_spill] sm:$0xff] }
 0x1aa   : > { %7507 = vmatprep.subr.mxu1 %v15314_v10  ;;  %7464 = vmatpush3.msra.mxu0 %v15315_v3  ;;  %15317 = vst [vmem:[#allocation30_spill] sm:$0xff] %v11638_v8  ;;  %v15322_v10 = vld [vmem:[#allocation192_spill] sm:$0xff]  ;;  %v11648_v3 = vpop.f32.mrf.mxu1  ;;  %v15331_v8 = vld [vmem:[#allocation201_spill] sm:$0xff] }
 0x1ab   : > { %2164 = vmatprep.mubr.f32.mxu0 %v6563_v51  ;;  %7508 = vmatpush3.msra.mxu1 %v15316_v37  ;;  %v11646_v53 = vpop.f32.mrf.mxu0  ;;  %v15323_v51 = vld [vmem:[#allocation193_spill] sm:$0xff] }
 0x1ac   : > { %2249 = vmatprep.mubr.f32.mxu1 %v6565_v30  ;;  %2165 = vmatmul.mubr.f32.vlgmr.msra.gmra.mxu0 %v6562_v45  ;;  %v15324_v30 = vld [vmem:[#allocation194_spill] sm:$0xff]  ;;  %v15325_v45 = vld [vmem:[#allocation195_spill] sm:$0xff]  ;;  %v15327_v37 = vld [vmem:[#allocation197_spill] sm:$0xff]  ;;  %v11660_v44 = vpop.f32.mrf.mxu1 }
 0x1ad   : > { %2250 = vmatmul.mubr.f32.vlgmr.msra.gmra.mxu1 %v6564_v38  ;;  %7521 = vmatprep.subr.mxu0 %v15319_v63  ;;  %v15326_v38 = vld [vmem:[#allocation196_spill] sm:$0xff]  ;;  %v15328_v63 = vld [vmem:[#allocation198_spill] sm:$0xff] }
 0x1ae   : > { %7565 = vmatprep.subr.mxu1 %v15320_v57  ;;  %7522 = vmatpush3.msra.mxu0 %v15321_v12  ;;  %v15329_v57 = vld [vmem:[#allocation199_spill] sm:$0xff]  ;;  %v15330_v12 = vld [vmem:[#allocation200_spill] sm:$0xff]  ;;  %v11672_v9 = vpop.f32.mrf.mxu1 }
 0x1af   : > { %7566 = vmatpush3.msra.mxu1 %v15322_v10  ;;  %7523 = vmatprep.subr.mxu0 %v15323_v51  ;;  %v11658_v10 = vpop.f32.mrf.mxu0  ;;  %v15332_v51 = vld [vmem:[#allocation202_spill] sm:$0xff]  ;;  %15340 = vst [vmem:[#allocation31_spill] sm:$0xff] %v11672_v9 }
 0x1b0   : > { %7567 = vmatprep.subr.mxu1 %v15324_v30  ;;  %7524 = vmatpush3.msra.mxu0 %v15325_v45  ;;  %v15333_v30 = vld [vmem:[#allocation203_spill] sm:$0xff]  ;;  %v15334_v45 = vld [vmem:[#allocation204_spill] sm:$0xff] }
 0x1b1   : > { %7568 = vmatpush3.msra.mxu1 %v15326_v38  ;;  %7525 = vmatprep.subr.mxu0 %v15327_v37  ;;  %v15335_v38 = vld [vmem:[#allocation205_spill] sm:$0xff]  ;;  %v15336_v37 = vld [vmem:[#allocation206_spill] sm:$0xff] }
 0x1b2   : > { %7569 = vmatprep.subr.mxu1 %v15328_v63  ;;  %7526 = vmatpush3.msra.mxu0 %v15329_v57  ;;  %v15337_v63 = vld [vmem:[#allocation207_spill] sm:$0xff]  ;;  %v15338_v57 = vld [vmem:[#allocation208_spill] sm:$0xff] }
 0x1b3   : > { %7570 = vmatpush3.msra.mxu1 %v15330_v12  ;;  %7527 = vmatprep.subr.mxu0 %v15331_v8  ;;  %v11670_v12 = vpop.f32.mrf.mxu0  ;;  %v15341_v8 = vld [vmem:[#allocation209_spill] sm:$0xff] }
 0x1b4   : > { %7571 = vmatprep.subr.mxu1 %v15332_v51  ;;  %7528 = vmatpush3.msra.mxu0 %v15333_v30  ;;  %15339 = vst [vmem:[#allocation22_spill] sm:$0xff] %v11670_v12  ;;  %v15342_v51 = vld [vmem:[#allocation210_spill] sm:$0xff]  ;;  %v15343_v30 = vld [vmem:[#allocation211_spill] sm:$0xff]  ;;  %v11684_v12 = vpop.f32.mrf.mxu1 }
 0x1b5   : > { %7572 = vmatpush3.msra.mxu1 %v15334_v45  ;;  %7529 = vmatprep.subr.mxu0 %v15335_v38  ;;  %v15344_v45 = vld [vmem:[#allocation212_spill] sm:$0xff]  ;;  %v15345_v38 = vld [vmem:[#allocation213_spill] sm:$0xff]  ;;  %v11682_v9 = vpop.f32.mrf.mxu0  ;;  %15350 = vst [vmem:[#allocation24_spill] sm:$0xff] %v11684_v12  ;;  %v6578_v12 = vld [vmem:[%s9084_s17 + $0x280] sm:$0xff] }
 0x1b6   : > { %7573 = vmatprep.subr.mxu1 %v15336_v37  ;;  %7530 = vmatpush3.msra.mxu0 %v15337_v63  ;;  %v15346_v37 = vld [vmem:[#allocation214_spill] sm:$0xff]  ;;  %v15347_v63 = vld [vmem:[#allocation215_spill] sm:$0xff]  ;;  %15349 = vst [vmem:[#allocation23_spill] sm:$0xff] %v11682_v9 }
 0x1b7   : > { %7574 = vmatpush3.msra.mxu1 %v15338_v57  ;;  %7531 = vmatprep.subr.mxu0 %v15341_v8  ;;  %v15348_v57 = vld [vmem:[#allocation216_spill] sm:$0xff]  ;;  %v15351_v8 = vld [vmem:[#allocation217_spill] sm:$0xff]  ;;  %v11698_v9 = vpop.f32.mrf.mxu0 }
 0x1b8   : > { %7575 = vmatprep.subr.mxu1 %v15342_v51  ;;  %7532 = vmatpush3.msra.mxu0 %v15343_v30  ;;  %v15352_v51 = vld [vmem:[#allocation218_spill] sm:$0xff]  ;;  %v15353_v30 = vld [vmem:[#allocation219_spill] sm:$0xff]  ;;  %15359 = vst [vmem:[#allocation34_spill] sm:$0xff] %v11698_v9 }
 0x1b9   : > { %7576 = vmatpush3.msra.mxu1 %v15344_v45  ;;  %7533 = vmatprep.subr.mxu0 %v15345_v38  ;;  %v15354_v45 = vld [vmem:[#allocation220_spill] sm:$0xff]  ;;  %v11708_v27 = vpop.f32.mrf.mxu0 }
 0x1ba   : > { %7577 = vmatprep.subr.mxu1 %v15346_v37  ;;  %7534 = vmatpush3.msra.mxu0 %v15347_v63  ;;  %v6579_v38 = vld [vmem:[%s9084_s17 + $0x288] sm:$0xff]  ;;  %v15355_v37 = vld [vmem:[#allocation221_spill] sm:$0xff]  ;;  %v15357_v63 = vld [vmem:[#allocation223_spill] sm:$0xff] }
 0x1bb   : > { %7578 = vmatpush3.msra.mxu1 %v15348_v57  ;;  %7535 = vmatprep.subr.mxu0 %v15351_v8  ;;  %v15358_v57 = vld [vmem:[#allocation224_spill] sm:$0xff]  ;;  %v6580_v8 = vld [vmem:[%s9084_s17 + $0x290] sm:$0xff] }
 0x1bc   : > { %7579 = vmatprep.subr.mxu1 %v15352_v51  ;;  %7536 = vmatpush3.msra.mxu0 %v15353_v30  ;;  %v11700_v51 = vpop.f32.mrf.mxu1  ;;  %v15361_v30 = vld [vmem:[#allocation225_spill] sm:$0xff] }
 0x1bd   : > { %7580 = vmatpush3.msra.mxu1 %v15354_v45  ;;  %7537 = vmatprep.subr.mxu0 %v15355_v37  ;;  %15360 = vst [vmem:[#allocation25_spill] sm:$0xff] %v11700_v51  ;;  %v15362_v45 = vld [vmem:[#allocation226_spill] sm:$0xff]  ;;  %v15364_v37 = vld [vmem:[#allocation228_spill] sm:$0xff]  ;;  %v15367_v51 = vld [vmem:[#allocation231_spill] sm:$0xff] }
 0x1be   : > { %7581 = vmatprep.subr.mxu1 %v15356_v0  ;;  %7538 = vmatpush3.msra.mxu0 %v15357_v63  ;;  %v15363_v0 = vld [vmem:[#allocation227_spill] sm:$0xff]  ;;  %v6595_v63 = vld [vmem:[%s9084_s17 + $0x308] sm:$0xff]  ;;  %v11710_v9 = vpop.f32.mrf.mxu1 }
 0x1bf   : > { %7582 = vmatpush3.msra.mxu1 %v15358_v57  ;;  %2169 = vmatprep.mubr.f32.mxu0 %v6579_v38  ;;  %v6597_v57 = vld [vmem:[%s9084_s17 + $0x318] sm:$0xff]  ;;  %v15365_v38 = vld [vmem:[#allocation229_spill] sm:$0xff] }
 0x1c0   : > { %2254 = vmatprep.mubr.f32.mxu1 %v6581_v47  ;;  %7539 = vmatprep.subr.mxu0 %v15361_v30  ;;  %v15366_v47 = vld [vmem:[#allocation230_spill] sm:$0xff]  ;;  %v15368_v30 = vld [vmem:[#allocation232_spill] sm:$0xff] }
 0x1c1   : > { %7583 = vmatprep.subr.mxu1 %v15362_v45  ;;  %2170 = vmatmul.mubr.f32.gmra.mxu0 %v6578_v12  ;;  %v6594_v12 = vld [vmem:[%s9084_s17 + $0x300] sm:$0xff]  ;;  %v15369_v45 = vld [vmem:[#allocation233_spill] sm:$0xff] }
 0x1c2   : > { %2255 = vmatmul.mubr.f32.gmra.mxu1 %v6580_v8  ;;  %7540 = vmatpush3.msra.mxu0 %v15363_v0  ;;  %v6596_v8 = vld [vmem:[%s9084_s17 + $0x310] sm:$0xff]  ;;  %v15370_v0 = vld [vmem:[#allocation234_spill] sm:$0xff] }
 0x1c3   : > { %7584 = vmatpush3.msra.mxu1 %v15364_v37  ;;  %7541 = vmatprep.subr.mxu0 %v15365_v38  ;;  %v11720_v37 = vpop.f32.mrf.mxu0  ;;  %v11722_v38 = vpop.f32.mrf.mxu1 }
 0x1c4   : > { %7585 = vmatprep.subr.mxu1 %v15366_v47  ;;  %7542 = vmatpush3.msra.mxu0 %v15367_v51  ;;  %v6763_v51 = vadd.f32 %v11356_v59, %v11338_v43  ;;  %v6807_v47 = vadd.f32 %v11363_v1, %v11346_v50  ;;  %v6610_v43 = vld [vmem:[%s9084_s17 + $0x380] sm:$0xff]  ;;  %v6612_v59 = vld [vmem:[%s9084_s17 + $0x390] sm:$0xff] }
 0x1c5   : > { %7586 = vmatpush3.msra.mxu1 %v15368_v30  ;;  %2174 = vmatprep.mubr.f32.mxu0 %v6595_v63  ;;  %v6611_v63 = vld [vmem:[%s9084_s17 + $0x388] sm:$0xff]  ;;  %v15371_v30 = vld [vmem:[#allocation235_spill] sm:$0xff]  ;;  %v11740_v50 = vpop.f32.mrf.mxu0 }
 0x1c6   : > { %2259 = vmatprep.mubr.f32.mxu1 %v6597_v57  ;;  %7543 = vmatprep.subr.mxu0 %v15369_v45  ;;  %v6613_v57 = vld [vmem:[%s9084_s17 + $0x398] sm:$0xff] }
 0x1c7   : > { %7587 = vmatprep.subr.mxu1 %v15370_v0  ;;  %2175 = vmatmul.mubr.f32.gmra.mxu0 %v6594_v12  ;;  %v6851_v12 = vadd.f32 %v11458_v54, %v11446_v40  ;;  %v15374_v54 = vld [vmem:[#allocation238_spill] sm:$0xff] }
 0x1c8   : > { %2260 = vmatmul.mubr.f32.gmra.mxu1 %v6596_v8  ;;  %7544 = vmatpush3.msra.mxu0 %v11107_v14  ;;  %v15372_v8 = vld [vmem:[#allocation236_spill] sm:$0xff]  ;;  %v11742_v14 = vpop.f32.mrf.mxu1 }
 0x1c9   : > { %7588 = vmatpush3.msra.mxu1 %v11113_v24  ;;  %7545 = vmatprep.subr.mxu0 %v11121_v16  ;;  %v763_v24 = vadd.f32 %v6807_v47, %v6763_v51  ;;  %v15373_v16 = vld [vmem:[#allocation237_spill] sm:$0xff]  ;;  %v6895_v51 = vadd.f32 %v11460_v55, %v11448_v41  ;;  %v15375_v47 = vld [vmem:[#allocation239_spill] sm:$0xff]  ;;  %v6939_v55 = vadd.f32 %v11567_v28, %v11554_v48 }
 0x1ca   : > { %7589 = vmatprep.subr.mxu1 %v15371_v30  ;;  %7546 = vmatpush3.msra.mxu0 %v15372_v8  ;;  %v15377_v8 = vld [vmem:[#allocation241_spill] sm:$0xff]  ;;  %v11762_v41 = vld [vmem:[%s9084_s17 + $0x220] sm:$0xff]  ;;  %v6769_v28 = vadd.f32 %v11407_v52, %v11394_v39  ;;  %v11796_v39 = vld [vmem:[%s9084_s17 + $0x2a8] sm:$0xff]  ;;  %v6857_v52 = vadd.f32 %v11514_v29, %v11501_v60 }
 0x1cb   : > { %7590 = vmatpush3.msra.mxu1 %v11139_v23  ;;  %2179 = vmatprep.mubr.f32.mxu0 %v6611_v63  ;;  %v848_v23 = vadd.f32 %v6851_v12, %v763_v24  ;;  %v15376_v63 = vld [vmem:[#allocation240_spill] sm:$0xff]  ;;  %v6810_v12 = vadd.f32 %v11385_v36, %v11371_v7  ;;  %v15381_v7 = vld [vmem:[#allocation245_spill] sm:$0xff] }
 0x1cc   : > { %2264 = vmatprep.mubr.f32.mxu1 %v6613_v57  ;;  %7547 = vmatprep.subr.mxu0 %v15373_v16  ;;  %v7113_v1 = vpop.f32.mrf.mxu0  ;;  %v15380_v24 = vld [vmem:[#allocation244_spill] sm:$0xff]  ;;  %v11769_v16 = vld [vmem:[%s9084_s17 + $0x238] sm:$0xff] }
 0x1cd   : > { %7591 = vmatprep.subr.mxu1 %v11151_v22  ;;  %v7157_v40 = vpop.f32.mrf.mxu1  ;;  %2180 = vmatmul.mubr.f32.gmra.mxu0 %v6610_v43  ;;  %v11753_v22 = vld [vmem:[%s9084_s17 + $0x228] sm:$0xff]  ;;  %v15378_v43 = vld [vmem:[#allocation242_spill] sm:$0xff]  ;;  %v933_v36 = vadd.f32 %v6895_v51, %v848_v23 }
 0x1ce   : > { %2265 = vmatmul.mubr.f32.gmra.mxu1 %v6612_v59  ;;  %7548 = vmatpush3.msra.mxu0 %v11159_v20  ;;  %v7114_v45 = vpop.f32.mrf.mxu0  ;;  %v6766_v20 = vadd.f32 %v11378_v13, %v11365_v2  ;;  %v15379_v59 = vld [vmem:[#allocation243_spill] sm:$0xff]  ;;  %v6854_v2 = vadd.f32 %v11484_v33, %v11470_v4  ;;  %v11778_v13 = vld [vmem:[%s9084_s17 + $0x230] sm:$0xff]  ;;  %v15384_v29 = vld [vmem:[#allocation248_spill] sm:$0xff] }
 0x1cf   : > { %7592 = vmatpush3.msra.mxu1 %v15374_v54  ;;  %v7158_v0 = vpop.f32.mrf.mxu1  ;;  %7549 = vmatprep.subr.mxu0 %v15375_v47  ;;  %v7115_v57 = vadd.f32 %v7114_v45, %v7113_v1  ;;  %v261_v4 = vld [vmem:[%s14475_s2 + $0x10] sm:$0xff]  ;;  %v1018_v33 = vadd.f32 %v6939_v55, %v933_v36  ;;  %v15386_v51 = vld [vmem:[#allocation14_spill] sm:$0xff]  ;;  %v11862_v47 = vld [vmem:[%s9084_s17 + $0x328] sm:$0xff] }
 0x1d0   : > { %7593 = vmatprep.subr.mxu1 %v15376_v63  ;;  %v7159_v30 = vadd.f32 %v7158_v0, %v7157_v40  ;;  %7550 = vmatpush3.msra.mxu0 %v15377_v8  ;;  %v768_v48 = vadd.f32 %v6810_v12, %v6766_v20  ;;  %v6813_v40 = vadd.f32 %v11416_v61, %v11401_v46  ;;  %v15382_v61 = vld [vmem:[#allocation246_spill] sm:$0xff]  ;;  %v15391_v8 = vld [vmem:[#allocation23_spill] sm:$0xff] }
 0x1d1   : > { %7594 = vmatpush3.msra.mxu1 %v15378_v43  ;;  %7551 = vmatprep.subr.mxu0 %v15379_v59  ;;  %v15389_v63 = vld [vmem:[#allocation18_spill] sm:$0xff]  ;;  %v11876_v55 = vld [vmem:[%s14476_s3 + $0x4e0] sm:$0xff] }
 0x1d2   : > { %7595 = vmatprep.subr.mxu1 %v15380_v24  ;;  %v11771_v1 = vadd.f32 %v7159_v30, %v7115_v57  ;;  %7552 = vmatpush3.msra.mxu0 %v15381_v7  ;;  %v853_v46 = vadd.f32 %v6854_v2, %v768_v48  ;;  %v773_v23 = vadd.f32 %v6813_v40, %v6769_v28  ;;  %v11869_v30 = vld [vmem:[%s9084_s17 + $0x320] sm:$0xff]  ;;  %v15390_v12 = vld [vmem:[#allocation22_spill] sm:$0xff]  ;;  %v15394_v40 = vld [vmem:[#allocation13_spill] sm:$0xff] }
 0x1d3   : > { %2334 = vmatprep.mubr.f32.mxu0 %v11753_v22  ;;  %7596 = vmatpush3.msra.mxu1 %v11219_v21  ;;  %v6983_v21 = vadd.f32 %v11569_v31, %v11556_v49  ;;  %v15383_v49 = vld [vmem:[#allocation247_spill] sm:$0xff]  ;;  %v7030_v43 = vadd.f32 %v15391_v8, %v15390_v12  ;;  %v11895_v36 = vld [vmem:[%s9084_s17 + $0x338] sm:$0xff]  ;;  %v15411_v12 = vld [vmem:[#allocation20_spill] sm:$0xff] }
 0x1d4   : > { %2335 = vmatmul.mubr.f32.vlgmr.msra.gmra.mxu0 %v11762_v41  ;;  %2419 = vmatprep.mubr.f32.mxu1 %v11769_v16  ;;  %v11809_v31 = vld [vmem:[%s9084_s17 + $0x2a0] sm:$0xff]  ;;  %v858_v54 = vadd.f32 %v6857_v52, %v773_v23  ;;  %v15397_v52 = vld [vmem:[#allocation28_spill] sm:$0xff]  ;;  %v11921_v23 = vld [vmem:[%s9084_s17 + $0x330] sm:$0xff] }
 0x1d5   : > { %7609 = vmatprep.subr.mxu0 %v11227_v17  ;;  %7653 = vmatprep.subr.mxu1 %v11235_v15  ;;  %v6898_v17 = vadd.f32 %v11486_v35, %v11472_v6  ;;  %v7027_v15 = vadd.f32 %v11658_v10, %v11646_v53  ;;  %v6942_v6 = vadd.f32 %v11590_v42, %v11579_v58  ;;  %v11841_v58 = vld [vmem:[%s14476_s3 + $0x5e8] sm:$0xff]  ;;  %v11882_v59 = vld [vmem:[%s14476_s3 + $0x5e0] sm:$0xff]  ;;  %v15412_v8 = vld [vmem:[#allocation21_spill] sm:$0xff] }
 0x1d6   : > { %2420 = vmatmul.mubr.f32.vlgmr.msra.gmra.mxu1 %v11778_v13  ;;  %7610 = vmatpush3.msra.mxu0 %v11241_v26  ;;  %v11816_v26 = vld [vmem:[%s9084_s17 + $0x2b8] sm:$0xff]  ;;  %v6772_v35 = vadd.f32 %v11436_v18, %v11423_v5  ;;  %v1103_v60 = vadd.f32 %v6983_v21, %v1018_v33  ;;  %v6816_v53 = vadd.f32 %v11441_v34, %v11429_v11  ;;  %v11832_v18 = vld [vmem:[%s9084_s17 + $0x2b0] sm:$0xff]  ;;  %v15385_v42 = vld [vmem:[#allocation12_spill] sm:$0xff] }
 0x1d7   : > { %7654 = vmatpush3.msra.mxu1 %v15382_v61  ;;  %3611 = vrot.lane.b32.xlu1 %v261_v4, %s8913_s29  ;;  %v938_v10 = vadd.f32 %v6898_v17, %v853_v46  ;;  %v262_v5 = vld [vmem:[%s14475_s2 + $0x18] sm:$0xff]  ;;  %v7071_v34 = vadd.f32 %v11660_v44, %v11648_v3  ;;  %v6860_v45 = vadd.f32 %v15385_v42, %v11530_v56  ;;  %v11852_v44 = vld [vmem:[%s14476_s3 + $0x468] sm:$0xff]  ;;  %v11891_v7 = vld [vmem:[%s14476_s3 + $0x460] sm:$0xff] }
 0x1d8   : > { %7611 = vmatprep.subr.mxu0 %v15383_v49  ;;  %7655 = vmatprep.subr.mxu1 %v11261_v25  ;;  %v8508_v25 = vld [vmem:[%s14476_s3 + $0x4e8] sm:$0xff]  ;;  %v1188_v11 = vadd.f32 %v7027_v15, %v1103_v60  ;;  %v778_v20 = vadd.f32 %v6816_v53, %v6772_v35  ;;  %v15393_v28 = vld [vmem:[#allocation11_spill] sm:$0xff]  ;;  %v15396_v17 = vld [vmem:[#allocation17_spill] sm:$0xff] }
 0x1d9   : > { %2339 = vmatprep.mubr.f32.mxu0 %v11796_v39  ;;  %7612 = vmatpush3.msra.mxu0 %v15384_v29  ;;  %v1023_v0 = vadd.f32 %v6942_v6, %v938_v10  ;;  %v11858_v3 = vld [vmem:[%s14476_s3 + $0x568] sm:$0xff]  ;;  %v6904_v4 = vadd.f32 %v15394_v40, %v15393_v28  ;;  %v11902_v21 = vld [vmem:[%s14476_s3 + $0x560] sm:$0xff]  ;;  %v6989_v61 = vadd.f32 %v15397_v52, %v15396_v17  ;;  %v11911_v15 = vld [vmem:[%s14476_s3 + $0x4d8] sm:$0xff] }
 0x1da   : > { %7656 = vmatpush3.msra.mxu1 %v11275_v19  ;;  %2340 = vmatmul.mubr.f32.gmra.mxu0 %v11809_v31  ;;  %v6901_v19 = vadd.f32 %v11516_v32, %v11503_v62  ;;  %v15387_v62 = vld [vmem:[#allocation15_spill] sm:$0xff]  ;;  %v15388_v56 = vld [vmem:[#allocation16_spill] sm:$0xff]  ;;  %v11885_v2 = vadd.f32 %v7071_v34, %v1188_v11  ;;  %v863_v48 = vadd.f32 %v6860_v45, %v778_v20  ;;  %v11917_v49 = vld [vmem:[%s14476_s3 + $0x5d8] sm:$0xff] }
 0x1db   : > { %7613 = vmatprep.subr.mxu0 %v8508_v25  ;;  %7657 = vmatprep.subr.mxu1 %v11841_v58  ;;  %v6986_v32 = vadd.f32 %v15387_v62, %v15386_v51  ;;  %v6945_v57 = vadd.f32 %v15389_v63, %v15388_v56  ;;  %15395 = vst [vmem:[#allocation27_spill] sm:$0xff] %v11902_v21  ;;  %15398 = vst [vmem:[#allocation29_spill] sm:$0xff] %v11911_v15  ;;  %v15400_v60 = vld [vmem:[#allocation19_spill] sm:$0xff]  ;;  %v15401_v29 = vld [vmem:[#allocation30_spill] sm:$0xff] }
 0x1dc   : > { %2424 = vmatprep.mubr.f32.mxu1 %v11816_v26  ;;  %7614 = vmatpush3.msra.mxu0 %v11852_v44  ;;  %v943_v24 = vadd.f32 %v6901_v19, %v858_v54  ;;  %15392 = vst [vmem:[#allocation26_spill] sm:$0xff] %v11885_v2  ;;  %15399 = vst [vmem:[#allocation39_spill] sm:$0xff] %v11917_v49  ;;  %v6948_v53 = vadd.f32 %v15401_v29, %v15400_v60  ;;  %v15402_v54 = vld [vmem:[#allocation31_spill] sm:$0xff]  ;;  %v15403_v25 = vld [vmem:[#allocation24_spill] sm:$0xff] }
 0x1dd   : > { %7658 = vmatpush3.msra.mxu1 %v11858_v3  ;;  %3613 = vrot.lane.b32.xlu1 %v262_v5, %s8913_s29  ;;  %v1108_v33 = vadd.f32 %v6986_v32, %v1023_v0  ;;  %v7074_v5 = vadd.f32 %v15403_v25, %v15402_v54  ;;  %v11935_v19 = vld [vmem:[%s14476_s3 + $0x458] sm:$0xff]  ;;  %v11939_v11 = vld [vmem:[%s9084_s17 + $0x3a8] sm:$0xff]  ;;  %v948_v62 = vadd.f32 %v6904_v4, %v863_v48  ;;  %v11959_v32 = vld [vmem:[%s14476_s3 + $0x4d0] sm:$0xff] }
 0x1de   : > { %2425 = vmatmul.mubr.f32.gmra.mxu1 %v11832_v18  ;;  %7615 = vmatprep.subr.mxu0 %v11876_v55  ;;  %v1028_v46 = vadd.f32 %v6945_v57, %v943_v24  ;;  %15404 = vst [vmem:[#allocation32_spill] sm:$0xff] %v11935_v19  ;;  %v11944_v34 = vld [vmem:[%s14476_s3 + $0x558] sm:$0xff]  ;;  %15407 = vst [vmem:[#allocation33_spill] sm:$0xff] %v11959_v32  ;;  %v11963_v56 = vld [vmem:[%s9084_s17 + $0x3a0] sm:$0xff]  ;;  %v7036_v60 = vadd.f32 %v11740_v50, %v11720_v37 }
 0x1df   : > { %7659 = vmatprep.subr.mxu1 %v11882_v59  ;;  %2344 = vmatprep.mubr.f32.mxu0 %v11862_v47  ;;  %v1193_v10 = vadd.f32 %v7030_v43, %v1108_v33  ;;  %15405 = vst [vmem:[#allocation42_spill] sm:$0xff] %v11944_v34  ;;  %v15406_v42 = vld [vmem:[#allocation34_spill] sm:$0xff]  ;;  %15408 = vst [vmem:[#allocation35_spill] sm:$0xff] %v11963_v56  ;;  %v1033_v20 = vadd.f32 %v6948_v53, %v948_v62  ;;  %v11982_v48 = vld [vmem:[%s14476_s3 + $0x450] sm:$0xff] }
 0x1e0   : > { %7616 = vmatpush3.msra.mxu0 %v11891_v7  ;;  %7660 = vmatpush3.msra.mxu1 %v11902_v21  ;;  %v7033_v45 = vadd.f32 %v11708_v27, %v15406_v42  ;;  %v1113_v63 = vadd.f32 %v6989_v61, %v1028_v46  ;;  %v11968_v27 = vld [vmem:[%s14476_s3 + $0x5d0] sm:$0xff]  ;;  %v11973_v57 = vld [vmem:[%s9084_s17 + $0x3b8] sm:$0xff]  ;;  %v6992_v43 = vadd.f32 %v15412_v8, %v15411_v12  ;;  %v11997_v46 = vld [vmem:[%s14476_s3 + $0x4c8] sm:$0xff] }
 0x1e1   : > { %2345 = vmatmul.mubr.f32.gmra.mxu0 %v11869_v30  ;;  %7617 = vmatprep.subr.mxu0 %v11911_v15  ;;  %v11923_v6 = vpop.f32.mrf.mxu0  ;;  %15409 = vst [vmem:[#allocation36_spill] sm:$0xff] %v11968_v27  ;;  %15410 = vst [vmem:[#allocation45_spill] sm:$0xff] %v11973_v57  ;;  %v11977_v24 = vadd.f32 %v7074_v5, %v1193_v10  ;;  %v11988_v28 = vld [vmem:[%s14476_s3 + $0x550] sm:$0xff]  ;;  %v259_v17 = vld [vmem:[%s14475_s2] sm:$0xff] }
 0x1e2   : > { %7661 = vmatprep.subr.mxu1 %v11917_v49  ;;  %v11925_v35 = vpop.f32.mrf.mxu1  ;;  %2429 = vmatprep.mubr.f32.mxu1 %v11895_v36  ;;  %15414 = vst [vmem:[#allocation38_spill] sm:$0xff] %v11982_v48  ;;  %15415 = vst [vmem:[#allocation40_spill] sm:$0xff] %v11988_v28  ;;  %v1198_v40 = vadd.f32 %v7033_v45, %v1113_v63  ;;  %v15416_v4 = vld [vmem:[#allocation25_spill] sm:$0xff]  ;;  %v12022_v53 = vld [vmem:[%s14476_s3 + $0x448] sm:$0xff]  ;;  %v1118_v25 = vadd.f32 %v6992_v43, %v1033_v20 }
 0x1e3   : > { %7618 = vmatpush3.msra.mxu0 %v11935_v19  ;;  %7662 = vmatpush3.msra.mxu1 %v11944_v34  ;;  %v11951_v0 = vpop.f32.mrf.mxu0  ;;  %15413 = vst [vmem:[#allocation37_spill] sm:$0xff] %v11977_v24  ;;  %v7077_v33 = vadd.f32 %v11710_v9, %v15416_v4  ;;  %15417 = vst [vmem:[#allocation49_spill] sm:$0xff] %v11997_v46  ;;  %v12010_v9 = vld [vmem:[%s14476_s3 + $0x5c8] sm:$0xff]  ;;  %v12017_v29 = vld [vmem:[%s9084_s17 + $0x3b0] sm:$0xff]  ;;  %v7080_v63 = vadd.f32 %v11742_v14, %v11722_v38 }
 0x1e4   : > { %3528 = vrot.lane.b32.xlu1 %v11885_v2, %s8914_s28  ;;  %v11953_v51 = vpop.f32.mrf.mxu1  ;;  %2430 = vmatmul.mubr.f32.gmra.mxu1 %v11921_v23  ;;  %15418 = vst [vmem:[#allocation41_spill] sm:$0xff] %v12010_v9  ;;  %15419 = vst [vmem:[#allocation51_spill] sm:$0xff] %v12017_v29  ;;  %v12028_v10 = vld [vmem:[%s14476_s3 + $0x548] sm:$0xff]  ;;  %v12042_v50 = vld [vmem:[%s14476_s3 + $0x4c0] sm:$0xff]  ;;  %v1203_v42 = vadd.f32 %v7036_v60, %v1118_v25 }
 0x1e5   : > { %7619 = vmatprep.subr.mxu0 %v11959_v32  ;;  %7663 = vmatprep.subr.mxu1 %v11968_v27  ;;  %15420 = vst [vmem:[#allocation43_spill] sm:$0xff] %v12022_v53  ;;  %15421 = vst [vmem:[#allocation44_spill] sm:$0xff] %v12028_v10  ;;  %v12036_v37 = vadd.f32 %v7077_v33, %v1198_v40  ;;  %v12050_v45 = vld [vmem:[%s14476_s3 + $0x5c0] sm:$0xff]  ;;  %v12070_v12 = vld [vmem:[%s14476_s3 + $0x4b8] sm:$0xff] }
 0x1e6   : > { %2349 = vmatprep.mubr.f32.mxu0 %v11939_v11  ;;  %7620 = vmatpush3.msra.mxu0 %v11982_v48  ;;  %15423 = vst [vmem:[#allocation46_spill] sm:$0xff] %v12042_v50  ;;  %15424 = vst [vmem:[#allocation47_spill] sm:$0xff] %v12050_v45  ;;  %v12056_v62 = vld [vmem:[%s14476_s3 + $0x440] sm:$0xff]  ;;  %v260_v8 = vld [vmem:[%s14475_s2 + $0x8] sm:$0xff] }
 0x1e7   : > { %7664 = vmatpush3.msra.mxu1 %v11988_v28  ;;  %2350 = vmatmul.mubr.f32.gmra.mxu0 %v11963_v56  ;;  %v12003_v52 = vpop.f32.mrf.mxu0  ;;  %15422 = vst [vmem:[#allocation54_spill] sm:$0xff] %v12036_v37  ;;  %15425 = vst [vmem:[#allocation48_spill] sm:$0xff] %v12056_v62  ;;  %v12064_v20 = vld [vmem:[%s14476_s3 + $0x540] sm:$0xff]  ;;  %v12081_v38 = vld [vmem:[%s14476_s3 + $0x5b8] sm:$0xff] }
 0x1e8   : > { %7621 = vmatprep.subr.mxu0 %v11997_v46  ;;  %v12005_v61 = vpop.f32.mrf.mxu1  ;;  %7665 = vmatprep.subr.mxu1 %v12010_v9  ;;  %15426 = vst [vmem:[#allocation57_spill] sm:$0xff] %v12064_v20  ;;  %15427 = vst [vmem:[#allocation50_spill] sm:$0xff] %v12070_v12  ;;  %v12087_v14 = vld [vmem:[%s14476_s3 + $0x438] sm:$0xff]  ;;  %v12108_v60 = vld [vmem:[%s14476_s3 + $0x4b0] sm:$0xff] }
 0x1e9   : > { %2434 = vmatprep.mubr.f32.mxu1 %v11973_v57  ;;  %7622 = vmatpush3.msra.mxu0 %v12022_v53  ;;  %v12031_v54 = vpop.f32.mrf.mxu0  ;;  %15428 = vst [vmem:[#allocation52_spill] sm:$0xff] %v12081_v38  ;;  %15429 = vst [vmem:[#allocation61_spill] sm:$0xff] %v12087_v14  ;;  %v12093_v40 = vld [vmem:[%s14476_s3 + $0x538] sm:$0xff]  ;;  %v12114_v25 = vld [vmem:[%s14476_s3 + $0x5b0] sm:$0xff] }
 0x1ea   : > { %7666 = vmatpush3.msra.mxu1 %v12028_v10  ;;  %3530 = vrot.lane.b32.xlu1 %v11977_v24, %s8914_s28  ;;  %v12045_v5 = vpop.f32.mrf.mxu1  ;;  %15430 = vst [vmem:[#allocation53_spill] sm:$0xff] %v12093_v40  ;;  %15432 = vst [vmem:[#allocation55_spill] sm:$0xff] %v12108_v60  ;;  %v12138_v2 = vld [vmem:[%s14476_s3 + $0x5a8] sm:$0xff]  ;;  %v12641_v10 = vld [vmem:[%s14476_s3 + $0x7a0] sm:$0xff] }
 0x1eb   : > { %3607 = vrot.lane.b32.xlu0 %v259_v17, %s8913_s29  ;;  %2435 = vmatmul.mubr.f32.gmra.mxu1 %v12017_v29  ;;  %v12102_v17 = vadd.f32 %v7080_v63, %v1203_v42  ;;  %15433 = vst [vmem:[#allocation56_spill] sm:$0xff] %v12114_v25  ;;  %v12120_v42 = vld [vmem:[%s14476_s3 + $0x430] sm:$0xff]  ;;  %15437 = vst [vmem:[#allocation60_spill] sm:$0xff] %v12138_v2  ;;  %v12144_v24 = vld [vmem:[%s14476_s3 + $0x428] sm:$0xff] }
 0x1ec   : > { %7623 = vmatprep.subr.mxu0 %v12042_v50  ;;  %7667 = vmatprep.subr.mxu1 %v12050_v45  ;;  %15434 = vst [vmem:[#allocation66_spill] sm:$0xff] %v12120_v42  ;;  %v12126_v63 = vld [vmem:[%s14476_s3 + $0x530] sm:$0xff]  ;;  %15438 = vst [vmem:[#allocation69_spill] sm:$0xff] %v12144_v24  ;;  %v12615_v45 = vld [vmem:[%s14476_s3 + $0x7a8] sm:$0xff] }
 0x1ed   : > { %7624 = vmatpush3.msra.mxu0 %v12056_v62  ;;  %7668 = vmatpush3.msra.mxu1 %v12064_v20  ;;  %v12076_v43 = vpop.f32.mrf.mxu0  ;;  %15431 = vst [vmem:[#allocation63_spill] sm:$0xff] %v12102_v17  ;;  %15435 = vst [vmem:[#allocation58_spill] sm:$0xff] %v12126_v63  ;;  %v12510_v20 = vld [vmem:[%s9084_s17 + $0x3d0] sm:$0xff]  ;;  %v12665_v46 = vld [vmem:[%s14476_s3 + $0x798] sm:$0xff] }
 0x1ee   : > { %7625 = vmatprep.subr.mxu0 %v12070_v12  ;;  %7669 = vmatprep.subr.mxu1 %v12081_v38  ;;  %v12098_v4 = vpop.f32.mrf.mxu1  ;;  %v12467_v38 = vld [vmem:[%s9084_s17 + $0x3c0] sm:$0xff]  ;;  %v12491_v12 = vld [vmem:[%s14476_s3 + $0x750] sm:$0xff]  ;;  %15501 = vst [vmem:[#allocation125_spill] sm:$0xff] %v12510_v20  ;;  %15517 = vst [vmem:[#allocation142_spill] sm:$0xff] %v12615_v45 }
 0x1ef   : > { %7626 = vmatpush3.msra.mxu0 %v12087_v14  ;;  %7670 = vmatpush3.msra.mxu1 %v12093_v40  ;;  %v12100_v33 = vpop.f32.mrf.mxu0  ;;  %v12421_v40 = vld [vmem:[%s14476_s3 + $0x760] sm:$0xff]  ;;  %15494 = vst [vmem:[#allocation119_spill] sm:$0xff] %v12467_v38  ;;  %15498 = vst [vmem:[#allocation123_spill] sm:$0xff] %v12491_v12  ;;  %v12589_v62 = vld [vmem:[%s14476_s3 + $0x7b0] sm:$0xff] }
 0x1f0   : > { %3532 = vrot.lane.b32.xlu1 %v12036_v37, %s8914_s28  ;;  %3609 = vrot.lane.b32.xlu0 %v260_v8, %s8913_s29  ;;  %v12132_v8 = vld [vmem:[%s14476_s3 + $0x4a8] sm:$0xff]  ;;  %v12147_v37 = vpop.f32.mrf.mxu1  ;;  %15486 = vst [vmem:[#allocation109_spill] sm:$0xff] %v12421_v40  ;;  %15513 = vst [vmem:[#allocation137_spill] sm:$0xff] %v12589_v62  ;;  %v12861_v29 = vld [vmem:[%s9084_s17 + $0x370] sm:$0xff] }
 0x1f1   : > { %7627 = vmatprep.subr.mxu0 %v12108_v60  ;;  %7671 = vmatprep.subr.mxu1 %v12114_v25  ;;  %15436 = vst [vmem:[#allocation59_spill] sm:$0xff] %v12132_v8  ;;  %v12190_v60 = vld [vmem:[%s14476_s3 + $0x598] sm:$0xff]  ;;  %15521 = vst [vmem:[#allocation150_spill] sm:$0xff] %v12641_v10  ;;  %v8658_v32 = vld [vmem:[%s14476_s3 + $0x40] sm:$0xff] }
 0x1f2   : > { %7628 = vmatpush3.msra.mxu0 %v12120_v42  ;;  %7672 = vmatpush3.msra.mxu1 %v12126_v63  ;;  %15445 = vst [vmem:[#allocation70_spill] sm:$0xff] %v12190_v60  ;;  %15525 = vst [vmem:[#allocation151_spill] sm:$0xff] %v12665_v46 }
 0x1f3   : > { %7629 = vmatprep.subr.mxu0 %v12132_v8  ;;  %7673 = vmatprep.subr.mxu1 %v12138_v2  ;;  %v12152_v8 = vld [vmem:[%s14476_s3 + $0x528] sm:$0xff]  ;;  %v12160_v2 = vld [vmem:[%s14476_s3 + $0x4a0] sm:$0xff]  ;;  %15551 = vst [vmem:[#allocation177_spill] sm:$0xff] %v12861_v29 }
 0x1f4   : > { %7630 = vmatpush3.msra.mxu0 %v12144_v24  ;;  %v7201_v63 = vpop.f32.mrf.mxu0  ;;  %15439 = vst [vmem:[#allocation62_spill] sm:$0xff] %v12152_v8  ;;  %7674 = vmatpush3.msra.mxu1 %v12152_v8  ;;  %15440 = vst [vmem:[#allocation64_spill] sm:$0xff] %v12160_v2  ;;  %v12166_v24 = vld [vmem:[%s14476_s3 + $0x5a0] sm:$0xff] }
 0x1f5   : > { %3534 = vrot.lane.b32.xlu0 %v12102_v17, %s8914_s28  ;;  %7631 = vmatprep.subr.mxu0 %v12160_v2  ;;  %15441 = vst [vmem:[#allocation73_spill] sm:$0xff] %v12166_v24  ;;  %v12172_v17 = vld [vmem:[%s14476_s3 + $0x420] sm:$0xff] }
 0x1f6   : > { %7675 = vmatprep.subr.mxu1 %v12166_v24  ;;  %v7245_v42 = vpop.f32.mrf.mxu1  ;;  %v7202_v25 = vpop.f32.mrf.mxu0  ;;  %15442 = vst [vmem:[#allocation65_spill] sm:$0xff] %v12172_v17  ;;  %7632 = vmatpush3.msra.mxu0 %v12172_v17  ;;  %v12178_v2 = vld [vmem:[%s14476_s3 + $0x520] sm:$0xff]  ;;  %v12184_v24 = vld [vmem:[%s14476_s3 + $0x498] sm:$0xff] }
 0x1f7   : > { %15443 = vst [vmem:[#allocation67_spill] sm:$0xff] %v12178_v2  ;;  %7676 = vmatpush3.msra.mxu1 %v12178_v2  ;;  %v7203_v8 = vadd.f32 %v7202_v25, %v7201_v63  ;;  %15444 = vst [vmem:[#allocation68_spill] sm:$0xff] %v12184_v24  ;;  %7633 = vmatprep.subr.mxu0 %v12184_v24  ;;  %v12196_v2 = vld [vmem:[%s14476_s3 + $0x418] sm:$0xff] }
 0x1f8   : > { %7677 = vmatprep.subr.mxu1 %v12190_v60  ;;  %v7246_v17 = vpop.f32.mrf.mxu1  ;;  %15446 = vst [vmem:[#allocation71_spill] sm:$0xff] %v12196_v2  ;;  %7634 = vmatpush3.msra.mxu0 %v12196_v2  ;;  %v12202_v25 = vld [vmem:[%s14476_s3 + $0x518] sm:$0xff]  ;;  %v12209_v60 = vld [vmem:[%s14476_s3 + $0x490] sm:$0xff] }
 0x1f9   : > { %15447 = vst [vmem:[#allocation72_spill] sm:$0xff] %v12202_v25  ;;  %7678 = vmatpush3.msra.mxu1 %v12202_v25  ;;  %v1592_v63 = vadd.f32 %v7203_v8, %v11771_v1  ;;  %v7247_v24 = vadd.f32 %v7246_v17, %v7245_v42  ;;  %15448 = vst [vmem:[#allocation74_spill] sm:$0xff] %v12209_v60  ;;  %7635 = vmatprep.subr.mxu0 %v12209_v60  ;;  %v12215_v2 = vld [vmem:[%s14476_s3 + $0x590] sm:$0xff]  ;;  %v12235_v8 = vld [vmem:[%s14476_s3 + $0x488] sm:$0xff] }
 0x1fa   : > { %15449 = vst [vmem:[#allocation75_spill] sm:$0xff] %v12215_v2  ;;  %7679 = vmatprep.subr.mxu1 %v12215_v2  ;;  %v12221_v1 = vld [vmem:[%s14476_s3 + $0x410] sm:$0xff]  ;;  %15452 = vst [vmem:[#allocation78_spill] sm:$0xff] %v12235_v8  ;;  %v12245_v2 = vld [vmem:[%s9084_s17 + $0x248] sm:$0xff] }
 0x1fb   : > { %15450 = vst [vmem:[#allocation76_spill] sm:$0xff] %v12221_v1  ;;  %7636 = vmatpush3.msra.mxu0 %v12221_v1  ;;  %v12227_v17 = vld [vmem:[%s14476_s3 + $0x510] sm:$0xff]  ;;  %v12230_v42 = vadd.f32 %v7247_v24, %v1592_v63  ;;  %v12241_v1 = vld [vmem:[%s14476_s3 + $0x588] sm:$0xff]  ;;  %15454 = vst [vmem:[#allocation80_spill] sm:$0xff] %v12245_v2  ;;  %2504 = vmatprep.mubr.f32.mxu0 %v12245_v2 }
 0x1fc   : > { %15451 = vst [vmem:[#allocation77_spill] sm:$0xff] %v12227_v17  ;;  %7680 = vmatpush3.msra.mxu1 %v12227_v17  ;;  %7637 = vmatprep.subr.mxu0 %v12235_v8  ;;  %15453 = vst [vmem:[#allocation79_spill] sm:$0xff] %v12241_v1  ;;  %v12250_v24 = vld [vmem:[%s14476_s3 + $0x408] sm:$0xff]  ;;  %v12260_v8 = vld [vmem:[%s9084_s17 + $0x240] sm:$0xff] }
 0x1fd   : > { %7681 = vmatprep.subr.mxu1 %v12241_v1  ;;  %15455 = vst [vmem:[#allocation81_spill] sm:$0xff] %v12250_v24  ;;  %7638 = vmatpush3.msra.mxu0 %v12250_v24  ;;  %v12256_v63 = vld [vmem:[%s14476_s3 + $0x508] sm:$0xff]  ;;  %15457 = vst [vmem:[#allocation83_spill] sm:$0xff] %v12260_v8  ;;  %v12265_v1 = vld [vmem:[%s14476_s3 + $0x480] sm:$0xff]  ;;  %v12382_v2 = vpop.f32.mrf.mxu1 }
 0x1fe   : > { %15456 = vst [vmem:[#allocation82_spill] sm:$0xff] %v12256_v63  ;;  %7682 = vmatpush3.msra.mxu1 %v12256_v63  ;;  %15458 = vst [vmem:[#allocation84_spill] sm:$0xff] %v12265_v1  ;;  %7639 = vmatprep.subr.mxu0 %v12265_v1  ;;  %v12271_v24 = vld [vmem:[%s14476_s3 + $0x580] sm:$0xff]  ;;  %v12275_v17 = vld [vmem:[%s9084_s17 + $0x258] sm:$0xff] }
 0x1ff   : > { %15459 = vst [vmem:[#allocation85_spill] sm:$0xff] %v12271_v24  ;;  %7683 = vmatprep.subr.mxu1 %v12271_v24  ;;  %15460 = vst [vmem:[#allocation86_spill] sm:$0xff] %v12275_v17  ;;  %v12280_v63 = vld [vmem:[%s14476_s3 + $0x400] sm:$0xff]  ;;  %v12285_v1 = vld [vmem:[%s9084_s17 + $0x250] sm:$0xff]  ;;  %2589 = vmatprep.mubr.f32.mxu1 %v12275_v17 }
 0x200   : > { %15461 = vst [vmem:[#allocation87_spill] sm:$0xff] %v12280_v63  ;;  %7640 = vmatpush3.msra.mxu0 %v12280_v63  ;;  %15462 = vst [vmem:[#allocation88_spill] sm:$0xff] %v12285_v1  ;;  %v12290_v60 = vld [vmem:[%s14476_s3 + $0x500] sm:$0xff]  ;;  %v12298_v63 = vld [vmem:[%s14476_s3 + $0x6f8] sm:$0xff] }
 0x201   : > { %15463 = vst [vmem:[#allocation89_spill] sm:$0xff] %v12290_v60  ;;  %7684 = vmatpush3.msra.mxu1 %v12290_v60  ;;  %2505 = vmatmul.mubr.f32.vlgmr.msra.gmra.mxu0 %v12260_v8  ;;  %15464 = vst [vmem:[#allocation90_spill] sm:$0xff] %v12298_v63  ;;  %v12304_v24 = vld [vmem:[%s14476_s3 + $0x7f8] sm:$0xff]  ;;  %v12309_v60 = vld [vmem:[%s9084_s17 + $0x2c8] sm:$0xff] }
 0x202   : > { %7697 = vmatprep.subr.mxu0 %v12298_v63  ;;  %15465 = vst [vmem:[#allocation91_spill] sm:$0xff] %v12304_v24  ;;  %7741 = vmatprep.subr.mxu1 %v12304_v24  ;;  %15466 = vst [vmem:[#allocation92_spill] sm:$0xff] %v12309_v60  ;;  %v12314_v17 = vld [vmem:[%s14476_s3 + $0x678] sm:$0xff]  ;;  %v12324_v8 = vld [vmem:[%s9084_s17 + $0x2c0] sm:$0xff] }
 0x203   : > { %2590 = vmatmul.mubr.f32.vlgmr.msra.gmra.mxu1 %v12285_v1  ;;  %15467 = vst [vmem:[#allocation93_spill] sm:$0xff] %v12314_v17  ;;  %7698 = vmatpush3.msra.mxu0 %v12314_v17  ;;  %v12320_v63 = vld [vmem:[%s14476_s3 + $0x778] sm:$0xff]  ;;  %15469 = vst [vmem:[#allocation95_spill] sm:$0xff] %v12324_v8  ;;  %v12329_v24 = vld [vmem:[%s14476_s3 + $0x6f0] sm:$0xff] }
 0x204   : > { %15468 = vst [vmem:[#allocation94_spill] sm:$0xff] %v12320_v63  ;;  %7742 = vmatpush3.msra.mxu1 %v12320_v63  ;;  %15470 = vst [vmem:[#allocation96_spill] sm:$0xff] %v12329_v24  ;;  %7699 = vmatprep.subr.mxu0 %v12329_v24  ;;  %v12335_v17 = vld [vmem:[%s14476_s3 + $0x7f0] sm:$0xff]  ;;  %v12346_v1 = vld [vmem:[%s9084_s17 + $0x2d8] sm:$0xff] }
 0x205   : > { %15471 = vst [vmem:[#allocation97_spill] sm:$0xff] %v12335_v17  ;;  %7743 = vmatprep.subr.mxu1 %v12335_v17  ;;  %2509 = vmatprep.mubr.f32.mxu0 %v12309_v60  ;;  %v12342_v63 = vld [vmem:[%s14476_s3 + $0x670] sm:$0xff]  ;;  %15473 = vst [vmem:[#allocation108_spill] sm:$0xff] %v12346_v1  ;;  %v12355_v17 = vpop.f32.mrf.mxu0  ;;  %v12360_v60 = vld [vmem:[%s14476_s3 + $0x6e8] sm:$0xff] }
 0x206   : > { %15472 = vst [vmem:[#allocation98_spill] sm:$0xff] %v12342_v63  ;;  %7700 = vmatpush3.msra.mxu0 %v12342_v63  ;;  %v12351_v24 = vld [vmem:[%s14476_s3 + $0x770] sm:$0xff]  ;;  %15475 = vst [vmem:[#allocation100_spill] sm:$0xff] %v12360_v60  ;;  %v12366_v63 = vld [vmem:[%s14476_s3 + $0x7e8] sm:$0xff]  ;;  %2594 = vmatprep.mubr.f32.mxu1 %v12346_v1 }
 0x207   : > { %15474 = vst [vmem:[#allocation99_spill] sm:$0xff] %v12351_v24  ;;  %7744 = vmatpush3.msra.mxu1 %v12351_v24  ;;  %2510 = vmatmul.mubr.f32.gmra.mxu0 %v12324_v8  ;;  %15476 = vst [vmem:[#allocation110_spill] sm:$0xff] %v12366_v63  ;;  %v12370_v24 = vld [vmem:[%s9084_s17 + $0x2d0] sm:$0xff]  ;;  %v12376_v8 = vld [vmem:[%s14476_s3 + $0x668] sm:$0xff] }
 0x208   : > { %7701 = vmatprep.subr.mxu0 %v12360_v60  ;;  %7745 = vmatprep.subr.mxu1 %v12366_v63  ;;  %15477 = vst [vmem:[#allocation101_spill] sm:$0xff] %v12370_v24  ;;  %15478 = vst [vmem:[#allocation102_spill] sm:$0xff] %v12376_v8  ;;  %v12380_v60 = vld [vmem:[%s9084_s17 + $0x348] sm:$0xff]  ;;  %v12393_v1 = vld [vmem:[%s14476_s3 + $0x6e0] sm:$0xff] }
 0x209   : > { %7702 = vmatpush3.msra.mxu0 %v12376_v8  ;;  %15479 = vst [vmem:[#allocation111_spill] sm:$0xff] %v12380_v60  ;;  %v12387_v63 = vld [vmem:[%s14476_s3 + $0x768] sm:$0xff]  ;;  %15481 = vst [vmem:[#allocation104_spill] sm:$0xff] %v12393_v1  ;;  %v12397_v25 = vld [vmem:[%s9084_s17 + $0x340] sm:$0xff]  ;;  %2595 = vmatmul.mubr.f32.gmra.mxu1 %v12370_v24 }
 0x20a   : > { %15480 = vst [vmem:[#allocation103_spill] sm:$0xff] %v12387_v63  ;;  %7746 = vmatpush3.msra.mxu1 %v12387_v63  ;;  %7703 = vmatprep.subr.mxu0 %v12393_v1  ;;  %15482 = vst [vmem:[#allocation112_spill] sm:$0xff] %v12397_v25  ;;  %v12403_v8 = vld [vmem:[%s14476_s3 + $0x7e0] sm:$0xff]  ;;  %v12406_v63 = vpop.f32.mrf.mxu0  ;;  %v12416_v24 = vld [vmem:[%s9084_s17 + $0x358] sm:$0xff] }
 0x20b   : > { %15483 = vst [vmem:[#allocation105_spill] sm:$0xff] %v12403_v8  ;;  %7747 = vmatprep.subr.mxu1 %v12403_v8  ;;  %2514 = vmatprep.mubr.f32.mxu0 %v12380_v60  ;;  %v12412_v1 = vld [vmem:[%s14476_s3 + $0x660] sm:$0xff]  ;;  %15485 = vst [vmem:[#allocation107_spill] sm:$0xff] %v12416_v24  ;;  %v12425_v8 = vpop.f32.mrf.mxu1  ;;  %v12430_v60 = vld [vmem:[%s14476_s3 + $0x6d8] sm:$0xff] }
 0x20c   : > { %15484 = vst [vmem:[#allocation106_spill] sm:$0xff] %v12412_v1  ;;  %7704 = vmatpush3.msra.mxu0 %v12412_v1  ;;  %7748 = vmatpush3.msra.mxu1 %v12421_v40  ;;  %15487 = vst [vmem:[#allocation115_spill] sm:$0xff] %v12430_v60  ;;  %v12436_v1 = vld [vmem:[%s14476_s3 + $0x7d8] sm:$0xff]  ;;  %v12440_v40 = vld [vmem:[%s9084_s17 + $0x350] sm:$0xff]  ;;  %v12452_v14 = vpop.f32.mrf.mxu0 }
 0x20d   : > { %2515 = vmatmul.mubr.f32.gmra.mxu0 %v12397_v25  ;;  %7705 = vmatprep.subr.mxu0 %v12430_v60  ;;  %15488 = vst [vmem:[#allocation113_spill] sm:$0xff] %v12436_v1  ;;  %15489 = vst [vmem:[#allocation118_spill] sm:$0xff] %v12440_v40  ;;  %v12446_v25 = vld [vmem:[%s14476_s3 + $0x658] sm:$0xff]  ;;  %v12450_v60 = vld [vmem:[%s9084_s17 + $0x3c8] sm:$0xff] }
 0x20e   : > { %7749 = vmatprep.subr.mxu1 %v12436_v1  ;;  %2599 = vmatprep.mubr.f32.mxu1 %v12416_v24  ;;  %15490 = vst [vmem:[#allocation114_spill] sm:$0xff] %v12446_v25  ;;  %15491 = vst [vmem:[#allocation116_spill] sm:$0xff] %v12450_v60  ;;  %v12457_v1 = vld [vmem:[%s14476_s3 + $0x758] sm:$0xff]  ;;  %v12463_v24 = vld [vmem:[%s14476_s3 + $0x6d0] sm:$0xff] }
 0x20f   : > { %7706 = vmatpush3.msra.mxu0 %v12446_v25  ;;  %15492 = vst [vmem:[#allocation117_spill] sm:$0xff] %v12457_v1  ;;  %7750 = vmatpush3.msra.mxu1 %v12457_v1  ;;  %15493 = vst [vmem:[#allocation122_spill] sm:$0xff] %v12463_v24  ;;  %v12473_v25 = vld [vmem:[%s14476_s3 + $0x7d0] sm:$0xff]  ;;  %v12476_v1 = vpop.f32.mrf.mxu1 }
 0x210   : > { %7707 = vmatprep.subr.mxu0 %v12463_v24  ;;  %2600 = vmatmul.mubr.f32.gmra.mxu1 %v12440_v40  ;;  %15495 = vst [vmem:[#allocation120_spill] sm:$0xff] %v12473_v25  ;;  %v12482_v24 = vld [vmem:[%s14476_s3 + $0x650] sm:$0xff]  ;;  %v12486_v40 = vld [vmem:[%s9084_s17 + $0x3d8] sm:$0xff] }
 0x211   : > { %7751 = vmatprep.subr.mxu1 %v12473_v25  ;;  %2519 = vmatprep.mubr.f32.mxu0 %v12450_v60  ;;  %15496 = vst [vmem:[#allocation121_spill] sm:$0xff] %v12482_v24  ;;  %15497 = vst [vmem:[#allocation126_spill] sm:$0xff] %v12486_v40  ;;  %v12495_v25 = vpop.f32.mrf.mxu0  ;;  %v12500_v60 = vld [vmem:[%s14476_s3 + $0x6c8] sm:$0xff] }
 0x212   : > { %7708 = vmatpush3.msra.mxu0 %v12482_v24  ;;  %7752 = vmatpush3.msra.mxu1 %v12491_v12  ;;  %15499 = vst [vmem:[#allocation128_spill] sm:$0xff] %v12500_v60  ;;  %v12506_v24 = vld [vmem:[%s14476_s3 + $0x7c8] sm:$0xff] }
 0x213   : > { %2520 = vmatmul.mubr.f32.gmra.mxu0 %v12467_v38  ;;  %7709 = vmatprep.subr.mxu0 %v12500_v60  ;;  %15500 = vst [vmem:[#allocation124_spill] sm:$0xff] %v12506_v24  ;;  %v12516_v12 = vld [vmem:[%s14476_s3 + $0x648] sm:$0xff]  ;;  %v12519_v38 = vpop.f32.mrf.mxu1 }
 0x214   : > { %7753 = vmatprep.subr.mxu1 %v12506_v24  ;;  %2604 = vmatprep.mubr.f32.mxu1 %v12486_v40  ;;  %15502 = vst [vmem:[#allocation131_spill] sm:$0xff] %v12516_v12  ;;  %v12524_v60 = vld [vmem:[%s14476_s3 + $0x748] sm:$0xff]  ;;  %v12530_v24 = vld [vmem:[%s14476_s3 + $0x6c0] sm:$0xff]  ;;  %v12540_v40 = vpop.f32.mrf.mxu0 }
 0x215   : > { %7710 = vmatpush3.msra.mxu0 %v12516_v12  ;;  %15503 = vst [vmem:[#allocation127_spill] sm:$0xff] %v12524_v60  ;;  %7754 = vmatpush3.msra.mxu1 %v12524_v60  ;;  %15504 = vst [vmem:[#allocation129_spill] sm:$0xff] %v12530_v24  ;;  %v12537_v12 = vld [vmem:[%s14476_s3 + $0x7c0] sm:$0xff] }
 0x216   : > { %7711 = vmatprep.subr.mxu0 %v12530_v24  ;;  %2605 = vmatmul.mubr.f32.gmra.mxu1 %v12510_v20  ;;  %15505 = vst [vmem:[#allocation130_spill] sm:$0xff] %v12537_v12  ;;  %v12545_v60 = vld [vmem:[%s14476_s3 + $0x640] sm:$0xff]  ;;  %v12563_v20 = vld [vmem:[%s14476_s3 + $0x7b8] sm:$0xff] }
 0x217   : > { %7755 = vmatprep.subr.mxu1 %v12537_v12  ;;  %15506 = vst [vmem:[#allocation134_spill] sm:$0xff] %v12545_v60  ;;  %7712 = vmatpush3.msra.mxu0 %v12545_v60  ;;  %v12551_v24 = vld [vmem:[%s14476_s3 + $0x740] sm:$0xff]  ;;  %v12557_v12 = vld [vmem:[%s14476_s3 + $0x6b8] sm:$0xff]  ;;  %15509 = vst [vmem:[#allocation138_spill] sm:$0xff] %v12563_v20  ;;  %v12566_v60 = vpop.f32.mrf.mxu1 }
 0x218   : > { %15507 = vst [vmem:[#allocation132_spill] sm:$0xff] %v12551_v24  ;;  %7756 = vmatpush3.msra.mxu1 %v12551_v24  ;;  %15508 = vst [vmem:[#allocation133_spill] sm:$0xff] %v12557_v12  ;;  %7713 = vmatprep.subr.mxu0 %v12557_v12  ;;  %v12571_v24 = vld [vmem:[%s14476_s3 + $0x638] sm:$0xff] }
 0x219   : > { %7757 = vmatprep.subr.mxu1 %v12563_v20  ;;  %15510 = vst [vmem:[#allocation135_spill] sm:$0xff] %v12571_v24  ;;  %7714 = vmatpush3.msra.mxu0 %v12571_v24  ;;  %v12577_v12 = vld [vmem:[%s14476_s3 + $0x738] sm:$0xff]  ;;  %v12583_v20 = vld [vmem:[%s14476_s3 + $0x6b0] sm:$0xff]  ;;  %v12592_v24 = vpop.f32.mrf.mxu0 }
 0x21a   : > { %15511 = vst [vmem:[#allocation140_spill] sm:$0xff] %v12577_v12  ;;  %7758 = vmatpush3.msra.mxu1 %v12577_v12  ;;  %15512 = vst [vmem:[#allocation136_spill] sm:$0xff] %v12583_v20  ;;  %7715 = vmatprep.subr.mxu0 %v12583_v20  ;;  %v12597_v12 = vld [vmem:[%s14476_s3 + $0x630] sm:$0xff] }
 0x21b   : > { %7759 = vmatprep.subr.mxu1 %v12589_v62  ;;  %15514 = vst [vmem:[#allocation143_spill] sm:$0xff] %v12597_v12  ;;  %7716 = vmatpush3.msra.mxu0 %v12597_v12  ;;  %v12603_v20 = vld [vmem:[%s14476_s3 + $0x730] sm:$0xff]  ;;  %v12609_v62 = vld [vmem:[%s14476_s3 + $0x6a8] sm:$0xff]  ;;  %v12618_v12 = vpop.f32.mrf.mxu1 }
 0x21c   : > { %15515 = vst [vmem:[#allocation139_spill] sm:$0xff] %v12603_v20  ;;  %7760 = vmatpush3.msra.mxu1 %v12603_v20  ;;  %15516 = vst [vmem:[#allocation141_spill] sm:$0xff] %v12609_v62  ;;  %7717 = vmatprep.subr.mxu0 %v12609_v62  ;;  %v7289_v50 = vpop.f32.mrf.mxu0  ;;  %v12623_v20 = vld [vmem:[%s14476_s3 + $0x628] sm:$0xff] }
 0x21d   : > { %7761 = vmatprep.subr.mxu1 %v12615_v45  ;;  %15518 = vst [vmem:[#allocation146_spill] sm:$0xff] %v12623_v20  ;;  %7718 = vmatpush3.msra.mxu0 %v12623_v20  ;;  %v12629_v62 = vld [vmem:[%s14476_s3 + $0x728] sm:$0xff]  ;;  %v12635_v45 = vld [vmem:[%s14476_s3 + $0x6a0] sm:$0xff] }
 0x21e   : > { %15519 = vst [vmem:[#allocation144_spill] sm:$0xff] %v12629_v62  ;;  %7762 = vmatpush3.msra.mxu1 %v12629_v62  ;;  %15520 = vst [vmem:[#allocation145_spill] sm:$0xff] %v12635_v45  ;;  %7719 = vmatprep.subr.mxu0 %v12635_v45  ;;  %v7333_v20 = vpop.f32.mrf.mxu1  ;;  %v7290_v53 = vpop.f32.mrf.mxu0  ;;  %v12647_v62 = vld [vmem:[%s14476_s3 + $0x620] sm:$0xff] }
 0x21f   : > { %7763 = vmatprep.subr.mxu1 %v12641_v10  ;;  %15522 = vst [vmem:[#allocation147_spill] sm:$0xff] %v12647_v62  ;;  %7720 = vmatpush3.msra.mxu0 %v12647_v62  ;;  %v12653_v45 = vld [vmem:[%s14476_s3 + $0x720] sm:$0xff]  ;;  %v7291_v9 = vadd.f32 %v7290_v53, %v7289_v50  ;;  %v12659_v10 = vld [vmem:[%s14476_s3 + $0x698] sm:$0xff] }
 0x220   : > { %15523 = vst [vmem:[#allocation148_spill] sm:$0xff] %v12653_v45  ;;  %7764 = vmatpush3.msra.mxu1 %v12653_v45  ;;  %15524 = vst [vmem:[#allocation149_spill] sm:$0xff] %v12659_v10  ;;  %7721 = vmatprep.subr.mxu0 %v12659_v10  ;;  %v7334_v62 = vpop.f32.mrf.mxu1  ;;  %v12671_v45 = vld [vmem:[%s14476_s3 + $0x618] sm:$0xff] }
 0x221   : > { %7765 = vmatprep.subr.mxu1 %v12665_v46  ;;  %15526 = vst [vmem:[#allocation152_spill] sm:$0xff] %v12671_v45  ;;  %7722 = vmatpush3.msra.mxu0 %v12671_v45  ;;  %v12677_v53 = vld [vmem:[%s14476_s3 + $0x718] sm:$0xff]  ;;  %v1762_v50 = vadd.f32 %v7291_v9, %v12230_v42  ;;  %v7335_v10 = vadd.f32 %v7334_v62, %v7333_v20  ;;  %v12684_v46 = vld [vmem:[%s14476_s3 + $0x690] sm:$0xff]  ;;  %v12710_v42 = vld [vmem:[%s14476_s3 + $0x688] sm:$0xff] }
 0x222   : > { %15527 = vst [vmem:[#allocation153_spill] sm:$0xff] %v12677_v53  ;;  %7766 = vmatpush3.msra.mxu1 %v12677_v53  ;;  %15528 = vst [vmem:[#allocation154_spill] sm:$0xff] %v12684_v46  ;;  %7723 = vmatprep.subr.mxu0 %v12684_v46  ;;  %v12690_v45 = vld [vmem:[%s14476_s3 + $0x790] sm:$0xff]  ;;  %v12765_v46 = vld [vmem:[%s14476_s3 + $0x700] sm:$0xff] }
 0x223   : > { %15529 = vst [vmem:[#allocation155_spill] sm:$0xff] %v12690_v45  ;;  %7767 = vmatprep.subr.mxu1 %v12690_v45  ;;  %v12696_v9 = vld [vmem:[%s14476_s3 + $0x610] sm:$0xff]  ;;  %v12705_v20 = vadd.f32 %v7335_v10, %v1762_v50  ;;  %15532 = vst [vmem:[#allocation158_spill] sm:$0xff] %v12710_v42  ;;  %v12720_v45 = vld [vmem:[%s9084_s17 + $0x268] sm:$0xff] }
 0x224   : > { %15530 = vst [vmem:[#allocation156_spill] sm:$0xff] %v12696_v9  ;;  %7724 = vmatpush3.msra.mxu0 %v12696_v9  ;;  %v12702_v62 = vld [vmem:[%s14476_s3 + $0x710] sm:$0xff]  ;;  %v12716_v9 = vld [vmem:[%s14476_s3 + $0x788] sm:$0xff]  ;;  %15534 = vst [vmem:[#allocation160_spill] sm:$0xff] %v12720_v45  ;;  %2674 = vmatprep.mubr.f32.mxu0 %v12720_v45 }
 0x225   : > { %15531 = vst [vmem:[#allocation157_spill] sm:$0xff] %v12702_v62  ;;  %7768 = vmatpush3.msra.mxu1 %v12702_v62  ;;  %7725 = vmatprep.subr.mxu0 %v12710_v42  ;;  %15533 = vst [vmem:[#allocation159_spill] sm:$0xff] %v12716_v9  ;;  %v12725_v10 = vld [vmem:[%s14476_s3 + $0x608] sm:$0xff]  ;;  %v12735_v42 = vld [vmem:[%s9084_s17 + $0x260] sm:$0xff]  ;;  %v12824_v53 = vpop.f32.mrf.mxu1 }
 0x226   : > { %7769 = vmatprep.subr.mxu1 %v12716_v9  ;;  %15535 = vst [vmem:[#allocation161_spill] sm:$0xff] %v12725_v10  ;;  %7726 = vmatpush3.msra.mxu0 %v12725_v10  ;;  %v12731_v50 = vld [vmem:[%s14476_s3 + $0x708] sm:$0xff]  ;;  %15537 = vst [vmem:[#allocation163_spill] sm:$0xff] %v12735_v42  ;;  %v12740_v9 = vld [vmem:[%s14476_s3 + $0x680] sm:$0xff] }
 0x227   : > { %15536 = vst [vmem:[#allocation162_spill] sm:$0xff] %v12731_v50  ;;  %7770 = vmatpush3.msra.mxu1 %v12731_v50  ;;  %15538 = vst [vmem:[#allocation164_spill] sm:$0xff] %v12740_v9  ;;  %7727 = vmatprep.subr.mxu0 %v12740_v9  ;;  %v12746_v10 = vld [vmem:[%s14476_s3 + $0x780] sm:$0xff]  ;;  %v12750_v62 = vld [vmem:[%s9084_s17 + $0x278] sm:$0xff] }
 0x228   : > { %15539 = vst [vmem:[#allocation165_spill] sm:$0xff] %v12746_v10  ;;  %7771 = vmatprep.subr.mxu1 %v12746_v10  ;;  %15540 = vst [vmem:[#allocation166_spill] sm:$0xff] %v12750_v62  ;;  %v12755_v50 = vld [vmem:[%s14476_s3 + $0x600] sm:$0xff]  ;;  %v12760_v9 = vld [vmem:[%s9084_s17 + $0x270] sm:$0xff]  ;;  %2759 = vmatprep.mubr.f32.mxu1 %v12750_v62 }
 0x229   : > { %15541 = vst [vmem:[#allocation167_spill] sm:$0xff] %v12755_v50  ;;  %7728 = vmatpush3.msra.mxu0 %v12755_v50  ;;  %15542 = vst [vmem:[#allocation168_spill] sm:$0xff] %v12760_v9  ;;  %7772 = vmatpush3.msra.mxu1 %v12765_v46  ;;  %v8628_v50 = vld [vmem:[%s14476_s3 + $0xf8] sm:$0xff]  ;;  %v12778_v45 = vld [vmem:[%s9084_s17 + $0x2e8] sm:$0xff] }
 0x22a   : > { %15543 = vst [vmem:[#allocation169_spill] sm:$0xff] %v12765_v46  ;;  %2675 = vmatmul.mubr.f32.vlgmr.msra.gmra.mxu0 %v12735_v42  ;;  %7785 = vmatprep.subr.mxu0 %v8628_v50  ;;  %v8629_v10 = vld [vmem:[%s14476_s3 + $0x1f8] sm:$0xff]  ;;  %15544 = vst [vmem:[#allocation170_spill] sm:$0xff] %v12778_v45  ;;  %v12787_v50 = vld [vmem:[%s9084_s17 + $0x2e0] sm:$0xff] }
 0x22b   : > { %7829 = vmatprep.subr.mxu1 %v8629_v10  ;;  %2760 = vmatmul.mubr.f32.vlgmr.msra.gmra.mxu1 %v12760_v9  ;;  %v8630_v46 = vld [vmem:[%s14476_s3 + $0x78] sm:$0xff]  ;;  %15545 = vst [vmem:[#allocation171_spill] sm:$0xff] %v12787_v50  ;;  %v8632_v10 = vld [vmem:[%s14476_s3 + $0xf0] sm:$0xff] }
 0x22c   : > { %7786 = vmatpush3.msra.mxu0 %v8630_v46  ;;  %v8631_v62 = vld [vmem:[%s14476_s3 + $0x178] sm:$0xff]  ;;  %v8633_v9 = vld [vmem:[%s14476_s3 + $0x1f0] sm:$0xff]  ;;  %2679 = vmatprep.mubr.f32.mxu0 %v12778_v45 }
 0x22d   : > { %7830 = vmatpush3.msra.mxu1 %v8631_v62  ;;  %7787 = vmatprep.subr.mxu0 %v8632_v10  ;;  %v8634_v46 = vld [vmem:[%s14476_s3 + $0x70] sm:$0xff]  ;;  %v12800_v62 = vld [vmem:[%s9084_s17 + $0x2f8] sm:$0xff]  ;;  %v12806_v10 = vpop.f32.mrf.mxu0 }
 0x22e   : > { %7831 = vmatprep.subr.mxu1 %v8633_v9  ;;  %7788 = vmatpush3.msra.mxu0 %v8634_v46  ;;  %15546 = vst [vmem:[#allocation172_spill] sm:$0xff] %v12800_v62  ;;  %v8635_v42 = vld [vmem:[%s14476_s3 + $0x170] sm:$0xff]  ;;  %v8636_v9 = vld [vmem:[%s14476_s3 + $0xe8] sm:$0xff] }
 0x22f   : > { %7832 = vmatpush3.msra.mxu1 %v8635_v42  ;;  %2680 = vmatmul.mubr.f32.gmra.mxu0 %v12787_v50  ;;  %v8637_v46 = vld [vmem:[%s14476_s3 + $0x1e8] sm:$0xff]  ;;  %v12815_v45 = vld [vmem:[%s9084_s17 + $0x2f0] sm:$0xff]  ;;  %v12839_v28 = vpop.f32.mrf.mxu0 }
 0x230   : > { %7789 = vmatprep.subr.mxu0 %v8636_v9  ;;  %7833 = vmatprep.subr.mxu1 %v8637_v46  ;;  %15547 = vst [vmem:[#allocation173_spill] sm:$0xff] %v12815_v45  ;;  %v8638_v42 = vld [vmem:[%s14476_s3 + $0x68] sm:$0xff]  ;;  %v8640_v46 = vld [vmem:[%s14476_s3 + $0xe0] sm:$0xff] }
 0x231   : > { %2764 = vmatprep.mubr.f32.mxu1 %v12800_v62  ;;  %7790 = vmatpush3.msra.mxu0 %v8638_v42  ;;  %v12822_v50 = vld [vmem:[%s9084_s17 + $0x368] sm:$0xff]  ;;  %v12833_v62 = vld [vmem:[%s9084_s17 + $0x360] sm:$0xff]  ;;  %v12870_v48 = vpop.f32.mrf.mxu0 }
 0x232   : > { %15548 = vst [vmem:[#allocation174_spill] sm:$0xff] %v12822_v50  ;;  %v8639_v9 = vld [vmem:[%s14476_s3 + $0x168] sm:$0xff]  ;;  %7791 = vmatprep.subr.mxu0 %v8640_v46  ;;  %15549 = vst [vmem:[#allocation175_spill] sm:$0xff] %v12833_v62  ;;  %2765 = vmatmul.mubr.f32.gmra.mxu1 %v12815_v45  ;;  %v8641_v42 = vld [vmem:[%s14476_s3 + $0x1e0] sm:$0xff] }
 0x233   : > { %7834 = vmatpush3.msra.mxu1 %v8639_v9  ;;  %2684 = vmatprep.mubr.f32.mxu0 %v12822_v50  ;;  %v8642_v9 = vld [vmem:[%s14476_s3 + $0x60] sm:$0xff]  ;;  %v12846_v46 = vld [vmem:[%s9084_s17 + $0x378] sm:$0xff]  ;;  %v12898_v57 = vpop.f32.mrf.mxu0 }
 0x234   : > { %7835 = vmatprep.subr.mxu1 %v8641_v42  ;;  %7792 = vmatpush3.msra.mxu0 %v8642_v9  ;;  %15550 = vst [vmem:[#allocation176_spill] sm:$0xff] %v12846_v46  ;;  %v8643_v45 = vld [vmem:[%s14476_s3 + $0x160] sm:$0xff]  ;;  %v12852_v42 = vpop.f32.mrf.mxu1  ;;  %v8644_v50 = vld [vmem:[%s14476_s3 + $0xd8] sm:$0xff] }
 0x235   : > { %7836 = vmatpush3.msra.mxu1 %v8643_v45  ;;  %2685 = vmatmul.mubr.f32.gmra.mxu0 %v12833_v62  ;;  %v8645_v9 = vld [vmem:[%s14476_s3 + $0x1d8] sm:$0xff]  ;;  %v12868_v62 = vld [vmem:[%s9084_s17 + $0x3e8] sm:$0xff] }
 0x236   : > { %7793 = vmatprep.subr.mxu0 %v8644_v50  ;;  %7837 = vmatprep.subr.mxu1 %v8645_v9  ;;  %v8646_v45 = vld [vmem:[%s14476_s3 + $0x58] sm:$0xff]  ;;  %15552 = vst [vmem:[#allocation178_spill] sm:$0xff] %v12868_v62  ;;  %v8648_v9 = vld [vmem:[%s14476_s3 + $0xd0] sm:$0xff]  ;;  %v12885_v27 = vpop.f32.mrf.mxu1 }
 0x237   : > { %2769 = vmatprep.mubr.f32.mxu1 %v12846_v46  ;;  %7794 = vmatpush3.msra.mxu0 %v8646_v45  ;;  %v8647_v50 = vld [vmem:[%s14476_s3 + $0x158] sm:$0xff]  ;;  %v12879_v46 = vld [vmem:[%s9084_s17 + $0x3e0] sm:$0xff]  ;;  %v8649_v45 = vld [vmem:[%s14476_s3 + $0x1d0] sm:$0xff] }
 0x238   : > { %7838 = vmatpush3.msra.mxu1 %v8647_v50  ;;  %7795 = vmatprep.subr.mxu0 %v8648_v9  ;;  %15553 = vst [vmem:[#allocation179_spill] sm:$0xff] %v12879_v46  ;;  %v8650_v50 = vld [vmem:[%s14476_s3 + $0x50] sm:$0xff]  ;;  %v12892_v9 = vld [vmem:[%s9084_s17 + $0x3f8] sm:$0xff] }
 0x239   : > { %2770 = vmatmul.mubr.f32.gmra.mxu1 %v12861_v29  ;;  %7839 = vmatprep.subr.mxu1 %v8649_v45  ;;  %15554 = vst [vmem:[#allocation180_spill] sm:$0xff] %v12892_v9  ;;  %v8651_v29 = vld [vmem:[%s14476_s3 + $0x150] sm:$0xff]  ;;  %v8652_v45 = vld [vmem:[%s14476_s3 + $0xc8] sm:$0xff] }
 0x23a   : > { %2689 = vmatprep.mubr.f32.mxu0 %v12868_v62  ;;  %7796 = vmatpush3.msra.mxu0 %v8650_v50  ;;  %v8653_v50 = vld [vmem:[%s14476_s3 + $0x1c8] sm:$0xff]  ;;  %v12907_v62 = vld [vmem:[%s9084_s17 + $0x3f0] sm:$0xff] }
 0x23b   : > { %7840 = vmatpush3.msra.mxu1 %v8651_v29  ;;  %2690 = vmatmul.mubr.f32.gmra.mxu0 %v12879_v46  ;;  %15555 = vst [vmem:[#allocation181_spill] sm:$0xff] %v12907_v62  ;;  %v8654_v29 = vld [vmem:[%s14476_s3 + $0x48] sm:$0xff]  ;;  %v12913_v46 = vpop.f32.mrf.mxu1 }
 0x23c   : > { %7797 = vmatprep.subr.mxu0 %v8652_v45  ;;  %7841 = vmatprep.subr.mxu1 %v8653_v50  ;;  %v8655_v45 = vld [vmem:[%s14476_s3 + $0x148] sm:$0xff]  ;;  %v8656_v50 = vld [vmem:[%s14476_s3 + $0xc0] sm:$0xff] }
 0x23d   : > { %2774 = vmatprep.mubr.f32.mxu1 %v12892_v9  ;;  %7798 = vmatpush3.msra.mxu0 %v8654_v29  ;;  %v8657_v9 = vld [vmem:[%s14476_s3 + $0x1c0] sm:$0xff]  ;;  %v12925_v29 = vpop.f32.mrf.mxu0 }
 0x23e   : > { %7842 = vmatpush3.msra.mxu1 %v8655_v45  ;;  %7799 = vmatprep.subr.mxu0 %v8656_v50  ;;  %15556 = vst [vmem:[#allocation182_spill] sm:$0xff] %v12925_v29  ;;  %v8659_v45 = vld [vmem:[%s14476_s3 + $0x140] sm:$0xff]  ;;  %v8660_v50 = vld [vmem:[%s14476_s3 + $0xb8] sm:$0xff]  ;;  %v8689_v29 = vld [vmem:[%s9084_s17 + $0x210] sm:$0xff] }
 0x23f   : > { %2775 = vmatmul.mubr.f32.gmra.mxu1 %v12907_v62  ;;  %7843 = vmatprep.subr.mxu1 %v8657_v9  ;;  %v8661_v9 = vld [vmem:[%s14476_s3 + $0x1b8] sm:$0xff]  ;;  %v12939_v62 = vpop.f32.mrf.mxu1  ;;  %v2782_v21 = vmul.f32 %v8689_v29, %v8689_v29  ;;  %v8694_v29 = vld [vmem:[%s14476_s3] sm:$0xff] }
 0x240   : > { %7800 = vmatpush3.msra.mxu0 %v8658_v32  ;;  %7844 = vmatpush3.msra.mxu1 %v8659_v45  ;;  %15557 = vst [vmem:[#allocation183_spill] sm:$0xff] %v12939_v62  ;;  %v8662_v32 = vld [vmem:[%s14476_s3 + $0x38] sm:$0xff]  ;;  %v12953_v62 = vpop.f32.mrf.mxu0 }
 0x241   : > { %7801 = vmatprep.subr.mxu0 %v8660_v50  ;;  %7845 = vmatprep.subr.mxu1 %v8661_v9  ;;  %v8663_v45 = vld [vmem:[%s14476_s3 + $0x138] sm:$0xff]  ;;  %v8664_v50 = vld [vmem:[%s14476_s3 + $0xb0] sm:$0xff]  ;;  %15558 = vst [vmem:[#allocation184_spill] sm:$0xff] %v12953_v62  ;;  %v12967_v34 = vpop.f32.mrf.mxu1 }
 0x242   : > { %7802 = vmatpush3.msra.mxu0 %v8662_v32  ;;  %7846 = vmatpush3.msra.mxu1 %v8663_v45  ;;  %v8665_v9 = vld [vmem:[%s14476_s3 + $0x1b0] sm:$0xff]  ;;  %15559 = vst [vmem:[#allocation185_spill] sm:$0xff] %v12967_v34 }
 0x243   : > { %7803 = vmatprep.subr.mxu0 %v8664_v50  ;;  %7847 = vmatprep.subr.mxu1 %v8665_v9  ;;  %v8666_v32 = vld [vmem:[%s14476_s3 + $0x30] sm:$0xff]  ;;  %v8668_v50 = vld [vmem:[%s14476_s3 + $0xa8] sm:$0xff] }
 0x244   : > { %7804 = vmatpush3.msra.mxu0 %v8666_v32  ;;  %v8667_v45 = vld [vmem:[%s14476_s3 + $0x130] sm:$0xff]  ;;  %v8669_v9 = vld [vmem:[%s14476_s3 + $0x1a8] sm:$0xff]  ;;  %v7377_v19 = vpop.f32.mrf.mxu0 }
 0x245   : > { %7848 = vmatpush3.msra.mxu1 %v8667_v45  ;;  %7805 = vmatprep.subr.mxu0 %v8668_v50  ;;  %v8670_v32 = vld [vmem:[%s14476_s3 + $0x28] sm:$0xff]  ;;  %v8672_v50 = vld [vmem:[%s14476_s3 + $0xa0] sm:$0xff] }
 0x246   : > { %7849 = vmatprep.subr.mxu1 %v8669_v9  ;;  %7806 = vmatpush3.msra.mxu0 %v8670_v32  ;;  %v8671_v45 = vld [vmem:[%s14476_s3 + $0x128] sm:$0xff]  ;;  %v8673_v9 = vld [vmem:[%s14476_s3 + $0x1a0] sm:$0xff]  ;;  %v7421_v34 = vpop.f32.mrf.mxu1  ;;  %v7378_v56 = vpop.f32.mrf.mxu0 }
 0x247   : > { %7850 = vmatpush3.msra.mxu1 %v8671_v45  ;;  %7807 = vmatprep.subr.mxu0 %v8672_v50  ;;  %v8674_v32 = vld [vmem:[%s14476_s3 + $0x20] sm:$0xff]  ;;  %v7379_v49 = vadd.f32 %v7378_v56, %v7377_v19  ;;  %v8676_v50 = vld [vmem:[%s14476_s3 + $0x98] sm:$0xff] }
 0x248   : > { %7851 = vmatprep.subr.mxu1 %v8673_v9  ;;  %7808 = vmatpush3.msra.mxu0 %v8674_v32  ;;  %v8675_v45 = vld [vmem:[%s14476_s3 + $0x120] sm:$0xff]  ;;  %v8677_v9 = vld [vmem:[%s14476_s3 + $0x198] sm:$0xff]  ;;  %v7422_v15 = vpop.f32.mrf.mxu1 }
 0x249   : > { %7852 = vmatpush3.msra.mxu1 %v8675_v45  ;;  %7809 = vmatprep.subr.mxu0 %v8676_v50  ;;  %v8678_v32 = vld [vmem:[%s14476_s3 + $0x18] sm:$0xff]  ;;  %v1932_v56 = vadd.f32 %v7379_v49, %v12705_v20  ;;  %v7423_v45 = vadd.f32 %v7422_v15, %v7421_v34  ;;  %v8680_v50 = vld [vmem:[%s14476_s3 + $0x90] sm:$0xff] }
 0x24a   : > { %7853 = vmatprep.subr.mxu1 %v8677_v9  ;;  %7810 = vmatpush3.msra.mxu0 %v8678_v32  ;;  %v8679_v19 = vld [vmem:[%s14476_s3 + $0x118] sm:$0xff]  ;;  %v8681_v9 = vld [vmem:[%s14476_s3 + $0x190] sm:$0xff]  ;;  %v8682_v32 = vld [vmem:[%s9084_s17 + $0x208] sm:$0xff] }
 0x24b   : > { %7854 = vmatpush3.msra.mxu1 %v8679_v19  ;;  %7811 = vmatprep.subr.mxu0 %v8680_v50  ;;  %v2781_v62 = vmul.f32 %v8682_v32, %v8682_v32  ;;  %v8683_v19 = vld [vmem:[%s14476_s3 + $0x10] sm:$0xff]  ;;  %v13013_v49 = vadd.f32 %v7423_v45, %v1932_v56  ;;  %v8685_v34 = vld [vmem:[%s9084_s17 + $0x218] sm:$0xff]  ;;  %v8686_v50 = vld [vmem:[%s14476_s3 + $0x88] sm:$0xff] }
 0x24c   : > { %7855 = vmatprep.subr.mxu1 %v8681_v9  ;;  %7812 = vmatpush3.msra.mxu0 %v8683_v19  ;;  %v8684_v15 = vld [vmem:[%s14476_s3 + $0x110] sm:$0xff]  ;;  %v2783_v20 = vmul.f32 %v8685_v34, %v8685_v34  ;;  %v8687_v9 = vld [vmem:[%s14476_s3 + $0x188] sm:$0xff]  ;;  %v8688_v32 = vld [vmem:[%s9084_s17 + $0x200] sm:$0xff] }
 0x24d   : > { %7856 = vmatpush3.msra.mxu1 %v8684_v15  ;;  %7813 = vmatprep.subr.mxu0 %v8686_v50  ;;  %v2780_v19 = vmul.f32 %v8688_v32, %v8688_v32  ;;  %v8690_v56 = vld [vmem:[%s14476_s3 + $0x8] sm:$0xff]  ;;  %v8692_v15 = vld [vmem:[%s14476_s3 + $0x80] sm:$0xff]  ;;  %v8697_v32 = vld [vmem:[%s14476_s3 + $0x3f8] sm:$0xff] }
 0x24e   : > { %7857 = vmatprep.subr.mxu1 %v8687_v9  ;;  %7814 = vmatpush3.msra.mxu0 %v8690_v56  ;;  %v8691_v45 = vld [vmem:[%s14476_s3 + $0x108] sm:$0xff]  ;;  %v8693_v34 = vld [vmem:[%s14476_s3 + $0x180] sm:$0xff]  ;;  %v8696_v9 = vld [vmem:[%s14476_s3 + $0x2f8] sm:$0xff] }
 0x24f   : > { %7858 = vmatpush3.msra.mxu1 %v8691_v45  ;;  %7815 = vmatprep.subr.mxu0 %v8692_v15  ;;  %v8695_v50 = vld [vmem:[%s14476_s3 + $0x100] sm:$0xff]  ;;  %v8702_v56 = vld [vmem:[%s14476_s3 + $0x270] sm:$0xff]  ;;  %v8704_v15 = vld [vmem:[%s14476_s3 + $0x2e8] sm:$0xff] }
 0x250   : > { %7859 = vmatprep.subr.mxu1 %v8693_v34  ;;  %7816 = vmatpush3.msra.mxu0 %v8694_v29  ;;  %v8703_v45 = vld [vmem:[%s14476_s3 + $0x370] sm:$0xff]  ;;  %v8705_v34 = vld [vmem:[%s14476_s3 + $0x3e8] sm:$0xff] }
 0x251   : > { %2908 = vmatprep.mubr.f32.mxu0 %v2781_v62  ;;  %7860 = vmatpush3.msra.mxu1 %v8695_v50  ;;  %v8698_v62 = vld [vmem:[%s14476_s3 + $0x278] sm:$0xff]  ;;  %v8706_v29 = vld [vmem:[%s14476_s3 + $0x268] sm:$0xff] }
 0x252   : > { %2993 = vmatprep.mubr.f32.mxu1 %v2783_v20  ;;  %2909 = vmatmul.mubr.f32.vlgmr.msra.gmra.mxu0 %v2780_v19  ;;  %v8699_v20 = vld [vmem:[%s14476_s3 + $0x378] sm:$0xff]  ;;  %v8701_v19 = vld [vmem:[%s14476_s3 + $0x3f0] sm:$0xff]  ;;  %v8707_v50 = vld [vmem:[%s14476_s3 + $0x368] sm:$0xff] }
 0x253   : > { %2994 = vmatmul.mubr.f32.vlgmr.msra.gmra.mxu1 %v2782_v21  ;;  %7873 = vmatprep.subr.mxu0 %v8696_v9  ;;  %v8700_v21 = vld [vmem:[%s14476_s3 + $0x2f0] sm:$0xff]  ;;  %v8708_v9 = vld [vmem:[%s14476_s3 + $0x2e0] sm:$0xff] }
 0x254   : > { %7917 = vmatprep.subr.mxu1 %v8697_v32  ;;  %7874 = vmatpush3.msra.mxu0 %v8698_v62  ;;  %v8709_v32 = vld [vmem:[%s14476_s3 + $0x3e0] sm:$0xff] }
 0x255   : > { %7918 = vmatpush3.msra.mxu1 %v8699_v20  ;;  %7875 = vmatprep.subr.mxu0 %v8700_v21  ;;  %v8710_v62 = vld [vmem:[%s14476_s3 + $0x260] sm:$0xff]  ;;  %v8712_v21 = vld [vmem:[%s14476_s3 + $0x2d8] sm:$0xff] }
 0x256   : > { %7919 = vmatprep.subr.mxu1 %v8701_v19  ;;  %7876 = vmatpush3.msra.mxu0 %v8702_v56  ;;  %v8711_v20 = vld [vmem:[%s14476_s3 + $0x360] sm:$0xff]  ;;  %v8713_v19 = vld [vmem:[%s14476_s3 + $0x3d8] sm:$0xff] }
 0x257   : > { %7920 = vmatpush3.msra.mxu1 %v8703_v45  ;;  %7877 = vmatprep.subr.mxu0 %v8704_v15  ;;  %v8714_v56 = vld [vmem:[%s14476_s3 + $0x258] sm:$0xff]  ;;  %v8716_v15 = vld [vmem:[%s14476_s3 + $0x2d0] sm:$0xff] }
 0x258   : > { %7921 = vmatprep.subr.mxu1 %v8705_v34  ;;  %7878 = vmatpush3.msra.mxu0 %v8706_v29  ;;  %v8715_v45 = vld [vmem:[%s14476_s3 + $0x358] sm:$0xff]  ;;  %v8717_v34 = vld [vmem:[%s14476_s3 + $0x3d0] sm:$0xff] }
 0x259   : > { %7922 = vmatpush3.msra.mxu1 %v8707_v50  ;;  %7879 = vmatprep.subr.mxu0 %v8708_v9  ;;  %v8718_v29 = vld [vmem:[%s14476_s3 + $0x250] sm:$0xff]  ;;  %v8720_v9 = vld [vmem:[%s14476_s3 + $0x2c8] sm:$0xff] }
 0x25a   : > { %7923 = vmatprep.subr.mxu1 %v8709_v32  ;;  %7880 = vmatpush3.msra.mxu0 %v8710_v62  ;;  %v8719_v50 = vld [vmem:[%s14476_s3 + $0x350] sm:$0xff]  ;;  %v8721_v32 = vld [vmem:[%s14476_s3 + $0x3c8] sm:$0xff] }
 0x25b   : > { %7924 = vmatpush3.msra.mxu1 %v8711_v20  ;;  %7881 = vmatprep.subr.mxu0 %v8712_v21  ;;  %v8722_v62 = vld [vmem:[%s14476_s3 + $0x248] sm:$0xff] }
 0x25c   : > { %7925 = vmatprep.subr.mxu1 %v8713_v19  ;;  %7882 = vmatpush3.msra.mxu0 %v8714_v56  ;;  %v8723_v20 = vld [vmem:[%s14476_s3 + $0x348] sm:$0xff]  ;;  %v8725_v56 = vld [vmem:[%s9084_s17 + $0x298] sm:$0xff] }
 0x25d   : > { %7926 = vmatpush3.msra.mxu1 %v8715_v45  ;;  %7883 = vmatprep.subr.mxu0 %v8716_v15  ;;  %v8724_v21 = vld [vmem:[%s9084_s17 + $0x288] sm:$0xff]  ;;  %v2799_v45 = vmul.f32 %v8725_v56, %v8725_v56  ;;  %v8726_v15 = vld [vmem:[%s14476_s3 + $0x2c0] sm:$0xff]  ;;  %v8733_v56 = vld [vmem:[%s14476_s3 + $0x3b8] sm:$0xff] }
 0x25e   : > { %7927 = vmatprep.subr.mxu1 %v8717_v34  ;;  %7884 = vmatpush3.msra.mxu0 %v8718_v29  ;;  %v2797_v19 = vmul.f32 %v8724_v21, %v8724_v21  ;;  %v8727_v34 = vld [vmem:[%s14476_s3 + $0x3c0] sm:$0xff]  ;;  %v8732_v21 = vld [vmem:[%s14476_s3 + $0x2b8] sm:$0xff] }
 0x25f   : > { %7928 = vmatpush3.msra.mxu1 %v8719_v50  ;;  %7885 = vmatprep.subr.mxu0 %v8720_v9  ;;  %v8728_v29 = vld [vmem:[%s14476_s3 + $0x240] sm:$0xff] }
 0x260   : > { %7929 = vmatprep.subr.mxu1 %v8721_v32  ;;  %7886 = vmatpush3.msra.mxu0 %v8722_v62  ;;  %v8729_v50 = vld [vmem:[%s14476_s3 + $0x340] sm:$0xff]  ;;  %v8731_v62 = vld [vmem:[%s9084_s17 + $0x290] sm:$0xff] }
 0x261   : > { %7930 = vmatpush3.msra.mxu1 %v8723_v20  ;;  %7887 = vmatprep.subr.mxu0 %v8726_v15  ;;  %v8730_v9 = vld [vmem:[%s9084_s17 + $0x280] sm:$0xff]  ;;  %v2798_v20 = vmul.f32 %v8731_v62, %v8731_v62  ;;  %v8734_v15 = vld [vmem:[%s14476_s3 + $0x238] sm:$0xff] }
 0x262   : > { %7931 = vmatprep.subr.mxu1 %v8727_v34  ;;  %7888 = vmatpush3.msra.mxu0 %v8728_v29  ;;  %v2796_v32 = vmul.f32 %v8730_v9, %v8730_v9  ;;  %v8735_v34 = vld [vmem:[%s14476_s3 + $0x338] sm:$0xff]  ;;  %v8736_v29 = vld [vmem:[%s14476_s3 + $0x2b0] sm:$0xff]  ;;  %v8738_v9 = vld [vmem:[%s9084_s17 + $0x308] sm:$0xff] }
 0x263   : > { %7932 = vmatpush3.msra.mxu1 %v8729_v50  ;;  %7889 = vmatprep.subr.mxu0 %v8732_v21  ;;  %v8737_v50 = vld [vmem:[%s14476_s3 + $0x3b0] sm:$0xff]  ;;  %v2813_v62 = vmul.f32 %v8738_v9, %v8738_v9  ;;  %v8739_v21 = vld [vmem:[%s9084_s17 + $0x318] sm:$0xff]  ;;  %v8746_v9 = vld [vmem:[%s14476_s3 + $0x228] sm:$0xff] }
 0x264   : > { %7933 = vmatprep.subr.mxu1 %v8733_v56  ;;  %7890 = vmatpush3.msra.mxu0 %v8734_v15  ;;  %v2815_v56 = vmul.f32 %v8739_v21, %v8739_v21  ;;  %v8742_v15 = vld [vmem:[%s9084_s17 + $0x300] sm:$0xff]  ;;  %v8747_v21 = vld [vmem:[%s14476_s3 + $0x328] sm:$0xff] }
 0x265   : > { %7934 = vmatpush3.msra.mxu1 %v8735_v34  ;;  %2913 = vmatprep.mubr.f32.mxu0 %v2797_v19  ;;  %v8740_v19 = vld [vmem:[%s14476_s3 + $0x230] sm:$0xff]  ;;  %v2812_v34 = vmul.f32 %v8742_v15, %v8742_v15  ;;  %v8750_v15 = vld [vmem:[%s9084_s17 + $0x388] sm:$0xff] }
 0x266   : > { %2998 = vmatprep.mubr.f32.mxu1 %v2799_v45  ;;  %7891 = vmatprep.subr.mxu0 %v8736_v29  ;;  %v8741_v45 = vld [vmem:[%s14476_s3 + $0x330] sm:$0xff] }
 0x267   : > { %7935 = vmatprep.subr.mxu1 %v8737_v50  ;;  %2914 = vmatmul.mubr.f32.gmra.mxu0 %v2796_v32  ;;  %v8743_v29 = vld [vmem:[%s9084_s17 + $0x310] sm:$0xff]  ;;  %v8744_v32 = vld [vmem:[%s14476_s3 + $0x2a8] sm:$0xff] }
 0x268   : > { %2999 = vmatmul.mubr.f32.gmra.mxu1 %v2798_v20  ;;  %7892 = vmatpush3.msra.mxu0 %v8740_v19  ;;  %v2814_v50 = vmul.f32 %v8743_v29, %v8743_v29  ;;  %v8745_v20 = vld [vmem:[%s14476_s3 + $0x3a8] sm:$0xff]  ;;  %v8748_v19 = vld [vmem:[%s14476_s3 + $0x2a0] sm:$0xff]  ;;  %v2829_v29 = vmul.f32 %v8750_v15, %v8750_v15  ;;  %v8756_v15 = vld [vmem:[%s14476_s3 + $0x298] sm:$0xff] }
 0x269   : > { %7936 = vmatpush3.msra.mxu1 %v8741_v45  ;;  %7893 = vmatprep.subr.mxu0 %v8744_v32  ;;  %v8749_v45 = vld [vmem:[%s14476_s3 + $0x3a0] sm:$0xff]  ;;  %v8751_v32 = vld [vmem:[%s9084_s17 + $0x398] sm:$0xff] }
 0x26a   : > { %7937 = vmatprep.subr.mxu1 %v8745_v20  ;;  %7894 = vmatpush3.msra.mxu0 %v8746_v9  ;;  %v2831_v20 = vmul.f32 %v8751_v32, %v8751_v32  ;;  %v8754_v9 = vld [vmem:[%s9084_s17 + $0x380] sm:$0xff]  ;;  %v8759_v32 = vld [vmem:[%s14476_s3 + $0x318] sm:$0xff] }
 0x26b   : > { %7938 = vmatpush3.msra.mxu1 %v8747_v21  ;;  %2918 = vmatprep.mubr.f32.mxu0 %v2813_v62  ;;  %v8752_v62 = vld [vmem:[%s14476_s3 + $0x220] sm:$0xff]  ;;  %v2828_v21 = vmul.f32 %v8754_v9, %v8754_v9  ;;  %v2785_v9 = vmul.f32 %v11753_v22, %v11753_v22  ;;  %v8764_v22 = vld [vmem:[%s14476_s3 + $0x288] sm:$0xff] }
 0x26c   : > { %3003 = vmatprep.mubr.f32.mxu1 %v2815_v56  ;;  %7895 = vmatprep.subr.mxu0 %v8748_v19  ;;  %v8753_v56 = vld [vmem:[%s14476_s3 + $0x320] sm:$0xff]  ;;  %v8755_v19 = vld [vmem:[%s9084_s17 + $0x390] sm:$0xff] }
 0x26d   : > { %7939 = vmatprep.subr.mxu1 %v8749_v45  ;;  %2919 = vmatmul.mubr.f32.gmra.mxu0 %v2812_v34  ;;  %v2830_v45 = vmul.f32 %v8755_v19, %v8755_v19  ;;  %v8757_v34 = vld [vmem:[%s14476_s3 + $0x398] sm:$0xff]  ;;  %v7118_v19 = vadd.f32 %v11951_v0, %v11923_v6  ;;  %v8765_v6 = vld [vmem:[%s14476_s3 + $0x388] sm:$0xff]  ;;  %v2787_v0 = vmul.f32 %v11769_v16, %v11769_v16  ;;  %v8768_v16 = vld [vmem:[%s14476_s3 + $0x280] sm:$0xff] }
 0x26e   : > { %3004 = vmatmul.mubr.f32.gmra.mxu1 %v2814_v50  ;;  %7896 = vmatpush3.msra.mxu0 %v8752_v62  ;;  %v8758_v50 = vld [vmem:[%s14476_s3 + $0x218] sm:$0xff]  ;;  %v8760_v62 = vld [vmem:[%s14476_s3 + $0x290] sm:$0xff] }
 0x26f   : > { %7940 = vmatpush3.msra.mxu1 %v8753_v56  ;;  %7897 = vmatprep.subr.mxu0 %v8756_v15  ;;  %v8761_v56 = vld [vmem:[%s14476_s3 + $0x390] sm:$0xff] }
 0x270   : > { %7941 = vmatprep.subr.mxu1 %v8757_v34  ;;  %7898 = vmatpush3.msra.mxu0 %v8758_v50  ;;  %v8763_v15 = vld [vmem:[%s14476_s3 + $0x310] sm:$0xff]  ;;  %v2786_v34 = vmul.f32 %v11778_v13, %v11778_v13  ;;  %v8770_v50 = vld [vmem:[%s14476_s3 + $0x200] sm:$0xff]  ;;  %v7121_v13 = vadd.f32 %v12031_v54, %v12003_v52  ;;  %v8772_v52 = vld [vmem:[%s14476_s3 + $0x4f8] sm:$0xff]  ;;  %v7209_v54 = vadd.f32 %v12495_v25, %v12452_v14 }
 0x271   : > { %7942 = vmatpush3.msra.mxu1 %v8759_v32  ;;  %2923 = vmatprep.mubr.f32.mxu0 %v2829_v29  ;;  %v7162_v29 = vadd.f32 %v11953_v51, %v11925_v35  ;;  %v13236_v35 = vpop.f32.mrf.mxu0  ;;  %v7206_v51 = vadd.f32 %v12406_v63, %v12355_v17  ;;  %v8769_v17 = vld [vmem:[%s14476_s3 + $0x380] sm:$0xff]  ;;  %v7165_v32 = vadd.f32 %v12045_v5, %v12005_v61  ;;  %v8774_v5 = vld [vmem:[%s14476_s3 + $0x478] sm:$0xff] }
 0x272   : > { %3008 = vmatprep.mubr.f32.mxu1 %v2831_v20  ;;  %7899 = vmatprep.subr.mxu0 %v8760_v62  ;;  %v8762_v20 = vld [vmem:[%s14476_s3 + $0x210] sm:$0xff]  ;;  %v8771_v62 = vld [vmem:[%s14476_s3 + $0x300] sm:$0xff]  ;;  %v2800_v61 = vmul.f32 %v11809_v31, %v11809_v31  ;;  %v8775_v31 = vld [vmem:[%s14476_s3 + $0x578] sm:$0xff]  ;;  %v2803_v14 = vmul.f32 %v11816_v26, %v11816_v26  ;;  %v2802_v25 = vmul.f32 %v11832_v18, %v11832_v18 }
 0x273   : > { %7943 = vmatprep.subr.mxu1 %v8761_v56  ;;  %2924 = vmatmul.mubr.f32.gmra.mxu0 %v2828_v21  ;;  %v2784_v21 = vmul.f32 %v11762_v41, %v11762_v41  ;;  %v8766_v41 = vld [vmem:[%s14476_s3 + $0x208] sm:$0xff]  ;;  %v1512_v63 = vadd.f32 %v7162_v29, %v7118_v19  ;;  %v7381_v56 = vpop.f32.mrf.mxu0  ;;  %v13266_v19 = vpop.f32.mrf.mxu1  ;;  %v2801_v29 = vmul.f32 %v11796_v39, %v11796_v39  ;;  %v8773_v39 = vld [vmem:[%s14476_s3 + $0x5f8] sm:$0xff] }
 0x274   : > { %3009 = vmatmul.mubr.f32.gmra.mxu1 %v2830_v45  ;;  %7900 = vmatpush3.msra.mxu0 %v8762_v20  ;;  %v8767_v45 = vld [vmem:[%s14476_s3 + $0x308] sm:$0xff]  ;;  %v7168_v26 = vadd.f32 %v12147_v37, %v12098_v4  ;;  %v7212_v37 = vadd.f32 %v12592_v24, %v12540_v40 }
 0x275   : > { %7944 = vmatpush3.msra.mxu1 %v8763_v15  ;;  %7901 = vmatprep.subr.mxu0 %v8764_v22  ;;  %v1597_v20 = vadd.f32 %v7206_v51, %v1512_v63  ;;  %v7383_v15 = vpop.f32.mrf.mxu0  ;;  %v7124_v22 = vadd.f32 %v12100_v33, %v12076_v43  ;;  %v8779_v43 = vld [vmem:[%s14476_s3 + $0x570] sm:$0xff]  ;;  %v7338_v33 = vadd.f32 %v12852_v42, %v12824_v53 }
 0x276   : > { %7945 = vmatprep.subr.mxu1 %v8765_v6  ;;  %7902 = vmatpush3.msra.mxu0 %v8766_v41  ;;  %v8778_v6 = vld [vmem:[%s14476_s3 + $0x470] sm:$0xff]  ;;  %v7253_v41 = vadd.f32 %v12519_v38, %v12476_v1  ;;  %v2816_v38 = vmul.f32 %v11869_v30, %v11869_v30  ;;  %v7297_v1 = vadd.f32 %v12898_v57, %v12870_v48 }
 0x277   : > { %7946 = vmatpush3.msra.mxu1 %v8767_v45  ;;  %7903 = vmatprep.subr.mxu0 %v8768_v16  ;;  %v7384_v40 = vpop.f32.mrf.mxu0  ;;  %v1522_v45 = vadd.f32 %v7168_v26, %v7124_v22  ;;  %v7382_v53 = vadd.f32 %v7381_v56, %v13236_v35  ;;  %v2818_v30 = vmul.f32 %v11921_v23, %v11921_v23  ;;  %v15560_v23 = vld [vmem:[#allocation27_spill] sm:$0xff]  ;;  %v15562_v16 = vld [vmem:[#allocation184_spill] sm:$0xff]  ;;  %v15563_v63 = vld [vmem:[#allocation29_spill] sm:$0xff] }
 0x278   : > { %7947 = vmatprep.subr.mxu1 %v8769_v17  ;;  %7904 = vmatpush3.msra.mxu0 %v8770_v50  ;;  %v7256_v57 = vadd.f32 %v12618_v12, %v12566_v60  ;;  %v15569_v56 = vld [vmem:[#allocation45_spill] sm:$0xff]  ;;  %v15578_v26 = vld [vmem:[#allocation43_spill] sm:$0xff] }
 0x279   : > { %3078 = vmatprep.mubr.f32.mxu0 %v2785_v9  ;;  %7948 = vmatpush3.msra.mxu1 %v8771_v62  ;;  %v7250_v9 = vadd.f32 %v12425_v8, %v12382_v2  ;;  %v7294_v2 = vadd.f32 %v12839_v28, %v12806_v10  ;;  %v1517_v8 = vadd.f32 %v7165_v32, %v7121_v13  ;;  %v8776_v28 = vld [vmem:[%s14476_s3 + $0x4f0] sm:$0xff]  ;;  %v7386_v35 = vpop.f32.mrf.mxu0  ;;  %v15567_v32 = vld [vmem:[#allocation42_spill] sm:$0xff] }
 0x27a   : > { %3079 = vmatmul.mubr.f32.vlgmr.msra.gmra.mxu0 %v2784_v21  ;;  %3163 = vmatprep.mubr.f32.mxu1 %v2787_v0  ;;  %v8777_v10 = vld [vmem:[%s14476_s3 + $0x5f0] sm:$0xff]  ;;  %v7425_v21 = vpop.f32.mrf.mxu1  ;;  %v2817_v0 = vmul.f32 %v11862_v47, %v11862_v47  ;;  %v8780_v47 = vld [vmem:[%s14476_s3 + $0x4e8] sm:$0xff] }
 0x27b   : > { %7961 = vmatprep.subr.mxu0 %v8772_v52  ;;  %8005 = vmatprep.subr.mxu1 %v8773_v39  ;;  %v1682_v18 = vadd.f32 %v7250_v9, %v1597_v20  ;;  %v1602_v51 = vadd.f32 %v7209_v54, %v1517_v8  ;;  %v7426_v60 = vadd.f32 %v7425_v21, %v13266_v19  ;;  %v15568_v62 = vld [vmem:[#allocation33_spill] sm:$0xff]  ;;  %v15570_v20 = vld [vmem:[#allocation36_spill] sm:$0xff]  ;;  %v7387_v9 = vpop.f32.mrf.mxu0  ;;  %v15571_v54 = vld [vmem:[#allocation183_spill] sm:$0xff] }
 0x27c   : > { %3164 = vmatmul.mubr.f32.vlgmr.msra.gmra.mxu1 %v2786_v34  ;;  %7962 = vmatpush3.msra.mxu0 %v8774_v5  ;;  %v7427_v24 = vpop.f32.mrf.mxu1  ;;  %v15561_v34 = vld [vmem:[#allocation182_spill] sm:$0xff]  ;;  %v15572_v39 = vld [vmem:[#allocation185_spill] sm:$0xff]  ;;  %v7388_v22 = vadd.f32 %v7387_v9, %v7386_v35 }
 0x27d   : > { %8006 = vmatpush3.msra.mxu1 %v8775_v31  ;;  %7963 = vmatprep.subr.mxu0 %v8776_v28  ;;  %v1767_v4 = vadd.f32 %v7294_v2, %v1682_v18  ;;  %v1687_v42 = vadd.f32 %v7253_v41, %v1602_v51  ;;  %v7300_v17 = vadd.f32 %v15562_v16, %v15561_v34  ;;  %v15573_v31 = vld [vmem:[#allocation38_spill] sm:$0xff]  ;;  %v15575_v28 = vld [vmem:[#allocation40_spill] sm:$0xff]  ;;  %v15577_v21 = vld [vmem:[#allocation41_spill] sm:$0xff] }
 0x27e   : > { %8007 = vmatprep.subr.mxu1 %v8777_v10  ;;  %3083 = vmatprep.mubr.f32.mxu0 %v2801_v29  ;;  %v2835_v29 = vmul.f32 %v15569_v56, %v15569_v56  ;;  %v7344_v2 = vadd.f32 %v15572_v39, %v15571_v54  ;;  %v15580_v41 = vld [vmem:[#allocation46_spill] sm:$0xff]  ;;  %v15596_v34 = vld [vmem:[#allocation64_spill] sm:$0xff]  ;;  %v15597_v16 = vld [vmem:[#allocation73_spill] sm:$0xff] }
 0x27f   : > { %7964 = vmatpush3.msra.mxu0 %v8778_v6  ;;  %8008 = vmatpush3.msra.mxu1 %v8779_v43  ;;  %v1852_v48 = vadd.f32 %v7338_v33, %v1767_v4  ;;  %v13368_v43 = vpop.f32.mrf.mxu0  ;;  %v15581_v4 = vld [vmem:[#allocation47_spill] sm:$0xff]  ;;  %v15582_v33 = vld [vmem:[#allocation48_spill] sm:$0xff]  ;;  %v15595_v35 = vld [vmem:[#allocation62_spill] sm:$0xff] }
 0x280   : > { %3084 = vmatmul.mubr.f32.gmra.mxu0 %v2800_v61  ;;  %7965 = vmatprep.subr.mxu0 %v8780_v47  ;;  %v15609_v9 = vld [vmem:[#allocation78_spill] sm:$0xff] }
 0x281   : > { %8009 = vmatprep.subr.mxu1 %v11841_v58  ;;  %3168 = vmatprep.mubr.f32.mxu1 %v2803_v14  ;;  %v2819_v58 = vmul.f32 %v11895_v36, %v11895_v36  ;;  %v7341_v36 = vadd.f32 %v12913_v46, %v12885_v27  ;;  %v1937_v12 = vadd.f32 %v7382_v53, %v1852_v48  ;;  %v15566_v27 = vld [vmem:[#allocation32_spill] sm:$0xff]  ;;  %v15574_v14 = vld [vmem:[#allocation51_spill] sm:$0xff]  ;;  %v15591_v48 = vld [vmem:[#allocation58_spill] sm:$0xff] }
 0x282   : > { %7966 = vmatpush3.msra.mxu0 %v11852_v44  ;;  %8010 = vmatpush3.msra.mxu1 %v11858_v3  ;;  %v1607_v44 = vadd.f32 %v7212_v37, %v1522_v45  ;;  %v2833_v3 = vmul.f32 %v11939_v11, %v11939_v11  ;;  %v15565_v11 = vld [vmem:[#allocation35_spill] sm:$0xff]  ;;  %v7385_v46 = vadd.f32 %v7384_v40, %v7383_v15  ;;  %v15576_v15 = vld [vmem:[#allocation49_spill] sm:$0xff]  ;;  %v15585_v40 = vld [vmem:[#allocation52_spill] sm:$0xff] }
 0x283   : > { %7967 = vmatprep.subr.mxu0 %v11876_v55  ;;  %3169 = vmatmul.mubr.f32.gmra.mxu1 %v2802_v25  ;;  %v1772_v55 = vadd.f32 %v7297_v1, %v1687_v42  ;;  %v2832_v50 = vmul.f32 %v15565_v11, %v15565_v11  ;;  %v2022_v5 = vadd.f32 %v7426_v60, %v1937_v12  ;;  %v15584_v1 = vld [vmem:[#allocation50_spill] sm:$0xff]  ;;  %v15587_v45 = vld [vmem:[#allocation53_spill] sm:$0xff]  ;;  %v15588_v42 = vld [vmem:[#allocation55_spill] sm:$0xff] }
 0x284   : > { %8011 = vmatprep.subr.mxu1 %v11882_v59  ;;  %3088 = vmatprep.mubr.f32.mxu0 %v2817_v0  ;;  %v7428_v59 = vpop.f32.mrf.mxu1  ;;  %v1692_v13 = vadd.f32 %v7256_v57, %v1607_v44  ;;  %v2834_v25 = vmul.f32 %v15574_v14, %v15574_v14  ;;  %v15579_v0 = vld [vmem:[#allocation44_spill] sm:$0xff]  ;;  %v15590_v57 = vld [vmem:[#allocation66_spill] sm:$0xff] }
 0x285   : > { %7968 = vmatpush3.msra.mxu0 %v11891_v7  ;;  %8012 = vmatpush3.msra.mxu1 %v15560_v23  ;;  %v15564_v7 = vld [vmem:[#allocation39_spill] sm:$0xff]  ;;  %v1857_v19 = vadd.f32 %v7341_v36, %v1772_v55  ;;  %v7429_v10 = vadd.f32 %v7428_v59, %v7427_v24  ;;  %v15586_v24 = vld [vmem:[#allocation61_spill] sm:$0xff]  ;;  %v15589_v44 = vld [vmem:[#allocation56_spill] sm:$0xff] }
 0x286   : > { %3089 = vmatmul.mubr.f32.gmra.mxu0 %v2816_v38  ;;  %7969 = vmatprep.subr.mxu0 %v15563_v63  ;;  %v7430_v52 = vpop.f32.mrf.mxu1  ;;  %v1777_v61 = vadd.f32 %v7300_v17, %v1692_v13  ;;  %v15583_v38 = vld [vmem:[#allocation57_spill] sm:$0xff]  ;;  %v15592_v55 = vld [vmem:[#allocation59_spill] sm:$0xff]  ;;  %v15593_v36 = vld [vmem:[#allocation60_spill] sm:$0xff] }
 0x287   : > { %8013 = vmatprep.subr.mxu1 %v15564_v7  ;;  %3173 = vmatprep.mubr.f32.mxu1 %v2819_v58  ;;  %v1942_v8 = vadd.f32 %v7385_v46, %v1857_v19  ;;  %v13380_v58 = vpop.f32.mrf.mxu0  ;;  %v15594_v23 = vld [vmem:[#allocation69_spill] sm:$0xff]  ;;  %v15599_v63 = vld [vmem:[#allocation67_spill] sm:$0xff]  ;;  %v15600_v7 = vld [vmem:[#allocation68_spill] sm:$0xff] }
 0x288   : > { %7970 = vmatpush3.msra.mxu0 %v15566_v27  ;;  %8014 = vmatpush3.msra.mxu1 %v15567_v32  ;;  %v7431_v18 = vpop.f32.mrf.mxu1  ;;  %v1862_v6 = vadd.f32 %v7344_v2, %v1777_v61  ;;  %v15598_v17 = vld [vmem:[#allocation65_spill] sm:$0xff]  ;;  %v15601_v11 = vld [vmem:[#allocation70_spill] sm:$0xff]  ;;  %v15603_v27 = vld [vmem:[#allocation72_spill] sm:$0xff] }
 0x289   : > { %7971 = vmatprep.subr.mxu0 %v15568_v62  ;;  %3174 = vmatmul.mubr.f32.gmra.mxu1 %v2818_v30  ;;  %v2027_v51 = vadd.f32 %v7429_v10, %v1942_v8  ;;  %v7432_v47 = vadd.f32 %v7431_v18, %v7430_v52  ;;  %v15604_v46 = vld [vmem:[#allocation74_spill] sm:$0xff]  ;;  %v15605_v13 = vld [vmem:[#allocation75_spill] sm:$0xff]  ;;  %v15606_v32 = vld [vmem:[#allocation76_spill] sm:$0xff] }
 0x28a   : > { %8015 = vmatprep.subr.mxu1 %v15570_v20  ;;  %3093 = vmatprep.mubr.f32.mxu0 %v2833_v3  ;;  %v1947_v37 = vadd.f32 %v7388_v22, %v1862_v6  ;;  %v13378_v53 = vpop.f32.mrf.mxu1  ;;  %v13386_v3 = vpop.f32.mrf.mxu0  ;;  %v15608_v20 = vld [vmem:[#allocation77_spill] sm:$0xff]  ;;  %v15610_v52 = vld [vmem:[#allocation83_spill] sm:$0xff]  ;;  %v15611_v54 = vld [vmem:[#allocation86_spill] sm:$0xff] }
 0x28b   : > { %7972 = vmatpush3.msra.mxu0 %v15573_v31  ;;  %8016 = vmatpush3.msra.mxu1 %v15575_v28  ;;  %v2788_v61 = vmul.f32 %v15610_v52, %v15610_v52  ;;  %v2791_v39 = vmul.f32 %v15611_v54, %v15611_v54  ;;  %v15612_v2 = vld [vmem:[#allocation79_spill] sm:$0xff]  ;;  %v15614_v31 = vld [vmem:[#allocation82_spill] sm:$0xff]  ;;  %v15615_v14 = vld [vmem:[#allocation84_spill] sm:$0xff] }
 0x28c   : > { %3094 = vmatmul.mubr.f32.gmra.mxu0 %v2832_v50  ;;  %7973 = vmatprep.subr.mxu0 %v15576_v15  ;;  %v2032_v30 = vadd.f32 %v7432_v47, %v1947_v37  ;;  %v13392_v59 = vpop.f32.mrf.mxu1  ;;  %v13400_v60 = vpop.f32.mrf.mxu0  ;;  %v15602_v50 = vld [vmem:[#allocation71_spill] sm:$0xff]  ;;  %v15617_v28 = vld [vmem:[#allocation85_spill] sm:$0xff]  ;;  %v15621_v6 = vld [vmem:[#allocation90_spill] sm:$0xff] }
 0x28d   : > { %8017 = vmatprep.subr.mxu1 %v15577_v21  ;;  %3178 = vmatprep.mubr.f32.mxu1 %v2835_v29  ;;  %v15607_v29 = vld [vmem:[#allocation80_spill] sm:$0xff]  ;;  %v15618_v10 = vld [vmem:[#allocation87_spill] sm:$0xff]  ;;  %v15619_v22 = vld [vmem:[#allocation89_spill] sm:$0xff] }
 0x28e   : > { %7974 = vmatpush3.msra.mxu0 %v15578_v26  ;;  %8018 = vmatpush3.msra.mxu1 %v15579_v0  ;;  %v13398_v12 = vpop.f32.mrf.mxu1  ;;  %v13412_v56 = vpop.f32.mrf.mxu0  ;;  %v2789_v19 = vmul.f32 %v15607_v29, %v15607_v29  ;;  %v15620_v26 = vld [vmem:[#allocation92_spill] sm:$0xff]  ;;  %v15622_v0 = vld [vmem:[#allocation91_spill] sm:$0xff]  ;;  %v15624_v37 = vld [vmem:[#allocation93_spill] sm:$0xff] }
 0x28f   : > { %3562 = vrot.lane.b32.xlu0 %v2022_v5, %s8915_s26  ;;  %3179 = vmatmul.mubr.f32.gmra.mxu1 %v2834_v25  ;;  %v15613_v5 = vld [vmem:[#allocation81_spill] sm:$0xff]  ;;  %v15616_v25 = vld [vmem:[#allocation88_spill] sm:$0xff]  ;;  %v2805_v18 = vmul.f32 %v15620_v26, %v15620_v26 }
 0x290   : > { %7975 = vmatprep.subr.mxu0 %v15580_v41  ;;  %8019 = vmatprep.subr.mxu1 %v15581_v4  ;;  %v13410_v62 = vpop.f32.mrf.mxu1  ;;  %v2790_v8 = vmul.f32 %v15616_v25, %v15616_v25  ;;  %v13432_v21 = vpop.f32.mrf.mxu0  ;;  %v15625_v47 = vld [vmem:[#allocation108_spill] sm:$0xff] }
 0x291   : > { %7976 = vmatpush3.msra.mxu0 %v15582_v33  ;;  %8020 = vmatpush3.msra.mxu1 %v15583_v38  ;;  %v2807_v38 = vmul.f32 %v15625_v47, %v15625_v47  ;;  %v15657_v47 = vld [vmem:[#allocation124_spill] sm:$0xff] }
 0x292   : > { %7977 = vmatprep.subr.mxu0 %v15584_v1  ;;  %8021 = vmatprep.subr.mxu1 %v15585_v40  ;;  %v13430_v15 = vpop.f32.mrf.mxu1  ;;  %v13444_v33 = vpop.f32.mrf.mxu0  ;;  %v15626_v1 = vld [vmem:[#allocation94_spill] sm:$0xff]  ;;  %v15627_v40 = vld [vmem:[#allocation96_spill] sm:$0xff] }
 0x293   : > { %7978 = vmatpush3.msra.mxu0 %v15586_v24  ;;  %8022 = vmatpush3.msra.mxu1 %v15587_v45  ;;  %v15628_v24 = vld [vmem:[#allocation97_spill] sm:$0xff] }
 0x294   : > { %3564 = vrot.lane.b32.xlu0 %v2027_v51, %s8915_s26  ;;  %7979 = vmatprep.subr.mxu0 %v15588_v42  ;;  %v15623_v51 = vld [vmem:[#allocation95_spill] sm:$0xff]  ;;  %v13442_v4 = vpop.f32.mrf.mxu1  ;;  %v15629_v45 = vld [vmem:[#allocation101_spill] sm:$0xff]  ;;  %v15630_v42 = vld [vmem:[#allocation98_spill] sm:$0xff] }
 0x295   : > { %8023 = vmatprep.subr.mxu1 %v15589_v44  ;;  %7980 = vmatpush3.msra.mxu0 %v15590_v57  ;;  %v2804_v41 = vmul.f32 %v15623_v51, %v15623_v51  ;;  %v15631_v44 = vld [vmem:[#allocation99_spill] sm:$0xff] }
 0x296   : > { %8024 = vmatpush3.msra.mxu1 %v15591_v48  ;;  %7981 = vmatprep.subr.mxu0 %v15592_v55  ;;  %v15632_v57 = vld [vmem:[#allocation111_spill] sm:$0xff]  ;;  %v15633_v55 = vld [vmem:[#allocation100_spill] sm:$0xff] }
 0x297   : > { %8025 = vmatprep.subr.mxu1 %v15593_v36  ;;  %7982 = vmatpush3.msra.mxu0 %v15594_v23  ;;  %v2821_v48 = vmul.f32 %v15632_v57, %v15632_v57  ;;  %v13458_v36 = vpop.f32.mrf.mxu1  ;;  %v13460_v23 = vpop.f32.mrf.mxu0  ;;  %v15655_v51 = vld [vmem:[#allocation123_spill] sm:$0xff]  ;;  %v15664_v57 = vld [vmem:[#allocation133_spill] sm:$0xff] }
 0x298   : > { %8026 = vmatpush3.msra.mxu1 %v15595_v35  ;;  %3566 = vrot.lane.b32.xlu0 %v2032_v30, %s8915_s26  ;;  %v2806_v30 = vmul.f32 %v15629_v45, %v15629_v45  ;;  %v15634_v35 = vld [vmem:[#allocation110_spill] sm:$0xff] }
 0x299   : > { %7983 = vmatprep.subr.mxu0 %v15596_v34  ;;  %8027 = vmatprep.subr.mxu1 %v15597_v16  ;;  %v15635_v34 = vld [vmem:[#allocation112_spill] sm:$0xff]  ;;  %v15661_v45 = vld [vmem:[#allocation130_spill] sm:$0xff] }
 0x29a   : > { %7984 = vmatpush3.msra.mxu0 %v15598_v17  ;;  %8028 = vmatpush3.msra.mxu1 %v15599_v63  ;;  %v2820_v16 = vmul.f32 %v15635_v34, %v15635_v34  ;;  %v15636_v17 = vld [vmem:[#allocation102_spill] sm:$0xff]  ;;  %v15637_v63 = vld [vmem:[#allocation103_spill] sm:$0xff]  ;;  %v15667_v34 = vld [vmem:[#allocation140_spill] sm:$0xff] }
 0x29b   : > { %7985 = vmatprep.subr.mxu0 %v15600_v7  ;;  %8029 = vmatprep.subr.mxu1 %v15601_v11  ;;  %v15638_v7 = vld [vmem:[#allocation107_spill] sm:$0xff] }
 0x29c   : > { %7986 = vmatpush3.msra.mxu0 %v15602_v50  ;;  %8030 = vmatpush3.msra.mxu1 %v15603_v27  ;;  %v2823_v11 = vmul.f32 %v15638_v7, %v15638_v7  ;;  %v15639_v50 = vld [vmem:[#allocation104_spill] sm:$0xff]  ;;  %v15640_v27 = vld [vmem:[#allocation105_spill] sm:$0xff] }
 0x29d   : > { %7987 = vmatprep.subr.mxu0 %v15604_v46  ;;  %8031 = vmatprep.subr.mxu1 %v15605_v13  ;;  %v13471_v46 = vpop.f32.mrf.mxu1  ;;  %v13473_v13 = vpop.f32.mrf.mxu0 }
 0x29e   : > { %7988 = vmatpush3.msra.mxu0 %v15606_v32  ;;  %8032 = vmatpush3.msra.mxu1 %v15608_v20  ;;  %v15641_v32 = vld [vmem:[#allocation118_spill] sm:$0xff]  ;;  %v15643_v20 = vld [vmem:[#allocation109_spill] sm:$0xff] }
 0x29f   : > { %7989 = vmatprep.subr.mxu0 %v15609_v9  ;;  %8033 = vmatprep.subr.mxu1 %v15612_v2  ;;  %v2822_v29 = vmul.f32 %v15641_v32, %v15641_v32  ;;  %v15644_v9 = vld [vmem:[#allocation116_spill] sm:$0xff]  ;;  %v13482_v54 = vpop.f32.mrf.mxu1  ;;  %v15647_v2 = vld [vmem:[#allocation119_spill] sm:$0xff]  ;;  %v13489_v25 = vpop.f32.mrf.mxu0  ;;  %v15674_v32 = vld [vmem:[#allocation146_spill] sm:$0xff] }
 0x2a0   : > { %7990 = vmatpush3.msra.mxu0 %v15613_v5  ;;  %8034 = vmatpush3.msra.mxu1 %v15614_v31  ;;  %v2837_v52 = vmul.f32 %v15644_v9, %v15644_v9  ;;  %v2836_v5 = vmul.f32 %v15647_v2, %v15647_v2  ;;  %v15648_v31 = vld [vmem:[#allocation114_spill] sm:$0xff]  ;;  %v15680_v2 = vld [vmem:[#allocation149_spill] sm:$0xff] }
 0x2a1   : > { %7991 = vmatprep.subr.mxu0 %v15615_v14  ;;  %8035 = vmatprep.subr.mxu1 %v15617_v28  ;;  %v15649_v14 = vld [vmem:[#allocation117_spill] sm:$0xff]  ;;  %v13495_v26 = vpop.f32.mrf.mxu1  ;;  %v15677_v9 = vld [vmem:[#allocation150_spill] sm:$0xff] }
 0x2a2   : > { %7992 = vmatpush3.msra.mxu0 %v15618_v10  ;;  %3248 = vmatprep.mubr.f32.mxu0 %v2789_v19  ;;  %v15642_v19 = vld [vmem:[#allocation106_spill] sm:$0xff] }
 0x2a3   : > { %8036 = vmatpush3.msra.mxu1 %v15619_v22  ;;  %3249 = vmatmul.mubr.f32.vlgmr.msra.gmra.mxu0 %v2788_v61  ;;  %v15645_v61 = vld [vmem:[#allocation115_spill] sm:$0xff]  ;;  %v15651_v10 = vld [vmem:[#allocation122_spill] sm:$0xff]  ;;  %v15652_v22 = vld [vmem:[#allocation120_spill] sm:$0xff] }
 0x2a4   : > { %3333 = vmatprep.mubr.f32.mxu1 %v2791_v39  ;;  %8049 = vmatprep.subr.mxu0 %v15621_v6  ;;  %v15646_v39 = vld [vmem:[#allocation113_spill] sm:$0xff] }
 0x2a5   : > { %8093 = vmatprep.subr.mxu1 %v15622_v0  ;;  %3334 = vmatmul.mubr.f32.vlgmr.msra.gmra.mxu1 %v2790_v8  ;;  %v15650_v8 = vld [vmem:[#allocation126_spill] sm:$0xff]  ;;  %v15654_v0 = vld [vmem:[#allocation121_spill] sm:$0xff] }
 0x2a6   : > { %8050 = vmatpush3.msra.mxu0 %v15624_v37  ;;  %8094 = vmatpush3.msra.mxu1 %v15626_v1  ;;  %v2839_v28 = vmul.f32 %v15650_v8, %v15650_v8  ;;  %v13502_v37 = vpop.f32.mrf.mxu0  ;;  %v15659_v1 = vld [vmem:[#allocation127_spill] sm:$0xff]  ;;  %v15683_v8 = vld [vmem:[#allocation153_spill] sm:$0xff] }
 0x2a7   : > { %8051 = vmatprep.subr.mxu0 %v15627_v40  ;;  %8095 = vmatprep.subr.mxu1 %v15628_v24  ;;  %v13507_v40 = vpop.f32.mrf.mxu1  ;;  %v15660_v24 = vld [vmem:[#allocation129_spill] sm:$0xff] }
 0x2a8   : > { %3253 = vmatprep.mubr.f32.mxu0 %v2805_v18  ;;  %8052 = vmatpush3.msra.mxu0 %v15630_v42  ;;  %v15653_v18 = vld [vmem:[#allocation125_spill] sm:$0xff]  ;;  %v13512_v42 = vpop.f32.mrf.mxu0 }
 0x2a9   : > { %8096 = vmatpush3.msra.mxu1 %v15631_v44  ;;  %3254 = vmatmul.mubr.f32.gmra.mxu0 %v2804_v41  ;;  %v2838_v6 = vmul.f32 %v15653_v18, %v15653_v18  ;;  %v15656_v41 = vld [vmem:[#allocation128_spill] sm:$0xff] }
 0x2aa   : > { %8053 = vmatprep.subr.mxu0 %v15633_v55  ;;  %8097 = vmatprep.subr.mxu1 %v15634_v35  ;;  %v15663_v44 = vld [vmem:[#allocation132_spill] sm:$0xff]  ;;  %v15666_v55 = vld [vmem:[#allocation135_spill] sm:$0xff]  ;;  %v13518_v35 = vpop.f32.mrf.mxu1  ;;  %v13524_v7 = vpop.f32.mrf.mxu0 }
 0x2ab   : > { %3338 = vmatprep.mubr.f32.mxu1 %v2807_v38  ;;  %8054 = vmatpush3.msra.mxu0 %v15636_v17  ;;  %v15658_v38 = vld [vmem:[#allocation131_spill] sm:$0xff]  ;;  %v15669_v17 = vld [vmem:[#allocation137_spill] sm:$0xff] }
 0x2ac   : > { %8098 = vmatpush3.msra.mxu1 %v15637_v63  ;;  %8055 = vmatprep.subr.mxu0 %v15639_v50  ;;  %v15670_v63 = vld [vmem:[#allocation143_spill] sm:$0xff]  ;;  %v15672_v50 = vld [vmem:[#allocation141_spill] sm:$0xff] }
 0x2ad   : > { %3339 = vmatmul.mubr.f32.gmra.mxu1 %v2806_v30  ;;  %8099 = vmatprep.subr.mxu1 %v15640_v27  ;;  %v15662_v30 = vld [vmem:[#allocation134_spill] sm:$0xff] }
 0x2ae   : > { %3258 = vmatprep.mubr.f32.mxu0 %v2821_v48  ;;  %8056 = vmatpush3.msra.mxu0 %v15642_v19  ;;  %v15665_v48 = vld [vmem:[#allocation138_spill] sm:$0xff]  ;;  %v15675_v19 = vld [vmem:[#allocation144_spill] sm:$0xff] }
 0x2af   : > { %8100 = vmatpush3.msra.mxu1 %v15643_v20  ;;  %3259 = vmatmul.mubr.f32.gmra.mxu0 %v2820_v16  ;;  %v15668_v16 = vld [vmem:[#allocation136_spill] sm:$0xff]  ;;  %v15673_v27 = vld [vmem:[#allocation142_spill] sm:$0xff]  ;;  %v15676_v20 = vld [vmem:[#allocation145_spill] sm:$0xff] }
 0x2b0   : > { %8057 = vmatprep.subr.mxu0 %v15645_v61  ;;  %8101 = vmatprep.subr.mxu1 %v15646_v39  ;;  %v13536_v61 = vpop.f32.mrf.mxu0  ;;  %v15679_v39 = vld [vmem:[#allocation148_spill] sm:$0xff] }
 0x2b1   : > { %3343 = vmatprep.mubr.f32.mxu1 %v2823_v11  ;;  %8058 = vmatpush3.msra.mxu0 %v15648_v31  ;;  %v15671_v11 = vld [vmem:[#allocation139_spill] sm:$0xff]  ;;  %v15682_v31 = vld [vmem:[#allocation152_spill] sm:$0xff] }
 0x2b2   : > { %8102 = vmatpush3.msra.mxu1 %v15649_v14  ;;  %8059 = vmatprep.subr.mxu0 %v15651_v10  ;;  %v15685_v10 = vld [vmem:[#allocation155_spill] sm:$0xff]  ;;  %v13548_v18 = vpop.f32.mrf.mxu0 }
 0x2b3   : > { %3344 = vmatmul.mubr.f32.gmra.mxu1 %v2822_v29  ;;  %8103 = vmatprep.subr.mxu1 %v15652_v22  ;;  %v13530_v29 = vpop.f32.mrf.mxu1  ;;  %v15686_v22 = vld [vmem:[#allocation156_spill] sm:$0xff] }
 0x2b4   : > { %3263 = vmatprep.mubr.f32.mxu0 %v2837_v52  ;;  %8060 = vmatpush3.msra.mxu0 %v15654_v0  ;;  %v15678_v52 = vld [vmem:[#allocation147_spill] sm:$0xff] }
 0x2b5   : > { %8104 = vmatpush3.msra.mxu1 %v15655_v51  ;;  %3264 = vmatmul.mubr.f32.gmra.mxu0 %v2836_v5  ;;  %v15681_v5 = vld [vmem:[#allocation151_spill] sm:$0xff]  ;;  %v13542_v14 = vpop.f32.mrf.mxu1  ;;  %v15688_v51 = vld [vmem:[#allocation157_spill] sm:$0xff] }
 0x2b6   : > { %8061 = vmatprep.subr.mxu0 %v15656_v41  ;;  %8105 = vmatprep.subr.mxu1 %v15657_v47  ;;  %v15689_v41 = vld [vmem:[#allocation158_spill] sm:$0xff]  ;;  %v15690_v47 = vld [vmem:[#allocation163_spill] sm:$0xff] }
 0x2b7   : > { %3348 = vmatprep.mubr.f32.mxu1 %v2839_v28  ;;  %8062 = vmatpush3.msra.mxu0 %v15658_v38  ;;  %v15684_v28 = vld [vmem:[#allocation154_spill] sm:$0xff]  ;;  %v2792_v38 = vmul.f32 %v15690_v47, %v15690_v47 }
 0x2b8   : > { %8106 = vmatpush3.msra.mxu1 %v15659_v1  ;;  %8063 = vmatprep.subr.mxu0 %v15660_v24  ;;  %v15691_v1 = vld [vmem:[#allocation166_spill] sm:$0xff] }
 0x2b9   : > { %3349 = vmatmul.mubr.f32.gmra.mxu1 %v2838_v6  ;;  %8107 = vmatprep.subr.mxu1 %v15661_v45  ;;  %v15687_v6 = vld [vmem:[#allocation160_spill] sm:$0xff]  ;;  %v2795_v24 = vmul.f32 %v15691_v1, %v15691_v1  ;;  %v15692_v45 = vld [vmem:[#allocation159_spill] sm:$0xff] }
 0x2ba   : > { %8064 = vmatpush3.msra.mxu0 %v15662_v30  ;;  %8108 = vmatpush3.msra.mxu1 %v15663_v44  ;;  %v2793_v0 = vmul.f32 %v15687_v6, %v15687_v6  ;;  %v15693_v30 = vld [vmem:[#allocation161_spill] sm:$0xff]  ;;  %v13560_v44 = vpop.f32.mrf.mxu1  ;;  %v15706_v6 = vld [vmem:[#allocation175_spill] sm:$0xff] }
 0x2bb   : > { %8065 = vmatprep.subr.mxu0 %v15664_v57  ;;  %8109 = vmatprep.subr.mxu1 %v15665_v48  ;;  %v15694_v57 = vld [vmem:[#allocation168_spill] sm:$0xff] }
 0x2bc   : > { %8066 = vmatpush3.msra.mxu0 %v15666_v55  ;;  %8110 = vmatpush3.msra.mxu1 %v15667_v34  ;;  %v2794_v48 = vmul.f32 %v15694_v57, %v15694_v57  ;;  %v15695_v55 = vld [vmem:[#allocation170_spill] sm:$0xff]  ;;  %v15710_v57 = vld [vmem:[#allocation179_spill] sm:$0xff] }
 0x2bd   : > { %8067 = vmatprep.subr.mxu0 %v15668_v16  ;;  %8111 = vmatprep.subr.mxu1 %v15669_v17  ;;  %v2809_v34 = vmul.f32 %v15695_v55, %v15695_v55  ;;  %v15696_v16 = vld [vmem:[#allocation162_spill] sm:$0xff]  ;;  %v15697_v17 = vld [vmem:[#allocation164_spill] sm:$0xff] }
 0x2be   : > { %8068 = vmatpush3.msra.mxu0 %v15670_v63  ;;  %8112 = vmatpush3.msra.mxu1 %v15671_v11  ;;  %v15698_v63 = vld [vmem:[#allocation172_spill] sm:$0xff] }
 0x2bf   : > { %8069 = vmatprep.subr.mxu0 %v15672_v50  ;;  %8113 = vmatprep.subr.mxu1 %v15673_v27  ;;  %v2811_v11 = vmul.f32 %v15698_v63, %v15698_v63  ;;  %v15699_v50 = vld [vmem:[#allocation165_spill] sm:$0xff]  ;;  %v15700_v27 = vld [vmem:[#allocation167_spill] sm:$0xff] }
 0x2c0   : > { %8070 = vmatpush3.msra.mxu0 %v15674_v32  ;;  %8114 = vmatpush3.msra.mxu1 %v15675_v19  ;;  %v13572_v32 = vpop.f32.mrf.mxu0  ;;  %v15701_v19 = vld [vmem:[#allocation169_spill] sm:$0xff] }
 0x2c1   : > { %8071 = vmatprep.subr.mxu0 %v15676_v20  ;;  %8115 = vmatprep.subr.mxu1 %v15677_v9  ;;  %v15702_v20 = vld [vmem:[#allocation171_spill] sm:$0xff] }
 0x2c2   : > { %8072 = vmatpush3.msra.mxu0 %v15678_v52  ;;  %8116 = vmatpush3.msra.mxu1 %v15679_v39  ;;  %v2808_v9 = vmul.f32 %v15702_v20, %v15702_v20  ;;  %v13577_v52 = vpop.f32.mrf.mxu1  ;;  %v7641_v39 = vpop.f32.mrf.mxu0 }
 0x2c3   : > { %8073 = vmatprep.subr.mxu0 %v15680_v2  ;;  %8117 = vmatprep.subr.mxu1 %v15681_v5  ;;  %v15703_v2 = vld [vmem:[#allocation173_spill] sm:$0xff] }
 0x2c4   : > { %8074 = vmatpush3.msra.mxu0 %v15682_v31  ;;  %8118 = vmatpush3.msra.mxu1 %v15683_v8  ;;  %v2810_v5 = vmul.f32 %v15703_v2, %v15703_v2  ;;  %v15704_v31 = vld [vmem:[#allocation174_spill] sm:$0xff] }
 0x2c5   : > { %8075 = vmatprep.subr.mxu0 %v15684_v28  ;;  %8119 = vmatprep.subr.mxu1 %v15685_v10  ;;  %v2825_v8 = vmul.f32 %v15704_v31, %v15704_v31  ;;  %v15705_v28 = vld [vmem:[#allocation176_spill] sm:$0xff] }
 0x2c6   : > { %8076 = vmatpush3.msra.mxu0 %v15686_v22  ;;  %8120 = vmatpush3.msra.mxu1 %v15688_v51  ;;  %v2827_v10 = vmul.f32 %v15705_v28, %v15705_v28  ;;  %v7685_v22 = vpop.f32.mrf.mxu1  ;;  %v7642_v51 = vpop.f32.mrf.mxu0  ;;  %v7514_v28 = vadd.f32 %v13410_v62, %v13398_v12  ;;  %v7602_v62 = vadd.f32 %v13518_v35, %v13507_v40 }
 0x2c7   : > { %8077 = vmatprep.subr.mxu0 %v15689_v41  ;;  %8121 = vmatprep.subr.mxu1 %v15692_v45  ;;  %v15707_v41 = vld [vmem:[#allocation177_spill] sm:$0xff]  ;;  %v7605_v35 = vadd.f32 %v13542_v14, %v13530_v29 }
 0x2c8   : > { %8078 = vmatpush3.msra.mxu0 %v15693_v30  ;;  %8122 = vmatpush3.msra.mxu1 %v15696_v16  ;;  %v2826_v47 = vmul.f32 %v15707_v41, %v15707_v41  ;;  %v7686_v30 = vpop.f32.mrf.mxu1  ;;  %v7644_v55 = vpop.f32.mrf.mxu0 }
 0x2c9   : > { %8079 = vmatprep.subr.mxu0 %v15697_v17  ;;  %8123 = vmatprep.subr.mxu1 %v15699_v50 }
 0x2ca   : > { %8080 = vmatpush3.msra.mxu0 %v15700_v27  ;;  %3418 = vmatprep.mubr.f32.mxu0 %v2793_v0  ;;  %v2824_v0 = vmul.f32 %v15706_v6, %v15706_v6  ;;  %v7688_v17 = vpop.f32.mrf.mxu1  ;;  %v7645_v63 = vpop.f32.mrf.mxu0  ;;  %v7467_v27 = vadd.f32 %v13380_v58, %v13368_v43  ;;  %v7599_v43 = vadd.f32 %v13495_v26, %v13482_v54 }
 0x2cb   : > { %8124 = vmatpush3.msra.mxu1 %v15701_v19  ;;  %3503 = vmatprep.mubr.f32.mxu1 %v2795_v24  ;;  %v15709_v24 = vld [vmem:[#allocation180_spill] sm:$0xff]  ;;  %v7511_v19 = vadd.f32 %v13392_v59, %v13378_v53  ;;  %v7558_v53 = vadd.f32 %v13512_v42, %v13502_v37  ;;  %v7643_v59 = vadd.f32 %v7642_v51, %v7641_v39 }
 0x2cc   : > { %3419 = vmatmul.mubr.f32.vlgmr.msra.gmra.mxu0 %v2792_v38  ;;  %3504 = vmatmul.mubr.f32.vlgmr.msra.gmra.mxu1 %v2794_v48  ;;  %v15708_v38 = vld [vmem:[#allocation178_spill] sm:$0xff]  ;;  %v2843_v45 = vmul.f32 %v15709_v24, %v15709_v24  ;;  %v2840_v48 = vmul.f32 %v15710_v57, %v15710_v57  ;;  %v7687_v26 = vadd.f32 %v7686_v30, %v7685_v22 }
 0x2cd   : > { %3423 = vmatprep.mubr.f32.mxu0 %v2809_v34  ;;  %3508 = vmatprep.mubr.f32.mxu1 %v2811_v11  ;;  %v2841_v1 = vmul.f32 %v15708_v38, %v15708_v38  ;;  %v15711_v34 = vld [vmem:[#allocation181_spill] sm:$0xff]  ;;  %v7689_v11 = vpop.f32.mrf.mxu1  ;;  %v7647_v50 = vpop.f32.mrf.mxu0  ;;  %v7561_v37 = vadd.f32 %v13536_v61, %v13524_v7  ;;  %v7646_v51 = vadd.f32 %v7645_v63, %v7644_v55 }
 0x2ce   : > { %v2842_v16 = vmul.f32 %v15711_v34, %v15711_v34  ;;  %v7690_v22 = vadd.f32 %v7689_v11, %v7688_v17  ;;  %v7564_v30 = vadd.f32 %v13572_v32, %v13548_v18 }
 0x2cf   : > { %v7648_v2 = vpop.f32.mrf.mxu0 }
 0x2d0   : > { %3424 = vmatmul.mubr.f32.gmra.mxu0 %v2808_v9  ;;  %3509 = vmatmul.mubr.f32.gmra.mxu1 %v2810_v5  ;;  %v7691_v20 = vpop.f32.mrf.mxu1  ;;  %v7555_v9 = vadd.f32 %v13489_v25, %v13473_v13  ;;  %v2252_v5 = vadd.f32 %v7511_v19, %v7467_v27 }
 0x2d1   : > { %3428 = vmatprep.mubr.f32.mxu0 %v2825_v8  ;;  %3513 = vmatprep.mubr.f32.mxu1 %v2827_v10  ;;  %v7470_v8 = vadd.f32 %v13400_v60, %v13386_v3  ;;  %v7517_v3 = vadd.f32 %v13442_v4, %v13430_v15  ;;  %v7476_v15 = vadd.f32 %v13460_v23, %v13444_v33 }
 0x2d2   : > { %v7692_v31 = vpop.f32.mrf.mxu1  ;;  %v2337_v10 = vadd.f32 %v7555_v9, %v2252_v5  ;;  %v7520_v4 = vadd.f32 %v13471_v46, %v13458_v36 }
 0x2d3   : > { %v7650_v58 = vpop.f32.mrf.mxu0  ;;  %v2257_v13 = vadd.f32 %v7514_v28, %v7470_v8  ;;  %v7693_v18 = vadd.f32 %v7692_v31, %v7691_v20 }
 0x2d4   : > { %3429 = vmatmul.mubr.f32.gmra.mxu0 %v2824_v0  ;;  %3514 = vmatmul.mubr.f32.gmra.mxu1 %v2826_v47  ;;  %v2422_v25 = vadd.f32 %v7599_v43, %v2337_v10  ;;  %v7473_v0 = vadd.f32 %v13432_v21, %v13412_v56  ;;  %v2267_v33 = vadd.f32 %v7520_v4, %v7476_v15 }
 0x2d5   : > { %3433 = vmatprep.mubr.f32.mxu0 %v2841_v1  ;;  %3518 = vmatprep.mubr.f32.mxu1 %v2843_v45  ;;  %v7651_v60 = vpop.f32.mrf.mxu0  ;;  %v2342_v12 = vadd.f32 %v7558_v53, %v2257_v13 }
 0x2d6   : > { %v7694_v6 = vpop.f32.mrf.mxu1  ;;  %v2507_v54 = vadd.f32 %v7643_v59, %v2422_v25  ;;  %v2262_v41 = vadd.f32 %v7517_v3, %v7473_v0  ;;  %v2352_v29 = vadd.f32 %v7564_v30, %v2267_v33 }
 0x2d7   : > { %v2427_v56 = vadd.f32 %v7602_v62, %v2342_v12  ;;  %v3608_v12 = vpop.permute.xlu0 %3607 }
 0x2d8   : > { %3434 = vmatmul.mubr.f32.gmra.mxu0 %v2840_v48  ;;  %3519 = vmatmul.mubr.f32.gmra.mxu1 %v2842_v16  ;;  %v7695_v42 = vpop.f32.mrf.mxu1  ;;  %v2592_v21 = vadd.f32 %v7687_v26, %v2507_v54  ;;  %v2347_v40 = vadd.f32 %v7561_v37, %v2262_v41  ;;  %v7649_v48 = vadd.f32 %v7648_v2, %v7647_v50  ;;  %v13651_v54 = vpop.permute.xlu1 %3611 }
 0x2d9   : > { %v2512_v61 = vadd.f32 %v7646_v51, %v2427_v56  ;;  %v7608_v16 = vadd.f32 %v13577_v52, %v13560_v44  ;;  %v7652_v50 = vadd.f32 %v7651_v60, %v7650_v58  ;;  %v7696_v43 = vadd.f32 %v7695_v42, %v7694_v6  ;;  %8196 = vmatprep.mubr.msk.f32.mxu1 %vm3736_vm0, %v3608_v12 }
 0x2da   : > { %v2432_v34 = vadd.f32 %v7605_v35, %v2347_v40  ;;  %15716 = vst [vmem:[#allocation190_spill] sm:$0xff] %v13651_v54 }
 0x2db   : > { %v2597_v36 = vadd.f32 %v7690_v22, %v2512_v61  ;;  %v2437_v9 = vadd.f32 %v7608_v16, %v2352_v29  ;;  %v13648_v62 = vpop.permute.xlu0 %3609 }
 0x2dc   : > { %v2517_v17 = vadd.f32 %v7649_v48, %v2432_v34  ;;  %v13654_v26 = vpop.permute.xlu1 %3613 }
 0x2dd   : > { %v2522_v10 = vadd.f32 %v7652_v50, %v2437_v9  ;;  %15717 = vst [vmem:[#allocation191_spill] sm:$0xff] %v13654_v26 }
 0x2de   : > { %v2602_v2 = vadd.f32 %v7693_v18, %v2517_v17 }
 0x2df   : > { %v2607_v59 = vadd.f32 %v7696_v43, %v2522_v10 }
 0x2ea   : > { %v7729_v39 = vpop.f32.mrf.mxu0 }
 0x2eb   : > { %v7773_v47 = vpop.f32.mrf.mxu1 }
 0x2ec   : > { %v7730_v38 = vpop.f32.mrf.mxu0 }
 0x2ed   : > { %v7731_v1 = vadd.f32 %v7730_v38, %v7729_v39  ;;  %v7774_v7 = vpop.f32.mrf.mxu1 }
 0x2ee   : > { %v7775_v45 = vadd.f32 %v7774_v7, %v7773_v47 }
 0x2ef   : > { %v2677_v24 = vadd.f32 %v7731_v1, %v2592_v21  ;;  %v7732_v57 = vpop.f32.mrf.mxu0 }
 0x2f1   : > { %v13627_v55 = vadd.f32 %v7775_v45, %v2677_v24  ;;  %v7733_v23 = vpop.f32.mrf.mxu0 }
 0x2f2   : > { %v7734_v46 = vadd.f32 %v7733_v23, %v7732_v57  ;;  %v7776_v14 = vpop.f32.mrf.mxu1 }
 0x2f3   : > { %15712 = vst [vmem:[#allocation186_spill] sm:$0xff] %v13627_v55  ;;  %3544 = vrot.lane.b32.xlu0 %v13627_v55, %s8916_s14 }
 0x2f4   : > { %v2682_v32 = vadd.f32 %v7734_v46, %v2597_v36  ;;  %v7777_v11 = vpop.f32.mrf.mxu1 }
 0x2f5   : > { %v7735_v63 = vpop.f32.mrf.mxu0  ;;  %v7778_v27 = vadd.f32 %v7777_v11, %v7776_v14 }
 0x2f7   : > { %v7736_v19 = vpop.f32.mrf.mxu0  ;;  %v13633_v5 = vadd.f32 %v7778_v27, %v2682_v32 }
 0x2f8   : > { %v7737_v8 = vadd.f32 %v7736_v19, %v7735_v63 }
 0x2f9   : > { %15713 = vst [vmem:[#allocation187_spill] sm:$0xff] %v13633_v5  ;;  %v7779_v28 = vpop.f32.mrf.mxu1  ;;  %3546 = vrot.lane.b32.xlu0 %v13633_v5, %s8916_s14 }
 0x2fa   : > { %v2687_v53 = vadd.f32 %v7737_v8, %v2602_v2 }
 0x2fb   : > { %v7738_v44 = vpop.f32.mrf.mxu0  ;;  %v7780_v52 = vpop.f32.mrf.mxu1 }
 0x2fc   : > { %v7781_v20 = vadd.f32 %v7780_v52, %v7779_v28 }
 0x2fd   : > { %v7739_v31 = vpop.f32.mrf.mxu0 }
 0x2fe   : > { %v13637_v58 = vadd.f32 %v7781_v20, %v2687_v53  ;;  %v7740_v13 = vadd.f32 %v7739_v31, %v7738_v44 }
 0x2ff   : > { %v7782_v25 = vpop.f32.mrf.mxu1 }
 0x300   : > { %15714 = vst [vmem:[#allocation188_spill] sm:$0xff] %v13637_v58  ;;  %v2692_v0 = vadd.f32 %v7740_v13, %v2607_v59  ;;  %3548 = vrot.lane.b32.xlu0 %v13637_v58, %s8916_s14 }
 0x301   : > { %v7783_v3 = vpop.f32.mrf.mxu1 }
 0x302   : > { %v7784_v60 = vadd.f32 %v7783_v3, %v7782_v25 }
 0x304   : > { %v13641_v6 = vadd.f32 %v7784_v60, %v2692_v0  ;;  %3560 = vrot.lane.b32.xlu0 %v13013_v49, %s8915_s26 }
 0x306   : > { %15715 = vst [vmem:[#allocation189_spill] sm:$0xff] %v13641_v6  ;;  %3550 = vrot.lane.b32.xlu1 %v13641_v6, %s8916_s14 }
 0x312   : > { %v13657_v49 = vpop.f32.mrf.mxu0 }
 0x313   : > { %v13659_v37 = vpop.f32.mrf.mxu1 }
 0x314   : > { %v13661_v42 = vpop.f32.mrf.mxu0 }
 0x315   : > { %v13663_v51 = vpop.f32.mrf.mxu1 }
 0x322   : > { %3619 = vxpose.xlu0.b32.start [1/4] (short) (narrow) %v3608_v12, 8 }
 0x326   : > { %3620 = vxpose.xlu0.b32.cont [2/4] (short) (narrow) %v13648_v62, 8 }
 0x327   : > { %v7820_v39 = vpop.f32.mrf.mxu0 }
 0x328   : > { %v7864_v41 = vpop.f32.mrf.mxu1 }
 0x329   : > { %v7821_v47 = vpop.f32.mrf.mxu0 }
 0x32a   : > { %3621 = vxpose.xlu0.b32.cont [3/4] (short) (narrow) %v13651_v54, 8  ;;  %v7865_v38 = vpop.f32.mrf.mxu1  ;;  %v7822_v3 = vadd.f32 %v7821_v47, %v7820_v39  ;;  %v7863_v39 = vadd.f32 %v13663_v51, %v13659_v37  ;;  %v8917_v37 = vmov 0.0  }
 0x32b   : > { %v7866_v60 = vadd.f32 %v7865_v38, %v7864_v41  ;;  %8183 = vmatprep.subr.mxu0 %v8917_v37  ;;  %8191 = vmatprep.mubr.msk.f32.mxu0 %vm8919_vm1, %v8917_v37 }
 0x32d   : > { %v7823_v56 = vpop.f32.mrf.mxu0  ;;  %v3001_v41 = vadd.f32 %v7866_v60, %v7822_v3 }
 0x32e   : > { %3622 = vxpose.xlu0.b32.end [4/4] (short) (narrow) %v13654_v26, 8  ;;  %v7867_v21 = vpop.f32.mrf.mxu1 }
 0x32f   : > { %v7824_v1 = vpop.f32.mrf.mxu0 }
 0x330   : > { %v7868_v15 = vpop.f32.mrf.mxu1  ;;  %v7825_v53 = vadd.f32 %v7824_v1, %v7823_v56 }
 0x331   : > { %v7869_v44 = vadd.f32 %v7868_v15, %v7867_v21  ;;  %v7819_v15 = vadd.f32 %v13661_v42, %v13657_v49 }
 0x333   : > { %v7826_v4 = vpop.f32.mrf.mxu0  ;;  %v3006_v59 = vadd.f32 %v7869_v44, %v7825_v53 }
 0x334   : > { %v7870_v40 = vpop.f32.mrf.mxu1 }
 0x335   : > { %v7827_v35 = vpop.f32.mrf.mxu0 }
 0x336   : > { %v7871_v7 = vpop.f32.mrf.mxu1  ;;  %v7828_v13 = vadd.f32 %v7827_v35, %v7826_v4 }
 0x337   : > { %v7872_v25 = vadd.f32 %v7871_v7, %v7870_v40 }
 0x339   : > { %v3011_v56 = vadd.f32 %v7872_v25, %v7828_v13 }
 0x33a   : > { %v7905_v61 = vpop.f32.mrf.mxu0 }
 0x33c   : > { %v13665_v22 = vpop.f32.mrf.mxu1  ;;  %v7906_v24 = vpop.f32.mrf.mxu0 }
 0x33d   : > { %v7907_v7 = vadd.f32 %v7906_v24, %v7905_v61 }
 0x33e   : > { %v13667_v45 = vpop.f32.mrf.mxu1 }
 0x340   : > { %v7908_v30 = vpop.f32.mrf.mxu0 }
 0x342   : > { %v7909_v48 = vpop.f32.mrf.mxu0 }
 0x343   : > { %v7952_v57 = vpop.f32.mrf.mxu1  ;;  %v7910_v26 = vadd.f32 %v7909_v48, %v7908_v30 }
 0x345   : > { %v7953_v33 = vpop.f32.mrf.mxu1 }
 0x346   : > { %v7911_v23 = vpop.f32.mrf.mxu0  ;;  %v7954_v30 = vadd.f32 %v7953_v33, %v7952_v57 }
 0x348   : > { %v7912_v36 = vpop.f32.mrf.mxu0 }
 0x349   : > { %v7955_v34 = vpop.f32.mrf.mxu1  ;;  %v7913_v20 = vadd.f32 %v7912_v36, %v7911_v23  ;;  %v3086_v23 = vadd.f32 %v7910_v26, %v3001_v41 }
 0x34b   : > { %v7956_v46 = vpop.f32.mrf.mxu1  ;;  %v3091_v55 = vadd.f32 %v7913_v20, %v3006_v59 }
 0x34c   : > { %v7914_v29 = vpop.f32.mrf.mxu0  ;;  %v7957_v58 = vadd.f32 %v7956_v46, %v7955_v34 }
 0x34e   : > { %v7915_v16 = vpop.f32.mrf.mxu0  ;;  %v3176_v38 = vadd.f32 %v7957_v58, %v3091_v55  ;;  %v3171_v58 = vadd.f32 %v7954_v30, %v3086_v23 }
 0x34f   : > { %v7958_v14 = vpop.f32.mrf.mxu1  ;;  %v7916_v5 = vadd.f32 %v7915_v16, %v7914_v29  ;;  %v2996_v16 = vadd.f32 %v7863_v39, %v7819_v15  ;;  %v3535_v15 = vpop.permute.xlu0 %3534 }
 0x351   : > { %v7959_v17 = vpop.f32.mrf.mxu1  ;;  %v3096_v4 = vadd.f32 %v7916_v5, %v3011_v56  ;;  %v3081_v55 = vadd.f32 %v7907_v7, %v2996_v16  ;;  %v7951_v5 = vadd.f32 %v13667_v45, %v13665_v22 }
 0x352   : > { %v7960_v40 = vadd.f32 %v7959_v17, %v7958_v14 }
 0x353   : > { %v3166_v53 = vadd.f32 %v7951_v5, %v3081_v55  ;;  %v3563_v39 = vpop.permute.xlu0 %3562 }
 0x354   : > { %v3181_v49 = vadd.f32 %v7960_v40, %v3096_v4 }
 0x357   : > { %v3565_v41 = vpop.permute.xlu0 %3564 }
 0x363   : > { %v13669_v18 = vpop.f32.mrf.mxu0 }
 0x365   : > { %v13671_v32 = vpop.f32.mrf.mxu1  ;;  %v13673_v63 = vpop.f32.mrf.mxu0 }
 0x366   : > { %v7995_v14 = vadd.f32 %v13673_v63, %v13669_v18 }
 0x367   : > { %v13675_v11 = vpop.f32.mrf.mxu1 }
 0x368   : > { %v8039_v13 = vadd.f32 %v13675_v11, %v13671_v32 }
 0x369   : > { %v7996_v50 = vpop.f32.mrf.mxu0 }
 0x36b   : > { %v7997_v19 = vpop.f32.mrf.mxu0 }
 0x36c   : > { %v7998_v42 = vadd.f32 %v7997_v19, %v7996_v50 }
 0x36d   : > { %v13677_v27 = vpop.f32.mrf.mxu1 }
 0x36e   : > { %v3256_v50 = vadd.f32 %v7998_v42, %v3171_v58 }
 0x36f   : > { %v8041_v9 = vpop.f32.mrf.mxu1  ;;  %v7999_v2 = vpop.f32.mrf.mxu0 }
 0x370   : > { %v8042_v19 = vadd.f32 %v8041_v9, %v13677_v27 }
 0x371   : > { %v8000_v28 = vpop.f32.mrf.mxu0 }
 0x372   : > { %v8001_v21 = vadd.f32 %v8000_v28, %v7999_v2  ;;  %v3341_v25 = vadd.f32 %v8042_v19, %v3256_v50  ;;  %v13732_v50 = vld [vmem:[%s14475_s2 + $0x8] sm:$0xff]  ;;  %v13738_v19 = vld [vmem:[%s14475_s2] sm:$0xff] }
 0x373   : > { %v8043_v8 = vpop.f32.mrf.mxu1 }
 0x374   : > { %v3261_v34 = vadd.f32 %v8001_v21, %v3176_v38  ;;  %v3567_v38 = vpop.permute.xlu0 %3566 }
 0x375   : > { %v8044_v10 = vpop.f32.mrf.mxu1  ;;  %v8002_v43 = vpop.f32.mrf.mxu0 }
 0x376   : > { %v8045_v36 = vadd.f32 %v8044_v10, %v8043_v8 }
 0x377   : > { %v8003_v31 = vpop.f32.mrf.mxu0 }
 0x378   : > { %v8004_v46 = vadd.f32 %v8003_v31, %v8002_v43  ;;  %v3346_v51 = vadd.f32 %v8045_v36, %v3261_v34 }
 0x379   : > { %v8046_v52 = vpop.f32.mrf.mxu1 }
 0x37a   : > { %v3266_v61 = vadd.f32 %v8004_v46, %v3181_v49 }
 0x37b   : > { %v8047_v0 = vpop.f32.mrf.mxu1 }
 0x37c   : > { %v8048_v24 = vadd.f32 %v8047_v0, %v8046_v52  ;;  %v3251_v52 = vadd.f32 %v7995_v14, %v3166_v53  ;;  %v13720_v14 = vld [vmem:[%s14475_s2 + $0x18] sm:$0xff]  ;;  %v13762_v53 = vld [vmem:[%s14475_s2 + $0x20] sm:$0xff] }
 0x37e   : > { %v3351_v22 = vadd.f32 %v8048_v24, %v3266_v61  ;;  %v3336_v3 = vadd.f32 %v8039_v13, %v3251_v52  ;;  %v15718_v52 = vld [vmem:[#allocation190_spill] sm:$0xff]  ;;  %v15719_v13 = vld [vmem:[#allocation191_spill] sm:$0xff] }
 0x38c   : > { %v13679_v12 = vpop.f32.mrf.mxu0  ;;  %v13681_v6 = vpop.f32.mrf.mxu1 }
 0x38e   : > { %v8082_v54 = vpop.f32.mrf.mxu0  ;;  %v13683_v1 = vpop.f32.mrf.mxu1 }
 0x38f   : > { %v8083_v27 = vadd.f32 %v8082_v54, %v13679_v12  ;;  %v8127_v32 = vadd.f32 %v13683_v1, %v13681_v6  ;;  %v3545_v54 = vpop.permute.xlu0 %3544 }
 0x390   : > { %v8084_v47 = vpop.f32.mrf.mxu0  ;;  %v8128_v35 = vpop.f32.mrf.mxu1 }
 0x391   : > { %v3421_v56 = vadd.f32 %v8083_v27, %v3336_v3 }
 0x392   : > { %v8085_v48 = vpop.f32.mrf.mxu0  ;;  %v8129_v29 = vpop.f32.mrf.mxu1 }
 0x393   : > { %v8086_v45 = vadd.f32 %v8085_v48, %v8084_v47  ;;  %v8130_v60 = vadd.f32 %v8129_v29, %v8128_v35  ;;  %v3506_v11 = vadd.f32 %v8127_v32, %v3421_v56  ;;  %v3529_v47 = vpop.permute.xlu1 %3528  ;;  %v3547_v40 = vpop.permute.xlu0 %3546 }
 0x394   : > { %v8087_v2 = vpop.f32.mrf.mxu0  ;;  %v8131_v28 = vpop.f32.mrf.mxu1 }
 0x395   : > { %v3426_v9 = vadd.f32 %v8086_v45, %v3341_v25  ;;  %v8922_v25 = vmov 2  }
 0x396   : > { %v8088_v26 = vpop.f32.mrf.mxu0  ;;  %v8132_v33 = vpop.f32.mrf.mxu1  ;;  %8341 = vset.pattern.permute.xlu0 %v8922_v25 }
 0x397   : > { %v8089_v57 = vadd.f32 %v8088_v26, %v8087_v2  ;;  %v8133_v10 = vadd.f32 %v8132_v33, %v8131_v28  ;;  %v3511_v21 = vadd.f32 %v8130_v60, %v3426_v9  ;;  %v3531_v4 = vpop.permute.xlu1 %3530  ;;  %v3549_v35 = vpop.permute.xlu0 %3548  ;;  %v3589_v28 = vsel %vm3588_vm2, %v3529_v47, %v3545_v54 }
 0x398   : > { %v8090_v17 = vpop.f32.mrf.mxu0  ;;  %v8134_v43 = vpop.f32.mrf.mxu1  ;;  %v3590_v34 = vsel %vm3588_vm2, %v3531_v4, %v3547_v40  ;;  %v8921_v33 = vmov 1  }
 0x399   : > { %v3431_v8 = vadd.f32 %v8089_v57, %v3346_v51  ;;  %v3595_v49 = vsel %vm3593_vm3, %v3590_v34, %v3563_v39  ;;  %8337 = vset.pattern.permute.xlu1 %v8921_v33 }
 0x39a   : > { %v8091_v44 = vpop.f32.mrf.mxu0  ;;  %v8135_v59 = vpop.f32.mrf.mxu1 }
 0x39b   : > { %v3516_v20 = vadd.f32 %v8133_v10, %v3431_v8  ;;  %v8092_v31 = vadd.f32 %v8091_v44, %v8090_v17  ;;  %v8136_v63 = vadd.f32 %v8135_v59, %v8134_v43  ;;  %v3533_v12 = vpop.permute.xlu1 %3532  ;;  %v3561_v16 = vpop.permute.xlu0 %3560  ;;  %v13726_v17 = vld [vmem:[%s14475_s2 + $0x10] sm:$0xff]  ;;  %v13744_v8 = vld [vmem:[%s14475_s2 + $0x38] sm:$0xff]  ;;  %v13756_v43 = vld [vmem:[%s14475_s2 + $0x28] sm:$0xff] }
 0x39c   : > { %v3591_v6 = vsel %vm3588_vm2, %v3533_v12, %v3549_v35  ;;  %v3594_v55 = vsel %vm3593_vm3, %v3589_v28, %v3561_v16  ;;  %v13750_v10 = vld [vmem:[%s14475_s2 + $0x30] sm:$0xff] }
 0x39d   : > { %v3436_v18 = vadd.f32 %v8092_v31, %v3351_v22  ;;  %3580 = vrot.lane.b32.xlu1 %v3516_v20, %s8918_s9  ;;  %v3596_v46 = vsel %vm3593_vm3, %v3591_v6, %v3565_v41  ;;  %v8924_v41 = vmov 0  }
 0x39f   : > { %v3521_v0 = vadd.f32 %v8136_v63, %v3436_v18  ;;  %v3551_v7 = vpop.permute.xlu1 %3550  ;;  %v3635_v58 = vpop.trf.xlu0  ;;  %v8923_v18 = vmov 3  }
 0x3a0   : > { %v3592_v30 = vsel %vm3588_vm2, %v3535_v15, %v3551_v7 }
 0x3a1   : > { %3582 = vrot.lane.b32.xlu1 %v3521_v0, %s8918_s9  ;;  %v3597_v48 = vsel %vm3593_vm3, %v3592_v30, %v3567_v38 }
 0x3a5   : > { %3578 = vrot.lane.b32.xlu1 %v3511_v21, %s8918_s9 }
 0x3a9   : > { %3576 = vrot.lane.b32.xlu1 %v3506_v11, %s8918_s9  ;;  %s8926_s9 = smov [#allocation7]  }
 0x40f   : > { %v3581_v23 = vpop.permute.xlu1 %3580 }
 0x410   : > { %v3601_v29 = vsel %vm3598_vm4, %v3596_v46, %v3581_v23 }
 0x413   : > { %v3583_v1 = vpop.permute.xlu1 %3582 }
 0x414   : > { %v3602_v36 = vsel %vm3598_vm4, %v3597_v48, %v3583_v1 }
 0x415   : > { %8184 = vmatpush3.msra.mxu0 %v3602_v36 }
 0x416   : > { %8185 = vmatprep.subr.mxu0 %v8917_v37 }
 0x417   : > { %v3579_v2 = vpop.permute.xlu1 %3578  ;;  %8186 = vmatpush3.msra.mxu0 %v3601_v29 }
 0x418   : > { %v3600_v42 = vsel %vm3598_vm4, %v3595_v49, %v3579_v2  ;;  %8187 = vmatprep.subr.mxu0 %v8917_v37 }
 0x419   : > { %8188 = vmatpush3.msra.mxu0 %v3600_v42 }
 0x41a   : > { %8189 = vmatprep.subr.mxu0 %v8917_v37 }
 0x41b   : > { %v3577_v5 = vpop.permute.xlu1 %3576 }
 0x41c   : > { %v3599_v26 = vsel %vm3598_vm4, %v3594_v55, %v3577_v5 }
 0x41d   : > { %8190 = vmatpush3.msra.mxu0 %v3599_v26 }
 0x41e   : > { %8192 = vmatmul.mubr.msk.f32.vlgmr.msra.gmra.mxu0 %vm3651_vm5, %v3635_v58  ;;  %v15720_v58 = vld [vmem:[#allocation189_spill] sm:$0xff] }
 0x4de   : > { %v3721_v51 = vpop.f32.mrf.mxu0 }
 0x4df   : > { %v3725_v61 = vmul.f32 0.00012207031, %v3721_v51 }
 0x4e0   : > { %v8193_v24 = vpop.f32.mrf.mxu0 }
 0x4e1   : > { %v3726_v57 = vmul.f32 %v3725_v61, %v3725_v61 }
 0x4e3   : > { %3728 = vrot.lane.b32.xlu1 %v3726_v57, %s8920_s16  ;;  %v15721_v57 = vld [vmem:[#allocation187_spill] sm:$0xff]  ;;  %s8843_s16 = sshll.u32 %s8926_s9, 4  ;;  %s8844_s16 = int_to_ptr.vmem [resolvable:$false] %s8843_s16 }
 0x4e4   : > { %s8845_s7 = scalar_lea.vmem %s8844_s16, 32768 }
 0x4e7   : > { %3843 = vperm.xlu1 %8337, %v13720_v14  }
 0x4eb   : > { %3839 = vperm.xlu1 %8337, %v13726_v17  }
 0x4ef   : > { %3835 = vperm.xlu1 %8337, %v13732_v50  }
 0x4f3   : > { %3831 = vperm.xlu1 %8337, %v13738_v19  }
 0x4f7   : > { %3887 = vperm.xlu1 %8337, %v13744_v8  }
 0x4fb   : > { %3882 = vperm.xlu1 %8337, %v13750_v10  }
 0x4ff   : > { %3877 = vperm.xlu1 %8337, %v13756_v43  }
 0x503   : > { %3872 = vperm.xlu1 %8337, %v13762_v53  }
 0x507   : > { %8338 = vset.pattern.permute.xlu1 %v8923_v18 }
 0x555   : > { %v3729_v44 = vpop.permute.xlu1 %3728 }
 0x556   : > { %v3731_v22 = vsub.f32 %v3725_v61, %v3729_v44  ;;  %v15722_v44 = vld [vmem:[#allocation188_spill] sm:$0xff] }
 0x558   : > { %v3732_v45 = vmax.f32 %v3731_v22, 0.0 }
 0x55a   : > { %v3733_v20 = vadd.f32 1e-05, %v3732_v45 }
 0x55c   : > { %8346 = vrsqrt.f32 %v3733_v20 }
 0x562   : > { %v3844_v63 = vpop.permute.xlu1 %3843 }
 0x566   : > { %v3840_v27 = vpop.permute.xlu1 %3839 }
 0x569   : > { %v8347_v31 = vpop.eup %8346 }
 0x56a   : > { %v3735_v59 = vsel %vm3593_vm3, %v3725_v61, %v8347_v31  ;;  %v3836_v9 = vpop.permute.xlu1 %3835  ;;  %v4006_v61 = vld [vmem:[%s14474_s1] sm:$0xff] }
 0x56b   : > { %8194 = vmatprep.subr.mxu1 %v3735_v59  ;;  %8210 = vmatprep.mubr.msk.f32.mxu0 %vm3651_vm5, %v4006_v61 }
 0x56c   : > { %8195 = vmatpush3.msra.mxu1 %v3735_v59  ;;  %v15723_v59 = vld [vmem:[#allocation186_spill] sm:$0xff] }
 0x56d   : > { %8197 = vmatmul.mubr.msk.f32.vlgmr.msra.gmra.mxu1 %vm3736_vm0, %v13648_v62 }
 0x56e   : > { %8199 = vmatprep.mubr.msk.f32.mxu1 %vm3736_vm0, %v15718_v52  ;;  %v3832_v15 = vpop.permute.xlu1 %3831 }
 0x571   : > { %8200 = vmatmul.mubr.msk.f32.gmra.mxu1 %vm3736_vm0, %v15719_v13 }
 0x572   : > { %v3888_v54 = vpop.permute.xlu1 %3887 }
 0x576   : > { %v3883_v12 = vpop.permute.xlu1 %3882 }
 0x57a   : > { %v3878_v40 = vpop.permute.xlu1 %3877 }
 0x57e   : > { %v3873_v7 = vpop.permute.xlu1 %3872 }
 0x62d   : > { %v8198_v0 = vpop.f32.mrf.mxu1 }
 0x62e   : > { %v3847_v3 = vmul.f32 %v8198_v0, %v3836_v9 }
 0x62f   : > { %v3811_v60 = vpop.f32.mrf.mxu1 }
 0x630   : > { %3856 = vrot.lane.b32.xlu0 %v3847_v3, %s8913_s29  ;;  %v3846_v39 = vmul.f32 %v3832_v15, %v3811_v60  ;;  %v3895_v47 = vmul.f32 0.00390625, %v3847_v3 }
 0x631   : > { %v8201_v56 = vpop.f32.mrf.mxu1 }
 0x632   : > { %v3849_v62 = vmul.f32 %v8201_v56, %v3844_v63  ;;  %v3894_v38 = vmul.f32 0.00390625, %v3846_v39 }
 0x633   : > { %v3821_v21 = vpop.f32.mrf.mxu1 }
 0x634   : > { %v3848_v32 = vmul.f32 %v3840_v27, %v3821_v21  ;;  %3860 = vrot.lane.b32.xlu1 %v3849_v62, %s8913_s29  ;;  %v3897_v4 = vmul.f32 0.00390625, %v3849_v62  ;;  %v15725_v62 = vld [vmem:[#allocation54_spill] sm:$0xff] }
 0x636   : > { %v3896_v11 = vmul.f32 0.00390625, %v3848_v32 }
 0x638   : > { %3858 = vrot.lane.b32.xlu1 %v3848_v32, %s8913_s29  ;;  %3910 = vperm.xlu0 %8341, %v3896_v11   ;;  %v15727_v32 = vld [vmem:[#allocation26_spill] sm:$0xff] }
 0x63c   : > { %3854 = vrot.lane.b32.xlu1 %v3846_v39, %s8913_s29  ;;  %8345 = vset.pattern.permute.xlu0 %v8924_v41 }
 0x640   : > { %3951 = vperm.xlu1 %8338, %v3895_v47  }
 0x644   : > { %3947 = vperm.xlu1 %8338, %v3894_v38  }
 0x648   : > { %3959 = vperm.xlu1 %8338, %v3897_v4  }
 0x64c   : > { %3955 = vperm.xlu1 %8338, %v3896_v11  }
 0x650   : > { %8339 = vset.pattern.permute.xlu1 %v8921_v33 }
 0x6a2   : > { %v3857_v35 = vpop.permute.xlu0 %3856 }
 0x6a3   : > { %v3867_v23 = vmul.f32 %v8198_v0, %v3857_v35  ;;  %v4009_v35 = vld [vmem:[%s14474_s1 + $0x18] sm:$0xff] }
 0x6a5   : > { %v3891_v30 = vsub.f32 %v3878_v40, %v3867_v23  ;;  %v4007_v40 = vld [vmem:[%s14474_s1 + $0x8] sm:$0xff]  ;;  %v4010_v23 = vld [vmem:[%s14474_s1 + $0x20] sm:$0xff] }
 0x6a6   : > { %v3861_v6 = vpop.permute.xlu1 %3860 }
 0x6a7   : > { %v3869_v1 = vmul.f32 %v8201_v56, %v3861_v6  ;;  %3971 = vperm.xlu1 %8339, %v3891_v30   ;;  %v4012_v6 = vld [vmem:[%s14474_s1 + $0x30] sm:$0xff] }
 0x6a9   : > { %v3893_v48 = vsub.f32 %v3888_v54, %v3869_v1  ;;  %v4013_v1 = vld [vmem:[%s14474_s1 + $0x38] sm:$0xff] }
 0x6aa   : > { %v3859_v34 = vpop.permute.xlu1 %3858 }
 0x6ab   : > { %v3868_v36 = vmul.f32 %v3859_v34, %v3821_v21  ;;  %3979 = vperm.xlu1 %8339, %v3893_v48   ;;  %v15726_v21 = vld [vmem:[#allocation37_spill] sm:$0xff]  ;;  %v4015_v34 = vld [vmem:[%s14474_s1 + $0x48] sm:$0xff] }
 0x6ad   : > { %v3892_v46 = vsub.f32 %v3883_v12, %v3868_v36 }
 0x6ae   : > { %v3855_v29 = vpop.permute.xlu1 %3854 }
 0x6af   : > { %v3866_v16 = vmul.f32 %v3855_v29, %v3811_v60  ;;  %3934 = vperm.xlu0 %8345, %v3892_v46   ;;  %3975 = vperm.xlu1 %8339, %v3892_v46  }
 0x6b1   : > { %v3890_v2 = vsub.f32 %v3873_v7, %v3866_v16  ;;  %v4008_v7 = vld [vmem:[%s14474_s1 + $0x10] sm:$0xff] }
 0x6b3   : > { %3924 = vperm.xlu0 %8345, %v3890_v2   ;;  %3967 = vperm.xlu1 %8339, %v3890_v2   ;;  %v3911_v9 = vpop.permute.xlu0 %3910 }
 0x6b7   : > { %8340 = vset.pattern.permute.xlu1 %v8922_v25 }
 0x6b8   : > { %3915 = vperm.xlu1 %8340, %v3897_v4  }
 0x6bb   : > { %v3952_v49 = vpop.permute.xlu1 %3951 }
 0x6bc   : > { %8342 = vset.pattern.permute.xlu1 %v8924_v41  ;;  %v3963_v33 = vmul.f32 %v3952_v49, %v15721_v57 }
 0x6bd   : > { %3939 = vperm.xlu1 %8342, %v3893_v48   ;;  %v4014_v48 = vld [vmem:[%s14474_s1 + $0x40] sm:$0xff] }
 0x6bf   : > { %v3948_v42 = vpop.permute.xlu1 %3947 }
 0x6c0   : > { %v3962_v52 = vmul.f32 %v3948_v42, %v15723_v59 }
 0x6c1   : > { %8343 = vset.pattern.permute.xlu1 %v8922_v25 }
 0x6c2   : > { %3905 = vperm.xlu1 %8343, %v3895_v47  }
 0x6c3   : > { %v3960_v28 = vpop.permute.xlu1 %3959 }
 0x6c4   : > { %v3965_v26 = vmul.f32 %v3960_v28, %v15720_v58 }
 0x6c6   : > { %3900 = vperm.xlu1 %8343, %v3894_v38  }
 0x6c7   : > { %v3956_v55 = vpop.permute.xlu1 %3955 }
 0x6c8   : > { %v3964_v22 = vmul.f32 %v3956_v55, %v15722_v44 }
 0x6ca   : > { %8344 = vset.pattern.permute.xlu1 %v8924_v41 }
 0x6cb   : > { %3929 = vperm.xlu1 %8344, %v3891_v30   ;;  %v4011_v30 = vld [vmem:[%s14474_s1 + $0x28] sm:$0xff] }
 0x722   : > { %v3972_v5 = vpop.permute.xlu1 %3971 }
 0x723   : > { %v3983_v20 = vadd.f32 %v3972_v5, %v3963_v33 }
 0x726   : > { %v3980_v51 = vpop.permute.xlu1 %3979 }
 0x727   : > { %v3985_v24 = vadd.f32 %v3980_v51, %v3965_v26 }
 0x729   : > { %3996 = vrot.lane.b32.xlu1 %v3985_v24, %s8925_s23 }
 0x72a   : > { %v3976_v45 = vpop.permute.xlu1 %3975  ;;  %v3935_v0 = vpop.permute.xlu0 %3934 }
 0x72b   : > { %v3984_v31 = vadd.f32 %v3976_v45, %v3964_v22 }
 0x72d   : > { %3992 = vrot.lane.b32.xlu1 %v3983_v20, %s8925_s23  ;;  %3994 = vrot.lane.b32.xlu0 %v3984_v31, %s8925_s23 }
 0x72e   : > { %v3968_v13 = vpop.permute.xlu1 %3967  ;;  %v3925_v56 = vpop.permute.xlu0 %3924 }
 0x72f   : > { %v3982_v25 = vadd.f32 %v3968_v13, %v3962_v52  ;;  %v268_v13 = vld [vmem:[%s14475_s2 + $0x48] sm:$0xff] }
 0x731   : > { %4019 = vperm.xlu1 %8344, %v13738_v19   ;;  %3990 = vrot.lane.b32.xlu0 %v3982_v25, %s8925_s23  ;;  %v4016_v25 = vld [vmem:[%s14474_s1 + $0x50] sm:$0xff] }
 0x733   : > { %v3916_v18 = vpop.permute.xlu1 %3915 }
 0x735   : > { %4027 = vperm.xlu1 %8344, %v13726_v17   ;;  %4023 = vperm.xlu0 %8345, %v13732_v50   ;;  %v15724_v17 = vld [vmem:[#allocation63_spill] sm:$0xff] }
 0x736   : > { %v3921_v60 = vmul.f32 %v3916_v18, %v15724_v17  ;;  %v4017_v18 = vld [vmem:[%s14474_s1 + $0x58] sm:$0xff] }
 0x738   : > { %v3940_v63 = vpop.permute.xlu1 %3939 }
 0x739   : > { %4047 = vperm.xlu1 %8344, %v13744_v8   ;;  %4031 = vperm.xlu0 %8345, %v13720_v14   ;;  %v3945_v50 = vadd.f32 %v3940_v63, %v3921_v60  ;;  %v3920_v14 = vmul.f32 %v3911_v9, %v15725_v62  ;;  %v273_v63 = vld [vmem:[%s14475_s2 + $0x70] sm:$0xff] }
 0x73d   : > { %4039 = vperm.xlu1 %8344, %v13756_v43   ;;  %4043 = vperm.xlu0 %8345, %v13750_v10   ;;  %v3906_v27 = vpop.permute.xlu1 %3905  ;;  %v3944_v10 = vadd.f32 %v3935_v0, %v3920_v14 }
 0x741   : > { %4035 = vperm.xlu0 %8345, %v13762_v53   ;;  %v3901_v19 = vpop.permute.xlu1 %3900  ;;  %v3919_v53 = vmul.f32 %v3906_v27, %v15726_v21 }
 0x742   : > { %v3918_v11 = vmul.f32 %v3901_v19, %v15727_v32  ;;  %v4346_v19 = vlaneseq }
 0x744   : > { %v3942_v38 = vadd.f32 %v3925_v56, %v3918_v11  ;;  %v4347_v0 = vshrl.u32 %v4346_v19, 7  ;;  %v4352_v17 = vand.u32 127, %v4346_v19 }
 0x746   : > { %v3930_v3 = vpop.permute.xlu1 %3929  ;;  %v4349_v56 = vcvt.s32.f32 %v4347_v0 }
 0x747   : > { %v3943_v41 = vadd.f32 %v3930_v3, %v3919_v53  ;;  %v4348_v3 = vadd.s32 8, %v4347_v0 }
 0x748   : > { %v4354_v14 = vadd.f32 0.5, %v4349_v56  ;;  %v4498_v56 = vld [vmem:[%s14474_s1 + $0x78] sm:$0xff] }
 0x749   : > { %v4350_v60 = vcvt.s32.f32 %v4348_v3 }
 0x74a   : > { %v4356_v21 = vmul.f32 0.125, %v4354_v14  ;;  %v13922_v14 = vld [vmem:[#allocation5] sm:$0xff] }
 0x74c   : > { %v4358_v11 = vfloor.f32 %v4356_v21  ;;  %v13930_v21 = vld [vmem:[#allocation5 + $0x38] sm:$0xff] }
 0x79b   : > { %v3997_v8 = vpop.permute.xlu1 %3996 }
 0x79c   : > { %v4005_v43 = vsel %vm3736_vm0, %v3945_v50, %v3997_v8  ;;  %v4353_v50 = vcvt.s32.f32 %v4352_v17  ;;  %v4355_v8 = vadd.f32 0.5, %v4350_v60  ;;  %v4496_v60 = vld [vmem:[%s14474_s1 + $0x68] sm:$0xff] }
 0x79d   : > { %8202 = vmatprep.subr.mxu0 %v4005_v43 }
 0x79e   : > { %8203 = vmatpush3.msra.mxu0 %v4005_v43  ;;  %v4360_v62 = vadd.f32 0.5, %v4353_v50  ;;  %v4357_v43 = vmul.f32 0.125, %v4355_v8  ;;  %v4497_v50 = vld [vmem:[%s14474_s1 + $0x70] sm:$0xff]  ;;  %v13916_v8 = vld [vmem:[#allocation5 + $0x8] sm:$0xff] }
 0x79f   : > { %v3995_v15 = vpop.permute.xlu0 %3994  ;;  %v3993_v39 = vpop.permute.xlu1 %3992 }
 0x7a0   : > { %v4004_v47 = vsel %vm3736_vm0, %v3944_v10, %v3995_v15  ;;  %v4003_v4 = vsel %vm3736_vm0, %v3943_v41, %v3993_v39  ;;  %v4361_v10 = vmul.f32 0.125, %v4360_v62  ;;  %v4359_v53 = vfloor.f32 %v4357_v43  ;;  %v13918_v62 = vld [vmem:[#allocation5 + $0x18] sm:$0xff]  ;;  %v13924_v43 = vld [vmem:[#allocation5 + $0x10] sm:$0xff] }
 0x7a1   : > { %8204 = vmatprep.subr.mxu0 %v4004_v47 }
 0x7a2   : > { %8205 = vmatpush3.msra.mxu0 %v4004_v47  ;;  %v4362_v32 = vfloor.f32 %v4361_v10  ;;  %v13928_v10 = vld [vmem:[#allocation5 + $0x28] sm:$0xff] }
 0x7a3   : > { %v3991_v54 = vpop.permute.xlu0 %3990  ;;  %8206 = vmatprep.subr.mxu0 %v4003_v4 }
 0x7a4   : > { %8207 = vmatpush3.msra.mxu0 %v4003_v4  ;;  %v4002_v12 = vsel %vm3736_vm0, %v3942_v38, %v3991_v54  ;;  %vm13853_vm6 = vcmp.eq.f32.partialorder %v4359_v53, %v4362_v32  ;;  %vm13857_vm8 = vcmp.eq.f32.partialorder %v4358_v11, %v4362_v32 }
 0x7a5   : > { %8208 = vmatprep.subr.mxu0 %v4002_v12 }
 0x7a6   : > { %8209 = vmatpush3.msra.mxu0 %v4002_v12 }
 0x7a7   : > { %8211 = vmatmul.mubr.msk.f32.vlgmr.msra.gmra.mxu0 %vm3651_vm5, %v4007_v40  ;;  %4658 = vmatprep.subr.mxu0 %v13916_v8 }
 0x7a8   : > { %8213 = vmatprep.mubr.msk.f32.mxu0 %vm3651_vm5, %v4008_v7  ;;  %4659 = vmatpush1.msra.mxu0 %v13922_v14 }
 0x7a9   : > { %4836 = vmatprep.subr.mxu0 %v13928_v10 }
 0x7ab   : > { %8214 = vmatmul.mubr.msk.f32.gmra.mxu0 %vm3651_vm5, %v4009_v35  ;;  %v267_v35 = vld [vmem:[%s14475_s2 + $0x40] sm:$0xff] }
 0x7ac   : > { %8216 = vmatprep.mubr.msk.f32.mxu0 %vm3651_vm5, %v4010_v23  ;;  %v4020_v36 = vpop.permute.xlu1 %4019  ;;  %v269_v23 = vld [vmem:[%s14475_s2 + $0x50] sm:$0xff] }
 0x7af   : > { %8217 = vmatmul.mubr.msk.f32.gmra.mxu0 %vm3651_vm5, %v4011_v30 }
 0x7b0   : > { %8219 = vmatprep.mubr.msk.f32.mxu0 %vm3651_vm5, %v4012_v6  ;;  %v4024_v46 = vpop.permute.xlu0 %4023  ;;  %v4028_v49 = vpop.permute.xlu1 %4027 }
 0x7b3   : > { %8220 = vmatmul.mubr.msk.f32.gmra.mxu0 %vm3651_vm5, %v4013_v1 }
 0x7b4   : > { %8222 = vmatprep.mubr.msk.f32.mxu0 %vm3651_vm5, %v4014_v48  ;;  %v4032_v28 = vpop.permute.xlu0 %4031  ;;  %v4048_v26 = vpop.permute.xlu1 %4047 }
 0x7b7   : > { %8223 = vmatmul.mubr.msk.f32.gmra.mxu0 %vm3651_vm5, %v4015_v34 }
 0x7b8   : > { %v4044_v24 = vpop.permute.xlu0 %4043  ;;  %v4040_v20 = vpop.permute.xlu1 %4039  ;;  %8225 = vmatprep.mubr.msk.f32.mxu0 %vm3651_vm5, %v4016_v25 }
 0x7bb   : > { %8226 = vmatmul.mubr.msk.f32.gmra.mxu0 %vm3651_vm5, %v4017_v18 }
 0x7bc   : > { %v4036_v59 = vpop.permute.xlu0 %4035  ;;  %4692 = vmatprep.mubr.f32.mxu0 %v8917_v37 }
 0x867   : > { %v8212_v29 = vpop.f32.mrf.mxu0 }
 0x868   : > { %v4178_v5 = vadd.f32 %v8212_v29, %v4024_v46 }
 0x869   : > { %v4172_v16 = vpop.f32.mrf.mxu0 }
 0x86a   : > { %v4173_v2 = vadd.f32 %v4172_v16, %v4020_v36 }
 0x86b   : > { %v8215_v42 = vpop.f32.mrf.mxu0 }
 0x86c   : > { %4231 = vxpose.xlu1.b32.start [1/4] (short) (narrow) %v4173_v2, 16  ;;  %v4188_v22 = vadd.f32 %v8215_v42, %v4032_v28 }
 0x86d   : > { %v4182_v55 = vpop.f32.mrf.mxu0 }
 0x86e   : > { %v4183_v61 = vadd.f32 %v4182_v55, %v4028_v49 }
 0x86f   : > { %v8218_v58 = vpop.f32.mrf.mxu0 }
 0x870   : > { %4232 = vxpose.xlu1.b32.cont [2/4] (short) (narrow) %v4178_v5, 16  ;;  %v4198_v31 = vadd.f32 %v8218_v58, %v4040_v20 }
 0x871   : > { %v4192_v51 = vpop.f32.mrf.mxu0 }
 0x872   : > { %v4193_v52 = vadd.f32 %v4192_v51, %v4036_v59  ;;  %v271_v51 = vld [vmem:[%s14475_s2 + $0x60] sm:$0xff] }
 0x873   : > { %v8221_v57 = vpop.f32.mrf.mxu0 }
 0x874   : > { %v4208_v33 = vadd.f32 %v8221_v57, %v4048_v26  ;;  %4233 = vxpose.xlu1.b32.cont [3/4] (short) (narrow) %v4183_v61, 16  ;;  %v270_v26 = vld [vmem:[%s14475_s2 + $0x58] sm:$0xff]  ;;  %v272_v61 = vld [vmem:[%s14475_s2 + $0x68] sm:$0xff] }
 0x875   : > { %v4202_v44 = vpop.f32.mrf.mxu0 }
 0x876   : > { %v4203_v45 = vadd.f32 %v4202_v44, %v4044_v24  ;;  %8228 = vmatprep.subr.mxu1 %v4208_v33  ;;  %v274_v24 = vld [vmem:[%s14475_s2 + $0x78] sm:$0xff] }
 0x877   : > { %8229 = vmatpush3.msra.mxu1 %v4208_v33  ;;  %v8224_v46 = vpop.f32.mrf.mxu0 }
 0x878   : > { %8230 = vmatprep.subr.mxu1 %v4203_v45  ;;  %4234 = vxpose.xlu1.b32.end [4/4] (short) (narrow) %v4188_v22, 16 }
 0x879   : > { %8231 = vmatpush3.msra.mxu1 %v4203_v45  ;;  %v4212_v29 = vpop.f32.mrf.mxu0 }
 0x87a   : > { %8232 = vmatprep.subr.mxu1 %v4198_v31 }
 0x87b   : > { %8233 = vmatpush3.msra.mxu1 %v4198_v31  ;;  %v8227_v20 = vpop.f32.mrf.mxu0 }
 0x87c   : > { %8234 = vmatprep.subr.mxu1 %v4193_v52 }
 0x87d   : > { %8235 = vmatpush3.msra.mxu1 %v4193_v52 }
 0x896   : > { %4057 = vperm.xlu1 %8344, %v268_v13   ;;  %v4222_v13 = vpop.f32.mrf.mxu0 }
 0x89a   : > { %4511 = vperm.xlu1 %8344, %v273_v63  }
 0x8e8   : > { %v4247_v27 = vpop.trf.xlu1 }
 0x8e9   : > { %8236 = vmatprep.mubr.msk.f32.mxu1 %vm3651_vm5, %v4247_v27 }
 0x8ec   : > { %v4248_v9 = vpop.trf.xlu1 }
 0x8ed   : > { %8237 = vmatmul.mubr.msk.f32.vlgmr.msra.gmra.mxu1 %vm3651_vm5, %v4248_v9  ;;  %v4495_v9 = vld [vmem:[%s14474_s1 + $0x60] sm:$0xff] }
 0x911   : > { %v4058_v52 = vpop.permute.xlu1 %4057 }
 0x912   : > { %v4218_v25 = vadd.f32 %v8224_v46, %v4058_v52  ;;  %v14026_v46 = vld [vmem:[#allocation5 + $0x70] sm:$0xff]  ;;  %v6087_v52 = vld [vmem:[%s9084_s17 + $0x98] sm:$0xff] }
 0x9ad   : > { %v8238_v15 = vpop.f32.mrf.mxu1 }
 0x9ae   : > { %v4345_v41 = vmul.f32 0.17677669, %v8238_v15 }
 0x9af   : > { %v4335_v47 = vpop.f32.mrf.mxu1 }
 0x9b0   : > { %v4344_v4 = vmul.f32 0.17677669, %v4335_v47  ;;  %v4366_v54 = vsel %vm13853_vm6, %v4345_v41, -3.4028235e+38 }
 0x9b1   : > { %v4371_v12 = vsel %vm4367_vm7, %v4366_v54, -inf  ;;  %v13946_v54 = vld [vmem:[#allocation5 + $0x20] sm:$0xff] }
 0x9b2   : > { %4372 = vmax.xlane.f32.xlu0 %v4371_v12  ;;  %v4365_v40 = vsel %vm13857_vm8, %v4344_v4, -3.4028235e+38  ;;  %v13948_v12 = vld [vmem:[#allocation5 + $0x30] sm:$0xff] }
 0x9b3   : > { %v4368_v7 = vsel %vm4367_vm7, %v4365_v40, -inf  ;;  %v4512_v40 = vpop.permute.xlu1 %4511 }
 0x9b6   : > { %4369 = vmax.xlane.f32.xlu0 %v4368_v7 }
 0x9cc   : > { %4052 = vperm.xlu0 %8345, %v267_v35  }
 0x9d0   : > { %4062 = vperm.xlu0 %8345, %v269_v23   ;;  %v13960_v23 = vld [vmem:[#allocation5 + $0x48] sm:$0xff] }
 0xa3b   : > { %v4373_v30 = vpop.xlane.xlu0 %4372 }
 0xa3c   : > { %v4375_v6 = vsub.f32 %v4345_v41, %v4373_v30  ;;  %v13966_v30 = vld [vmem:[#allocation5 + $0x58] sm:$0xff] }
 0xa3e   : > { %v4378_v1 = vmul.f32 1.442695, %v4375_v6  ;;  %v13986_v6 = vld [vmem:[#allocation5 + $0x40] sm:$0xff] }
 0xa3f   : > { %v4370_v48 = vpop.xlane.xlu0 %4369 }
 0xa40   : > { %8348 = vpow2.f32 %v4378_v1  ;;  %v4374_v34 = vsub.f32 %v4344_v4, %v4370_v48  ;;  %v13990_v1 = vld [vmem:[#allocation5 + $0x50] sm:$0xff]  ;;  %v13992_v48 = vld [vmem:[#allocation5 + $0x68] sm:$0xff] }
 0xa42   : > { %v4376_v36 = vmul.f32 1.442695, %v4374_v34  ;;  %v13997_v34 = vld [vmem:[#allocation5 + $0x78] sm:$0xff] }
 0xa44   : > { %8350 = vpow2.f32 %v4376_v36  ;;  %v14022_v36 = vld [vmem:[#allocation5 + $0x60] sm:$0xff] }
 0xa47   : > { %v4053_v16 = vpop.permute.xlu0 %4052 }
 0xa48   : > { %v4213_v2 = vadd.f32 %v4212_v29, %v4053_v16 }
 0xa4a   : > { %8243 = vmatprep.mubr.msk.f32.mxu1 %vm4367_vm7, %v4213_v2 }
 0xa4b   : > { %v4063_v57 = vpop.permute.xlu0 %4062 }
 0xa4c   : > { %v4223_v18 = vadd.f32 %v4222_v13, %v4063_v57  ;;  %v6084_v57 = vld [vmem:[%s9084_s17 + $0x80] sm:$0xff] }
 0xa4d   : > { %v8349_v49 = vpop.eup %8348 }
 0xa4e   : > { %v4381_v42 = vsel %vm13853_vm6, %v8349_v49, 0.0 }
 0xa4f   : > { %v4385_v28 = vsel %vm4367_vm7, %v4381_v42, 0.0 }
 0xa50   : > { %4386 = vadd.xlane.f32.xlu0 %v4385_v28  ;;  %v6070_v28 = vld [vmem:[%s9084_s17 + $0x10] sm:$0xff] }
 0xa51   : > { %v8351_v55 = vpop.eup %8350 }
 0xa52   : > { %v4380_v5 = vsel %vm13857_vm8, %v8351_v55, 0.0 }
 0xa53   : > { %v4382_v58 = vsel %vm4367_vm7, %v4380_v5, 0.0 }
 0xa54   : > { %4383 = vadd.xlane.f32.xlu0 %v4382_v58 }
 0xa6a   : > { %4067 = vperm.xlu0 %8345, %v270_v26  }
 0xa6e   : > { %4501 = vperm.xlu0 %8345, %v271_v51   ;;  %v6071_v51 = vld [vmem:[%s9084_s17 + $0x18] sm:$0xff] }
 0xa72   : > { %4506 = vperm.xlu0 %8345, %v272_v61  }
 0xa76   : > { %4516 = vperm.xlu0 %8345, %v274_v24  }
 0xad9   : > { %v4387_v33 = vpop.xlane.xlu0 %4386 }
 0xada   : > { %8352 = vrcp.f32 %v4387_v33 }
 0xadd   : > { %v4384_v44 = vpop.xlane.xlu0 %4383 }
 0xade   : > { %8354 = vrcp.f32 %v4384_v44  ;;  %v6086_v44 = vld [vmem:[%s9084_s17 + $0x90] sm:$0xff] }
 0xae5   : > { %v4068_v63 = vpop.permute.xlu0 %4067 }
 0xae6   : > { %v4228_v27 = vadd.f32 %v8227_v20, %v4068_v63  ;;  %v6085_v20 = vld [vmem:[%s9084_s17 + $0x88] sm:$0xff] }
 0xae7   : > { %v8353_v22 = vpop.eup %8352 }
 0xae8   : > { %v4391_v45 = vmul.f32 %v8353_v22, %v4381_v42  ;;  %v6068_v42 = vld [vmem:[%s9084_s17] sm:$0xff] }
 0xae9   : > { %v4502_v53 = vpop.permute.xlu0 %4501 }
 0xaea   : > { %8239 = vmatprep.subr.msk.mxu1 %vm4367_vm7, %v4391_v45 }
 0xaeb   : > { %v8355_v31 = vpop.eup %8354  ;;  %8240 = vmatpush3.xpose.msk.msra.mxu1 %vm4367_vm7, %v4391_v45 }
 0xaec   : > { %v4390_v59 = vmul.f32 %v8355_v31, %v4380_v5  ;;  %v6069_v5 = vld [vmem:[%s9084_s17 + $0x8] sm:$0xff] }
 0xaed   : > { %v4507_v32 = vpop.permute.xlu0 %4506 }
 0xaee   : > { %8241 = vmatprep.subr.msk.mxu1 %vm4367_vm7, %v4390_v59 }
 0xaef   : > { %8242 = vmatpush3.xpose.msk.msra.mxu1 %vm4367_vm7, %v4390_v59 }
 0xaf1   : > { %v4517_v47 = vpop.permute.xlu0 %4516 }
 0xaf2   : > { %8244 = vmatmul.mubr.msk.f32.vlgmr.msra.gmra.mxu1 %vm4367_vm7, %v4218_v25 }
 0xaf3   : > { %8246 = vmatprep.mubr.msk.f32.mxu1 %vm4367_vm7, %v4223_v18  ;;  %v6100_v18 = vld [vmem:[%s9084_s17 + $0x100] sm:$0xff] }
 0xaf6   : > { %8247 = vmatmul.mubr.msk.f32.gmra.mxu1 %vm4367_vm7, %v4228_v27 }
 0xaf7   : > { %8257 = vmatprep.mubr.msk.f32.mxu1 %vm3651_vm5, %v4495_v9  ;;  %v6102_v9 = vld [vmem:[%s9084_s17 + $0x110] sm:$0xff] }
 0xbb2   : > { %v8245_v19 = vpop.f32.mrf.mxu1 }
 0xbb4   : > { %v4476_v0 = vpop.f32.mrf.mxu1 }
 0xbb6   : > { %v8248_v3 = vpop.f32.mrf.mxu1 }
 0xbb7   : > { %8249 = vmatprep.subr.mxu1 %v8248_v3 }
 0xbb8   : > { %v4486_v17 = vpop.f32.mrf.mxu1  ;;  %8250 = vmatpush3.msra.mxu1 %v8248_v3  ;;  %v6101_v3 = vld [vmem:[%s9084_s17 + $0x108] sm:$0xff] }
 0xbb9   : > { %8251 = vmatprep.subr.mxu1 %v4486_v17 }
 0xbba   : > { %8252 = vmatpush3.msra.mxu1 %v4486_v17 }
 0xbbb   : > { %8253 = vmatprep.subr.mxu1 %v8245_v19 }
 0xbbc   : > { %8254 = vmatpush3.msra.mxu1 %v8245_v19 }
 0xbbd   : > { %8255 = vmatprep.subr.mxu1 %v4476_v0 }
 0xbbe   : > { %8256 = vmatpush3.msra.mxu1 %v4476_v0 }
 0xbbf   : > { %8258 = vmatmul.mubr.msk.f32.vlgmr.msra.gmra.mxu1 %vm3651_vm5, %v4496_v60  ;;  %4747 = vmatprep.subr.mxu1 %v13918_v62 }
 0xbc0   : > { %8260 = vmatprep.mubr.msk.f32.mxu1 %vm3651_vm5, %v4497_v50  ;;  %4748 = vmatpush1.msra.mxu1 %v13924_v43  ;;  %v6103_v50 = vld [vmem:[%s9084_s17 + $0x118] sm:$0xff] }
 0xbc1   : > { %4925 = vmatprep.subr.mxu1 %v13930_v21 }
 0xbc3   : > { %8261 = vmatmul.mubr.msk.f32.gmra.mxu1 %vm3651_vm5, %v4498_v56 }
 0xbc4   : > { %4781 = vmatprep.mubr.f32.mxu1 %v8917_v37 }
 0xc7f   : > { %v8259_v11 = vpop.f32.mrf.mxu1 }
 0xc80   : > { %v13934_v15 = vadd.f32 %v8259_v11, %v4507_v32  ;;  %v6117_v32 = vld [vmem:[%s9084_s17 + $0x188] sm:$0xff] }
 0xc81   : > { %v4597_v39 = vpop.f32.mrf.mxu1 }
 0xc82   : > { %v13936_v41 = vadd.f32 %v4597_v39, %v4502_v53  ;;  %5342 = vrot.lane.b32.xlu0 %v13934_v15, %s8914_s28  ;;  %v6119_v39 = vld [vmem:[%s9084_s17 + $0x198] sm:$0xff] }
 0xc83   : > { %v8262_v38 = vpop.f32.mrf.mxu1 }
 0xc84   : > { %v13940_v4 = vadd.f32 %v8262_v38, %v4517_v47  ;;  %5340 = vrot.lane.b32.xlu1 %v13936_v41, %s8914_s28  ;;  %6655 = vmatmul.mubr.msk.f32.vlgmr.msra.gmra.mxu0 %vm3736_vm0, %v13936_v41  ;;  %v6072_v38 = vld [vmem:[%s9084_s17 + $0x20] sm:$0xff] }
 0xc85   : > { %6659 = vmatmul.mubr.msk.f32.vlgmr.msra.gmra.mxu1 %vm3736_vm0, %v13936_v41  ;;  %v4607_v7 = vpop.f32.mrf.mxu1  ;;  %4698 = vmatprep.mubr.f32.mxu0 %v8917_v37 }
 0xc86   : > { %v13953_v35 = vadd.f32 %v4607_v7, %v4512_v40  ;;  %5346 = vrot.lane.b32.xlu0 %v13940_v4, %s8914_s28  ;;  %4787 = vmatprep.mubr.f32.mxu1 %v8917_v37 }
 0xc87   : > { %4837 = vmatpush1.msra.mxu0 %v13946_v54  ;;  %4926 = vmatpush1.msra.mxu1 %v13948_v12 }
 0xc88   : > { %6656 = vmatmul.mubr.msk.f32.gmra.mxu0 %vm3736_vm0, %v13934_v15  ;;  %5344 = vrot.lane.b32.xlu1 %v13953_v35, %s8914_s28  ;;  %s14171_s28 = scalar_lea.vmem [#allocation7], %s6559_s15  ;;  %s6728_s15 = sshll.u32 %s8980_s22, 14 }
 0xc89   : > { %6660 = vmatmul.mubr.msk.f32.gmra.mxu1 %vm3736_vm0, %v13934_v15  ;;  %4704 = vmatprep.mubr.f32.mxu0 %v8917_v37  ;;  %s6467_s11 = sshll.u32 %s14171_s28, 4  ;;  %s14425_s14 = scalar_lea.hbm %s14478_s5, %s6728_s15  ;;  %s14427_s11 = int_to_ptr.vmem [resolvable:$true] %s6467_s11 }
 0xc8a   : > { %4793 = vmatprep.mubr.f32.mxu1 %v8917_v37  ;;  %5014 = vmatprep.subr.mxu0 %v13960_v23  ;;  %s6453_s22 = scalar_lea.sflag [#allocation4], %s9078_s13  ;;  %p8846_p8 = scmp.lt.s32.totalorder %s14427_s11, %s8844_s16 }
 0xc8b   : > { %5103 = vmatprep.subr.mxu1 %v13966_v30 }
 0xc8c   : > { %6657 = vmatmul.mubr.msk.f32.gmra.mxu0 %vm3736_vm0, %v13953_v35 }
 0xc8d   : > { %6661 = vmatmul.mubr.msk.f32.gmra.mxu1 %vm3736_vm0, %v13953_v35  ;;  %4710 = vmatprep.mubr.f32.mxu0 %v8917_v37 }
 0xc8e   : > { %4799 = vmatprep.mubr.f32.mxu1 %v8917_v37 }
 0xc90   : > { %6658 = vmatmul.mubr.msk.f32.gmra.mxu0 %vm3736_vm0, %v13940_v4 }
 0xc91   : > { %6662 = vmatmul.mubr.msk.f32.gmra.mxu1 %vm3736_vm0, %v13940_v4  ;;  %4870 = vmatprep.mubr.f32.mxu0 %v8917_v37 }
 0xc92   : > { %4959 = vmatprep.mubr.f32.mxu1 %v8917_v37 }
 0xc94   : > { %6663 = vmatmul.mubr.msk.f32.vlgmr.msra.gmra.mxu0 %vm3736_vm0, %v13936_v41 }
 0xc95   : > { %6667 = vmatmul.mubr.msk.f32.vlgmr.msra.gmra.mxu1 %vm3736_vm0, %v13936_v41  ;;  %4876 = vmatprep.mubr.f32.mxu0 %v8917_v37 }
 0xc96   : > { %4965 = vmatprep.mubr.f32.mxu1 %v8917_v37  ;;  %5015 = vmatpush1.msra.mxu0 %v13986_v6 }
 0xc97   : > { %5104 = vmatpush1.msra.mxu1 %v13990_v1  ;;  %5192 = vmatprep.subr.mxu0 %v13992_v48 }
 0xc98   : > { %6664 = vmatmul.mubr.msk.f32.gmra.mxu0 %vm3736_vm0, %v13934_v15  ;;  %5281 = vmatprep.subr.mxu1 %v13997_v34 }
 0xc99   : > { %6668 = vmatmul.mubr.msk.f32.gmra.mxu1 %vm3736_vm0, %v13934_v15  ;;  %4882 = vmatprep.mubr.f32.mxu0 %v8917_v37 }
 0xc9a   : > { %4971 = vmatprep.mubr.f32.mxu1 %v8917_v37 }
 0xc9c   : > { %6665 = vmatmul.mubr.msk.f32.gmra.mxu0 %vm3736_vm0, %v13953_v35 }
 0xc9d   : > { %6669 = vmatmul.mubr.msk.f32.gmra.mxu1 %vm3736_vm0, %v13953_v35  ;;  %4888 = vmatprep.mubr.f32.mxu0 %v8917_v37 }
 0xc9e   : > { %4977 = vmatprep.mubr.f32.mxu1 %v8917_v37 }
 0xca0   : > { %6666 = vmatmul.mubr.msk.f32.gmra.mxu0 %vm3736_vm0, %v13940_v4 }
 0xca1   : > { %6670 = vmatmul.mubr.msk.f32.gmra.mxu1 %vm3736_vm0, %v13940_v4  ;;  %5048 = vmatprep.mubr.f32.mxu0 %v8917_v37 }
 0xca2   : > { %5137 = vmatprep.mubr.f32.mxu1 %v8917_v37 }
 0xca4   : > { %6671 = vmatmul.mubr.msk.f32.vlgmr.msra.gmra.mxu0 %vm3736_vm0, %v13936_v41 }
 0xca5   : > { %6675 = vmatmul.mubr.msk.f32.vlgmr.msra.gmra.mxu1 %vm3736_vm0, %v13936_v41  ;;  %5054 = vmatprep.mubr.f32.mxu0 %v8917_v37 }
 0xca6   : > { %5143 = vmatprep.mubr.f32.mxu1 %v8917_v37  ;;  %5193 = vmatpush1.msra.mxu0 %v14022_v36 }
 0xca7   : > { %5282 = vmatpush1.msra.mxu1 %v14026_v46  ;;  %5386 = vmatprep.subr.mxu0 %v13916_v8 }
 0xca8   : > { %6672 = vmatmul.mubr.msk.f32.gmra.mxu0 %vm3736_vm0, %v13934_v15  ;;  %5475 = vmatprep.subr.mxu1 %v13918_v62  ;;  %v6116_v62 = vld [vmem:[%s9084_s17 + $0x180] sm:$0xff] }
 0xca9   : > { %6676 = vmatmul.mubr.msk.f32.gmra.mxu1 %vm3736_vm0, %v13934_v15  ;;  %5060 = vmatprep.mubr.f32.mxu0 %v8917_v37 }
 0xcaa   : > { %5149 = vmatprep.mubr.f32.mxu1 %v8917_v37 }
 0xcac   : > { %6673 = vmatmul.mubr.msk.f32.gmra.mxu0 %vm3736_vm0, %v13953_v35 }
 0xcad   : > { %6677 = vmatmul.mubr.msk.f32.gmra.mxu1 %vm3736_vm0, %v13953_v35  ;;  %5066 = vmatprep.mubr.f32.mxu0 %v8917_v37 }
 0xcae   : > { %5155 = vmatprep.mubr.f32.mxu1 %v8917_v37 }
 0xcb0   : > { %6674 = vmatmul.mubr.msk.f32.gmra.mxu0 %vm3736_vm0, %v13940_v4 }
 0xcb1   : > { %6678 = vmatmul.mubr.msk.f32.gmra.mxu1 %vm3736_vm0, %v13940_v4  ;;  %5226 = vmatprep.mubr.f32.mxu0 %v8917_v37 }
 0xcb2   : > { %5315 = vmatprep.mubr.f32.mxu1 %v8917_v37 }
 0xcb4   : > { %6679 = vmatmul.mubr.msk.f32.vlgmr.msra.gmra.mxu0 %vm3736_vm0, %v13936_v41 }
 0xcb5   : > { %6683 = vmatmul.mubr.msk.f32.vlgmr.msra.gmra.mxu1 %vm3736_vm0, %v13936_v41  ;;  %5232 = vmatprep.mubr.f32.mxu0 %v8917_v37 }
 0xcb6   : > { %5321 = vmatprep.mubr.f32.mxu1 %v8917_v37  ;;  %5387 = vmatpush1.msra.mxu0 %v13922_v14 }
 0xcb7   : > { %5476 = vmatpush1.msra.mxu1 %v13924_v43  ;;  %5564 = vmatprep.subr.mxu0 %v13928_v10  ;;  %v6118_v10 = vld [vmem:[%s9084_s17 + $0x190] sm:$0xff] }
 0xcb8   : > { %6680 = vmatmul.mubr.msk.f32.gmra.mxu0 %vm3736_vm0, %v13934_v15  ;;  %5653 = vmatprep.subr.mxu1 %v13930_v21 }
 0xcb9   : > { %6684 = vmatmul.mubr.msk.f32.gmra.mxu1 %vm3736_vm0, %v13934_v15  ;;  %5238 = vmatprep.mubr.f32.mxu0 %v8917_v37 }
 0xcba   : > { %5327 = vmatprep.mubr.f32.mxu1 %v8917_v37 }
 0xcbc   : > { %6681 = vmatmul.mubr.msk.f32.gmra.mxu0 %vm3736_vm0, %v13953_v35 }
 0xcbd   : > { %6685 = vmatmul.mubr.msk.f32.gmra.mxu1 %vm3736_vm0, %v13953_v35  ;;  %5244 = vmatprep.mubr.f32.mxu0 %v8917_v37  ;;  %v6073_v35 = vld [vmem:[%s9084_s17 + $0x28] sm:$0xff] }
 0xcbe   : > { %5333 = vmatprep.mubr.f32.mxu1 %v8917_v37 }
 0xcc0   : > { %6682 = vmatmul.mubr.msk.f32.gmra.mxu0 %vm3736_vm0, %v13940_v4 }
 0xcc1   : > { %6686 = vmatmul.mubr.msk.f32.gmra.mxu1 %vm3736_vm0, %v13940_v4  ;;  %5420 = vmatprep.mubr.f32.mxu0 %v8917_v37 }
 0xcc2   : > { %5509 = vmatprep.mubr.f32.mxu1 %v8917_v37 }
 0xcf4   : > { %v5343_v16 = vpop.permute.xlu0 %5342 }
 0xcf6   : > { %v14082_v29 = vpop.permute.xlu1 %5340 }
 0xcf7   : > { %6687 = vmatmul.mubr.msk.f32.vlgmr.msra.gmra.mxu0 %vm3736_vm0, %v14082_v29  ;;  %6691 = vmatmul.mubr.msk.f32.vlgmr.msra.gmra.mxu1 %vm3736_vm0, %v14082_v29 }
 0xcf8   : > { %5426 = vmatprep.mubr.f32.mxu0 %v8917_v37  ;;  %5515 = vmatprep.mubr.f32.mxu1 %v8917_v37  ;;  %v5347_v49 = vpop.permute.xlu0 %5346 }
 0xcf9   : > { %5565 = vmatpush1.msra.mxu0 %v13946_v54  ;;  %5654 = vmatpush1.msra.mxu1 %v13948_v12  ;;  %v6074_v12 = vld [vmem:[%s9084_s17 + $0x30] sm:$0xff] }
 0xcfa   : > { %5742 = vmatprep.subr.mxu0 %v13960_v23  ;;  %5831 = vmatprep.subr.mxu1 %v13966_v30  ;;  %v5345_v2 = vpop.permute.xlu1 %5344 }
 0xcfb   : > { %6688 = vmatmul.mubr.msk.f32.gmra.mxu0 %vm3736_vm0, %v5343_v16  ;;  %6692 = vmatmul.mubr.msk.f32.gmra.mxu1 %vm3736_vm0, %v5343_v16 }
 0xcfc   : > { %5432 = vmatprep.mubr.f32.mxu0 %v8917_v37  ;;  %5521 = vmatprep.mubr.f32.mxu1 %v8917_v37 }
 0xcff   : > { %6689 = vmatmul.mubr.msk.f32.gmra.mxu0 %vm3736_vm0, %v5345_v2  ;;  %6693 = vmatmul.mubr.msk.f32.gmra.mxu1 %vm3736_vm0, %v5345_v2 }
 0xd00   : > { %5438 = vmatprep.mubr.f32.mxu0 %v8917_v37  ;;  %5527 = vmatprep.mubr.f32.mxu1 %v8917_v37 }
 0xd03   : > { %6690 = vmatmul.mubr.msk.f32.gmra.mxu0 %vm3736_vm0, %v5347_v49  ;;  %6694 = vmatmul.mubr.msk.f32.gmra.mxu1 %vm3736_vm0, %v5347_v49 }
 0xd04   : > { %5598 = vmatprep.mubr.f32.mxu0 %v8917_v37  ;;  %5687 = vmatprep.mubr.f32.mxu1 %v8917_v37 }
 0xd07   : > { %6695 = vmatmul.mubr.msk.f32.vlgmr.msra.gmra.mxu0 %vm3736_vm0, %v14082_v29  ;;  %6699 = vmatmul.mubr.msk.f32.vlgmr.msra.gmra.mxu1 %vm3736_vm0, %v14082_v29 }
 0xd08   : > { %5604 = vmatprep.mubr.f32.mxu0 %v8917_v37  ;;  %5693 = vmatprep.mubr.f32.mxu1 %v8917_v37 }
 0xd09   : > { %5743 = vmatpush1.msra.mxu0 %v13986_v6  ;;  %5832 = vmatpush1.msra.mxu1 %v13990_v1  ;;  %v6075_v6 = vld [vmem:[%s9084_s17 + $0x38] sm:$0xff] }
 0xd0a   : > { %5920 = vmatprep.subr.mxu0 %v13992_v48  ;;  %6009 = vmatprep.subr.mxu1 %v13997_v34  ;;  %v6088_v34 = vld [vmem:[%s9084_s17 + $0xa0] sm:$0xff] }
 0xd0b   : > { %6696 = vmatmul.mubr.msk.f32.gmra.mxu0 %vm3736_vm0, %v5343_v16  ;;  %6700 = vmatmul.mubr.msk.f32.gmra.mxu1 %vm3736_vm0, %v5343_v16 }
 0xd0c   : > { %5610 = vmatprep.mubr.f32.mxu0 %v8917_v37  ;;  %5699 = vmatprep.mubr.f32.mxu1 %v8917_v37 }
 0xd0f   : > { %6697 = vmatmul.mubr.msk.f32.gmra.mxu0 %vm3736_vm0, %v5345_v2  ;;  %6701 = vmatmul.mubr.msk.f32.gmra.mxu1 %vm3736_vm0, %v5345_v2 }
 0xd10   : > { %5616 = vmatprep.mubr.f32.mxu0 %v8917_v37  ;;  %5705 = vmatprep.mubr.f32.mxu1 %v8917_v37 }
 0xd13   : > { %6698 = vmatmul.mubr.msk.f32.gmra.mxu0 %vm3736_vm0, %v5347_v49  ;;  %6702 = vmatmul.mubr.msk.f32.gmra.mxu1 %vm3736_vm0, %v5347_v49 }
 0xd14   : > { %5776 = vmatprep.mubr.f32.mxu0 %v8917_v37  ;;  %5865 = vmatprep.mubr.f32.mxu1 %v8917_v37 }
 0xd17   : > { %6703 = vmatmul.mubr.msk.f32.vlgmr.msra.gmra.mxu0 %vm3736_vm0, %v14082_v29  ;;  %6707 = vmatmul.mubr.msk.f32.vlgmr.msra.gmra.mxu1 %vm3736_vm0, %v14082_v29 }
 0xd18   : > { %5782 = vmatprep.mubr.f32.mxu0 %v8917_v37  ;;  %5871 = vmatprep.mubr.f32.mxu1 %v8917_v37 }
 0xd19   : > { %5921 = vmatpush1.msra.mxu0 %v14022_v36  ;;  %6010 = vmatpush1.msra.mxu1 %v14026_v46 }
 0xd1b   : > { %6704 = vmatmul.mubr.msk.f32.gmra.mxu0 %vm3736_vm0, %v5343_v16  ;;  %6708 = vmatmul.mubr.msk.f32.gmra.mxu1 %vm3736_vm0, %v5343_v16 }
 0xd1c   : > { %5788 = vmatprep.mubr.f32.mxu0 %v8917_v37  ;;  %5877 = vmatprep.mubr.f32.mxu1 %v8917_v37 }
 0xd1f   : > { %6705 = vmatmul.mubr.msk.f32.gmra.mxu0 %vm3736_vm0, %v5345_v2  ;;  %6709 = vmatmul.mubr.msk.f32.gmra.mxu1 %vm3736_vm0, %v5345_v2 }
 0xd20   : > { %5794 = vmatprep.mubr.f32.mxu0 %v8917_v37  ;;  %5883 = vmatprep.mubr.f32.mxu1 %v8917_v37 }
 0xd23   : > { %6706 = vmatmul.mubr.msk.f32.gmra.mxu0 %vm3736_vm0, %v5347_v49  ;;  %6710 = vmatmul.mubr.msk.f32.gmra.mxu1 %vm3736_vm0, %v5347_v49 }
 0xd24   : > { %5954 = vmatprep.mubr.f32.mxu0 %v8917_v37  ;;  %6043 = vmatprep.mubr.f32.mxu1 %v8917_v37 }
 0xd27   : > { %6711 = vmatmul.mubr.msk.f32.vlgmr.msra.gmra.mxu0 %vm3736_vm0, %v14082_v29  ;;  %6715 = vmatmul.mubr.msk.f32.vlgmr.msra.gmra.mxu1 %vm3736_vm0, %v14082_v29  ;;  %v6090_v29 = vld [vmem:[%s9084_s17 + $0xb0] sm:$0xff] }
 0xd28   : > { %5960 = vmatprep.mubr.f32.mxu0 %v8917_v37  ;;  %6049 = vmatprep.mubr.f32.mxu1 %v8917_v37 }
 0xd2b   : > { %6712 = vmatmul.mubr.msk.f32.gmra.mxu0 %vm3736_vm0, %v5343_v16  ;;  %6716 = vmatmul.mubr.msk.f32.gmra.mxu1 %vm3736_vm0, %v5343_v16 }
 0xd2c   : > { %5966 = vmatprep.mubr.f32.mxu0 %v8917_v37  ;;  %6055 = vmatprep.mubr.f32.mxu1 %v8917_v37 }
 0xd2f   : > { %6713 = vmatmul.mubr.msk.f32.gmra.mxu0 %vm3736_vm0, %v5345_v2  ;;  %6717 = vmatmul.mubr.msk.f32.gmra.mxu1 %vm3736_vm0, %v5345_v2 }
 0xd30   : > { %5972 = vmatprep.mubr.f32.mxu0 %v8917_v37  ;;  %6061 = vmatprep.mubr.f32.mxu1 %v8917_v37 }
 0xd33   : > { %6714 = vmatmul.mubr.msk.f32.gmra.mxu0 %vm3736_vm0, %v5347_v49  ;;  %6718 = vmatmul.mubr.msk.f32.gmra.mxu1 %vm3736_vm0, %v5347_v49  ;;  %v6089_v49 = vld [vmem:[%s9084_s17 + $0xa8] sm:$0xff] }
 0xd44   : > { %v4694_v55 = vpop.f32.mrf.mxu0 }
 0xd45   : > { %v6196_v58 = vadd.f32 %v6068_v42, %v4694_v55  ;;  %v4783_v26 = vpop.f32.mrf.mxu1  ;;  %v6091_v55 = vld [vmem:[%s9084_s17 + $0xb8] sm:$0xff] }
 0xd46   : > { %v6198_v61 = vadd.f32 %v6070_v28, %v4783_v26  ;;  %v4696_v24 = vpop.f32.mrf.mxu0  ;;  %v6104_v26 = vld [vmem:[%s9084_s17 + $0x120] sm:$0xff] }
 0xd47   : > { %6324 = vst [vmem:[%s14171_s28] sm:$0xff] %v6196_v58  ;;  %v6197_v37 = vadd.f32 %v6069_v5, %v4696_v24  ;;  %v4785_v33 = vpop.f32.mrf.mxu1  ;;  %v6106_v24 = vld [vmem:[%s9084_s17 + $0x130] sm:$0xff] }
 0xd48   : > { %6326 = vst [vmem:[%s14171_s28 + $0x10] sm:$0xff] %v6198_v61  ;;  %v6199_v22 = vadd.f32 %v6071_v51, %v4785_v33  ;;  %v4700_v45 = vpop.f32.mrf.mxu0  ;;  %v6105_v33 = vld [vmem:[%s9084_s17 + $0x128] sm:$0xff] }
 0xd49   : > { %6325 = vst [vmem:[%s14171_s28 + $0x8] sm:$0xff] %v6197_v37  ;;  %v6212_v31 = vadd.f32 %v6084_v57, %v4700_v45  ;;  %v4789_v59 = vpop.f32.mrf.mxu1  ;;  %v6107_v45 = vld [vmem:[%s9084_s17 + $0x138] sm:$0xff] }
 0xd4a   : > { %6327 = vst [vmem:[%s14171_s28 + $0x18] sm:$0xff] %v6199_v22  ;;  %v6214_v13 = vadd.f32 %v6086_v44, %v4789_v59  ;;  %v4702_v25 = vpop.f32.mrf.mxu0  ;;  %v6120_v59 = vld [vmem:[%s9084_s17 + $0x1a0] sm:$0xff] }
 0xd4b   : > { %6340 = vst [vmem:[%s14171_s28 + $0x80] sm:$0xff] %v6212_v31  ;;  %v6213_v63 = vadd.f32 %v6085_v20, %v4702_v25  ;;  %v4791_v27 = vpop.f32.mrf.mxu1  ;;  %v6122_v25 = vld [vmem:[%s9084_s17 + $0x1b0] sm:$0xff] }
 0xd4c   : > { %6342 = vst [vmem:[%s14171_s28 + $0x90] sm:$0xff] %v6214_v13  ;;  %v6215_v19 = vadd.f32 %v6087_v52, %v4791_v27  ;;  %v4706_v0 = vpop.f32.mrf.mxu0  ;;  %v6121_v27 = vld [vmem:[%s9084_s17 + $0x1a8] sm:$0xff] }
 0xd4d   : > { %6341 = vst [vmem:[%s14171_s28 + $0x88] sm:$0xff] %v6213_v63  ;;  %v6228_v17 = vadd.f32 %v6100_v18, %v4706_v0  ;;  %v4795_v60 = vpop.f32.mrf.mxu1  ;;  %v6123_v0 = vld [vmem:[%s9084_s17 + $0x1b8] sm:$0xff] }
 0xd4e   : > { %6343 = vst [vmem:[%s14171_s28 + $0x98] sm:$0xff] %v6215_v19  ;;  %v6230_v56 = vadd.f32 %v6102_v9, %v4795_v60  ;;  %v4708_v8 = vpop.f32.mrf.mxu0  ;;  %v6076_v60 = vld [vmem:[%s9084_s17 + $0x40] sm:$0xff] }
 0xd4f   : > { %6356 = vst [vmem:[%s14171_s28 + $0x100] sm:$0xff] %v6228_v17  ;;  %v6229_v14 = vadd.f32 %v6101_v3, %v4708_v8  ;;  %v4797_v43 = vpop.f32.mrf.mxu1  ;;  %v6078_v8 = vld [vmem:[%s9084_s17 + $0x50] sm:$0xff] }
 0xd50   : > { %6358 = vst [vmem:[%s14171_s28 + $0x110] sm:$0xff] %v6230_v56  ;;  %v6231_v21 = vadd.f32 %v6103_v50, %v4797_v43  ;;  %v4712_v53 = vpop.f32.mrf.mxu0  ;;  %v6077_v43 = vld [vmem:[%s9084_s17 + $0x48] sm:$0xff] }
 0xd51   : > { %6357 = vst [vmem:[%s14171_s28 + $0x108] sm:$0xff] %v6229_v14  ;;  %v6244_v11 = vadd.f32 %v6116_v62, %v4712_v53  ;;  %v4801_v15 = vpop.f32.mrf.mxu1  ;;  %v6079_v53 = vld [vmem:[%s9084_s17 + $0x58] sm:$0xff] }
 0xd52   : > { %6359 = vst [vmem:[%s14171_s28 + $0x118] sm:$0xff] %v6231_v21  ;;  %v6246_v41 = vadd.f32 %v6118_v10, %v4801_v15  ;;  %v4714_v47 = vpop.f32.mrf.mxu0  ;;  %v6092_v15 = vld [vmem:[%s9084_s17 + $0xc0] sm:$0xff] }
 0xd53   : > { %6372 = vst [vmem:[%s14171_s28 + $0x180] sm:$0xff] %v6244_v11  ;;  %v6245_v4 = vadd.f32 %v6117_v32, %v4714_v47  ;;  %v4803_v54 = vpop.f32.mrf.mxu1  ;;  %v6094_v47 = vld [vmem:[%s9084_s17 + $0xd0] sm:$0xff] }
 0xd54   : > { %6374 = vst [vmem:[%s14171_s28 + $0x190] sm:$0xff] %v6246_v41  ;;  %v6247_v40 = vadd.f32 %v6119_v39, %v4803_v54  ;;  %v4872_v7 = vpop.f32.mrf.mxu0  ;;  %v6093_v54 = vld [vmem:[%s9084_s17 + $0xc8] sm:$0xff] }
 0xd55   : > { %6373 = vst [vmem:[%s14171_s28 + $0x188] sm:$0xff] %v6245_v4  ;;  %v6200_v23 = vadd.f32 %v6072_v38, %v4872_v7  ;;  %v4961_v30 = vpop.f32.mrf.mxu1  ;;  %v6095_v7 = vld [vmem:[%s9084_s17 + $0xd8] sm:$0xff] }
 0xd56   : > { %6375 = vst [vmem:[%s14171_s28 + $0x198] sm:$0xff] %v6247_v40  ;;  %v6202_v1 = vadd.f32 %v6074_v12, %v4961_v30  ;;  %v4874_v48 = vpop.f32.mrf.mxu0  ;;  %v6108_v30 = vld [vmem:[%s9084_s17 + $0x140] sm:$0xff] }
 0xd57   : > { %6328 = vst [vmem:[%s14171_s28 + $0x20] sm:$0xff] %v6200_v23  ;;  %v6201_v36 = vadd.f32 %v6073_v35, %v4874_v48  ;;  %v4963_v46 = vpop.f32.mrf.mxu1  ;;  %v6110_v48 = vld [vmem:[%s9084_s17 + $0x150] sm:$0xff] }
 0xd58   : > { %6330 = vst [vmem:[%s14171_s28 + $0x30] sm:$0xff] %v6202_v1  ;;  %v6203_v16 = vadd.f32 %v6075_v6, %v4963_v46  ;;  %v4878_v2 = vpop.f32.mrf.mxu0  ;;  %v6109_v46 = vld [vmem:[%s9084_s17 + $0x148] sm:$0xff] }
 0xd59   : > { %6329 = vst [vmem:[%s14171_s28 + $0x28] sm:$0xff] %v6201_v36  ;;  %v6216_v42 = vadd.f32 %v6088_v34, %v4878_v2  ;;  %v4967_v28 = vpop.f32.mrf.mxu1  ;;  %v6111_v2 = vld [vmem:[%s9084_s17 + $0x158] sm:$0xff] }
 0xd5a   : > { %6331 = vst [vmem:[%s14171_s28 + $0x38] sm:$0xff] %v6203_v16  ;;  %v6218_v5 = vadd.f32 %v6090_v29, %v4967_v28  ;;  %v4880_v58 = vpop.f32.mrf.mxu0  ;;  %v6124_v28 = vld [vmem:[%s9084_s17 + $0x1c0] sm:$0xff] }
 0xd5b   : > { %6344 = vst [vmem:[%s14171_s28 + $0xa0] sm:$0xff] %v6216_v42  ;;  %v6217_v51 = vadd.f32 %v6089_v49, %v4880_v58  ;;  %v4969_v61 = vpop.f32.mrf.mxu1  ;;  %v6126_v58 = vld [vmem:[%s9084_s17 + $0x1d0] sm:$0xff] }
 0xd5c   : > { %6346 = vst [vmem:[%s14171_s28 + $0xb0] sm:$0xff] %v6218_v5  ;;  %v6219_v57 = vadd.f32 %v6091_v55, %v4969_v61  ;;  %v4884_v37 = vpop.f32.mrf.mxu0  ;;  %v6125_v61 = vld [vmem:[%s9084_s17 + $0x1c8] sm:$0xff] }
 0xd5d   : > { %6345 = vst [vmem:[%s14171_s28 + $0xa8] sm:$0xff] %v6217_v51  ;;  %v6232_v44 = vadd.f32 %v6104_v26, %v4884_v37  ;;  %v4973_v22 = vpop.f32.mrf.mxu1  ;;  %v6127_v37 = vld [vmem:[%s9084_s17 + $0x1d8] sm:$0xff] }
 0xd5e   : > { %6347 = vst [vmem:[%s14171_s28 + $0xb8] sm:$0xff] %v6219_v57  ;;  %v6234_v20 = vadd.f32 %v6106_v24, %v4973_v22  ;;  %v4886_v31 = vpop.f32.mrf.mxu0  ;;  %v6080_v22 = vld [vmem:[%s9084_s17 + $0x60] sm:$0xff] }
 0xd5f   : > { %6360 = vst [vmem:[%s14171_s28 + $0x120] sm:$0xff] %v6232_v44  ;;  %v6233_v52 = vadd.f32 %v6105_v33, %v4886_v31  ;;  %v4975_v13 = vpop.f32.mrf.mxu1  ;;  %v6082_v31 = vld [vmem:[%s9084_s17 + $0x70] sm:$0xff] }
 0xd60   : > { %6362 = vst [vmem:[%s14171_s28 + $0x130] sm:$0xff] %v6234_v20  ;;  %v6235_v18 = vadd.f32 %v6107_v45, %v4975_v13  ;;  %v4890_v63 = vpop.f32.mrf.mxu0  ;;  %v6081_v13 = vld [vmem:[%s9084_s17 + $0x68] sm:$0xff] }
 0xd61   : > { %6361 = vst [vmem:[%s14171_s28 + $0x128] sm:$0xff] %v6233_v52  ;;  %v6248_v9 = vadd.f32 %v6120_v59, %v4890_v63  ;;  %v4979_v19 = vpop.f32.mrf.mxu1  ;;  %v6083_v63 = vld [vmem:[%s9084_s17 + $0x78] sm:$0xff] }
 0xd62   : > { %6363 = vst [vmem:[%s14171_s28 + $0x138] sm:$0xff] %v6235_v18  ;;  %v6250_v3 = vadd.f32 %v6122_v25, %v4979_v19  ;;  %v4892_v17 = vpop.f32.mrf.mxu0  ;;  %v6096_v19 = vld [vmem:[%s9084_s17 + $0xe0] sm:$0xff] }
 0xd63   : > { %6376 = vst [vmem:[%s14171_s28 + $0x1a0] sm:$0xff] %v6248_v9  ;;  %v6249_v50 = vadd.f32 %v6121_v27, %v4892_v17  ;;  %v4981_v56 = vpop.f32.mrf.mxu1  ;;  %v6098_v17 = vld [vmem:[%s9084_s17 + $0xf0] sm:$0xff] }
 0xd64   : > { %6378 = vst [vmem:[%s14171_s28 + $0x1b0] sm:$0xff] %v6250_v3  ;;  %v6251_v62 = vadd.f32 %v6123_v0, %v4981_v56  ;;  %v5050_v14 = vpop.f32.mrf.mxu0  ;;  %v6097_v56 = vld [vmem:[%s9084_s17 + $0xe8] sm:$0xff] }
 0xd65   : > { %6377 = vst [vmem:[%s14171_s28 + $0x1a8] sm:$0xff] %v6249_v50  ;;  %v6204_v10 = vadd.f32 %v6076_v60, %v5050_v14  ;;  %v5139_v21 = vpop.f32.mrf.mxu1  ;;  %v6099_v14 = vld [vmem:[%s9084_s17 + $0xf8] sm:$0xff] }
 0xd66   : > { %6379 = vst [vmem:[%s14171_s28 + $0x1b8] sm:$0xff] %v6251_v62  ;;  %v6206_v32 = vadd.f32 %v6078_v8, %v5139_v21  ;;  %v5052_v11 = vpop.f32.mrf.mxu0  ;;  %v6112_v21 = vld [vmem:[%s9084_s17 + $0x160] sm:$0xff] }
 0xd67   : > { %6332 = vst [vmem:[%s14171_s28 + $0x40] sm:$0xff] %v6204_v10  ;;  %v6205_v39 = vadd.f32 %v6077_v43, %v5052_v11  ;;  %v5141_v41 = vpop.f32.mrf.mxu1  ;;  %v6114_v11 = vld [vmem:[%s9084_s17 + $0x170] sm:$0xff] }
 0xd68   : > { %6334 = vst [vmem:[%s14171_s28 + $0x50] sm:$0xff] %v6206_v32  ;;  %v6207_v38 = vadd.f32 %v6079_v53, %v5141_v41  ;;  %v5056_v4 = vpop.f32.mrf.mxu0  ;;  %v6113_v41 = vld [vmem:[%s9084_s17 + $0x168] sm:$0xff] }
 0xd69   : > { %6333 = vst [vmem:[%s14171_s28 + $0x48] sm:$0xff] %v6205_v39  ;;  %v6220_v12 = vadd.f32 %v6092_v15, %v5056_v4  ;;  %v5145_v40 = vpop.f32.mrf.mxu1  ;;  %v6115_v4 = vld [vmem:[%s9084_s17 + $0x178] sm:$0xff] }
 0xd6a   : > { %6335 = vst [vmem:[%s14171_s28 + $0x58] sm:$0xff] %v6207_v38  ;;  %v6222_v35 = vadd.f32 %v6094_v47, %v5145_v40  ;;  %v5058_v23 = vpop.f32.mrf.mxu0  ;;  %v6128_v40 = vld [vmem:[%s9084_s17 + $0x1e0] sm:$0xff] }
 0xd6b   : > { %6348 = vst [vmem:[%s14171_s28 + $0xc0] sm:$0xff] %v6220_v12  ;;  %v6221_v6 = vadd.f32 %v6093_v54, %v5058_v23  ;;  %v5147_v1 = vpop.f32.mrf.mxu1  ;;  %v6130_v23 = vld [vmem:[%s9084_s17 + $0x1f0] sm:$0xff] }
 0xd6c   : > { %6350 = vst [vmem:[%s14171_s28 + $0xd0] sm:$0xff] %v6222_v35  ;;  %v6223_v34 = vadd.f32 %v6095_v7, %v5147_v1  ;;  %v5062_v36 = vpop.f32.mrf.mxu0  ;;  %v6129_v1 = vld [vmem:[%s9084_s17 + $0x1e8] sm:$0xff] }
 0xd6d   : > { %6349 = vst [vmem:[%s14171_s28 + $0xc8] sm:$0xff] %v6221_v6  ;;  %v6236_v29 = vadd.f32 %v6108_v30, %v5062_v36  ;;  %v5151_v16 = vpop.f32.mrf.mxu1  ;;  %v6131_v36 = vld [vmem:[%s9084_s17 + $0x1f8] sm:$0xff] }
 0xd6e   : > { %6351 = vst [vmem:[%s14171_s28 + $0xd8] sm:$0xff] %v6223_v34  ;;  %v6238_v49 = vadd.f32 %v6110_v48, %v5151_v16  ;;  %v5064_v42 = vpop.f32.mrf.mxu0 }
 0xd6f   : > { %6364 = vst [vmem:[%s14171_s28 + $0x140] sm:$0xff] %v6236_v29  ;;  %v6237_v55 = vadd.f32 %v6109_v46, %v5064_v42  ;;  %v5153_v5 = vpop.f32.mrf.mxu1  ;;  %v6132_v42 = vld [vmem:[%s9084_s17 + $0x200] sm:$0xff] }
 0xd70   : > { %6366 = vst [vmem:[%s14171_s28 + $0x150] sm:$0xff] %v6238_v49  ;;  %v6239_v26 = vadd.f32 %v6111_v2, %v5153_v5  ;;  %v5068_v51 = vpop.f32.mrf.mxu0 }
 0xd71   : > { %6365 = vst [vmem:[%s14171_s28 + $0x148] sm:$0xff] %v6237_v55  ;;  %v6252_v24 = vadd.f32 %v6124_v28, %v5068_v51  ;;  %v5157_v57 = vpop.f32.mrf.mxu1  ;;  %v6134_v28 = vld [vmem:[%s9084_s17 + $0x210] sm:$0xff] }
 0xd72   : > { %6367 = vst [vmem:[%s14171_s28 + $0x158] sm:$0xff] %v6239_v26  ;;  %v6254_v33 = vadd.f32 %v6126_v58, %v5157_v57  ;;  %v5070_v44 = vpop.f32.mrf.mxu0  ;;  %v6133_v58 = vld [vmem:[%s9084_s17 + $0x208] sm:$0xff]  ;;  %v6135_v26 = vld [vmem:[%s9084_s17 + $0x218] sm:$0xff] }
 0xd73   : > { %6380 = vst [vmem:[%s14171_s28 + $0x1c0] sm:$0xff] %v6252_v24  ;;  %v6253_v45 = vadd.f32 %v6125_v61, %v5070_v44  ;;  %v5159_v20 = vpop.f32.mrf.mxu1 }
 0xd74   : > { %6382 = vst [vmem:[%s14171_s28 + $0x1d0] sm:$0xff] %v6254_v33  ;;  %v6255_v59 = vadd.f32 %v6127_v37, %v5159_v20  ;;  %v5228_v52 = vpop.f32.mrf.mxu0  ;;  %v6148_v37 = vld [vmem:[%s9084_s17 + $0x280] sm:$0xff]  ;;  %v6150_v33 = vld [vmem:[%s9084_s17 + $0x290] sm:$0xff] }
 0xd75   : > { %6381 = vst [vmem:[%s14171_s28 + $0x1c8] sm:$0xff] %v6253_v45  ;;  %v6208_v25 = vadd.f32 %v6080_v22, %v5228_v52  ;;  %v5317_v18 = vpop.f32.mrf.mxu1 }
 0xd76   : > { %6383 = vst [vmem:[%s14171_s28 + $0x1d8] sm:$0xff] %v6255_v59  ;;  %v6210_v27 = vadd.f32 %v6082_v31, %v5317_v18  ;;  %v5230_v9 = vpop.f32.mrf.mxu0  ;;  %v6149_v31 = vld [vmem:[%s9084_s17 + $0x288] sm:$0xff]  ;;  %v6151_v59 = vld [vmem:[%s9084_s17 + $0x298] sm:$0xff] }
 0xd77   : > { %6336 = vst [vmem:[%s14171_s28 + $0x60] sm:$0xff] %v6208_v25  ;;  %v6209_v0 = vadd.f32 %v6081_v13, %v5230_v9  ;;  %v5319_v3 = vpop.f32.mrf.mxu1 }
 0xd78   : > { %6338 = vst [vmem:[%s14171_s28 + $0x70] sm:$0xff] %v6210_v27  ;;  %v6211_v60 = vadd.f32 %v6083_v63, %v5319_v3  ;;  %v5234_v50 = vpop.f32.mrf.mxu0  ;;  %v6164_v63 = vld [vmem:[%s9084_s17 + $0x300] sm:$0xff]  ;;  %v6166_v27 = vld [vmem:[%s9084_s17 + $0x310] sm:$0xff] }
 0xd79   : > { %6337 = vst [vmem:[%s14171_s28 + $0x68] sm:$0xff] %v6209_v0  ;;  %v6224_v8 = vadd.f32 %v6096_v19, %v5234_v50  ;;  %v5323_v62 = vpop.f32.mrf.mxu1 }
 0xd7a   : > { %6339 = vst [vmem:[%s14171_s28 + $0x78] sm:$0xff] %v6211_v60  ;;  %v6226_v43 = vadd.f32 %v6098_v17, %v5323_v62  ;;  %v5236_v10 = vpop.f32.mrf.mxu0  ;;  %v6165_v17 = vld [vmem:[%s9084_s17 + $0x308] sm:$0xff]  ;;  %v6167_v60 = vld [vmem:[%s9084_s17 + $0x318] sm:$0xff] }
 0xd7b   : > { %6352 = vst [vmem:[%s14171_s28 + $0xe0] sm:$0xff] %v6224_v8  ;;  %v6225_v53 = vadd.f32 %v6097_v56, %v5236_v10  ;;  %v5325_v32 = vpop.f32.mrf.mxu1 }
 0xd7c   : > { %6354 = vst [vmem:[%s14171_s28 + $0xf0] sm:$0xff] %v6226_v43  ;;  %v6227_v15 = vadd.f32 %v6099_v14, %v5325_v32  ;;  %v5240_v39 = vpop.f32.mrf.mxu0  ;;  %v6180_v14 = vld [vmem:[%s9084_s17 + $0x380] sm:$0xff]  ;;  %v6182_v43 = vld [vmem:[%s9084_s17 + $0x390] sm:$0xff] }
 0xd7d   : > { %6353 = vst [vmem:[%s14171_s28 + $0xe8] sm:$0xff] %v6225_v53  ;;  %v6240_v47 = vadd.f32 %v6112_v21, %v5240_v39  ;;  %v5329_v38 = vpop.f32.mrf.mxu1 }
 0xd7e   : > { %6355 = vst [vmem:[%s14171_s28 + $0xf8] sm:$0xff] %v6227_v15  ;;  %v6242_v54 = vadd.f32 %v6114_v11, %v5329_v38  ;;  %v5242_v12 = vpop.f32.mrf.mxu0  ;;  %v6181_v11 = vld [vmem:[%s9084_s17 + $0x388] sm:$0xff]  ;;  %v6183_v15 = vld [vmem:[%s9084_s17 + $0x398] sm:$0xff] }
 0xd7f   : > { %6368 = vst [vmem:[%s14171_s28 + $0x160] sm:$0xff] %v6240_v47  ;;  %v6241_v7 = vadd.f32 %v6113_v41, %v5242_v12  ;;  %v5331_v35 = vpop.f32.mrf.mxu1 }
 0xd80   : > { %6370 = vst [vmem:[%s14171_s28 + $0x170] sm:$0xff] %v6242_v54  ;;  %v6243_v30 = vadd.f32 %v6115_v4, %v5331_v35  ;;  %v5246_v6 = vpop.f32.mrf.mxu0  ;;  %v6136_v4 = vld [vmem:[%s9084_s17 + $0x220] sm:$0xff]  ;;  %v6138_v54 = vld [vmem:[%s9084_s17 + $0x230] sm:$0xff] }
 0xd81   : > { %6369 = vst [vmem:[%s14171_s28 + $0x168] sm:$0xff] %v6241_v7  ;;  %v6256_v48 = vadd.f32 %v6128_v40, %v5246_v6  ;;  %v5335_v34 = vpop.f32.mrf.mxu1 }
 0xd82   : > { %6371 = vst [vmem:[%s14171_s28 + $0x178] sm:$0xff] %v6243_v30  ;;  %v6258_v46 = vadd.f32 %v6130_v23, %v5335_v34  ;;  %v5248_v29 = vpop.f32.mrf.mxu0  ;;  %v6137_v23 = vld [vmem:[%s9084_s17 + $0x228] sm:$0xff]  ;;  %v6139_v30 = vld [vmem:[%s9084_s17 + $0x238] sm:$0xff] }
 0xd83   : > { %6384 = vst [vmem:[%s14171_s28 + $0x1e0] sm:$0xff] %v6256_v48  ;;  %v6257_v16 = vadd.f32 %v6129_v1, %v5248_v29  ;;  %v5337_v2 = vpop.f32.mrf.mxu1 }
 0xd84   : > { %6386 = vst [vmem:[%s14171_s28 + $0x1f0] sm:$0xff] %v6258_v46  ;;  %v6259_v49 = vadd.f32 %v6131_v36, %v5337_v2  ;;  %v6152_v36 = vld [vmem:[%s9084_s17 + $0x2a0] sm:$0xff]  ;;  %v6154_v46 = vld [vmem:[%s9084_s17 + $0x2b0] sm:$0xff] }
 0xd85   : > { %6385 = vst [vmem:[%s14171_s28 + $0x1e8] sm:$0xff] %v6257_v16 }
 0xd86   : > { %6387 = vst [vmem:[%s14171_s28 + $0x1f8] sm:$0xff] %v6259_v49 }
 0xdb7   : > { %v5422_v55 = vpop.f32.mrf.mxu0  ;;  %v5511_v5 = vpop.f32.mrf.mxu1 }
 0xdb8   : > { %v6260_v51 = vadd.f32 %v6132_v42, %v5422_v55  ;;  %v6262_v61 = vadd.f32 %v6134_v28, %v5511_v5  ;;  %v6153_v42 = vld [vmem:[%s9084_s17 + $0x2a8] sm:$0xff]  ;;  %v6155_v28 = vld [vmem:[%s9084_s17 + $0x2b8] sm:$0xff] }
 0xdb9   : > { %v5424_v24 = vpop.f32.mrf.mxu0  ;;  %v5513_v57 = vpop.f32.mrf.mxu1 }
 0xdba   : > { %6388 = vst [vmem:[%s14171_s28 + $0x200] sm:$0xff] %v6260_v51  ;;  %6390 = vst [vmem:[%s14171_s28 + $0x210] sm:$0xff] %v6262_v61  ;;  %v6261_v44 = vadd.f32 %v6133_v58, %v5424_v24  ;;  %v6263_v22 = vadd.f32 %v6135_v26, %v5513_v57  ;;  %v6168_v51 = vld [vmem:[%s9084_s17 + $0x320] sm:$0xff]  ;;  %v6170_v61 = vld [vmem:[%s9084_s17 + $0x330] sm:$0xff] }
 0xdbb   : > { %v5428_v45 = vpop.f32.mrf.mxu0  ;;  %v5517_v20 = vpop.f32.mrf.mxu1 }
 0xdbc   : > { %6389 = vst [vmem:[%s14171_s28 + $0x208] sm:$0xff] %v6261_v44  ;;  %6391 = vst [vmem:[%s14171_s28 + $0x218] sm:$0xff] %v6263_v22  ;;  %v6276_v52 = vadd.f32 %v6148_v37, %v5428_v45  ;;  %v6278_v13 = vadd.f32 %v6150_v33, %v5517_v20  ;;  %v6169_v44 = vld [vmem:[%s9084_s17 + $0x328] sm:$0xff]  ;;  %v6171_v22 = vld [vmem:[%s9084_s17 + $0x338] sm:$0xff] }
 0xdbd   : > { %v5430_v25 = vpop.f32.mrf.mxu0  ;;  %v5519_v18 = vpop.f32.mrf.mxu1 }
 0xdbe   : > { %6404 = vst [vmem:[%s14171_s28 + $0x280] sm:$0xff] %v6276_v52  ;;  %6406 = vst [vmem:[%s14171_s28 + $0x290] sm:$0xff] %v6278_v13  ;;  %v6277_v9 = vadd.f32 %v6149_v31, %v5430_v25  ;;  %v6279_v19 = vadd.f32 %v6151_v59, %v5519_v18  ;;  %v6184_v52 = vld [vmem:[%s9084_s17 + $0x3a0] sm:$0xff]  ;;  %v6186_v13 = vld [vmem:[%s9084_s17 + $0x3b0] sm:$0xff] }
 0xdbf   : > { %v5434_v0 = vpop.f32.mrf.mxu0  ;;  %v5523_v3 = vpop.f32.mrf.mxu1 }
 0xdc0   : > { %6405 = vst [vmem:[%s14171_s28 + $0x288] sm:$0xff] %v6277_v9  ;;  %6407 = vst [vmem:[%s14171_s28 + $0x298] sm:$0xff] %v6279_v19  ;;  %v6292_v50 = vadd.f32 %v6164_v63, %v5434_v0  ;;  %v6294_v56 = vadd.f32 %v6166_v27, %v5523_v3  ;;  %v6185_v9 = vld [vmem:[%s9084_s17 + $0x3a8] sm:$0xff]  ;;  %v6187_v19 = vld [vmem:[%s9084_s17 + $0x3b8] sm:$0xff] }
 0xdc1   : > { %v5436_v8 = vpop.f32.mrf.mxu0  ;;  %v5525_v62 = vpop.f32.mrf.mxu1 }
 0xdc2   : > { %6420 = vst [vmem:[%s14171_s28 + $0x300] sm:$0xff] %v6292_v50  ;;  %6422 = vst [vmem:[%s14171_s28 + $0x310] sm:$0xff] %v6294_v56  ;;  %v6293_v10 = vadd.f32 %v6165_v17, %v5436_v8  ;;  %v6295_v21 = vadd.f32 %v6167_v60, %v5525_v62  ;;  %v6140_v50 = vld [vmem:[%s9084_s17 + $0x240] sm:$0xff]  ;;  %v6142_v56 = vld [vmem:[%s9084_s17 + $0x250] sm:$0xff] }
 0xdc3   : > { %v5440_v53 = vpop.f32.mrf.mxu0  ;;  %v5529_v32 = vpop.f32.mrf.mxu1 }
 0xdc4   : > { %6421 = vst [vmem:[%s14171_s28 + $0x308] sm:$0xff] %v6293_v10  ;;  %6423 = vst [vmem:[%s14171_s28 + $0x318] sm:$0xff] %v6295_v21  ;;  %v6308_v39 = vadd.f32 %v6180_v14, %v5440_v53  ;;  %v6310_v41 = vadd.f32 %v6182_v43, %v5529_v32  ;;  %v6141_v10 = vld [vmem:[%s9084_s17 + $0x248] sm:$0xff]  ;;  %v6143_v21 = vld [vmem:[%s9084_s17 + $0x258] sm:$0xff] }
 0xdc5   : > { %v5442_v47 = vpop.f32.mrf.mxu0  ;;  %v5531_v38 = vpop.f32.mrf.mxu1 }
 0xdc6   : > { %6436 = vst [vmem:[%s14171_s28 + $0x380] sm:$0xff] %v6308_v39  ;;  %6438 = vst [vmem:[%s14171_s28 + $0x390] sm:$0xff] %v6310_v41  ;;  %v6309_v12 = vadd.f32 %v6181_v11, %v5442_v47  ;;  %v6311_v40 = vadd.f32 %v6183_v15, %v5531_v38  ;;  %v6156_v39 = vld [vmem:[%s9084_s17 + $0x2c0] sm:$0xff]  ;;  %v6158_v41 = vld [vmem:[%s9084_s17 + $0x2d0] sm:$0xff] }
 0xdc7   : > { %v5600_v7 = vpop.f32.mrf.mxu0  ;;  %v5689_v35 = vpop.f32.mrf.mxu1 }
 0xdc8   : > { %6437 = vst [vmem:[%s14171_s28 + $0x388] sm:$0xff] %v6309_v12  ;;  %6439 = vst [vmem:[%s14171_s28 + $0x398] sm:$0xff] %v6311_v40  ;;  %v6264_v6 = vadd.f32 %v6136_v4, %v5600_v7  ;;  %v6266_v1 = vadd.f32 %v6138_v54, %v5689_v35  ;;  %v6157_v12 = vld [vmem:[%s9084_s17 + $0x2c8] sm:$0xff]  ;;  %v6159_v40 = vld [vmem:[%s9084_s17 + $0x2d8] sm:$0xff] }
 0xdc9   : > { %v5602_v48 = vpop.f32.mrf.mxu0  ;;  %v5691_v34 = vpop.f32.mrf.mxu1 }
 0xdca   : > { %6392 = vst [vmem:[%s14171_s28 + $0x220] sm:$0xff] %v6264_v6  ;;  %6394 = vst [vmem:[%s14171_s28 + $0x230] sm:$0xff] %v6266_v1  ;;  %v6265_v29 = vadd.f32 %v6137_v23, %v5602_v48  ;;  %v6267_v16 = vadd.f32 %v6139_v30, %v5691_v34  ;;  %v6172_v6 = vld [vmem:[%s9084_s17 + $0x340] sm:$0xff]  ;;  %v6174_v1 = vld [vmem:[%s9084_s17 + $0x350] sm:$0xff] }
 0xdcb   : > { %v5606_v2 = vpop.f32.mrf.mxu0  ;;  %v5695_v49 = vpop.f32.mrf.mxu1 }
 0xdcc   : > { %6393 = vst [vmem:[%s14171_s28 + $0x228] sm:$0xff] %v6265_v29  ;;  %6395 = vst [vmem:[%s14171_s28 + $0x238] sm:$0xff] %v6267_v16  ;;  %v6280_v55 = vadd.f32 %v6152_v36, %v5606_v2  ;;  %v6282_v5 = vadd.f32 %v6154_v46, %v5695_v49  ;;  %v6173_v29 = vld [vmem:[%s9084_s17 + $0x348] sm:$0xff]  ;;  %v6175_v16 = vld [vmem:[%s9084_s17 + $0x358] sm:$0xff] }
 0xdcd   : > { %v5608_v58 = vpop.f32.mrf.mxu0  ;;  %v5697_v26 = vpop.f32.mrf.mxu1 }
 0xdce   : > { %6408 = vst [vmem:[%s14171_s28 + $0x2a0] sm:$0xff] %v6280_v55  ;;  %6410 = vst [vmem:[%s14171_s28 + $0x2b0] sm:$0xff] %v6282_v5  ;;  %v6281_v24 = vadd.f32 %v6153_v42, %v5608_v58  ;;  %v6283_v57 = vadd.f32 %v6155_v28, %v5697_v26  ;;  %v6188_v55 = vld [vmem:[%s9084_s17 + $0x3c0] sm:$0xff]  ;;  %v6190_v5 = vld [vmem:[%s9084_s17 + $0x3d0] sm:$0xff] }
 0xdcf   : > { %v5612_v37 = vpop.f32.mrf.mxu0  ;;  %v5701_v33 = vpop.f32.mrf.mxu1 }
 0xdd0   : > { %6409 = vst [vmem:[%s14171_s28 + $0x2a8] sm:$0xff] %v6281_v24  ;;  %6411 = vst [vmem:[%s14171_s28 + $0x2b8] sm:$0xff] %v6283_v57  ;;  %v6296_v45 = vadd.f32 %v6168_v51, %v5612_v37  ;;  %v6298_v20 = vadd.f32 %v6170_v61, %v5701_v33  ;;  %v6189_v24 = vld [vmem:[%s9084_s17 + $0x3c8] sm:$0xff]  ;;  %v6191_v57 = vld [vmem:[%s9084_s17 + $0x3d8] sm:$0xff] }
 0xdd1   : > { %v5614_v31 = vpop.f32.mrf.mxu0  ;;  %v5703_v59 = vpop.f32.mrf.mxu1 }
 0xdd2   : > { %6424 = vst [vmem:[%s14171_s28 + $0x320] sm:$0xff] %v6296_v45  ;;  %6426 = vst [vmem:[%s14171_s28 + $0x330] sm:$0xff] %v6298_v20  ;;  %v6297_v25 = vadd.f32 %v6169_v44, %v5614_v31  ;;  %v6299_v18 = vadd.f32 %v6171_v22, %v5703_v59  ;;  %v6144_v45 = vld [vmem:[%s9084_s17 + $0x260] sm:$0xff]  ;;  %v6146_v20 = vld [vmem:[%s9084_s17 + $0x270] sm:$0xff] }
 0xdd3   : > { %v5618_v63 = vpop.f32.mrf.mxu0  ;;  %v5707_v27 = vpop.f32.mrf.mxu1 }
 0xdd4   : > { %6425 = vst [vmem:[%s14171_s28 + $0x328] sm:$0xff] %v6297_v25  ;;  %6427 = vst [vmem:[%s14171_s28 + $0x338] sm:$0xff] %v6299_v18  ;;  %v6312_v0 = vadd.f32 %v6184_v52, %v5618_v63  ;;  %v6314_v3 = vadd.f32 %v6186_v13, %v5707_v27  ;;  %v6145_v25 = vld [vmem:[%s9084_s17 + $0x268] sm:$0xff]  ;;  %v6147_v18 = vld [vmem:[%s9084_s17 + $0x278] sm:$0xff] }
 0xdd5   : > { %v5620_v17 = vpop.f32.mrf.mxu0  ;;  %v5709_v60 = vpop.f32.mrf.mxu1 }
 0xdd6   : > { %6440 = vst [vmem:[%s14171_s28 + $0x3a0] sm:$0xff] %v6312_v0  ;;  %6442 = vst [vmem:[%s14171_s28 + $0x3b0] sm:$0xff] %v6314_v3  ;;  %v6313_v8 = vadd.f32 %v6185_v9, %v5620_v17  ;;  %v6315_v62 = vadd.f32 %v6187_v19, %v5709_v60  ;;  %v6160_v0 = vld [vmem:[%s9084_s17 + $0x2e0] sm:$0xff]  ;;  %v6162_v3 = vld [vmem:[%s9084_s17 + $0x2f0] sm:$0xff] }
 0xdd7   : > { %v5778_v14 = vpop.f32.mrf.mxu0  ;;  %v5867_v43 = vpop.f32.mrf.mxu1 }
 0xdd8   : > { %6441 = vst [vmem:[%s14171_s28 + $0x3a8] sm:$0xff] %v6313_v8  ;;  %6443 = vst [vmem:[%s14171_s28 + $0x3b8] sm:$0xff] %v6315_v62  ;;  %v6268_v53 = vadd.f32 %v6140_v50, %v5778_v14  ;;  %v6270_v32 = vadd.f32 %v6142_v56, %v5867_v43  ;;  %v6161_v8 = vld [vmem:[%s9084_s17 + $0x2e8] sm:$0xff]  ;;  %v6163_v62 = vld [vmem:[%s9084_s17 + $0x2f8] sm:$0xff] }
 0xdd9   : > { %v5780_v11 = vpop.f32.mrf.mxu0  ;;  %v5869_v15 = vpop.f32.mrf.mxu1 }
 0xdda   : > { %6396 = vst [vmem:[%s14171_s28 + $0x240] sm:$0xff] %v6268_v53  ;;  %6398 = vst [vmem:[%s14171_s28 + $0x250] sm:$0xff] %v6270_v32  ;;  %v6269_v47 = vadd.f32 %v6141_v10, %v5780_v11  ;;  %v6271_v38 = vadd.f32 %v6143_v21, %v5869_v15  ;;  %v6176_v53 = vld [vmem:[%s9084_s17 + $0x360] sm:$0xff]  ;;  %v6178_v32 = vld [vmem:[%s9084_s17 + $0x370] sm:$0xff] }
 0xddb   : > { %v5784_v4 = vpop.f32.mrf.mxu0  ;;  %v5873_v54 = vpop.f32.mrf.mxu1 }
 0xddc   : > { %6397 = vst [vmem:[%s14171_s28 + $0x248] sm:$0xff] %v6269_v47  ;;  %6399 = vst [vmem:[%s14171_s28 + $0x258] sm:$0xff] %v6271_v38  ;;  %v6284_v7 = vadd.f32 %v6156_v39, %v5784_v4  ;;  %v6286_v35 = vadd.f32 %v6158_v41, %v5873_v54  ;;  %v6177_v47 = vld [vmem:[%s9084_s17 + $0x368] sm:$0xff]  ;;  %v6179_v38 = vld [vmem:[%s9084_s17 + $0x378] sm:$0xff] }
 0xddd   : > { %v5786_v23 = vpop.f32.mrf.mxu0  ;;  %v5875_v30 = vpop.f32.mrf.mxu1 }
 0xdde   : > { %6412 = vst [vmem:[%s14171_s28 + $0x2c0] sm:$0xff] %v6284_v7  ;;  %6414 = vst [vmem:[%s14171_s28 + $0x2d0] sm:$0xff] %v6286_v35  ;;  %v6285_v48 = vadd.f32 %v6157_v12, %v5786_v23  ;;  %v6287_v34 = vadd.f32 %v6159_v40, %v5875_v30  ;;  %v6192_v7 = vld [vmem:[%s9084_s17 + $0x3e0] sm:$0xff]  ;;  %v6194_v35 = vld [vmem:[%s9084_s17 + $0x3f0] sm:$0xff] }
 0xddf   : > { %v5790_v36 = vpop.f32.mrf.mxu0  ;;  %v5879_v46 = vpop.f32.mrf.mxu1 }
 0xde0   : > { %6413 = vst [vmem:[%s14171_s28 + $0x2c8] sm:$0xff] %v6285_v48  ;;  %6415 = vst [vmem:[%s14171_s28 + $0x2d8] sm:$0xff] %v6287_v34  ;;  %v6300_v2 = vadd.f32 %v6172_v6, %v5790_v36  ;;  %v6302_v49 = vadd.f32 %v6174_v1, %v5879_v46  ;;  %v6193_v48 = vld [vmem:[%s9084_s17 + $0x3e8] sm:$0xff]  ;;  %v6195_v34 = vld [vmem:[%s9084_s17 + $0x3f8] sm:$0xff]  ;;  %s8839_s17 = scalar_lea.vmem %s14427_s11, 16384 }
 0xde1   : > { %v5792_v42 = vpop.f32.mrf.mxu0  ;;  %v5881_v28 = vpop.f32.mrf.mxu1  ;;  %p8840_p12 = scmp.ne.s32.totalorder %s14427_s11, %s8839_s17  ;;  %p8847_p9 = scmp.lt.s32.totalorder %s8845_s7, %s8839_s17 }
 0xde2   : > { %6428 = vst [vmem:[%s14171_s28 + $0x340] sm:$0xff] %v6300_v2  ;;  %6430 = vst [vmem:[%s14171_s28 + $0x350] sm:$0xff] %v6302_v49  ;;  %v6301_v58 = vadd.f32 %v6173_v29, %v5792_v42  ;;  %v6303_v26 = vadd.f32 %v6175_v16, %v5881_v28 }
 0xde3   : > { %v5796_v51 = vpop.f32.mrf.mxu0  ;;  %v5885_v61 = vpop.f32.mrf.mxu1  ;;  %p8841_p0 = pnand %p8840_p12, %p15732_p2  ;;  %p8848_p10 = por %p8847_p9, %p8846_p8 }
 0xde4   : > { %6429 = vst [vmem:[%s14171_s28 + $0x348] sm:$0xff] %v6301_v58  ;;  %6431 = vst [vmem:[%s14171_s28 + $0x358] sm:$0xff] %v6303_v26  ;;  %v6316_v37 = vadd.f32 %v6188_v55, %v5796_v51  ;;  %v6318_v33 = vadd.f32 %v6190_v5, %v5885_v61 }
 0xde5   : > { %v5798_v44 = vpop.f32.mrf.mxu0  ;;  %v5887_v22 = vpop.f32.mrf.mxu1  ;;  %p8842_p7 = pneg %p8841_p0 }
 0xde6   : > { %6444 = vst [vmem:[%s14171_s28 + $0x3c0] sm:$0xff] %v6316_v37  ;;  %6446 = vst [vmem:[%s14171_s28 + $0x3d0] sm:$0xff] %v6318_v33  ;;  %v6317_v31 = vadd.f32 %v6189_v24, %v5798_v44  ;;  %v6319_v59 = vadd.f32 %v6191_v57, %v5887_v22 }
 0xde7   : > { %v5956_v52 = vpop.f32.mrf.mxu0  ;;  %v6045_v13 = vpop.f32.mrf.mxu1  ;;  %p8849_p1 = pnand %p8848_p10, %p8842_p7 }
 0xde8   : > { %6445 = vst [vmem:[%s14171_s28 + $0x3c8] sm:$0xff] %v6317_v31  ;;  %6447 = vst [vmem:[%s14171_s28 + $0x3d8] sm:$0xff] %v6319_v59  ;;  %v6272_v63 = vadd.f32 %v6144_v45, %v5956_v52  ;;  %v6274_v27 = vadd.f32 %v6146_v20, %v6045_v13 }
 0xde9   : > { %v5958_v9 = vpop.f32.mrf.mxu0  ;;  %v6047_v19 = vpop.f32.mrf.mxu1 }
 0xdea   : > { %6400 = vst [vmem:[%s14171_s28 + $0x260] sm:$0xff] %v6272_v63  ;;  %6402 = vst [vmem:[%s14171_s28 + $0x270] sm:$0xff] %v6274_v27  ;;  %v6273_v17 = vadd.f32 %v6145_v25, %v5958_v9  ;;  %v6275_v60 = vadd.f32 %v6147_v18, %v6047_v19 }
 0xdeb   : > { %v5962_v50 = vpop.f32.mrf.mxu0  ;;  %v6051_v56 = vpop.f32.mrf.mxu1 }
 0xdec   : > { %6401 = vst [vmem:[%s14171_s28 + $0x268] sm:$0xff] %v6273_v17  ;;  %6403 = vst [vmem:[%s14171_s28 + $0x278] sm:$0xff] %v6275_v60  ;;  %v6288_v14 = vadd.f32 %v6160_v0, %v5962_v50  ;;  %v6290_v43 = vadd.f32 %v6162_v3, %v6051_v56 }
 0xded   : > { %v5964_v10 = vpop.f32.mrf.mxu0  ;;  %v6053_v21 = vpop.f32.mrf.mxu1 }
 0xdee   : > { %6416 = vst [vmem:[%s14171_s28 + $0x2e0] sm:$0xff] %v6288_v14  ;;  %6418 = vst [vmem:[%s14171_s28 + $0x2f0] sm:$0xff] %v6290_v43  ;;  %v6289_v11 = vadd.f32 %v6161_v8, %v5964_v10  ;;  %v6291_v15 = vadd.f32 %v6163_v62, %v6053_v21 }
 0xdef   : > { %v5968_v39 = vpop.f32.mrf.mxu0  ;;  %v6057_v41 = vpop.f32.mrf.mxu1 }
 0xdf0   : > { %6417 = vst [vmem:[%s14171_s28 + $0x2e8] sm:$0xff] %v6289_v11  ;;  %6419 = vst [vmem:[%s14171_s28 + $0x2f8] sm:$0xff] %v6291_v15  ;;  %v6304_v4 = vadd.f32 %v6176_v53, %v5968_v39  ;;  %v6306_v54 = vadd.f32 %v6178_v32, %v6057_v41 }
 0xdf1   : > { %v5970_v12 = vpop.f32.mrf.mxu0  ;;  %v6059_v40 = vpop.f32.mrf.mxu1 }
 0xdf2   : > { %6432 = vst [vmem:[%s14171_s28 + $0x360] sm:$0xff] %v6304_v4  ;;  %6434 = vst [vmem:[%s14171_s28 + $0x370] sm:$0xff] %v6306_v54  ;;  %v6305_v23 = vadd.f32 %v6177_v47, %v5970_v12  ;;  %v6307_v30 = vadd.f32 %v6179_v38, %v6059_v40 }
 0xdf3   : > { %v5974_v6 = vpop.f32.mrf.mxu0  ;;  %v6063_v1 = vpop.f32.mrf.mxu1 }
 0xdf4   : > { %6433 = vst [vmem:[%s14171_s28 + $0x368] sm:$0xff] %v6305_v23  ;;  %6435 = vst [vmem:[%s14171_s28 + $0x378] sm:$0xff] %v6307_v30  ;;  %v6320_v36 = vadd.f32 %v6192_v7, %v5974_v6  ;;  %v6322_v46 = vadd.f32 %v6194_v35, %v6063_v1 }
 0xdf5   : > { %v5976_v29 = vpop.f32.mrf.mxu0  ;;  %v6065_v16 = vpop.f32.mrf.mxu1 }
 0xdf6   : > { %6448 = vst [vmem:[%s14171_s28 + $0x3e0] sm:$0xff] %v6320_v36  ;;  %6450 = vst [vmem:[%s14171_s28 + $0x3f0] sm:$0xff] %v6322_v46  ;;  %v6321_v2 = vadd.f32 %v6193_v48, %v5976_v29  ;;  %v6323_v49 = vadd.f32 %v6195_v34, %v6065_v16 }
 0xdf8   : > { %6449 = vst [vmem:[%s14171_s28 + $0x3e8] sm:$0xff] %v6321_v2  ;;  %6451 = vst [vmem:[%s14171_s28 + $0x3f8] sm:$0xff] %v6323_v49 }
 0xdf9   : > { %8852 = shalt.err (!%p8849_p1)
}
 0xdfa   : > { %s8853_s12 = scalar_lea.hbm %s14425_s14, 16384  ;;  %s8857_s10 = scalar_lea.hbm %s14478_s5, 65536 }
 0xdfb   : > { %p8854_p4 = scmp.ne.s32.totalorder %s14425_s14, %s8853_s12  ;;  %p8858_p6 = scmp.lt.s32.totalorder %s14425_s14, %s14478_s5 }
 0xdfc   : > { %p8859_p13 = scmp.lt.s32.totalorder %s8857_s10, %s8853_s12 }
 0xdfd   : > { %p8855_p11 = pnand %p8854_p4, %p15732_p2 }
 0xdfe   : > { %p8860_p3 = por %p8859_p13, %p8858_p6 }
 0xdff   : > { %p8856_p5 = pneg %p8855_p11 }
 0xe01   : > { %p8861_p12 = pnand %p8860_p3, %p8856_p5 }
 0xe03   : > { %8864 = shalt.err (!%p8861_p12)
}
 0xe04   : > { %s8927_s15 = smov 2048   ;;  %s8928_s23 = smov 128  }
 0xe05   : > { %8269 = dma.vmem_to_hbm [thread:$0]  (%p15732_p2), %s14427_s11, 16384, %s14425_s14, %s6453_s22, %s8927_s15, %s8927_s15, %s8928_s23  }
 0xe06 PF: > { %p8286_p0 = scmp.ge.s32.totalorder %s8907_s21, 2  ;;  %s6482_s26 = sand.u32 1, %s8895_s18  }
 0xe07   : > { %p15733_p7 = scmp.ne.s32.totalorder %s14882_s6, 0  ;;  %s6483_s17 = scalar_lea.sflag [#allocation4], %s6482_s26 }
 0xe09   : > { %p8280_p8 = pnand %p8286_p0, %p15733_p7 }
 0xe0b   : > { %p8281_p9 = pneg %p8280_p8 }
 0xe0d   : > { %8890 = dma.done.wait (%p8281_p9), %s6483_s17, 16384  }
 0xe0e   : > { %8892 = vsyncadd (%p8281_p9), %s6483_s17, 4294950912  ;;  %p19_p10 = scmp.ge.s32.totalorder %s8984_s24, 6   ;;  %s15734_s18 = smov %s8899_s19 }
 0xe0f   : > { %s15735_s19 = smov %s8903_s20  ;;  %s15736_s20 = smov %s8996_s27 }
 0xe10   : > { %s15737_s21 = smov %s8984_s24  ;;  %21 = sbr.rel (!%p19_p10) target bundleno = 6 (0x6), region = 90 }
 0xe15   :  { %6488 = vsyncpa [#allocation3], 1 }
 0xe16   :  { %6490 = vsyncpa [#allocation3 + $0x1], 1 }
 0xe17   :  { %6491 = vsyncpa [#allocation6], 1 }
 0xe18   :  { %6492 = vsyncpa [#allocation4], 1 }
 0xe19   :  { %6494 = vsyncpa [#allocation4 + $0x1], 1 }

</bundles_post_ra>
